<compile_context>
chip_gen: v7x
topology: tpu7x:2x2x1
jax: 0.10.0
libtpu: 0.0.40
codegen_flags: <defaults>
</compile_context>

<pallas_src>
import jax
import jax.numpy as jnp
from jax import lax
from jax.experimental import pallas as pl
from jax.experimental.pallas import tpu as pltpu

EPS = 1e-5
_VMEM_LIMIT_BYTES = 64 * 1024 * 1024   # <= v7x physical VMEM, >> scoped defaults


def _round_up(x, m):
    return (x + m - 1) // m * m


# ---------------------------------------------------------------------------
# Pallas kernel: conv-as-tap-matmuls + [bias] + [InstanceNorm] + [act] + [+res]
# ---------------------------------------------------------------------------
def _make_tap_kernel(offsets, pp, period, width, p_valid, inv_count,
                     norm, act, has_bias, has_residual, res_offset):
    def kernel(x_ref, w_ref, *rest):
        rest = list(rest)
        b_ref = rest.pop(0) if has_bias else None
        res_ref = rest.pop(0) if has_residual else None
        o_ref = rest[0]

        # Convolution: accumulate shifted-slice matmuls.  Offsets are static
        # Python ints; operands are bf16 (MXU native), accumulation is f32.
        acc = jnp.dot(x_ref[0, pl.ds(offsets[0], pp), :], w_ref[0],
                      preferred_element_type=jnp.float32)
        for t in range(1, len(offsets)):
            acc = acc + jnp.dot(x_ref[0, pl.ds(offsets[t], pp), :], w_ref[t],
                                preferred_element_type=jnp.float32)

        if has_bias:            # only for stages NOT followed by InstanceNorm
            acc = acc + b_ref[...].astype(jnp.float32)

        if norm:
            # InstanceNorm2d (PyTorch defaults): per-channel mean / biased
            # variance over the valid spatial positions, eps=1e-5, no affine.
            # Single pass: masked sum and sum-of-squares; rows with
            # (r % period) >= width or r >= p_valid are conv halo garbage.
            r = lax.broadcasted_iota(jnp.int32, (pp, 1), 0)
            valid = jnp.logical_and(r % period < width, r < p_valid)
            xm = jnp.where(valid, acc, 0.0)
            mean = jnp.sum(xm, axis=0, keepdims=True) * inv_count
            ex2 = jnp.sum(xm * xm, axis=0, keepdims=True) * inv_count
            var = jnp.maximum(ex2 - mean * mean, 0.0)
            acc = (acc - mean) * lax.rsqrt(var + EPS)

        if act == "relu":
            acc = jnp.maximum(acc, 0.0)
        elif act == "tanh":
            acc = jnp.tanh(acc)

        if has_residual:
            # Residual (block input) read from the same flattened padded map
            # that fed the block's first conv (interior offset = period + 1).
            acc = acc + res_ref[0, pl.ds(res_offset, pp), :].astype(jnp.float32)

        o_ref[0] = acc.astype(o_ref.dtype)

    return kernel


# ---------------------------------------------------------------------------
# One fused conv stage (per-image grid)
# ---------------------------------------------------------------------------
def _tap_conv(x4d, w_taps, offsets, *, h_out, w_out, norm, act,
              bias=None, residual=None, res_offset=0,
              cout_valid=None, out_dtype=jnp.bfloat16):
    """Conv stage on a row-major (N, A, B, Ct) tap input.

    Output pixel (i, j) (i < h_out, j < w_out) lives at flat row i*B + j and
    equals sum_t x_flat[i*B + j + offsets[t]] @ w_taps[t].
    Returns (N, h_out, w_out, cout_valid) plus the flattened bf16 input
    (reusable as the residual operand of a later stage in the same block).
    """
    n, a, b, ct = x4d.shape
    t_taps, _, cout = w_taps.shape
    period = b
    p_valid = h_out * period
    pp = _round_up(p_valid, 8)
    r_rows = _round_up(max(offsets) + pp, 8)

    # Flatten spatial dims, zero-pad rows so every tap slice stays in bounds.
    x_flat = x4d.reshape(n, a * b, ct)
    if r_rows > a * b:
        x_flat = jnp.pad(x_flat, ((0, 0), (0, r_rows - a * b), (0, 0)))
    x_flat = x_flat.astype(jnp.bfloat16)
    w_taps = w_taps.astype(jnp.bfloat16)

    in_specs = [
        pl.BlockSpec((1, r_rows, ct), lambda i: (i, 0, 0)),
        pl.BlockSpec((t_taps, ct, cout), lambda i: (0, 0, 0)),
    ]
    args = [x_flat, w_taps]
    if bias is not None:
        in_specs.append(pl.BlockSpec((1, cout), lambda i: (0, 0)))
        args.append(bias.astype(jnp.float32))
    if residual is not None:
        assert residual.shape[1] >= res_offset + pp and residual.shape[-1] == cout
        in_specs.append(pl.BlockSpec((1, residual.shape[1], cout),
                                     lambda i: (i, 0, 0)))
        args.append(residual)

    kernel = _make_tap_kernel(tuple(int(o) for o in offsets), pp, period, w_out,
                              p_valid, 1.0 / float(h_out * w_out), norm, act,
                              bias is not None, residual is not None, res_offset)

    # TODO(synk): for very large images, add a halo'd spatial (P) grid axis
    # (pl.Element windows or manual DMA) and accumulate the IN sum/sumsq across
    # tiles (finalize under pl.when); per-image blocks are used here since the
    # whole stage fits VMEM at these sizes and vmem_limit_bytes is set for v7x.
    out_flat = pl.pallas_call(
        kernel,
        out_shape=jax.ShapeDtypeStruct((n, pp, cout), out_dtype),
        grid=(n,),
        in_specs=in_specs,
        out_specs=pl.BlockSpec((1, pp, cout), lambda i: (i, 0, 0)),
        compiler_params=pltpu.CompilerParams(
            dimension_semantics=("parallel",),
            vmem_limit_bytes=_VMEM_LIMIT_BYTES),
    )(*args)

    out = out_flat[:, :p_valid, :].reshape(n, h_out, period, cout)
    out = out[:, :, :w_out, :(cout_valid if cout_valid is not None else cout)]
    return out, x_flat


# ---------------------------------------------------------------------------
# XLA glue: reflection padding + kx-folding (pure data movement)
# ---------------------------------------------------------------------------
def _reflect_pad(x, p):
    if p == 0:
        return x
    return jnp.pad(x, ((0, 0), (p, p), (p, p), (0, 0)), mode="reflect")


def _merge_kx(xp, k):
    # (N, Hp, Wp, C) -> (N, Hp, Wp-k+1, k*C): fold the kernel's kx extent into
    # channels so a KxK conv becomes K row-tap matmuls (contraction k*C).
    n, hp, wp, c = xp.shape
    wo = wp - k + 1
    cols = [xp[:, :, kx:kx + wo, :] for kx in range(k)]
    return jnp.concatenate(cols, axis=-1)


# ---------------------------------------------------------------------------
# Parameters (deterministic synthetic init, mirrors the PyTorch module) and
# the full forward pass.
# ---------------------------------------------------------------------------
def init_refiner_params(key, input_nc, nb_features, n_residual_blocks):
    key, k1, k2 = jax.random.split(key, 3)
    params = {
        "w0": jax.random.normal(k1, (13, 13, input_nc, 64), jnp.float32) * 0.05,
        # b0 / b1 / b2 exist in the PyTorch module but are exactly cancelled by
        # the following InstanceNorm's mean subtraction -> never fed to kernels.
        "b0": jax.random.normal(k2, (64,), jnp.float32) * 0.05,
        "blocks": [],
    }
    for _ in range(n_residual_blocks):
        key, a, bkey, c, d = jax.random.split(key, 5)
        params["blocks"].append(dict(
            w1=jax.random.normal(a, (3, 3, nb_features, nb_features), jnp.float32) * 0.05,
            b1=jax.random.normal(bkey, (nb_features,), jnp.float32) * 0.05,
            w2=jax.random.normal(c, (3, 3, nb_features, nb_features), jnp.float32) * 0.05,
            b2=jax.random.normal(d, (nb_features,), jnp.float32) * 0.05,
        ))
    key, k3, k4 = jax.random.split(key, 3)
    params["wf"] = jax.random.normal(k3, (1, 1, 64, input_nc), jnp.float32) * 0.05
    params["bf"] = jax.random.normal(k4, (input_nc,), jnp.float32) * 0.05
    return params


def refiner_forward(params, x_nchw):
    # NCHW (PyTorch convention) in/out; NHWC + flattened spatial internally.
    x = jnp.transpose(x_nchw, (0, 2, 3, 1)).astype(jnp.float32)
    n, h0, w0, input_nc = x.shape

    # --- ReflectionPad2d(3) -> Conv2d(input_nc, 64, 13) -> InstanceNorm -> ReLU
    # kx folded into channels: 13 row taps of contraction 13*input_nc.
    ho, wo = h0 - 6, w0 - 6
    xk = _merge_kx(_reflect_pad(x, 3), 13)              # (N, h0+6, wo, 13*input_nc)
    w0t = params["w0"].reshape(13, 13 * input_nc, 64)
    y, _ = _tap_conv(xk, w0t, [ky * wo for ky in range(13)],
                     h_out=ho, w_out=wo, norm=True, act="relu")

    # --- Residual blocks: x + (pad1->conv3->IN->ReLU->pad1->conv3->IN)(x)
    nf = y.shape[-1]
    wp = wo + 2
    offs3 = [ky * wp + kx for ky in range(3) for kx in range(3)]
    for blk in params["blocks"]:
        xp1 = _reflect_pad(y, 1)                                    # (N, ho+2, wp, nf)
        h, y_flat = _tap_conv(xp1, blk["w1"].reshape(9, nf, nf), offs3,
                              h_out=ho, w_out=wo, norm=True, act="relu")
        # Only the intermediate h round-trips HBM (for its reflection pad);
        # the residual add is fused into the second conv's kernel.
        xp2 = _reflect_pad(h, 1)
        y, _ = _tap_conv(xp2, blk["w2"].reshape(9, nf, nf), offs3,
                         h_out=ho, w_out=wo, norm=True, act=None,
                         residual=y_flat, res_offset=wp + 1)

    # --- ReflectionPad2d(3) -> Conv2d(64, input_nc, 1) -> Tanh
    # Pad cout input_nc -> 128 for lane-dense MXU output / stores; slice after.
    yp = _reflect_pad(y, 3)                                          # (N, h0, w0, nf)
    cpad = 128
    wft = jnp.pad(params["wf"].reshape(1, nf, input_nc),
                  ((0, 0), (0, 0), (0, cpad - input_nc)))
    bft = jnp.pad(params["bf"].reshape(1, input_nc), ((0, 0), (0, cpad - input_nc)))
    out, _ = _tap_conv(yp, wft, [0], h_out=h0, w_out=w0,
                       norm=False, act="tanh", bias=bft,
                       cout_valid=input_nc, out_dtype=jnp.float32)
    return jnp.transpose(out, (0, 3, 1, 2))


if __name__ == "__main__":
    # nb_features must be 64 (the module hard-codes 64 output channels of the
    # first conv); fewer residual blocks than the default 9 keeps compile small.
    input_nc, nb_features, n_residual_blocks = 3, 64, 3
    N, H, W = 2, 16, 16

    key = jax.random.PRNGKey(0)
    kparams, kx = jax.random.split(key)
    params = init_refiner_params(kparams, input_nc, nb_features, n_residual_blocks)
    x = jax.random.normal(kx, (N, input_nc, H, W), jnp.float32)

    fwd = jax.jit(refiner_forward)
    out = jax.block_until_ready(fwd(params, x))

    assert out.shape == (N, input_nc, H, W), out.shape
    assert bool(jnp.all(jnp.isfinite(out)))
    assert bool(jnp.all(jnp.abs(out) <= 1.0 + 1e-6))   # tanh output range
    print("KERNEL_OK")
</pallas_src>

<mosaic_0001>
module attributes {stable_mosaic.version = 11 : i64} {
  func.func @kernel(%arg0: i32, %arg1: memref<1x224x39xbf16, #tpu.memory_space<vmem>>, %arg2: memref<13x39x64xbf16, #tpu.memory_space<vmem>>, %arg3: memref<1x104x64xbf16, #tpu.memory_space<vmem>>) attributes {dimension_semantics = [#tpu.dimension_semantics<parallel>], iteration_bounds = array<i64: 2>, scalar_prefetch = 0 : i64, scratch_operands = 0 : i64, tpu.core_type = #tpu.core_type<tc>, window_params = [{transform_indices = @transform_0, window_bounds = array<i64: 1, 224, 39>}, {pipeline_mode = #tpu.pipeline_mode<synchronous>, transform_indices = @transform_1, window_bounds = array<i64: 13, 39, 64>}, {transform_indices = @transform_2, window_bounds = array<i64: 1, 104, 64>}]} {
    %c0 = arith.constant 0 : index
    %c0_0 = arith.constant 0 : index
    %c0_1 = arith.constant 0 : index
    %0 = vector.load %arg1[%c0, %c0_0, %c0_1] : memref<1x224x39xbf16, #tpu.memory_space<vmem>>, vector<1x104x39xbf16>
    %1 = vector.shape_cast %0 : vector<1x104x39xbf16> to vector<104x39xbf16>
    %c0_2 = arith.constant 0 : index
    %c0_3 = arith.constant 0 : index
    %c0_4 = arith.constant 0 : index
    %2 = vector.load %arg2[%c0_2, %c0_3, %c0_4] : memref<13x39x64xbf16, #tpu.memory_space<vmem>>, vector<1x39x64xbf16>
    %3 = vector.shape_cast %2 : vector<1x39x64xbf16> to vector<39x64xbf16>
    %cst = arith.constant dense<0.000000e+00> : vector<104x64xf32>
    %4 = tpu.matmul %1, %3, %cst {dimension_numbers = #tpu.dot_dimension_numbers<[1], [0], [0], [1], [0, 0, 1, 1], [], []>} : vector<104x39xbf16>, vector<39x64xbf16>, vector<104x64xf32> -> vector<104x64xf32>
    %c0_5 = arith.constant 0 : index
    %c10 = arith.constant 10 : index
    %c0_6 = arith.constant 0 : index
    %5 = vector.load %arg1[%c0_5, %c10, %c0_6] : memref<1x224x39xbf16, #tpu.memory_space<vmem>>, vector<1x104x39xbf16>
    %6 = vector.shape_cast %5 : vector<1x104x39xbf16> to vector<104x39xbf16>
    %c1 = arith.constant 1 : index
    %c0_7 = arith.constant 0 : index
    %c0_8 = arith.constant 0 : index
    %7 = vector.load %arg2[%c1, %c0_7, %c0_8] : memref<13x39x64xbf16, #tpu.memory_space<vmem>>, vector<1x39x64xbf16>
    %8 = vector.shape_cast %7 : vector<1x39x64xbf16> to vector<39x64xbf16>
    %cst_9 = arith.constant dense<0.000000e+00> : vector<104x64xf32>
    %9 = tpu.matmul %6, %8, %cst_9 {dimension_numbers = #tpu.dot_dimension_numbers<[1], [0], [0], [1], [0, 0, 1, 1], [], []>} : vector<104x39xbf16>, vector<39x64xbf16>, vector<104x64xf32> -> vector<104x64xf32>
    %10 = arith.addf %4, %9 : vector<104x64xf32>
    %c0_10 = arith.constant 0 : index
    %c20 = arith.constant 20 : index
    %c0_11 = arith.constant 0 : index
    %11 = vector.load %arg1[%c0_10, %c20, %c0_11] : memref<1x224x39xbf16, #tpu.memory_space<vmem>>, vector<1x104x39xbf16>
    %12 = vector.shape_cast %11 : vector<1x104x39xbf16> to vector<104x39xbf16>
    %c2 = arith.constant 2 : index
    %c0_12 = arith.constant 0 : index
    %c0_13 = arith.constant 0 : index
    %13 = vector.load %arg2[%c2, %c0_12, %c0_13] : memref<13x39x64xbf16, #tpu.memory_space<vmem>>, vector<1x39x64xbf16>
    %14 = vector.shape_cast %13 : vector<1x39x64xbf16> to vector<39x64xbf16>
    %cst_14 = arith.constant dense<0.000000e+00> : vector<104x64xf32>
    %15 = tpu.matmul %12, %14, %cst_14 {dimension_numbers = #tpu.dot_dimension_numbers<[1], [0], [0], [1], [0, 0, 1, 1], [], []>} : vector<104x39xbf16>, vector<39x64xbf16>, vector<104x64xf32> -> vector<104x64xf32>
    %16 = arith.addf %10, %15 : vector<104x64xf32>
    %c0_15 = arith.constant 0 : index
    %c30 = arith.constant 30 : index
    %c0_16 = arith.constant 0 : index
    %17 = vector.load %arg1[%c0_15, %c30, %c0_16] : memref<1x224x39xbf16, #tpu.memory_space<vmem>>, vector<1x104x39xbf16>
    %18 = vector.shape_cast %17 : vector<1x104x39xbf16> to vector<104x39xbf16>
    %c3 = arith.constant 3 : index
    %c0_17 = arith.constant 0 : index
    %c0_18 = arith.constant 0 : index
    %19 = vector.load %arg2[%c3, %c0_17, %c0_18] : memref<13x39x64xbf16, #tpu.memory_space<vmem>>, vector<1x39x64xbf16>
    %20 = vector.shape_cast %19 : vector<1x39x64xbf16> to vector<39x64xbf16>
    %cst_19 = arith.constant dense<0.000000e+00> : vector<104x64xf32>
    %21 = tpu.matmul %18, %20, %cst_19 {dimension_numbers = #tpu.dot_dimension_numbers<[1], [0], [0], [1], [0, 0, 1, 1], [], []>} : vector<104x39xbf16>, vector<39x64xbf16>, vector<104x64xf32> -> vector<104x64xf32>
    %22 = arith.addf %16, %21 : vector<104x64xf32>
    %c0_20 = arith.constant 0 : index
    %c40 = arith.constant 40 : index
    %c0_21 = arith.constant 0 : index
    %23 = vector.load %arg1[%c0_20, %c40, %c0_21] : memref<1x224x39xbf16, #tpu.memory_space<vmem>>, vector<1x104x39xbf16>
    %24 = vector.shape_cast %23 : vector<1x104x39xbf16> to vector<104x39xbf16>
    %c4 = arith.constant 4 : index
    %c0_22 = arith.constant 0 : index
    %c0_23 = arith.constant 0 : index
    %25 = vector.load %arg2[%c4, %c0_22, %c0_23] : memref<13x39x64xbf16, #tpu.memory_space<vmem>>, vector<1x39x64xbf16>
    %26 = vector.shape_cast %25 : vector<1x39x64xbf16> to vector<39x64xbf16>
    %cst_24 = arith.constant dense<0.000000e+00> : vector<104x64xf32>
    %27 = tpu.matmul %24, %26, %cst_24 {dimension_numbers = #tpu.dot_dimension_numbers<[1], [0], [0], [1], [0, 0, 1, 1], [], []>} : vector<104x39xbf16>, vector<39x64xbf16>, vector<104x64xf32> -> vector<104x64xf32>
    %28 = arith.addf %22, %27 : vector<104x64xf32>
    %c0_25 = arith.constant 0 : index
    %c50 = arith.constant 50 : index
    %c0_26 = arith.constant 0 : index
    %29 = vector.load %arg1[%c0_25, %c50, %c0_26] : memref<1x224x39xbf16, #tpu.memory_space<vmem>>, vector<1x104x39xbf16>
    %30 = vector.shape_cast %29 : vector<1x104x39xbf16> to vector<104x39xbf16>
    %c5 = arith.constant 5 : index
    %c0_27 = arith.constant 0 : index
    %c0_28 = arith.constant 0 : index
    %31 = vector.load %arg2[%c5, %c0_27, %c0_28] : memref<13x39x64xbf16, #tpu.memory_space<vmem>>, vector<1x39x64xbf16>
    %32 = vector.shape_cast %31 : vector<1x39x64xbf16> to vector<39x64xbf16>
    %cst_29 = arith.constant dense<0.000000e+00> : vector<104x64xf32>
    %33 = tpu.matmul %30, %32, %cst_29 {dimension_numbers = #tpu.dot_dimension_numbers<[1], [0], [0], [1], [0, 0, 1, 1], [], []>} : vector<104x39xbf16>, vector<39x64xbf16>, vector<104x64xf32> -> vector<104x64xf32>
    %34 = arith.addf %28, %33 : vector<104x64xf32>
    %c0_30 = arith.constant 0 : index
    %c60 = arith.constant 60 : index
    %c0_31 = arith.constant 0 : index
    %35 = vector.load %arg1[%c0_30, %c60, %c0_31] : memref<1x224x39xbf16, #tpu.memory_space<vmem>>, vector<1x104x39xbf16>
    %36 = vector.shape_cast %35 : vector<1x104x39xbf16> to vector<104x39xbf16>
    %c6 = arith.constant 6 : index
    %c0_32 = arith.constant 0 : index
    %c0_33 = arith.constant 0 : index
    %37 = vector.load %arg2[%c6, %c0_32, %c0_33] : memref<13x39x64xbf16, #tpu.memory_space<vmem>>, vector<1x39x64xbf16>
    %38 = vector.shape_cast %37 : vector<1x39x64xbf16> to vector<39x64xbf16>
    %cst_34 = arith.constant dense<0.000000e+00> : vector<104x64xf32>
    %39 = tpu.matmul %36, %38, %cst_34 {dimension_numbers = #tpu.dot_dimension_numbers<[1], [0], [0], [1], [0, 0, 1, 1], [], []>} : vector<104x39xbf16>, vector<39x64xbf16>, vector<104x64xf32> -> vector<104x64xf32>
    %40 = arith.addf %34, %39 : vector<104x64xf32>
    %c0_35 = arith.constant 0 : index
    %c70 = arith.constant 70 : index
    %c0_36 = arith.constant 0 : index
    %41 = vector.load %arg1[%c0_35, %c70, %c0_36] : memref<1x224x39xbf16, #tpu.memory_space<vmem>>, vector<1x104x39xbf16>
    %42 = vector.shape_cast %41 : vector<1x104x39xbf16> to vector<104x39xbf16>
    %c7 = arith.constant 7 : index
    %c0_37 = arith.constant 0 : index
    %c0_38 = arith.constant 0 : index
    %43 = vector.load %arg2[%c7, %c0_37, %c0_38] : memref<13x39x64xbf16, #tpu.memory_space<vmem>>, vector<1x39x64xbf16>
    %44 = vector.shape_cast %43 : vector<1x39x64xbf16> to vector<39x64xbf16>
    %cst_39 = arith.constant dense<0.000000e+00> : vector<104x64xf32>
    %45 = tpu.matmul %42, %44, %cst_39 {dimension_numbers = #tpu.dot_dimension_numbers<[1], [0], [0], [1], [0, 0, 1, 1], [], []>} : vector<104x39xbf16>, vector<39x64xbf16>, vector<104x64xf32> -> vector<104x64xf32>
    %46 = arith.addf %40, %45 : vector<104x64xf32>
    %c0_40 = arith.constant 0 : index
    %c80 = arith.constant 80 : index
    %c0_41 = arith.constant 0 : index
    %47 = vector.load %arg1[%c0_40, %c80, %c0_41] : memref<1x224x39xbf16, #tpu.memory_space<vmem>>, vector<1x104x39xbf16>
    %48 = vector.shape_cast %47 : vector<1x104x39xbf16> to vector<104x39xbf16>
    %c8 = arith.constant 8 : index
    %c0_42 = arith.constant 0 : index
    %c0_43 = arith.constant 0 : index
    %49 = vector.load %arg2[%c8, %c0_42, %c0_43] : memref<13x39x64xbf16, #tpu.memory_space<vmem>>, vector<1x39x64xbf16>
    %50 = vector.shape_cast %49 : vector<1x39x64xbf16> to vector<39x64xbf16>
    %cst_44 = arith.constant dense<0.000000e+00> : vector<104x64xf32>
    %51 = tpu.matmul %48, %50, %cst_44 {dimension_numbers = #tpu.dot_dimension_numbers<[1], [0], [0], [1], [0, 0, 1, 1], [], []>} : vector<104x39xbf16>, vector<39x64xbf16>, vector<104x64xf32> -> vector<104x64xf32>
    %52 = arith.addf %46, %51 : vector<104x64xf32>
    %c0_45 = arith.constant 0 : index
    %c90 = arith.constant 90 : index
    %c0_46 = arith.constant 0 : index
    %53 = vector.load %arg1[%c0_45, %c90, %c0_46] : memref<1x224x39xbf16, #tpu.memory_space<vmem>>, vector<1x104x39xbf16>
    %54 = vector.shape_cast %53 : vector<1x104x39xbf16> to vector<104x39xbf16>
    %c9 = arith.constant 9 : index
    %c0_47 = arith.constant 0 : index
    %c0_48 = arith.constant 0 : index
    %55 = vector.load %arg2[%c9, %c0_47, %c0_48] : memref<13x39x64xbf16, #tpu.memory_space<vmem>>, vector<1x39x64xbf16>
    %56 = vector.shape_cast %55 : vector<1x39x64xbf16> to vector<39x64xbf16>
    %cst_49 = arith.constant dense<0.000000e+00> : vector<104x64xf32>
    %57 = tpu.matmul %54, %56, %cst_49 {dimension_numbers = #tpu.dot_dimension_numbers<[1], [0], [0], [1], [0, 0, 1, 1], [], []>} : vector<104x39xbf16>, vector<39x64xbf16>, vector<104x64xf32> -> vector<104x64xf32>
    %58 = arith.addf %52, %57 : vector<104x64xf32>
    %c0_50 = arith.constant 0 : index
    %c100 = arith.constant 100 : index
    %c0_51 = arith.constant 0 : index
    %59 = vector.load %arg1[%c0_50, %c100, %c0_51] : memref<1x224x39xbf16, #tpu.memory_space<vmem>>, vector<1x104x39xbf16>
    %60 = vector.shape_cast %59 : vector<1x104x39xbf16> to vector<104x39xbf16>
    %c10_52 = arith.constant 10 : index
    %c0_53 = arith.constant 0 : index
    %c0_54 = arith.constant 0 : index
    %61 = vector.load %arg2[%c10_52, %c0_53, %c0_54] : memref<13x39x64xbf16, #tpu.memory_space<vmem>>, vector<1x39x64xbf16>
    %62 = vector.shape_cast %61 : vector<1x39x64xbf16> to vector<39x64xbf16>
    %cst_55 = arith.constant dense<0.000000e+00> : vector<104x64xf32>
    %63 = tpu.matmul %60, %62, %cst_55 {dimension_numbers = #tpu.dot_dimension_numbers<[1], [0], [0], [1], [0, 0, 1, 1], [], []>} : vector<104x39xbf16>, vector<39x64xbf16>, vector<104x64xf32> -> vector<104x64xf32>
    %64 = arith.addf %58, %63 : vector<104x64xf32>
    %c0_56 = arith.constant 0 : index
    %c110 = arith.constant 110 : index
    %c0_57 = arith.constant 0 : index
    %65 = vector.load %arg1[%c0_56, %c110, %c0_57] : memref<1x224x39xbf16, #tpu.memory_space<vmem>>, vector<1x104x39xbf16>
    %66 = vector.shape_cast %65 : vector<1x104x39xbf16> to vector<104x39xbf16>
    %c11 = arith.constant 11 : index
    %c0_58 = arith.constant 0 : index
    %c0_59 = arith.constant 0 : index
    %67 = vector.load %arg2[%c11, %c0_58, %c0_59] : memref<13x39x64xbf16, #tpu.memory_space<vmem>>, vector<1x39x64xbf16>
    %68 = vector.shape_cast %67 : vector<1x39x64xbf16> to vector<39x64xbf16>
    %cst_60 = arith.constant dense<0.000000e+00> : vector<104x64xf32>
    %69 = tpu.matmul %66, %68, %cst_60 {dimension_numbers = #tpu.dot_dimension_numbers<[1], [0], [0], [1], [0, 0, 1, 1], [], []>} : vector<104x39xbf16>, vector<39x64xbf16>, vector<104x64xf32> -> vector<104x64xf32>
    %70 = arith.addf %64, %69 : vector<104x64xf32>
    %c0_61 = arith.constant 0 : index
    %c120 = arith.constant 120 : index
    %c0_62 = arith.constant 0 : index
    %71 = vector.load %arg1[%c0_61, %c120, %c0_62] : memref<1x224x39xbf16, #tpu.memory_space<vmem>>, vector<1x104x39xbf16>
    %72 = vector.shape_cast %71 : vector<1x104x39xbf16> to vector<104x39xbf16>
    %c12 = arith.constant 12 : index
    %c0_63 = arith.constant 0 : index
    %c0_64 = arith.constant 0 : index
    %73 = vector.load %arg2[%c12, %c0_63, %c0_64] : memref<13x39x64xbf16, #tpu.memory_space<vmem>>, vector<1x39x64xbf16>
    %74 = vector.shape_cast %73 : vector<1x39x64xbf16> to vector<39x64xbf16>
    %cst_65 = arith.constant dense<0.000000e+00> : vector<104x64xf32>
    %75 = tpu.matmul %72, %74, %cst_65 {dimension_numbers = #tpu.dot_dimension_numbers<[1], [0], [0], [1], [0, 0, 1, 1], [], []>} : vector<104x39xbf16>, vector<39x64xbf16>, vector<104x64xf32> -> vector<104x64xf32>
    %76 = arith.addf %70, %75 : vector<104x64xf32>
    %77 = tpu.iota {dimensions = array<i32: 0>} : vector<104x1xi32>
    %c10_i32 = arith.constant 10 : i32
    %c0_i32 = arith.constant 0 : i32
    %78 = arith.cmpi eq, %c10_i32, %c0_i32 : i32
    %c1_i32 = arith.constant 1 : i32
    %79 = arith.select %78, %c1_i32, %c10_i32 : i32
    %80 = vector.broadcast %79 : i32 to vector<104x1xi32>
    %81 = arith.remsi %77, %80 : vector<104x1xi32>
    %c0_i32_66 = arith.constant 0 : i32
    %82 = vector.broadcast %c0_i32_66 : i32 to vector<104x1xi32>
    %83 = arith.cmpi ne, %81, %82 : vector<104x1xi32>
    %c0_i32_67 = arith.constant 0 : i32
    %84 = vector.broadcast %c0_i32_67 : i32 to vector<104x1xi32>
    %85 = arith.cmpi slt, %81, %84 : vector<104x1xi32>
    %c0_i32_68 = arith.constant 0 : i32
    %86 = arith.cmpi slt, %79, %c0_i32_68 : i32
    %87 = vector.broadcast %86 : i1 to vector<104x1xi1>
    %88 = vector.broadcast %87 : vector<104x1xi1> to vector<104x1xi1>
    %89 = arith.xori %85, %88 : vector<104x1xi1>
    %90 = arith.andi %89, %83 : vector<104x1xi1>
    %91 = vector.broadcast %79 : i32 to vector<104x1xi32>
    %92 = arith.addi %81, %91 : vector<104x1xi32>
    %93 = arith.select %90, %92, %81 : vector<104x1xi1>, vector<104x1xi32>
    %c10_i32_69 = arith.constant 10 : i32
    %94 = vector.broadcast %c10_i32_69 : i32 to vector<104x1xi32>
    %95 = arith.cmpi slt, %93, %94 : vector<104x1xi32>
    %c100_i32 = arith.constant 100 : i32
    %96 = vector.broadcast %c100_i32 : i32 to vector<104x1xi32>
    %97 = arith.cmpi slt, %77, %96 : vector<104x1xi32>
    %98 = arith.andi %95, %97 : vector<104x1xi1>
    %cst_70 = arith.constant 0.000000e+00 : f32
    %99 = vector.shape_cast %98 : vector<104x1xi1> to vector<104x1xi1>
    %100 = vector.broadcast %99 : vector<104x1xi1> to vector<104x64xi1>
    %101 = vector.broadcast %cst_70 : f32 to vector<104x64xf32>
    %102 = arith.select %100, %76, %101 : vector<104x64xi1>, vector<104x64xf32>
    %cst_71 = arith.constant dense<0.000000e+00> : vector<64xf32>
    %103 = vector.multi_reduction <add>, %102, %cst_71 [0] : vector<104x64xf32> to vector<64xf32>
    %104 = vector.shape_cast %103 : vector<64xf32> to vector<1x64xf32>
    %cst_72 = arith.constant 0.00999999977 : f32
    %105 = vector.broadcast %cst_72 : f32 to vector<1x64xf32>
    %106 = arith.mulf %104, %105 : vector<1x64xf32>
    %107 = arith.mulf %102, %102 : vector<104x64xf32>
    %cst_73 = arith.constant dense<0.000000e+00> : vector<64xf32>
    %108 = vector.multi_reduction <add>, %107, %cst_73 [0] : vector<104x64xf32> to vector<64xf32>
    %109 = vector.shape_cast %108 : vector<64xf32> to vector<1x64xf32>
    %cst_74 = arith.constant 0.00999999977 : f32
    %110 = vector.broadcast %cst_74 : f32 to vector<1x64xf32>
    %111 = arith.mulf %109, %110 : vector<1x64xf32>
    %112 = arith.mulf %106, %106 : vector<1x64xf32>
    %113 = arith.subf %111, %112 : vector<1x64xf32>
    %cst_75 = arith.constant 0.000000e+00 : f32
    %114 = vector.broadcast %cst_75 : f32 to vector<1x64xf32>
    %115 = arith.maximumf %113, %114 : vector<1x64xf32>
    %116 = vector.broadcast %106 : vector<1x64xf32> to vector<104x64xf32>
    %117 = arith.subf %76, %116 : vector<104x64xf32>
    %cst_76 = arith.constant 9.99999974E-6 : f32
    %118 = vector.broadcast %cst_76 : f32 to vector<1x64xf32>
    %119 = arith.addf %115, %118 : vector<1x64xf32>
    %120 = math.rsqrt %119 : vector<1x64xf32>
    %121 = vector.broadcast %120 : vector<1x64xf32> to vector<104x64xf32>
    %122 = arith.mulf %117, %121 : vector<104x64xf32>
    %cst_77 = arith.constant 0.000000e+00 : f32
    %123 = vector.broadcast %cst_77 : f32 to vector<104x64xf32>
    %124 = arith.maximumf %122, %123 : vector<104x64xf32>
    %125 = arith.truncf %124 : vector<104x64xf32> to vector<104x64xbf16>
    %c0_78 = arith.constant 0 : index
    %c0_79 = arith.constant 0 : index
    %c0_80 = arith.constant 0 : index
    %126 = vector.load %arg3[%c0_78, %c0_79, %c0_80] : memref<1x104x64xbf16, #tpu.memory_space<vmem>>, vector<1x104x64xbf16>
    %127 = vector.shape_cast %126 : vector<1x104x64xbf16> to vector<104x64xbf16>
    %128 = vector.shape_cast %125 : vector<104x64xbf16> to vector<1x104x64xbf16>
    tpu.vector_store %arg3[%c0_78, %c0_79, %c0_80], %128 {strides = array<i32>} : memref<1x104x64xbf16, #tpu.memory_space<vmem>>, vector<1x104x64xbf16>,
    return
  }
  func.func @transform_0(%arg0: i32) -> (i32, i32, i32) {
    %c0_i32 = arith.constant 0 : i32
    %c0_i32_0 = arith.constant 0 : i32
    %c0_i32_1 = arith.constant 0 : i32
    return %arg0, %c0_i32, %c0_i32_0 : i32, i32, i32
  }
  func.func @transform_1(%arg0: i32) -> (i32, i32, i32) {
    %c0_i32 = arith.constant 0 : i32
    %c0_i32_0 = arith.constant 0 : i32
    %c0_i32_1 = arith.constant 0 : i32
    %c0_i32_2 = arith.constant 0 : i32
    return %c0_i32, %c0_i32_0, %c0_i32_1 : i32, i32, i32
  }
  func.func @transform_2(%arg0: i32) -> (i32, i32, i32) {
    %c0_i32 = arith.constant 0 : i32
    %c0_i32_0 = arith.constant 0 : i32
    %c0_i32_1 = arith.constant 0 : i32
    return %arg0, %c0_i32, %c0_i32_0 : i32, i32, i32
  }
}

module attributes {stable_mosaic.version = 11 : i64} {
  func.func @kernel(%arg0: i32, %arg1: memref<1x152x64xbf16, #tpu.memory_space<vmem>>, %arg2: memref<9x64x64xbf16, #tpu.memory_space<vmem>>, %arg3: memref<1x120x64xbf16, #tpu.memory_space<vmem>>) attributes {dimension_semantics = [#tpu.dimension_semantics<parallel>], iteration_bounds = array<i64: 2>, scalar_prefetch = 0 : i64, scratch_operands = 0 : i64, tpu.core_type = #tpu.core_type<tc>, window_params = [{transform_indices = @transform_0, window_bounds = array<i64: 1, 152, 64>}, {pipeline_mode = #tpu.pipeline_mode<synchronous>, transform_indices = @transform_1, window_bounds = array<i64: 9, 64, 64>}, {transform_indices = @transform_2, window_bounds = array<i64: 1, 120, 64>}]} {
    %c0 = arith.constant 0 : index
    %c0_0 = arith.constant 0 : index
    %c0_1 = arith.constant 0 : index
    %0 = vector.load %arg1[%c0, %c0_0, %c0_1] : memref<1x152x64xbf16, #tpu.memory_space<vmem>>, vector<1x120x64xbf16>
    %1 = vector.shape_cast %0 : vector<1x120x64xbf16> to vector<120x64xbf16>
    %c0_2 = arith.constant 0 : index
    %c0_3 = arith.constant 0 : index
    %c0_4 = arith.constant 0 : index
    %2 = vector.load %arg2[%c0_2, %c0_3, %c0_4] : memref<9x64x64xbf16, #tpu.memory_space<vmem>>, vector<1x64x64xbf16>
    %3 = vector.shape_cast %2 : vector<1x64x64xbf16> to vector<64x64xbf16>
    %cst = arith.constant dense<0.000000e+00> : vector<120x64xf32>
    %4 = tpu.matmul %1, %3, %cst {dimension_numbers = #tpu.dot_dimension_numbers<[1], [0], [0], [1], [0, 0, 1, 1], [], []>} : vector<120x64xbf16>, vector<64x64xbf16>, vector<120x64xf32> -> vector<120x64xf32>
    %c0_5 = arith.constant 0 : index
    %c1 = arith.constant 1 : index
    %c0_6 = arith.constant 0 : index
    %5 = vector.load %arg1[%c0_5, %c1, %c0_6] : memref<1x152x64xbf16, #tpu.memory_space<vmem>>, vector<1x120x64xbf16>
    %6 = vector.shape_cast %5 : vector<1x120x64xbf16> to vector<120x64xbf16>
    %c1_7 = arith.constant 1 : index
    %c0_8 = arith.constant 0 : index
    %c0_9 = arith.constant 0 : index
    %7 = vector.load %arg2[%c1_7, %c0_8, %c0_9] : memref<9x64x64xbf16, #tpu.memory_space<vmem>>, vector<1x64x64xbf16>
    %8 = vector.shape_cast %7 : vector<1x64x64xbf16> to vector<64x64xbf16>
    %cst_10 = arith.constant dense<0.000000e+00> : vector<120x64xf32>
    %9 = tpu.matmul %6, %8, %cst_10 {dimension_numbers = #tpu.dot_dimension_numbers<[1], [0], [0], [1], [0, 0, 1, 1], [], []>} : vector<120x64xbf16>, vector<64x64xbf16>, vector<120x64xf32> -> vector<120x64xf32>
    %10 = arith.addf %4, %9 : vector<120x64xf32>
    %c0_11 = arith.constant 0 : index
    %c2 = arith.constant 2 : index
    %c0_12 = arith.constant 0 : index
    %11 = vector.load %arg1[%c0_11, %c2, %c0_12] : memref<1x152x64xbf16, #tpu.memory_space<vmem>>, vector<1x120x64xbf16>
    %12 = vector.shape_cast %11 : vector<1x120x64xbf16> to vector<120x64xbf16>
    %c2_13 = arith.constant 2 : index
    %c0_14 = arith.constant 0 : index
    %c0_15 = arith.constant 0 : index
    %13 = vector.load %arg2[%c2_13, %c0_14, %c0_15] : memref<9x64x64xbf16, #tpu.memory_space<vmem>>, vector<1x64x64xbf16>
    %14 = vector.shape_cast %13 : vector<1x64x64xbf16> to vector<64x64xbf16>
    %cst_16 = arith.constant dense<0.000000e+00> : vector<120x64xf32>
    %15 = tpu.matmul %12, %14, %cst_16 {dimension_numbers = #tpu.dot_dimension_numbers<[1], [0], [0], [1], [0, 0, 1, 1], [], []>} : vector<120x64xbf16>, vector<64x64xbf16>, vector<120x64xf32> -> vector<120x64xf32>
    %16 = arith.addf %10, %15 : vector<120x64xf32>
    %c0_17 = arith.constant 0 : index
    %c12 = arith.constant 12 : index
    %c0_18 = arith.constant 0 : index
    %17 = vector.load %arg1[%c0_17, %c12, %c0_18] : memref<1x152x64xbf16, #tpu.memory_space<vmem>>, vector<1x120x64xbf16>
    %18 = vector.shape_cast %17 : vector<1x120x64xbf16> to vector<120x64xbf16>
    %c3 = arith.constant 3 : index
    %c0_19 = arith.constant 0 : index
    %c0_20 = arith.constant 0 : index
    %19 = vector.load %arg2[%c3, %c0_19, %c0_20] : memref<9x64x64xbf16, #tpu.memory_space<vmem>>, vector<1x64x64xbf16>
    %20 = vector.shape_cast %19 : vector<1x64x64xbf16> to vector<64x64xbf16>
    %cst_21 = arith.constant dense<0.000000e+00> : vector<120x64xf32>
    %21 = tpu.matmul %18, %20, %cst_21 {dimension_numbers = #tpu.dot_dimension_numbers<[1], [0], [0], [1], [0, 0, 1, 1], [], []>} : vector<120x64xbf16>, vector<64x64xbf16>, vector<120x64xf32> -> vector<120x64xf32>
    %22 = arith.addf %16, %21 : vector<120x64xf32>
    %c0_22 = arith.constant 0 : index
    %c13 = arith.constant 13 : index
    %c0_23 = arith.constant 0 : index
    %23 = vector.load %arg1[%c0_22, %c13, %c0_23] : memref<1x152x64xbf16, #tpu.memory_space<vmem>>, vector<1x120x64xbf16>
    %24 = vector.shape_cast %23 : vector<1x120x64xbf16> to vector<120x64xbf16>
    %c4 = arith.constant 4 : index
    %c0_24 = arith.constant 0 : index
    %c0_25 = arith.constant 0 : index
    %25 = vector.load %arg2[%c4, %c0_24, %c0_25] : memref<9x64x64xbf16, #tpu.memory_space<vmem>>, vector<1x64x64xbf16>
    %26 = vector.shape_cast %25 : vector<1x64x64xbf16> to vector<64x64xbf16>
    %cst_26 = arith.constant dense<0.000000e+00> : vector<120x64xf32>
    %27 = tpu.matmul %24, %26, %cst_26 {dimension_numbers = #tpu.dot_dimension_numbers<[1], [0], [0], [1], [0, 0, 1, 1], [], []>} : vector<120x64xbf16>, vector<64x64xbf16>, vector<120x64xf32> -> vector<120x64xf32>
    %28 = arith.addf %22, %27 : vector<120x64xf32>
    %c0_27 = arith.constant 0 : index
    %c14 = arith.constant 14 : index
    %c0_28 = arith.constant 0 : index
    %29 = vector.load %arg1[%c0_27, %c14, %c0_28] : memref<1x152x64xbf16, #tpu.memory_space<vmem>>, vector<1x120x64xbf16>
    %30 = vector.shape_cast %29 : vector<1x120x64xbf16> to vector<120x64xbf16>
    %c5 = arith.constant 5 : index
    %c0_29 = arith.constant 0 : index
    %c0_30 = arith.constant 0 : index
    %31 = vector.load %arg2[%c5, %c0_29, %c0_30] : memref<9x64x64xbf16, #tpu.memory_space<vmem>>, vector<1x64x64xbf16>
    %32 = vector.shape_cast %31 : vector<1x64x64xbf16> to vector<64x64xbf16>
    %cst_31 = arith.constant dense<0.000000e+00> : vector<120x64xf32>
    %33 = tpu.matmul %30, %32, %cst_31 {dimension_numbers = #tpu.dot_dimension_numbers<[1], [0], [0], [1], [0, 0, 1, 1], [], []>} : vector<120x64xbf16>, vector<64x64xbf16>, vector<120x64xf32> -> vector<120x64xf32>
    %34 = arith.addf %28, %33 : vector<120x64xf32>
    %c0_32 = arith.constant 0 : index
    %c24 = arith.constant 24 : index
    %c0_33 = arith.constant 0 : index
    %35 = vector.load %arg1[%c0_32, %c24, %c0_33] : memref<1x152x64xbf16, #tpu.memory_space<vmem>>, vector<1x120x64xbf16>
    %36 = vector.shape_cast %35 : vector<1x120x64xbf16> to vector<120x64xbf16>
    %c6 = arith.constant 6 : index
    %c0_34 = arith.constant 0 : index
    %c0_35 = arith.constant 0 : index
    %37 = vector.load %arg2[%c6, %c0_34, %c0_35] : memref<9x64x64xbf16, #tpu.memory_space<vmem>>, vector<1x64x64xbf16>
    %38 = vector.shape_cast %37 : vector<1x64x64xbf16> to vector<64x64xbf16>
    %cst_36 = arith.constant dense<0.000000e+00> : vector<120x64xf32>
    %39 = tpu.matmul %36, %38, %cst_36 {dimension_numbers = #tpu.dot_dimension_numbers<[1], [0], [0], [1], [0, 0, 1, 1], [], []>} : vector<120x64xbf16>, vector<64x64xbf16>, vector<120x64xf32> -> vector<120x64xf32>
    %40 = arith.addf %34, %39 : vector<120x64xf32>
    %c0_37 = arith.constant 0 : index
    %c25 = arith.constant 25 : index
    %c0_38 = arith.constant 0 : index
    %41 = vector.load %arg1[%c0_37, %c25, %c0_38] : memref<1x152x64xbf16, #tpu.memory_space<vmem>>, vector<1x120x64xbf16>
    %42 = vector.shape_cast %41 : vector<1x120x64xbf16> to vector<120x64xbf16>
    %c7 = arith.constant 7 : index
    %c0_39 = arith.constant 0 : index
    %c0_40 = arith.constant 0 : index
    %43 = vector.load %arg2[%c7, %c0_39, %c0_40] : memref<9x64x64xbf16, #tpu.memory_space<vmem>>, vector<1x64x64xbf16>
    %44 = vector.shape_cast %43 : vector<1x64x64xbf16> to vector<64x64xbf16>
    %cst_41 = arith.constant dense<0.000000e+00> : vector<120x64xf32>
    %45 = tpu.matmul %42, %44, %cst_41 {dimension_numbers = #tpu.dot_dimension_numbers<[1], [0], [0], [1], [0, 0, 1, 1], [], []>} : vector<120x64xbf16>, vector<64x64xbf16>, vector<120x64xf32> -> vector<120x64xf32>
    %46 = arith.addf %40, %45 : vector<120x64xf32>
    %c0_42 = arith.constant 0 : index
    %c26 = arith.constant 26 : index
    %c0_43 = arith.constant 0 : index
    %47 = vector.load %arg1[%c0_42, %c26, %c0_43] : memref<1x152x64xbf16, #tpu.memory_space<vmem>>, vector<1x120x64xbf16>
    %48 = vector.shape_cast %47 : vector<1x120x64xbf16> to vector<120x64xbf16>
    %c8 = arith.constant 8 : index
    %c0_44 = arith.constant 0 : index
    %c0_45 = arith.constant 0 : index
    %49 = vector.load %arg2[%c8, %c0_44, %c0_45] : memref<9x64x64xbf16, #tpu.memory_space<vmem>>, vector<1x64x64xbf16>
    %50 = vector.shape_cast %49 : vector<1x64x64xbf16> to vector<64x64xbf16>
    %cst_46 = arith.constant dense<0.000000e+00> : vector<120x64xf32>
    %51 = tpu.matmul %48, %50, %cst_46 {dimension_numbers = #tpu.dot_dimension_numbers<[1], [0], [0], [1], [0, 0, 1, 1], [], []>} : vector<120x64xbf16>, vector<64x64xbf16>, vector<120x64xf32> -> vector<120x64xf32>
    %52 = arith.addf %46, %51 : vector<120x64xf32>
    %53 = tpu.iota {dimensions = array<i32: 0>} : vector<120x1xi32>
    %c12_i32 = arith.constant 12 : i32
    %c0_i32 = arith.constant 0 : i32
    %54 = arith.cmpi eq, %c12_i32, %c0_i32 : i32
    %c1_i32 = arith.constant 1 : i32
    %55 = arith.select %54, %c1_i32, %c12_i32 : i32
    %56 = vector.broadcast %55 : i32 to vector<120x1xi32>
    %57 = arith.remsi %53, %56 : vector<120x1xi32>
    %c0_i32_47 = arith.constant 0 : i32
    %58 = vector.broadcast %c0_i32_47 : i32 to vector<120x1xi32>
    %59 = arith.cmpi ne, %57, %58 : vector<120x1xi32>
    %c0_i32_48 = arith.constant 0 : i32
    %60 = vector.broadcast %c0_i32_48 : i32 to vector<120x1xi32>
    %61 = arith.cmpi slt, %57, %60 : vector<120x1xi32>
    %c0_i32_49 = arith.constant 0 : i32
    %62 = arith.cmpi slt, %55, %c0_i32_49 : i32
    %63 = vector.broadcast %62 : i1 to vector<120x1xi1>
    %64 = vector.broadcast %63 : vector<120x1xi1> to vector<120x1xi1>
    %65 = arith.xori %61, %64 : vector<120x1xi1>
    %66 = arith.andi %65, %59 : vector<120x1xi1>
    %67 = vector.broadcast %55 : i32 to vector<120x1xi32>
    %68 = arith.addi %57, %67 : vector<120x1xi32>
    %69 = arith.select %66, %68, %57 : vector<120x1xi1>, vector<120x1xi32>
    %c10_i32 = arith.constant 10 : i32
    %70 = vector.broadcast %c10_i32 : i32 to vector<120x1xi32>
    %71 = arith.cmpi slt, %69, %70 : vector<120x1xi32>
    %c120_i32 = arith.constant 120 : i32
    %72 = vector.broadcast %c120_i32 : i32 to vector<120x1xi32>
    %73 = arith.cmpi slt, %53, %72 : vector<120x1xi32>
    %74 = arith.andi %71, %73 : vector<120x1xi1>
    %cst_50 = arith.constant 0.000000e+00 : f32
    %75 = vector.shape_cast %74 : vector<120x1xi1> to vector<120x1xi1>
    %76 = vector.broadcast %75 : vector<120x1xi1> to vector<120x64xi1>
    %77 = vector.broadcast %cst_50 : f32 to vector<120x64xf32>
    %78 = arith.select %76, %52, %77 : vector<120x64xi1>, vector<120x64xf32>
    %cst_51 = arith.constant dense<0.000000e+00> : vector<64xf32>
    %79 = vector.multi_reduction <add>, %78, %cst_51 [0] : vector<120x64xf32> to vector<64xf32>
    %80 = vector.shape_cast %79 : vector<64xf32> to vector<1x64xf32>
    %cst_52 = arith.constant 0.00999999977 : f32
    %81 = vector.broadcast %cst_52 : f32 to vector<1x64xf32>
    %82 = arith.mulf %80, %81 : vector<1x64xf32>
    %83 = arith.mulf %78, %78 : vector<120x64xf32>
    %cst_53 = arith.constant dense<0.000000e+00> : vector<64xf32>
    %84 = vector.multi_reduction <add>, %83, %cst_53 [0] : vector<120x64xf32> to vector<64xf32>
    %85 = vector.shape_cast %84 : vector<64xf32> to vector<1x64xf32>
    %cst_54 = arith.constant 0.00999999977 : f32
    %86 = vector.broadcast %cst_54 : f32 to vector<1x64xf32>
    %87 = arith.mulf %85, %86 : vector<1x64xf32>
    %88 = arith.mulf %82, %82 : vector<1x64xf32>
    %89 = arith.subf %87, %88 : vector<1x64xf32>
    %cst_55 = arith.constant 0.000000e+00 : f32
    %90 = vector.broadcast %cst_55 : f32 to vector<1x64xf32>
    %91 = arith.maximumf %89, %90 : vector<1x64xf32>
    %92 = vector.broadcast %82 : vector<1x64xf32> to vector<120x64xf32>
    %93 = arith.subf %52, %92 : vector<120x64xf32>
    %cst_56 = arith.constant 9.99999974E-6 : f32
    %94 = vector.broadcast %cst_56 : f32 to vector<1x64xf32>
    %95 = arith.addf %91, %94 : vector<1x64xf32>
    %96 = math.rsqrt %95 : vector<1x64xf32>
    %97 = vector.broadcast %96 : vector<1x64xf32> to vector<120x64xf32>
    %98 = arith.mulf %93, %97 : vector<120x64xf32>
    %cst_57 = arith.constant 0.000000e+00 : f32
    %99 = vector.broadcast %cst_57 : f32 to vector<120x64xf32>
    %100 = arith.maximumf %98, %99 : vector<120x64xf32>
    %101 = arith.truncf %100 : vector<120x64xf32> to vector<120x64xbf16>
    %c0_58 = arith.constant 0 : index
    %c0_59 = arith.constant 0 : index
    %c0_60 = arith.constant 0 : index
    %102 = vector.load %arg3[%c0_58, %c0_59, %c0_60] : memref<1x120x64xbf16, #tpu.memory_space<vmem>>, vector<1x120x64xbf16>
    %103 = vector.shape_cast %102 : vector<1x120x64xbf16> to vector<120x64xbf16>
    %104 = vector.shape_cast %101 : vector<120x64xbf16> to vector<1x120x64xbf16>
    tpu.vector_store %arg3[%c0_58, %c0_59, %c0_60], %104 {strides = array<i32>} : memref<1x120x64xbf16, #tpu.memory_space<vmem>>, vector<1x120x64xbf16>,
    return
  }
  func.func @transform_0(%arg0: i32) -> (i32, i32, i32) {
    %c0_i32 = arith.constant 0 : i32
    %c0_i32_0 = arith.constant 0 : i32
    %c0_i32_1 = arith.constant 0 : i32
    return %arg0, %c0_i32, %c0_i32_0 : i32, i32, i32
  }
  func.func @transform_1(%arg0: i32) -> (i32, i32, i32) {
    %c0_i32 = arith.constant 0 : i32
    %c0_i32_0 = arith.constant 0 : i32
    %c0_i32_1 = arith.constant 0 : i32
    %c0_i32_2 = arith.constant 0 : i32
    return %c0_i32, %c0_i32_0, %c0_i32_1 : i32, i32, i32
  }
  func.func @transform_2(%arg0: i32) -> (i32, i32, i32) {
    %c0_i32 = arith.constant 0 : i32
    %c0_i32_0 = arith.constant 0 : i32
    %c0_i32_1 = arith.constant 0 : i32
    return %arg0, %c0_i32, %c0_i32_0 : i32, i32, i32
  }
}

module attributes {stable_mosaic.version = 11 : i64} {
  func.func @kernel(%arg0: i32, %arg1: memref<1x152x64xbf16, #tpu.memory_space<vmem>>, %arg2: memref<9x64x64xbf16, #tpu.memory_space<vmem>>, %arg3: memref<1x152x64xbf16, #tpu.memory_space<vmem>>, %arg4: memref<1x120x64xbf16, #tpu.memory_space<vmem>>) attributes {dimension_semantics = [#tpu.dimension_semantics<parallel>], iteration_bounds = array<i64: 2>, scalar_prefetch = 0 : i64, scratch_operands = 0 : i64, tpu.core_type = #tpu.core_type<tc>, window_params = [{transform_indices = @transform_0, window_bounds = array<i64: 1, 152, 64>}, {pipeline_mode = #tpu.pipeline_mode<synchronous>, transform_indices = @transform_1, window_bounds = array<i64: 9, 64, 64>}, {transform_indices = @transform_2, window_bounds = array<i64: 1, 152, 64>}, {transform_indices = @transform_3, window_bounds = array<i64: 1, 120, 64>}]} {
    %c0 = arith.constant 0 : index
    %c0_0 = arith.constant 0 : index
    %c0_1 = arith.constant 0 : index
    %0 = vector.load %arg1[%c0, %c0_0, %c0_1] : memref<1x152x64xbf16, #tpu.memory_space<vmem>>, vector<1x120x64xbf16>
    %1 = vector.shape_cast %0 : vector<1x120x64xbf16> to vector<120x64xbf16>
    %c0_2 = arith.constant 0 : index
    %c0_3 = arith.constant 0 : index
    %c0_4 = arith.constant 0 : index
    %2 = vector.load %arg2[%c0_2, %c0_3, %c0_4] : memref<9x64x64xbf16, #tpu.memory_space<vmem>>, vector<1x64x64xbf16>
    %3 = vector.shape_cast %2 : vector<1x64x64xbf16> to vector<64x64xbf16>
    %cst = arith.constant dense<0.000000e+00> : vector<120x64xf32>
    %4 = tpu.matmul %1, %3, %cst {dimension_numbers = #tpu.dot_dimension_numbers<[1], [0], [0], [1], [0, 0, 1, 1], [], []>} : vector<120x64xbf16>, vector<64x64xbf16>, vector<120x64xf32> -> vector<120x64xf32>
    %c0_5 = arith.constant 0 : index
    %c1 = arith.constant 1 : index
    %c0_6 = arith.constant 0 : index
    %5 = vector.load %arg1[%c0_5, %c1, %c0_6] : memref<1x152x64xbf16, #tpu.memory_space<vmem>>, vector<1x120x64xbf16>
    %6 = vector.shape_cast %5 : vector<1x120x64xbf16> to vector<120x64xbf16>
    %c1_7 = arith.constant 1 : index
    %c0_8 = arith.constant 0 : index
    %c0_9 = arith.constant 0 : index
    %7 = vector.load %arg2[%c1_7, %c0_8, %c0_9] : memref<9x64x64xbf16, #tpu.memory_space<vmem>>, vector<1x64x64xbf16>
    %8 = vector.shape_cast %7 : vector<1x64x64xbf16> to vector<64x64xbf16>
    %cst_10 = arith.constant dense<0.000000e+00> : vector<120x64xf32>
    %9 = tpu.matmul %6, %8, %cst_10 {dimension_numbers = #tpu.dot_dimension_numbers<[1], [0], [0], [1], [0, 0, 1, 1], [], []>} : vector<120x64xbf16>, vector<64x64xbf16>, vector<120x64xf32> -> vector<120x64xf32>
    %10 = arith.addf %4, %9 : vector<120x64xf32>
    %c0_11 = arith.constant 0 : index
    %c2 = arith.constant 2 : index
    %c0_12 = arith.constant 0 : index
    %11 = vector.load %arg1[%c0_11, %c2, %c0_12] : memref<1x152x64xbf16, #tpu.memory_space<vmem>>, vector<1x120x64xbf16>
    %12 = vector.shape_cast %11 : vector<1x120x64xbf16> to vector<120x64xbf16>
    %c2_13 = arith.constant 2 : index
    %c0_14 = arith.constant 0 : index
    %c0_15 = arith.constant 0 : index
    %13 = vector.load %arg2[%c2_13, %c0_14, %c0_15] : memref<9x64x64xbf16, #tpu.memory_space<vmem>>, vector<1x64x64xbf16>
    %14 = vector.shape_cast %13 : vector<1x64x64xbf16> to vector<64x64xbf16>
    %cst_16 = arith.constant dense<0.000000e+00> : vector<120x64xf32>
    %15 = tpu.matmul %12, %14, %cst_16 {dimension_numbers = #tpu.dot_dimension_numbers<[1], [0], [0], [1], [0, 0, 1, 1], [], []>} : vector<120x64xbf16>, vector<64x64xbf16>, vector<120x64xf32> -> vector<120x64xf32>
    %16 = arith.addf %10, %15 : vector<120x64xf32>
    %c0_17 = arith.constant 0 : index
    %c12 = arith.constant 12 : index
    %c0_18 = arith.constant 0 : index
    %17 = vector.load %arg1[%c0_17, %c12, %c0_18] : memref<1x152x64xbf16, #tpu.memory_space<vmem>>, vector<1x120x64xbf16>
    %18 = vector.shape_cast %17 : vector<1x120x64xbf16> to vector<120x64xbf16>
    %c3 = arith.constant 3 : index
    %c0_19 = arith.constant 0 : index
    %c0_20 = arith.constant 0 : index
    %19 = vector.load %arg2[%c3, %c0_19, %c0_20] : memref<9x64x64xbf16, #tpu.memory_space<vmem>>, vector<1x64x64xbf16>
    %20 = vector.shape_cast %19 : vector<1x64x64xbf16> to vector<64x64xbf16>
    %cst_21 = arith.constant dense<0.000000e+00> : vector<120x64xf32>
    %21 = tpu.matmul %18, %20, %cst_21 {dimension_numbers = #tpu.dot_dimension_numbers<[1], [0], [0], [1], [0, 0, 1, 1], [], []>} : vector<120x64xbf16>, vector<64x64xbf16>, vector<120x64xf32> -> vector<120x64xf32>
    %22 = arith.addf %16, %21 : vector<120x64xf32>
    %c0_22 = arith.constant 0 : index
    %c13 = arith.constant 13 : index
    %c0_23 = arith.constant 0 : index
    %23 = vector.load %arg1[%c0_22, %c13, %c0_23] : memref<1x152x64xbf16, #tpu.memory_space<vmem>>, vector<1x120x64xbf16>
    %24 = vector.shape_cast %23 : vector<1x120x64xbf16> to vector<120x64xbf16>
    %c4 = arith.constant 4 : index
    %c0_24 = arith.constant 0 : index
    %c0_25 = arith.constant 0 : index
    %25 = vector.load %arg2[%c4, %c0_24, %c0_25] : memref<9x64x64xbf16, #tpu.memory_space<vmem>>, vector<1x64x64xbf16>
    %26 = vector.shape_cast %25 : vector<1x64x64xbf16> to vector<64x64xbf16>
    %cst_26 = arith.constant dense<0.000000e+00> : vector<120x64xf32>
    %27 = tpu.matmul %24, %26, %cst_26 {dimension_numbers = #tpu.dot_dimension_numbers<[1], [0], [0], [1], [0, 0, 1, 1], [], []>} : vector<120x64xbf16>, vector<64x64xbf16>, vector<120x64xf32> -> vector<120x64xf32>
    %28 = arith.addf %22, %27 : vector<120x64xf32>
    %c0_27 = arith.constant 0 : index
    %c14 = arith.constant 14 : index
    %c0_28 = arith.constant 0 : index
    %29 = vector.load %arg1[%c0_27, %c14, %c0_28] : memref<1x152x64xbf16, #tpu.memory_space<vmem>>, vector<1x120x64xbf16>
    %30 = vector.shape_cast %29 : vector<1x120x64xbf16> to vector<120x64xbf16>
    %c5 = arith.constant 5 : index
    %c0_29 = arith.constant 0 : index
    %c0_30 = arith.constant 0 : index
    %31 = vector.load %arg2[%c5, %c0_29, %c0_30] : memref<9x64x64xbf16, #tpu.memory_space<vmem>>, vector<1x64x64xbf16>
    %32 = vector.shape_cast %31 : vector<1x64x64xbf16> to vector<64x64xbf16>
    %cst_31 = arith.constant dense<0.000000e+00> : vector<120x64xf32>
    %33 = tpu.matmul %30, %32, %cst_31 {dimension_numbers = #tpu.dot_dimension_numbers<[1], [0], [0], [1], [0, 0, 1, 1], [], []>} : vector<120x64xbf16>, vector<64x64xbf16>, vector<120x64xf32> -> vector<120x64xf32>
    %34 = arith.addf %28, %33 : vector<120x64xf32>
    %c0_32 = arith.constant 0 : index
    %c24 = arith.constant 24 : index
    %c0_33 = arith.constant 0 : index
    %35 = vector.load %arg1[%c0_32, %c24, %c0_33] : memref<1x152x64xbf16, #tpu.memory_space<vmem>>, vector<1x120x64xbf16>
    %36 = vector.shape_cast %35 : vector<1x120x64xbf16> to vector<120x64xbf16>
    %c6 = arith.constant 6 : index
    %c0_34 = arith.constant 0 : index
    %c0_35 = arith.constant 0 : index
    %37 = vector.load %arg2[%c6, %c0_34, %c0_35] : memref<9x64x64xbf16, #tpu.memory_space<vmem>>, vector<1x64x64xbf16>
    %38 = vector.shape_cast %37 : vector<1x64x64xbf16> to vector<64x64xbf16>
    %cst_36 = arith.constant dense<0.000000e+00> : vector<120x64xf32>
    %39 = tpu.matmul %36, %38, %cst_36 {dimension_numbers = #tpu.dot_dimension_numbers<[1], [0], [0], [1], [0, 0, 1, 1], [], []>} : vector<120x64xbf16>, vector<64x64xbf16>, vector<120x64xf32> -> vector<120x64xf32>
    %40 = arith.addf %34, %39 : vector<120x64xf32>
    %c0_37 = arith.constant 0 : index
    %c25 = arith.constant 25 : index
    %c0_38 = arith.constant 0 : index
    %41 = vector.load %arg1[%c0_37, %c25, %c0_38] : memref<1x152x64xbf16, #tpu.memory_space<vmem>>, vector<1x120x64xbf16>
    %42 = vector.shape_cast %41 : vector<1x120x64xbf16> to vector<120x64xbf16>
    %c7 = arith.constant 7 : index
    %c0_39 = arith.constant 0 : index
    %c0_40 = arith.constant 0 : index
    %43 = vector.load %arg2[%c7, %c0_39, %c0_40] : memref<9x64x64xbf16, #tpu.memory_space<vmem>>, vector<1x64x64xbf16>
    %44 = vector.shape_cast %43 : vector<1x64x64xbf16> to vector<64x64xbf16>
    %cst_41 = arith.constant dense<0.000000e+00> : vector<120x64xf32>
    %45 = tpu.matmul %42, %44, %cst_41 {dimension_numbers = #tpu.dot_dimension_numbers<[1], [0], [0], [1], [0, 0, 1, 1], [], []>} : vector<120x64xbf16>, vector<64x64xbf16>, vector<120x64xf32> -> vector<120x64xf32>
    %46 = arith.addf %40, %45 : vector<120x64xf32>
    %c0_42 = arith.constant 0 : index
    %c26 = arith.constant 26 : index
    %c0_43 = arith.constant 0 : index
    %47 = vector.load %arg1[%c0_42, %c26, %c0_43] : memref<1x152x64xbf16, #tpu.memory_space<vmem>>, vector<1x120x64xbf16>
    %48 = vector.shape_cast %47 : vector<1x120x64xbf16> to vector<120x64xbf16>
    %c8 = arith.constant 8 : index
    %c0_44 = arith.constant 0 : index
    %c0_45 = arith.constant 0 : index
    %49 = vector.load %arg2[%c8, %c0_44, %c0_45] : memref<9x64x64xbf16, #tpu.memory_space<vmem>>, vector<1x64x64xbf16>
    %50 = vector.shape_cast %49 : vector<1x64x64xbf16> to vector<64x64xbf16>
    %cst_46 = arith.constant dense<0.000000e+00> : vector<120x64xf32>
    %51 = tpu.matmul %48, %50, %cst_46 {dimension_numbers = #tpu.dot_dimension_numbers<[1], [0], [0], [1], [0, 0, 1, 1], [], []>} : vector<120x64xbf16>, vector<64x64xbf16>, vector<120x64xf32> -> vector<120x64xf32>
    %52 = arith.addf %46, %51 : vector<120x64xf32>
    %53 = tpu.iota {dimensions = array<i32: 0>} : vector<120x1xi32>
    %c12_i32 = arith.constant 12 : i32
    %c0_i32 = arith.constant 0 : i32
    %54 = arith.cmpi eq, %c12_i32, %c0_i32 : i32
    %c1_i32 = arith.constant 1 : i32
    %55 = arith.select %54, %c1_i32, %c12_i32 : i32
    %56 = vector.broadcast %55 : i32 to vector<120x1xi32>
    %57 = arith.remsi %53, %56 : vector<120x1xi32>
    %c0_i32_47 = arith.constant 0 : i32
    %58 = vector.broadcast %c0_i32_47 : i32 to vector<120x1xi32>
    %59 = arith.cmpi ne, %57, %58 : vector<120x1xi32>
    %c0_i32_48 = arith.constant 0 : i32
    %60 = vector.broadcast %c0_i32_48 : i32 to vector<120x1xi32>
    %61 = arith.cmpi slt, %57, %60 : vector<120x1xi32>
    %c0_i32_49 = arith.constant 0 : i32
    %62 = arith.cmpi slt, %55, %c0_i32_49 : i32
    %63 = vector.broadcast %62 : i1 to vector<120x1xi1>
    %64 = vector.broadcast %63 : vector<120x1xi1> to vector<120x1xi1>
    %65 = arith.xori %61, %64 : vector<120x1xi1>
    %66 = arith.andi %65, %59 : vector<120x1xi1>
    %67 = vector.broadcast %55 : i32 to vector<120x1xi32>
    %68 = arith.addi %57, %67 : vector<120x1xi32>
    %69 = arith.select %66, %68, %57 : vector<120x1xi1>, vector<120x1xi32>
    %c10_i32 = arith.constant 10 : i32
    %70 = vector.broadcast %c10_i32 : i32 to vector<120x1xi32>
    %71 = arith.cmpi slt, %69, %70 : vector<120x1xi32>
    %c120_i32 = arith.constant 120 : i32
    %72 = vector.broadcast %c120_i32 : i32 to vector<120x1xi32>
    %73 = arith.cmpi slt, %53, %72 : vector<120x1xi32>
    %74 = arith.andi %71, %73 : vector<120x1xi1>
    %cst_50 = arith.constant 0.000000e+00 : f32
    %75 = vector.shape_cast %74 : vector<120x1xi1> to vector<120x1xi1>
    %76 = vector.broadcast %75 : vector<120x1xi1> to vector<120x64xi1>
    %77 = vector.broadcast %cst_50 : f32 to vector<120x64xf32>
    %78 = arith.select %76, %52, %77 : vector<120x64xi1>, vector<120x64xf32>
    %cst_51 = arith.constant dense<0.000000e+00> : vector<64xf32>
    %79 = vector.multi_reduction <add>, %78, %cst_51 [0] : vector<120x64xf32> to vector<64xf32>
    %80 = vector.shape_cast %79 : vector<64xf32> to vector<1x64xf32>
    %cst_52 = arith.constant 0.00999999977 : f32
    %81 = vector.broadcast %cst_52 : f32 to vector<1x64xf32>
    %82 = arith.mulf %80, %81 : vector<1x64xf32>
    %83 = arith.mulf %78, %78 : vector<120x64xf32>
    %cst_53 = arith.constant dense<0.000000e+00> : vector<64xf32>
    %84 = vector.multi_reduction <add>, %83, %cst_53 [0] : vector<120x64xf32> to vector<64xf32>
    %85 = vector.shape_cast %84 : vector<64xf32> to vector<1x64xf32>
    %cst_54 = arith.constant 0.00999999977 : f32
    %86 = vector.broadcast %cst_54 : f32 to vector<1x64xf32>
    %87 = arith.mulf %85, %86 : vector<1x64xf32>
    %88 = arith.mulf %82, %82 : vector<1x64xf32>
    %89 = arith.subf %87, %88 : vector<1x64xf32>
    %cst_55 = arith.constant 0.000000e+00 : f32
    %90 = vector.broadcast %cst_55 : f32 to vector<1x64xf32>
    %91 = arith.maximumf %89, %90 : vector<1x64xf32>
    %92 = vector.broadcast %82 : vector<1x64xf32> to vector<120x64xf32>
    %93 = arith.subf %52, %92 : vector<120x64xf32>
    %cst_56 = arith.constant 9.99999974E-6 : f32
    %94 = vector.broadcast %cst_56 : f32 to vector<1x64xf32>
    %95 = arith.addf %91, %94 : vector<1x64xf32>
    %96 = math.rsqrt %95 : vector<1x64xf32>
    %97 = vector.broadcast %96 : vector<1x64xf32> to vector<120x64xf32>
    %98 = arith.mulf %93, %97 : vector<120x64xf32>
    %c0_57 = arith.constant 0 : index
    %c13_58 = arith.constant 13 : index
    %c0_59 = arith.constant 0 : index
    %99 = vector.load %arg3[%c0_57, %c13_58, %c0_59] : memref<1x152x64xbf16, #tpu.memory_space<vmem>>, vector<1x120x64xbf16>
    %100 = vector.shape_cast %99 : vector<1x120x64xbf16> to vector<120x64xbf16>
    %101 = arith.extf %100 : vector<120x64xbf16> to vector<120x64xf32>
    %102 = arith.addf %98, %101 : vector<120x64xf32>
    %103 = arith.truncf %102 : vector<120x64xf32> to vector<120x64xbf16>
    %c0_60 = arith.constant 0 : index
    %c0_61 = arith.constant 0 : index
    %c0_62 = arith.constant 0 : index
    %104 = vector.load %arg4[%c0_60, %c0_61, %c0_62] : memref<1x120x64xbf16, #tpu.memory_space<vmem>>, vector<1x120x64xbf16>
    %105 = vector.shape_cast %104 : vector<1x120x64xbf16> to vector<120x64xbf16>
    %106 = vector.shape_cast %103 : vector<120x64xbf16> to vector<1x120x64xbf16>
    tpu.vector_store %arg4[%c0_60, %c0_61, %c0_62], %106 {strides = array<i32>} : memref<1x120x64xbf16, #tpu.memory_space<vmem>>, vector<1x120x64xbf16>,
    return
  }
  func.func @transform_0(%arg0: i32) -> (i32, i32, i32) {
    %c0_i32 = arith.constant 0 : i32
    %c0_i32_0 = arith.constant 0 : i32
    %c0_i32_1 = arith.constant 0 : i32
    return %arg0, %c0_i32, %c0_i32_0 : i32, i32, i32
  }
  func.func @transform_1(%arg0: i32) -> (i32, i32, i32) {
    %c0_i32 = arith.constant 0 : i32
    %c0_i32_0 = arith.constant 0 : i32
    %c0_i32_1 = arith.constant 0 : i32
    %c0_i32_2 = arith.constant 0 : i32
    return %c0_i32, %c0_i32_0, %c0_i32_1 : i32, i32, i32
  }
  func.func @transform_2(%arg0: i32) -> (i32, i32, i32) {
    %c0_i32 = arith.constant 0 : i32
    %c0_i32_0 = arith.constant 0 : i32
    %c0_i32_1 = arith.constant 0 : i32
    return %arg0, %c0_i32, %c0_i32_0 : i32, i32, i32
  }
  func.func @transform_3(%arg0: i32) -> (i32, i32, i32) {
    %c0_i32 = arith.constant 0 : i32
    %c0_i32_0 = arith.constant 0 : i32
    %c0_i32_1 = arith.constant 0 : i32
    return %arg0, %c0_i32, %c0_i32_0 : i32, i32, i32
  }
}

module attributes {stable_mosaic.version = 11 : i64} {
  func.func @kernel(%arg0: i32, %arg1: memref<1x256x64xbf16, #tpu.memory_space<vmem>>, %arg2: memref<1x64x128xbf16, #tpu.memory_space<vmem>>, %arg3: memref<1x128xf32, #tpu.memory_space<vmem>>, %arg4: memref<1x256x128xf32, #tpu.memory_space<vmem>>) attributes {dimension_semantics = [#tpu.dimension_semantics<parallel>], iteration_bounds = array<i64: 2>, scalar_prefetch = 0 : i64, scratch_operands = 0 : i64, tpu.core_type = #tpu.core_type<tc>, window_params = [{transform_indices = @transform_0, window_bounds = array<i64: 1, 256, 64>}, {pipeline_mode = #tpu.pipeline_mode<synchronous>, transform_indices = @transform_1, window_bounds = array<i64: 1, 64, 128>}, {pipeline_mode = #tpu.pipeline_mode<synchronous>, transform_indices = @transform_2, window_bounds = array<i64: 1, 128>}, {transform_indices = @transform_3, window_bounds = array<i64: 1, 256, 128>}]} {
    %c0 = arith.constant 0 : index
    %c0_0 = arith.constant 0 : index
    %c0_1 = arith.constant 0 : index
    %0 = vector.load %arg1[%c0, %c0_0, %c0_1] : memref<1x256x64xbf16, #tpu.memory_space<vmem>>, vector<1x256x64xbf16>
    %1 = vector.shape_cast %0 : vector<1x256x64xbf16> to vector<256x64xbf16>
    %c0_2 = arith.constant 0 : index
    %c0_3 = arith.constant 0 : index
    %c0_4 = arith.constant 0 : index
    %2 = vector.load %arg2[%c0_2, %c0_3, %c0_4] : memref<1x64x128xbf16, #tpu.memory_space<vmem>>, vector<1x64x128xbf16>
    %3 = vector.shape_cast %2 : vector<1x64x128xbf16> to vector<64x128xbf16>
    %cst = arith.constant dense<0.000000e+00> : vector<256x128xf32>
    %4 = tpu.matmul %1, %3, %cst {dimension_numbers = #tpu.dot_dimension_numbers<[1], [0], [0], [1], [0, 0, 1, 1], [], []>} : vector<256x64xbf16>, vector<64x128xbf16>, vector<256x128xf32> -> vector<256x128xf32>
    %c0_5 = arith.constant 0 : index
    %c0_6 = arith.constant 0 : index
    %5 = vector.load %arg3[%c0_5, %c0_6] : memref<1x128xf32, #tpu.memory_space<vmem>>, vector<1x128xf32>
    %6 = vector.broadcast %5 : vector<1x128xf32> to vector<256x128xf32>
    %7 = arith.addf %4, %6 : vector<256x128xf32>
    %8 = math.tanh %7 : vector<256x128xf32>
    %c0_7 = arith.constant 0 : index
    %c0_8 = arith.constant 0 : index
    %c0_9 = arith.constant 0 : index
    %9 = vector.load %arg4[%c0_7, %c0_8, %c0_9] : memref<1x256x128xf32, #tpu.memory_space<vmem>>, vector<1x256x128xf32>
    %10 = vector.shape_cast %9 : vector<1x256x128xf32> to vector<256x128xf32>
    %11 = vector.shape_cast %8 : vector<256x128xf32> to vector<1x256x128xf32>
    tpu.vector_store %arg4[%c0_7, %c0_8, %c0_9], %11 {strides = array<i32>} : memref<1x256x128xf32, #tpu.memory_space<vmem>>, vector<1x256x128xf32>,
    return
  }
  func.func @transform_0(%arg0: i32) -> (i32, i32, i32) {
    %c0_i32 = arith.constant 0 : i32
    %c0_i32_0 = arith.constant 0 : i32
    %c0_i32_1 = arith.constant 0 : i32
    return %arg0, %c0_i32, %c0_i32_0 : i32, i32, i32
  }
  func.func @transform_1(%arg0: i32) -> (i32, i32, i32) {
    %c0_i32 = arith.constant 0 : i32
    %c0_i32_0 = arith.constant 0 : i32
    %c0_i32_1 = arith.constant 0 : i32
    %c0_i32_2 = arith.constant 0 : i32
    return %c0_i32, %c0_i32_0, %c0_i32_1 : i32, i32, i32
  }
  func.func @transform_2(%arg0: i32) -> (i32, i32) {
    %c0_i32 = arith.constant 0 : i32
    %c0_i32_0 = arith.constant 0 : i32
    %c0_i32_1 = arith.constant 0 : i32
    return %c0_i32, %c0_i32_0 : i32, i32
  }
  func.func @transform_3(%arg0: i32) -> (i32, i32, i32) {
    %c0_i32 = arith.constant 0 : i32
    %c0_i32_0 = arith.constant 0 : i32
    %c0_i32_1 = arith.constant 0 : i32
    return %arg0, %c0_i32, %c0_i32_0 : i32, i32, i32
  }
}

</mosaic_0001>

<bundles_post_ra>
// kernel: refiner_forward.8
= control target key start
LH: loop header
LB: loop body
LE: loop exit
PB: predicated region body
PF: predicated region fallthrough
CT: control target
= control target key end

     0   :  { %7 = vsyncpa [#allocation3], 0  ;;  %s6032_s0 = inlined_call_operand.hbm [shape: bf16[2,224,39], index: 0, kind: input, shape index: {}]   ;;  %s6033_s1 = inlined_call_operand.hbm [shape: bf16[13,39,64], index: 1, kind: input, shape index: {}]   ;;  %s6034_s2 = inlined_call_operand.hbm [shape: bf16[2,104,64], index: 2, kind: output, shape index: {}]  }
   0x1   :  { %9 = vsyncpa [#allocation3 + $0x1], 0 }
   0x2   :  { %10 = vsyncpa [#allocation6], 0 }
   0x3   :  { %11 = vsyncpa [#allocation4], 0 }
   0x4   :  { %13 = vsyncpa [#allocation4 + $0x1], 0  ;;  %s4892_s9 = smov 0   ;;  %s4894_s10 = smov 0  }
   0x5   :  { %s4896_s11 = smov 0   ;;  %s4898_s12 = smov 0  }
   0x6 LB: > { %s4913_s13 = sadd.s32 4294967295, %s4865_s12   ;;  %s3352_s14 = sadd.s32 4294967294, %s4865_s12   ;;  %s4865_s12 = sphi %s4898_s12, %s6090_s12   ;;  %s4861_s11 = sphi %s4896_s11, %s6089_s11   ;;  %s4857_s10 = sphi %s4894_s10, %s6088_s10   ;;  %s4853_s9 = sphi %s4892_s9, %s6087_s9  }
   0x7   : > { %p39_p0 = scmp.ne.s32.totalorder %s4857_s10, %s4853_s9  ;;  %p6035_p1 = scmp.eq.s32.totalorder %s4913_s13, 0 }
   0x8   : > { %p90_p3 = scmp.eq.s32.totalorder %s3352_s14, 1  ;;  %p3353_p5 = scmp.ge.s32.totalorder %s4865_s12, 1 }
   0x9   : > { %p4922_p4 = por %p6035_p1, %p39_p0  ;;  %p97_p7 = scmp.lt.s32.totalorder %s4865_s12, 3 }
   0xa   : > { %p4927_p6 = por %p90_p3, %p39_p0  ;;  %s4867_s18 = smov [#allocation5]  }
   0xb   : > { %s6038_s15 = scalar_select %p4922_p4, 1, 0 }
   0xc   : > { %s6039_s16 = scalar_select %p4927_p6, 1, 0 }
   0xd   : > { %p4932_p8 = pnand %p3353_p5, %p97_p7  ;;  %s109_s19 = sshll.u32 %s4867_s18, 4  ;;  %s4936_s19 = int_to_ptr.vmem [resolvable:$true] %s109_s19 }
   0xe   : > { %s4948_s21 = sadd.s32 1, %s4865_s12   ;;  %s26_s22 = sadd.s32 1, %s4861_s11 }
   0xf   : > { %s6040_s17 = scalar_select %p4932_p8, 1, 0 }
  0x10   : > { %p4547_p9 = pneg %p4932_p8  ;;  %s23_s23 = ssub.s32 %s4865_s12, %s4948_s21 }
  0x11   : > { %s4737_s26 = scalar_lea.hbm %s6033_s1, 4160 }
  0x12   : > { %p4943_p11 = pnand %p4547_p9, %p6035_p1  ;;  %p4738_p12 = scmp.ne.s32.totalorder %s6033_s1, %s4737_s26 }
  0x13   : > { %p4744_p5 = scmp.lt.u32.totalorder %s4737_s26, %s6033_s1 }
  0x14   : > { %p4739_p13 = pneg %p4943_p11 }
  0x16   : > { %p4740_p0 = pnand %p4739_p13, %p4738_p12 }
  0x18   : > { %p4741_p3 = pneg %p4740_p0 }
  0x1a   : > { %p4746_p7 = pnand %p4744_p5, %p4741_p3 }
  0x1c   : > { %4749 = shalt.err (!%p4746_p7)
}
  0x1d   : > { %s4750_s3 = scalar_lea.vmem %s4936_s19, 4160  ;;  %p4758_p2 = scmp.lt.s32.totalorder %s4936_s19, %s4936_s19 }
  0x1e   : > { %p4751_p9 = scmp.ne.s32.totalorder %s4936_s19, %s4750_s3  ;;  %p4759_p6 = scmp.lt.s32.totalorder %s4750_s3, %s4750_s3 }
  0x20   : > { %p4753_p10 = pnand %p4751_p9, %p4739_p13  ;;  %p4760_p4 = por %p4759_p6, %p4758_p2 }
  0x22   : > { %p4754_p1 = pneg %p4753_p10 }
  0x24   : > { %p4761_p8 = pnand %p4760_p4, %p4754_p1 }
  0x26   : > { %4764 = shalt.err (!%p4761_p8)
}
  0x27   : > { %s4868_s4 = smov 64   ;;  %s4869_s5 = smov 4  }
  0x28   : > { %4550 = dma.hbm_to_vmem [thread:$0]  (!%p4943_p11), %s6033_s1, 4160, %s4936_s19, [#allocation6], %s4868_s4, %s4868_s4, %s4869_s5  }
  0x29   : > { %p24_p1 = scmp.eq.s32.totalorder %s23_s23, 0  ;;  %p33_p2 = scmp.ne.s32.totalorder %s4861_s11, %s4857_s10 }
  0x2a   : > { %p34_p4 = scmp.eq.s32.totalorder %s4865_s12, 0  ;;  %p4560_p6 = scmp.lt.s32.totalorder %s4865_s12, 2 }
  0x2b   : > { %s4982_s8 = scalar_select %p24_p1, %s4861_s11, %s26_s22  }
  0x2c   : > { %p35_p8 = por %p34_p4, %p33_p2  ;;  %p6042_p10 = scmp.eq.s32.totalorder %s4913_s13, 1 }
  0x2d   : > { %s123_s18 = sand.u32 1, %s4861_s11   ;;  %s4509_s20 = smul.u32 1792, %s4865_s12 }
  0x2e   : > { %p4986_p12 = por %p6042_p10, %p33_p2  ;;  %s4508_s24 = smul.u32 112, %s123_s18 }
  0x2f   : > { %p4992_p13 = pnand %p4560_p6, %p35_p8  ;;  %s4999_s22 = scalar_lea.hbm %s6032_s0, %s4509_s20 }
  0x30   : > { %s127_s26 = scalar_lea.vmem [#allocation2], %s4508_s24  ;;  %s5003_s28 = scalar_lea.sflag [#allocation3], %s123_s18 }
  0x31   : > { %s134_s27 = sshll.u32 %s127_s26, 4  ;;  %s4765_s29 = scalar_lea.hbm %s4999_s22, 1792  ;;  %s5001_s27 = int_to_ptr.vmem [resolvable:$true] %s134_s27 }
  0x32   : > { %p4766_p11 = scmp.ne.s32.totalorder %s4999_s22, %s4765_s29  ;;  %p4767_p0 = pneg %p4992_p13 }
  0x33   : > { %s4770_s6 = scalar_lea.hbm %s6032_s0, 3584  ;;  %p4771_p7 = scmp.lt.u32.totalorder %s4999_s22, %s6032_s0 }
  0x34   : > { %p4768_p3 = pnand %p4767_p0, %p4766_p11  ;;  %p4772_p9 = scmp.lt.u32.totalorder %s4770_s6, %s4765_s29 }
  0x35   : > { %p4774_p2 = scmp.lt.u32.totalorder %s4765_s29, %s4999_s22 }
  0x36   : > { %p4769_p5 = pneg %p4768_p3  ;;  %p4773_p1 = por %p4772_p9, %p4771_p7 }
  0x38   : > { %p4775_p4 = por %p4774_p2, %p4773_p1 }
  0x3a   : > { %p4776_p6 = pnand %p4775_p4, %p4769_p5 }
  0x3c   : > { %4779 = shalt.err (!%p4776_p6)
}
  0x3d   : > { %s4780_s18 = scalar_lea.vmem %s5001_s27, 1792  ;;  %s4870_s24 = smov [#allocation2]  }
  0x3e   : > { %p4781_p8 = scmp.ne.s32.totalorder %s5001_s27, %s4780_s18  ;;  %s4785_s19 = sshll.u32 %s4870_s24, 4  ;;  %s4786_s19 = int_to_ptr.vmem [resolvable:$false] %s4785_s19 }
  0x3f   : > { %s4787_s23 = scalar_lea.vmem %s4786_s19, 3584  ;;  %p4788_p3 = scmp.lt.s32.totalorder %s5001_s27, %s4786_s19 }
  0x40   : > { %p4783_p10 = pnand %p4781_p8, %p4767_p0  ;;  %p4789_p7 = scmp.lt.s32.totalorder %s4787_s23, %s4780_s18 }
  0x42   : > { %p4784_p11 = pneg %p4783_p10  ;;  %p4790_p9 = por %p4789_p7, %p4788_p3 }
  0x44   : > { %p4791_p1 = pnand %p4790_p9, %p4784_p11 }
  0x46   : > { %4794 = shalt.err (!%p4791_p1)
}
  0x47   : > { %4554 = dma.hbm_to_vmem [thread:$0]  (!%p4992_p13), %s4999_s22, 1792, %s5001_s27, %s5003_s28, %s4868_s4, %s4868_s4, %s4869_s5  }
  0x48   : > { %p6045_p0 = scmp.ne.s32.totalorder %s6040_s17, 0 }
  0x49   : > { %s5037_s26 = sand.u32 (!%p6045_p0), 1, %s4857_s10   ;;  %p6046_p5 = scmp.ne.s32.totalorder (!%p6045_p0), %s6038_s15, 0 }
  0x4a   : > { %146 = sbr.rel (%p6045_p0) target bundleno = 739 (0x2e3), region = 28  ;;  %s149_s30 = scalar_lea.sflag (!%p6045_p0), [#allocation3], %s5037_s26 }
  0x4b   : > { %s4510_s29 = smul.u32 (!%p6045_p0), 112, %s5037_s26 }
  0x4d   : > { %s5041_s3 = scalar_lea.vmem (!%p6045_p0), [#allocation2], %s4510_s29 }
  0x51   : > { %4840 = dma.done.wait (%p6046_p5), %s149_s30, 1792  }
  0x52   : > { %4842 = vsyncadd (%p6046_p5), %s149_s30, 4294965504  ;;  %p6047_p13 = scmp.eq.s32.totalorder %s4913_s13, 0 }
  0x54   : > { %4844 = dma.done.wait (%p6047_p13), [#allocation6], 4160   ;;  %p6048_p2 = pmov %p6047_p13 }
  0x55   : > { %v4871_v0 = vmov 0.0   ;;  %vm4872_vm0 = vmmov 0   ;;  %vm291_vm1 = vcmask 1042432   ;;  %vm292_vm2 = vcmask 1043456   ;;  %v4603_v1 = vld [vmem:[#allocation5 + $0x14] sm:$0xff]   ;;  %v4605_v5 = vld [vmem:[#allocation5 + $0x1c] sm:$0xff]  }
  0x56   : > { %4846 = vsyncadd (%p6048_p2), [#allocation6], 4294963136  ;;  %3739 = vmatprep.subr.bf16.mxu1 %v4871_v0  ;;  %3943 = vmatprep.subr.bf16.mxu0 %v4871_v0  ;;  %v4873_v2 = vmov 65535   ;;  %v4604_v4 = vld [vmem:[#allocation5 + $0x78] sm:$0xff]   ;;  %vm240_vm3 = vcmask 1046528   ;;  %vm269_vm4 = vcmask 318464  }
  0x57   : > { %3745 = vmatprep.mubr.msk.bf16.mxu1 %vm4872_vm0, %v4871_v0  ;;  %3949 = vmatprep.mubr.msk.bf16.mxu0 %vm4872_vm0, %v4871_v0  ;;  %v293_v3 = vsel %vm291_vm1, 4294967295, %v4873_v2  ;;  %v4606_v6 = vld [vmem:[#allocation5 + $0x80] sm:$0xff]   ;;  %v4608_v9 = vld [vmem:[#allocation5 + $0x88] ss:$0 sps:$4 sm:$0xff]   ;;  %v5065_v11 = vld [vmem:[%s5041_s3 + $0xc] sm:$0xf] }
  0x58   : > { %3740 = vmatpush3.bf16.msra.mxu1 %v4603_v1  ;;  %3944 = vmatpush3.bf16.msra.mxu0 %v4604_v4  ;;  %v5058_v7 = vsel %vm292_vm2, %v293_v3, 0  ;;  %v4607_v8 = vld [vmem:[#allocation5 + $0x24] ss:$0 sps:$4 sm:$0xff]   ;;  %v5062_v10 = vld [vmem:[%s5041_s3 + $0x8] sm:$0xf]  ;;  %vm579_vm5 = vcmask 1045504  }
  0x59   : > { %3741 = vmatprep.subr.bf16.mxu1 %v4871_v0  ;;  %3945 = vmatprep.subr.bf16.mxu0 %v4871_v0  ;;  %v296_v12 = vand.u32 %v4607_v8, %v5058_v7  ;;  %v5069_v13 = vld [vmem:[%s5041_s3 + $0x10] sm:$0xf]  ;;  %v196_v14 = vld [vmem:[%s5041_s3 + $0x4] sm:$0xe]  ;;  %v3377_v15 = vcombine.low %v5062_v10, %v5065_v11  ;;  %v5076_v16 = vand.u32 %v4608_v9, %v5058_v7  ;;  %v4611_v19 = vld [vmem:[%s5041_s3 + $0x1c] sm:$0xfc]  }
  0x5a   : > { %v3359_v17 = vcombine.low %v196_v14, %v5062_v10  ;;  %v3360_v18 = vcombine.low %v5065_v11, %v5069_v13  ;;  %v4612_v20 = vld [vmem:[%s5041_s3 + $0x24] sm:$0xff]   ;;  %v4613_v23 = vld [vmem:[#allocation5 + $0x8c] sm:$0xff]   ;;  %v1397_v25 = vrot.slane %v4611_v19, 2  ;;  %v5086_v27 = vld [vmem:[%s5041_s3 + $0x14] sm:$0xf]  ;;  %vm788_vm6 = vcmask 1044480  }
  0x5b   : > { %v4615_v24 = vld [vmem:[%s5041_s3 + $0x2c] sm:$0xff]   ;;  %v1398_v26 = vrot.slane %v4612_v20, 2  ;;  %v5089_v28 = vld [vmem:[%s5041_s3 + $0x18] sm:$0xf]  ;;  %v3378_v32 = vcombine.low %v5069_v13, %v5086_v27  ;;  %v5102_v35 = vld [vmem:[%s5041_s3 + $0x1c] sm:$0xf] }
  0x5c   : > { %3742 = vmatpush3.bf16.msra.mxu1 %v4605_v5  ;;  %3946 = vmatpush3.bf16.msra.mxu0 %v4606_v6  ;;  %v241_v21 = vrot.slane %v3359_v17, 1  ;;  %v242_v22 = vrot.slane %v3360_v18, 1  ;;  %v3361_v30 = vcombine.low %v5086_v27, %v5089_v28  ;;  %v4616_v31 = vld [vmem:[#allocation5] sm:$0xff]   ;;  %v1400_v34 = vrot.slane %v4615_v24, 2  ;;  %v4617_v37 = vld [vmem:[#allocation5 + $0x94] sm:$0xff]   ;;  %v4623_v42 = vld [vmem:[#allocation5 + $0x8] sm:$0xff]  }
  0x5d   : > { %3743 = vmatprep.subr.bf16.mxu1 %v4871_v0  ;;  %3947 = vmatprep.subr.bf16.mxu0 %v4871_v0  ;;  %v1399_v33 = vsel %vm579_vm5, %v1397_v25, %v1398_v26  ;;  %v3379_v38 = vcombine.low %v5089_v28, %v5102_v35  ;;  %v5112_v39 = vld [vmem:[%s5041_s3 + $0x20] sm:$0xf]  ;;  %v4620_v40 = vld [vmem:[#allocation5 + $0x9c] ss:$0 sps:$4 sm:$0xff]   ;;  %v5116_v41 = vld [vmem:[%s5041_s3 + $0x24] sm:$0xf] }
  0x5e   : > { %v243_v29 = vsel %vm240_vm3, %v241_v21, %v242_v22  ;;  %v244_v36 = vrot.slane %v3361_v30, 1  ;;  %v3362_v44 = vcombine.low %v5102_v35, %v5112_v39  ;;  %v4619_v45 = vld [vmem:[%s5041_s3 + $0x34] sm:$0xff]   ;;  %v3380_v46 = vcombine.low %v5112_v39, %v5116_v41  ;;  %v5128_v49 = vld [vmem:[%s5041_s3 + $0x28] sm:$0xf]  ;;  %v5131_v50 = vld [vmem:[%s5041_s3 + $0x2c] sm:$0xf] }
  0x5f   : > { %v1401_v47 = vsel %vm579_vm5, %v1398_v26, %v1400_v34  ;;  %v1655_v48 = vand.u32 %v4620_v40, %v5058_v7  ;;  %v3381_v51 = vcombine.low %v5128_v49, %v5131_v50  ;;  %v1402_v53 = vrot.slane %v4619_v45, 2  ;;  %v4630_v54 = vld [vmem:[#allocation5 + $0x10] ss:$0 sps:$4 sm:$0xff]   ;;  %v4625_v63 = vld [vmem:[%s5041_s3 + $0x20] sm:$0xf8]   ;;  %v4626_v4 = vld [vmem:[%s5041_s3 + $0x28] sm:$0xff]  }
  0x60   : > { %3744 = vmatpush3.bf16.msra.mxu1 %v296_v12  ;;  %3948 = vmatpush3.bf16.msra.mxu0 %v5076_v16  ;;  %v245_v43 = vsel %vm240_vm3, %v242_v22, %v244_v36  ;;  %v246_v52 = vrot.slane %v3362_v44, 1  ;;  %v3363_v56 = vcombine.low %v5116_v41, %v5128_v49  ;;  %v5148_v57 = vld [vmem:[%s5041_s3 + $0x3c] sm:$0xff]   ;;  %v434_v59 = vand.u32 %v4630_v54, %v5058_v7  ;;  %v5160_v62 = vld [vmem:[%s5041_s3 + $0x30] sm:$0xf]  ;;  %v4628_v9 = vld [vmem:[%s5041_s3 + $0x34] sm:$0x1f]  }
  0x61   : > { %3773 = vmatprep.subr.bf16.mxu1 %v4871_v0  ;;  %3977 = vmatprep.subr.bf16.mxu0 %v4871_v0  ;;  %v1403_v58 = vsel %vm579_vm5, %v1400_v34, %v1402_v53  ;;  %v1404_v61 = vrot.slane %v5148_v57, 2  ;;  %v3364_v2 = vcombine.low %v5131_v50, %v5160_v62  ;;  %v1605_v6 = vrot.slane %v4625_v63, 3  ;;  %v4629_v14 = vld [vmem:[%s5041_s3 + $0x30] sm:$0xff]   ;;  %v4632_v21 = vld [vmem:[#allocation5 + $0xa8] sm:$0xff]   ;;  %v4634_v30 = vld [vmem:[%s5041_s3 + $0x40] sm:$0xff]   ;;  %s4511_s15 = smul.u32 52, %s5037_s26 }
  0x62   : > { %v247_v55 = vsel %vm240_vm3, %v244_v36, %v246_v52  ;;  %v248_v60 = vrot.slane %v3363_v56, 1  ;;  %v1606_v8 = vrot.slane %v4626_v4, 3  ;;  %v4627_v18 = vld [vmem:[#allocation5 + $0xa0] sm:$0xff]   ;;  %v252_v19 = vrot.slane %v4628_v9, 1  ;;  %v4638_v22 = vld [vmem:[#allocation5 + $0xb0] ss:$0 sps:$4 sm:$0xff]  }
  0x63   : > { %3746 = vmatmul.mubr.msk.bf16.vlgmr.msra.gmra.mrb[0].mxu1 %vm269_vm4, %v243_v29  ;;  %3950 = vmatmul.mubr.msk.bf16.vlgmr.msra.gmra.mrb[0].mxu0 %vm269_vm4, %v1399_v33  ;;  %v1405_v3 = vsel %vm579_vm5, %v1402_v53, %v1404_v61  ;;  %v250_v5 = vrot.slane %v3364_v2, 1  ;;  %v1608_v20 = vrot.slane %v4629_v14, 3  ;;  %v4631_v25 = vld [vmem:[%s5041_s3 + $0x38] sm:$0xff]   ;;  %v1847_v26 = vand.u32 %v4638_v22, %v5058_v7  ;;  %v4633_v34 = vld [vmem:[%s5041_s3] sm:$0xff]   ;;  %v4636_v36 = vld [vmem:[%s5041_s3 + $0x48] sm:$0xff]   ;;  %s4538_s17 = smul.u32 832, %s4913_s13 }
  0x64   : > { %3749 = vmatprep.mubr.msk.bf16.mxu1 %vm4872_vm0, %v4871_v0  ;;  %3978 = vmatpush3.bf16.msra.mxu0 %v4613_v23  ;;  %v249_v1 = vsel %vm240_vm3, %v246_v52, %v248_v60  ;;  %v1607_v17 = vsel %vm788_vm6, %v1605_v6, %v1606_v8  ;;  %v1610_v29 = vrot.slane %v4631_v25, 3  ;;  %v1612_v33 = vrot.slane %v4634_v30, 3  ;;  %v4637_v40 = vld [vmem:[#allocation5 + $0x28] sm:$0xff]   ;;  %v4648_v44 = vld [vmem:[#allocation5 + $0x38] ss:$0 sps:$4 sm:$0xff]   ;;  %v4651_v13 = vld [vmem:[#allocation5 + $0xbc] sm:$0xff]  }
  0x65   : > { %3953 = vmatprep.mubr.msk.bf16.mxu0 %vm4872_vm0, %v4871_v0  ;;  %3774 = vmatpush3.bf16.msra.mxu1 %v4616_v31  ;;  %v251_v12 = vsel %vm240_vm3, %v248_v60, %v250_v5  ;;  %v253_v23 = vsel %vm240_vm3, %v250_v5, %v252_v19  ;;  %v1609_v24 = vsel %vm788_vm6, %v1606_v8, %v1608_v20  ;;  %v4640_v45 = vld [vmem:[%s5041_s3 + $0x50] sm:$0x7f]   ;;  %v4644_v10 = vld [vmem:[%s5041_s3 + $0x28] sm:$0xff]   ;;  %v4650_v35 = vld [vmem:[%s5041_s3 + $0x38] sm:$0xff]   ;;  %s5954_s4 = scalar_lea.vmem [#allocation7], %s4511_s15  ;;  %s5964_s22 = scalar_lea.hbm %s6034_s2, %s4538_s17 }
  0x66   : > { %3979 = vmatprep.subr.bf16.mxu0 %v4871_v0  ;;  %3775 = vmatprep.subr.bf16.mxu1 %v4871_v0  ;;  %v1611_v31 = vsel %vm788_vm6, %v1608_v20, %v1610_v29  ;;  %v1616_v52 = vrot.slane %v4640_v45, 3  ;;  %v4645_v11 = vld [vmem:[#allocation5 + $0xb4] sm:$0xff]   ;;  %v4657_v54 = vld [vmem:[#allocation5 + $0x3c] sm:$0xff]   ;;  %v4663_v56 = vld [vmem:[#allocation5 + $0x44] sm:$0xff]   ;;  %s3269_s5 = sshll.u32 %s5954_s4, 4  ;;  %s3256_s27 = scalar_lea.sflag [#allocation4], %s5037_s26  ;;  %s5966_s5 = int_to_ptr.vmem [resolvable:$true] %s3269_s5 }
  0x67   : > { %v4647_v27 = vld [vmem:[%s5041_s3 + $0x30] sm:$0xff]   ;;  %v4654_v50 = vld [vmem:[%s5041_s3 + $0x40] sm:$0xff]   ;;  %v4656_v60 = vld [vmem:[%s5041_s3 + $0x48] sm:$0xff]   ;;  %s4795_s28 = scalar_lea.vmem %s5966_s5, 832  ;;  %s4874_s6 = smov [#allocation7]  }
  0x68   : > { %3980 = vmatpush3.bf16.msra.mxu0 %v4617_v37  ;;  %v1613_v37 = vsel %vm788_vm6, %v1610_v29, %v1612_v33  ;;  %v4653_v39 = vld [vmem:[%s5041_s3 + $0x10] sm:$0xff]   ;;  %v4661_v4 = vld [vmem:[%s5041_s3 + $0x28] sm:$0xff]   ;;  %v4662_v8 = vld [vmem:[%s5041_s3 + $0x58] ss:$0 sps:$4 sm:$0xff]   ;;  %p4796_p4 = scmp.ne.s32.totalorder %s5966_s5, %s4795_s28  ;;  %s4799_s7 = sshll.u32 %s4874_s6, 4  ;;  %s4800_s7 = int_to_ptr.vmem [resolvable:$false] %s4799_s7 }
  0x69   : > { %3981 = vmatprep.subr.bf16.mxu0 %v4871_v0  ;;  %3776 = vmatpush3.bf16.msra.mxu1 %v4623_v42  ;;  %v1614_v42 = vrot.slane %v4636_v36, 3  ;;  %v587_v5 = vrot.slane %v4661_v4, 2  ;;  %v4664_v9 = vld [vmem:[%s5041_s3 + $0x30] sm:$0xff]   ;;  %v4679_v30 = vld [vmem:[#allocation5 + $0xd8] ss:$0 sps:$4 sm:$0xff]   ;;  %s4801_s20 = scalar_lea.vmem %s4800_s7, 1664  ;;  %p4802_p10 = scmp.lt.s32.totalorder %s5966_s5, %s4800_s7 }
  0x6a   : > { %3777 = vmatprep.subr.bf16.mxu1 %v4871_v0  ;;  %v4666_v14 = vld [vmem:[%s5041_s3 + $0x34] sm:$0xff]   ;;  %v2263_v36 = vand.u32 %v4679_v30, %v5058_v7  ;;  %v4688_v4 = vld [vmem:[%s5041_s3 + $0x3c] sm:$0x7f]   ;;  %v4731_v57 = vld [vmem:[%s5041_s3 + $0x64] sm:$0xff]   ;;  %p4797_p6 = pnand %p4796_p4, %p4986_p12  ;;  %p4803_p11 = scmp.lt.s32.totalorder %s4801_s20, %s4795_s28 }
  0x6b   : > { %3750 = vmatmul.mubr.msk.bf16.gmra.mrb[4].mxu1 %vm269_vm4, %v245_v43  ;;  %3954 = vmatmul.mubr.msk.bf16.gmra.mrb[4].mxu0 %vm269_vm4, %v1401_v47  ;;  %v4642_v43 = vld [vmem:[#allocation5 + $0x30] sm:$0xff]   ;;  %v1615_v47 = vsel %vm788_vm6, %v1612_v33, %v1614_v42  ;;  %v1617_v53 = vsel %vm788_vm6, %v1614_v42, %v1616_v52  ;;  %v4696_v30 = vld [vmem:[%s5041_s3 + $0x58] sm:$0xff]  }
  0x6c   : > { %3753 = vmatprep.mubr.msk.bf16.mxu1 %vm4872_vm0, %v4871_v0  ;;  %3957 = vmatprep.mubr.msk.bf16.mxu0 %vm4872_vm0, %v4871_v0  ;;  %v4672_v29 = vld [vmem:[#allocation5 + $0xd0] sm:$0xff]   ;;  %p4798_p8 = pneg %p4797_p6  ;;  %p4804_p3 = por %p4803_p11, %p4802_p10 }
  0x6d   : > { %3982 = vmatpush3.bf16.msra.mxu0 %v1655_v48  ;;  %3778 = vmatpush3.bf16.msra.mxu1 %v434_v59  ;;  %v630_v48 = vand.u32 %v4648_v44, %v5058_v7  ;;  %v4674_v42 = vld [vmem:[%s5041_s3 + $0x14] sm:$0xff]   ;;  %v4675_v44 = vld [vmem:[%s5041_s3 + $0x4c] sm:$0xff]  }
  0x6e   : > { %4011 = vmatprep.subr.bf16.mxu0 %v4871_v0  ;;  %3807 = vmatprep.subr.bf16.mxu1 %v4871_v0  ;;  %p4805_p7 = pnand %p4804_p3, %p4798_p8 }
  0x73   : > { %3754 = vmatmul.mubr.msk.bf16.gmra.mrb[8].mxu1 %vm269_vm4, %v247_v55  ;;  %3958 = vmatmul.mubr.msk.bf16.gmra.mrb[8].mxu0 %vm269_vm4, %v1403_v58  ;;  %v4670_v58 = vld [vmem:[#allocation5 + $0x4c] ss:$0 sps:$4 sm:$0xff]  }
  0x74   : > { %3757 = vmatprep.mubr.msk.bf16.mxu1 %vm4872_vm0, %v4871_v0  ;;  %3961 = vmatprep.mubr.msk.bf16.mxu0 %vm4872_vm0, %v4871_v0  ;;  %v839_v63 = vand.u32 %v4670_v58, %v5058_v7 }
  0x7b   : > { %3758 = vmatmul.mubr.msk.bf16.gmra.mrb[12].mxu1 %vm269_vm4, %v249_v1  ;;  %3962 = vmatmul.mubr.msk.bf16.gmra.mrb[12].mxu0 %vm269_vm4, %v1405_v3  ;;  %v4660_v3 = vld [vmem:[%s5041_s3 + $0x50] sm:$0xff]  }
  0x7c   : > { %3761 = vmatprep.mubr.msk.bf16.mxu1 %vm4872_vm0, %v4871_v0  ;;  %3983 = vmatprep.mubr.msk.bf16.mxu0 %vm4872_vm0, %v4871_v0 }
  0x83   : > { %3762 = vmatmul.mubr.msk.bf16.gmra.mrb[16].mxu1 %vm269_vm4, %v251_v12  ;;  %3984 = vmatmul.mubr.msk.bf16.vlgmr.msra.gmra.mrb[0].mxu0 %vm269_vm4, %v1607_v17  ;;  %v4665_v12 = vld [vmem:[%s5041_s3 + $0x2c] sm:$0xfe]   ;;  %v589_v17 = vrot.slane %v4664_v9, 2  ;;  %v800_v9 = vrot.slane %v4688_v4, 3 }
  0x84   : > { %3765 = vmatprep.mubr.msk.bf16.mxu1 %vm4872_vm0, %v4871_v0  ;;  %4012 = vmatpush3.bf16.msra.mxu0 %v4627_v18  ;;  %v2005_v18 = vrot.slane %v4665_v12, 1 }
  0x85   : > { %3987 = vmatprep.mubr.msk.bf16.mxu0 %vm4872_vm0, %v4871_v0  ;;  %4013 = vmatprep.subr.bf16.mxu0 %v4871_v0  ;;  %v590_v20 = vsel %vm579_vm5, %v587_v5, %v589_v17 }
  0x88   : > { %4014 = vmatpush3.bf16.msra.mxu0 %v4632_v21  ;;  %v4668_v21 = vld [vmem:[%s5041_s3 + $0x38] sm:$0x3f]  }
  0x89   : > { %4015 = vmatprep.subr.bf16.mxu0 %v4871_v0  ;;  %v591_v25 = vrot.slane %v4668_v21, 2 }
  0x8b   : > { %3766 = vmatmul.mubr.msk.bf16.gmra.mrb[20].mxu1 %vm269_vm4, %v253_v23  ;;  %3988 = vmatmul.mubr.msk.bf16.gmra.mrb[4].mxu0 %vm269_vm4, %v1609_v24  ;;  %v4667_v23 = vld [vmem:[#allocation5 + $0xc8] sm:$0xff]  }
  0x8c   : > { %3769 = vmatprep.mubr.msk.bf16.mxu1 %vm4872_vm0, %v4871_v0  ;;  %3991 = vmatprep.mubr.msk.bf16.mxu0 %vm4872_vm0, %v4871_v0  ;;  %v4669_v24 = vld [vmem:[%s5041_s3 + $0x3c] sm:$0xff]  }
  0x8d   : > { %4016 = vmatpush3.bf16.msra.mxu0 %v1847_v26  ;;  %v2008_v26 = vrot.slane %v4669_v24, 1  ;;  %v4694_v24 = vld [vmem:[%s5041_s3 + $0x50] sm:$0xff]  }
  0x8e   : > { %4045 = vmatprep.subr.bf16.mxu0 %v4871_v0 }
  0x93   : > { %3770 = vmatmul.mubr.msk.bf16.gmra.mrb[24].mxu1 %vm269_vm4, %v252_v19  ;;  %3992 = vmatmul.mubr.msk.bf16.gmra.mrb[8].mxu0 %vm269_vm4, %v1611_v31  ;;  %v2006_v19 = vrot.slane %v4666_v14, 1  ;;  %v592_v31 = vsel %vm579_vm5, %v589_v17, %v591_v25  ;;  %v4692_v14 = vld [vmem:[#allocation5 + $0xe4] sm:$0xff]   ;;  %v4698_v17 = vld [vmem:[#allocation5 + $0xec] ss:$0 sps:$4 sm:$0xff]  }
  0x94   : > { %3779 = vmatprep.mubr.msk.bf16.mxu1 %vm4872_vm0, %v4871_v0  ;;  %3995 = vmatprep.mubr.msk.bf16.mxu0 %vm4872_vm0, %v4871_v0  ;;  %v2471_v21 = vand.u32 %v4698_v17, %v5058_v7 }
  0x95   : > { %v2007_v22 = vsel %vm240_vm3, %v2005_v18, %v2006_v19  ;;  %v2009_v33 = vsel %vm240_vm3, %v2006_v19, %v2008_v26 }
  0x9b   : > { %3780 = vmatmul.mubr.msk.bf16.vlgmr.msra.gmra.mrb[0].mxu1 %vm269_vm4, %v4633_v34  ;;  %3996 = vmatmul.mubr.msk.bf16.gmra.mrb[12].mxu0 %vm269_vm4, %v1613_v37  ;;  %v4671_v34 = vld [vmem:[%s5041_s3 + $0x44] sm:$0xff]  }
  0x9c   : > { %3783 = vmatprep.mubr.msk.bf16.mxu1 %vm4872_vm0, %v4871_v0  ;;  %3999 = vmatprep.mubr.msk.bf16.mxu0 %vm4872_vm0, %v4871_v0  ;;  %v2010_v37 = vrot.slane %v4671_v34, 1  ;;  %v4702_v34 = vld [vmem:[#allocation5 + $0x6c] sm:$0xff]  }
  0x9d   : > { %3808 = vmatpush3.bf16.msra.mxu1 %v4637_v40  ;;  %v4673_v40 = vld [vmem:[%s5041_s3 + $0xc] sm:$0xf8]  }
  0x9e   : > { %3809 = vmatprep.subr.bf16.mxu1 %v4871_v0  ;;  %v789_v45 = vrot.slane %v4673_v40, 3 }
  0xa1   : > { %3810 = vmatpush3.bf16.msra.mxu1 %v4642_v43  ;;  %v2011_v43 = vsel %vm240_vm3, %v2008_v26, %v2010_v37  ;;  %v4693_v26 = vld [vmem:[%s5041_s3 + $0x14] sm:$0xff]  }
  0xa2   : > { %3811 = vmatprep.subr.bf16.mxu1 %v4871_v0 }
  0xa3   : > { %3784 = vmatmul.mubr.msk.bf16.gmra.mrb[4].mxu1 %vm269_vm4, %v3377_v15  ;;  %4000 = vmatmul.mubr.msk.bf16.gmra.mrb[16].mxu0 %vm269_vm4, %v1615_v47  ;;  %v4658_v15 = vld [vmem:[#allocation5 + $0xc4] ss:$0 sps:$4 sm:$0xff]   ;;  %v790_v47 = vrot.slane %v4674_v42, 3 }
  0xa4   : > { %3787 = vmatprep.mubr.msk.bf16.mxu1 %vm4872_vm0, %v4871_v0  ;;  %4003 = vmatprep.mubr.msk.bf16.mxu0 %vm4872_vm0, %v4871_v0  ;;  %v2055_v28 = vand.u32 %v4658_v15, %v5058_v7  ;;  %v4700_v42 = vld [vmem:[%s5041_s3 + $0x60] sm:$0x3f]  }
  0xa5   : > { %3812 = vmatpush3.bf16.msra.mxu1 %v630_v48  ;;  %v2012_v48 = vrot.slane %v4675_v44, 1  ;;  %v2224_v44 = vrot.slane %v4700_v42, 2  ;;  %v4728_v42 = vld [vmem:[%s5041_s3 + $0x54] sm:$0xff]  }
  0xa6   : > { %3841 = vmatprep.subr.bf16.mxu1 %v4871_v0 }
  0xab   : > { %3788 = vmatmul.mubr.msk.bf16.gmra.mrb[8].mxu1 %vm269_vm4, %v3378_v32  ;;  %4004 = vmatmul.mubr.msk.bf16.gmra.mrb[20].mxu0 %vm269_vm4, %v1617_v53  ;;  %v3382_v32 = vcombine.low %v5160_v62, %v5160_v62  ;;  %v4659_v62 = vld [vmem:[%s5041_s3 + $0x20] sm:$0xff]  }
  0xac   : > { %3791 = vmatprep.mubr.msk.bf16.mxu1 %vm4872_vm0, %v4871_v0  ;;  %4007 = vmatprep.mubr.msk.bf16.mxu0 %vm4872_vm0, %v4871_v0  ;;  %v585_v1 = vrot.slane %v4659_v62, 2  ;;  %v4676_v53 = vld [vmem:[%s5041_s3 + $0x1c] sm:$0xff]  }
  0xad   : > { %v792_v15 = vrot.slane %v4676_v53, 3  ;;  %v4686_v62 = vld [vmem:[%s5041_s3 + $0x38] sm:$0xff]  }
  0xae   : > { %v588_v6 = vsel %vm579_vm5, %v585_v1, %v587_v5  ;;  %v4705_v53 = vld [vmem:[%s5041_s3 + $0x3c] sm:$0xff]  }
  0xb3   : > { %3792 = vmatmul.mubr.msk.bf16.gmra.mrb[12].mxu1 %vm269_vm4, %v3379_v38  ;;  %4008 = vmatmul.mubr.msk.bf16.gmra.mrb[24].mxu0 %vm269_vm4, %v1616_v52  ;;  %v4652_v38 = vld [vmem:[%s5041_s3 + $0x8] sm:$0xfc]   ;;  %v791_v52 = vsel %vm788_vm6, %v789_v45, %v790_v47 }
  0xb4   : > { %3795 = vmatprep.mubr.msk.bf16.mxu1 %vm4872_vm0, %v4871_v0  ;;  %4017 = vmatprep.mubr.msk.bf16.mxu0 %vm4872_vm0, %v4871_v0  ;;  %v580_v41 = vrot.slane %v4652_v38, 2  ;;  %v4680_v38 = vld [vmem:[%s5041_s3 + $0x24] sm:$0xff]  }
  0xb5   : > { %v4699_v45 = vld [vmem:[%s5041_s3 + $0x24] sm:$0xff]  }
  0xbb   : > { %3796 = vmatmul.mubr.msk.bf16.gmra.mrb[16].mxu1 %vm269_vm4, %v3380_v46  ;;  %4018 = vmatmul.mubr.msk.bf16.vlgmr.msra.gmra.mrb[0].mxu0 %vm269_vm4, %v4644_v10  ;;  %v581_v46 = vrot.slane %v4653_v39, 2  ;;  %v2013_v10 = vsel %vm240_vm3, %v2010_v37, %v2012_v48  ;;  %v4695_v37 = vld [vmem:[%s5041_s3 + $0x1c] sm:$0xff]  }
  0xbc   : > { %3799 = vmatprep.mubr.msk.bf16.mxu1 %vm4872_vm0, %v4871_v0  ;;  %4046 = vmatpush3.bf16.msra.mxu0 %v4645_v11  ;;  %v4677_v11 = vld [vmem:[%s5041_s3 + $0x54] sm:$0xff]  }
  0xbd   : > { %4021 = vmatprep.mubr.msk.bf16.mxu0 %vm4872_vm0, %v4871_v0  ;;  %4047 = vmatprep.subr.bf16.mxu0 %v4871_v0  ;;  %v582_v49 = vsel %vm579_vm5, %v580_v41, %v581_v46  ;;  %v4681_v41 = vld [vmem:[%s5041_s3 + $0x5c] sm:$0x1f]  }
  0xc0   : > { %4048 = vmatpush3.bf16.msra.mxu0 %v4651_v13  ;;  %v4678_v13 = vld [vmem:[#allocation5 + $0x50] sm:$0xff]  }
  0xc1   : > { %4049 = vmatprep.subr.bf16.mxu0 %v4871_v0 }
  0xc3   : > { %3800 = vmatmul.mubr.msk.bf16.gmra.mrb[20].mxu1 %vm269_vm4, %v3381_v51  ;;  %4022 = vmatmul.mubr.msk.bf16.gmra.mrb[4].mxu0 %vm269_vm4, %v4647_v27  ;;  %v4655_v51 = vld [vmem:[%s5041_s3 + $0x18] sm:$0xff]   ;;  %v2014_v27 = vrot.slane %v4677_v11, 1  ;;  %v2422_v11 = vrot.slane %v4705_v53, 3 }
  0xc4   : > { %3803 = vmatprep.mubr.msk.bf16.mxu1 %vm4872_vm0, %v4871_v0  ;;  %4025 = vmatprep.mubr.msk.bf16.mxu0 %vm4872_vm0, %v4871_v0  ;;  %v583_v55 = vrot.slane %v4655_v51, 2 }
  0xc5   : > { %4050 = vmatpush3.bf16.msra.mxu0 %v2055_v28  ;;  %v4683_v28 = vld [vmem:[#allocation5 + $0x58] sm:$0xff]   ;;  %v2015_v39 = vsel %vm240_vm3, %v2012_v48, %v2014_v27 }
  0xc6   : > { %4079 = vmatprep.subr.bf16.mxu0 %v4871_v0  ;;  %v584_v59 = vsel %vm579_vm5, %v581_v46, %v583_v55  ;;  %v586_v2 = vsel %vm579_vm5, %v583_v55, %v585_v1  ;;  %v4701_v48 = vld [vmem:[%s5041_s3 + $0x2c] sm:$0xff]  }
  0xcb   : > { %3804 = vmatmul.mubr.msk.bf16.gmra.mrb[24].mxu1 %vm269_vm4, %v3382_v32  ;;  %4026 = vmatmul.mubr.msk.bf16.gmra.mrb[8].mxu0 %vm269_vm4, %v4650_v35  ;;  %v4690_v32 = vld [vmem:[#allocation5 + $0x60] ss:$0 sps:$4 sm:$0xff]   ;;  %v793_v35 = vsel %vm788_vm6, %v790_v47, %v792_v15 }
  0xcc   : > { %3813 = vmatprep.mubr.msk.bf16.mxu1 %vm4872_vm0, %v4871_v0  ;;  %4029 = vmatprep.mubr.msk.bf16.mxu0 %vm4872_vm0, %v4871_v0  ;;  %v1031_v46 = vand.u32 %v4690_v32, %v5058_v7 }
  0xd3   : > { %3814 = vmatmul.mubr.msk.bf16.vlgmr.msra.gmra.mrb[0].mxu1 %vm269_vm4, %v582_v49  ;;  %4030 = vmatmul.mubr.msk.bf16.gmra.mrb[12].mxu0 %vm269_vm4, %v4654_v50  ;;  %v794_v49 = vrot.slane %v4680_v38, 3  ;;  %v2016_v50 = vrot.slane %v4681_v41, 1  ;;  %v4718_v38 = vld [vmem:[#allocation5 + $0x100] ss:$0 sps:$4 sm:$0xff]  }
  0xd4   : > { %3817 = vmatprep.mubr.msk.bf16.mxu1 %vm4872_vm0, %v4871_v0  ;;  %4033 = vmatprep.mubr.msk.bf16.mxu0 %vm4872_vm0, %v4871_v0 }
  0xd5   : > { %3842 = vmatpush3.bf16.msra.mxu1 %v4657_v54  ;;  %v795_v51 = vsel %vm788_vm6, %v792_v15, %v794_v49  ;;  %v4682_v54 = vld [vmem:[%s5041_s3 + $0x2c] sm:$0xff]   ;;  %v2017_v55 = vsel %vm240_vm3, %v2014_v27, %v2016_v50 }
  0xd6   : > { %3843 = vmatprep.subr.bf16.mxu1 %v4871_v0  ;;  %v4706_v27 = vld [vmem:[#allocation5 + $0xf0] sm:$0xff]  }
  0xd9   : > { %3844 = vmatpush3.bf16.msra.mxu1 %v4663_v56  ;;  %v796_v56 = vrot.slane %v4682_v54, 3  ;;  %v4713_v54 = vld [vmem:[%s5041_s3 + $0x18] sm:$0xfe]  }
  0xda   : > { %3845 = vmatprep.subr.bf16.mxu1 %v4871_v0 }
  0xdb   : > { %3818 = vmatmul.mubr.msk.bf16.gmra.mrb[4].mxu1 %vm269_vm4, %v584_v59  ;;  %4034 = vmatmul.mubr.msk.bf16.gmra.mrb[16].mxu0 %vm269_vm4, %v4656_v60  ;;  %v797_v58 = vsel %vm788_vm6, %v794_v49, %v796_v56  ;;  %v4684_v59 = vld [vmem:[%s5041_s3 + $0x34] sm:$0xff]   ;;  %v2663_v49 = vand.u32 %v4718_v38, %v5058_v7 }
  0xdc   : > { %3821 = vmatprep.mubr.msk.bf16.mxu1 %vm4872_vm0, %v4871_v0  ;;  %4037 = vmatprep.mubr.msk.bf16.mxu0 %vm4872_vm0, %v4871_v0  ;;  %v4685_v60 = vld [vmem:[%s5041_s3 + $0x30] sm:$0xfc]  }
  0xdd   : > { %3846 = vmatpush3.bf16.msra.mxu1 %v839_v63  ;;  %v798_v63 = vrot.slane %v4684_v59, 3  ;;  %v2213_v1 = vrot.slane %v4685_v60, 2 }
  0xde   : > { %3875 = vmatprep.subr.bf16.mxu1 %v4871_v0 }
  0xdf   : > { %v801_v18 = vsel %vm788_vm6, %v798_v63, %v800_v9 }
  0xe3   : > { %3822 = vmatmul.mubr.msk.bf16.gmra.mrb[8].mxu1 %vm269_vm4, %v586_v2  ;;  %4038 = vmatmul.mubr.msk.bf16.gmra.mrb[20].mxu0 %vm269_vm4, %v4660_v3  ;;  %v2214_v2 = vrot.slane %v4686_v62, 2  ;;  %v799_v3 = vsel %vm788_vm6, %v796_v56, %v798_v63  ;;  %v4715_v56 = vld [vmem:[%s5041_s3 + $0x54] sm:$0xff]   ;;  %v4716_v63 = vld [vmem:[%s5041_s3 + $0x28] sm:$0xff]  }
  0xe4   : > { %3825 = vmatprep.mubr.msk.bf16.mxu1 %vm4872_vm0, %v4871_v0  ;;  %4041 = vmatprep.mubr.msk.bf16.mxu0 %vm4872_vm0, %v4871_v0  ;;  %v2428_v60 = vrot.slane %v4715_v56, 3 }
  0xe5   : > { %v2215_v5 = vsel %vm579_vm5, %v2213_v1, %v2214_v2 }
  0xeb   : > { %3826 = vmatmul.mubr.msk.bf16.gmra.mrb[12].mxu1 %vm269_vm4, %v588_v6  ;;  %4042 = vmatmul.mubr.msk.bf16.gmra.mrb[24].mxu0 %vm269_vm4, %v4662_v8  ;;  %v4687_v6 = vld [vmem:[#allocation5 + $0xdc] sm:$0xff]  }
  0xec   : > { %3829 = vmatprep.mubr.msk.bf16.mxu1 %vm4872_vm0, %v4871_v0  ;;  %4051 = vmatprep.mubr.msk.bf16.mxu0 %vm4872_vm0, %v4871_v0  ;;  %v4689_v8 = vld [vmem:[%s5041_s3 + $0x40] sm:$0xff]  }
  0xed   : > { %v2216_v12 = vrot.slane %v4689_v8, 2  ;;  %v4719_v8 = vld [vmem:[%s5041_s3 + $0x30] sm:$0xff]  }
  0xee   : > { %v1194_v17 = vrot.slane %v4719_v8, 1 }
  0xef   : > { %v2217_v19 = vsel %vm579_vm5, %v2214_v2, %v2216_v12  ;;  %v4717_v2 = vld [vmem:[%s5041_s3 + $0x5c] sm:$0xff]  }
  0xf0   : > { %v2430_v4 = vrot.slane %v4717_v2, 3 }
  0xf3   : > { %3830 = vmatmul.mubr.msk.bf16.gmra.mrb[16].mxu1 %vm269_vm4, %v590_v20  ;;  %4052 = vmatmul.mubr.msk.bf16.vlgmr.msra.gmra.mrb[0].mxu0 %vm269_vm4, %v2007_v22  ;;  %v4691_v20 = vld [vmem:[%s5041_s3 + $0x48] sm:$0xff]  }
  0xf4   : > { %3833 = vmatprep.mubr.msk.bf16.mxu1 %vm4872_vm0, %v4871_v0  ;;  %4080 = vmatpush3.bf16.msra.mxu0 %v4667_v23  ;;  %v2218_v22 = vrot.slane %v4691_v20, 2  ;;  %v4721_v20 = vld [vmem:[%s5041_s3 + $0x38] sm:$0xff]  }
  0xf5   : > { %4055 = vmatprep.mubr.msk.bf16.mxu0 %vm4872_vm0, %v4871_v0  ;;  %4081 = vmatprep.subr.bf16.mxu0 %v4871_v0 }
  0xf6   : > { %v2219_v23 = vsel %vm579_vm5, %v2216_v12, %v2218_v22  ;;  %v4720_v12 = vld [vmem:[%s5041_s3 + $0x64] sm:$0x7f]  }
  0xf8   : > { %4082 = vmatpush3.bf16.msra.mxu0 %v4672_v29 }
  0xf9   : > { %4083 = vmatprep.subr.bf16.mxu0 %v4871_v0 }
  0xfb   : > { %3834 = vmatmul.mubr.msk.bf16.gmra.mrb[20].mxu1 %vm269_vm4, %v592_v31  ;;  %4056 = vmatmul.mubr.msk.bf16.gmra.mrb[4].mxu0 %vm269_vm4, %v2009_v33  ;;  %v4697_v31 = vld [vmem:[#allocation5 + $0x64] sm:$0xff]   ;;  %v2222_v33 = vrot.slane %v4696_v30, 2 }
  0xfc   : > { %3837 = vmatprep.mubr.msk.bf16.mxu1 %vm4872_vm0, %v4871_v0  ;;  %4059 = vmatprep.mubr.msk.bf16.mxu0 %vm4872_vm0, %v4871_v0 }
  0xfd   : > { %4084 = vmatpush3.bf16.msra.mxu0 %v2263_v36  ;;  %v4709_v36 = vld [vmem:[#allocation5 + $0x74] ss:$0 sps:$4 sm:$0xff]   ;;  %v2225_v47 = vsel %vm579_vm5, %v2222_v33, %v2224_v44 }
  0xfe   : > { %4113 = vmatprep.subr.bf16.mxu0 %v4871_v0 }
 0x103   : > { %3838 = vmatmul.mubr.msk.bf16.gmra.mrb[24].mxu1 %vm269_vm4, %v591_v25  ;;  %4060 = vmatmul.mubr.msk.bf16.gmra.mrb[8].mxu0 %vm269_vm4, %v2011_v43  ;;  %v2220_v25 = vrot.slane %v4694_v24, 2  ;;  %v1239_v43 = vand.u32 %v4709_v36, %v5058_v7  ;;  %v4727_v36 = vld [vmem:[%s5041_s3 + $0x44] sm:$0xff]  }
 0x104   : > { %3847 = vmatprep.mubr.msk.bf16.mxu1 %vm4872_vm0, %v4871_v0  ;;  %4063 = vmatprep.mubr.msk.bf16.mxu0 %vm4872_vm0, %v4871_v0 }
 0x105   : > { %v2221_v29 = vsel %vm579_vm5, %v2218_v22, %v2220_v25  ;;  %v2223_v40 = vsel %vm579_vm5, %v2220_v25, %v2222_v33  ;;  %v1196_v22 = vrot.slane %v4721_v20, 1  ;;  %v4725_v33 = vld [vmem:[%s5041_s3 + $0x44] sm:$0xff]  }
 0x10b   : > { %3848 = vmatmul.mubr.msk.bf16.vlgmr.msra.gmra.mrb[0].mxu1 %vm269_vm4, %v791_v52  ;;  %4064 = vmatmul.mubr.msk.bf16.gmra.mrb[12].mxu0 %vm269_vm4, %v2013_v10  ;;  %v4704_v52 = vld [vmem:[%s5041_s3 + $0x34] sm:$0xf8]  }
 0x10c   : > { %3851 = vmatprep.mubr.msk.bf16.mxu1 %vm4872_vm0, %v4871_v0  ;;  %4067 = vmatprep.mubr.msk.bf16.mxu0 %vm4872_vm0, %v4871_v0  ;;  %v2421_v10 = vrot.slane %v4704_v52, 3 }
 0x10d   : > { %3876 = vmatpush3.bf16.msra.mxu1 %v4678_v13  ;;  %v4703_v13 = vld [vmem:[%s5041_s3 + $0x34] sm:$0xff]  }
 0x10e   : > { %3877 = vmatprep.subr.bf16.mxu1 %v4871_v0  ;;  %v2423_v15 = vsel %vm788_vm6, %v2421_v10, %v2422_v11 }
 0x111   : > { %3878 = vmatpush3.bf16.msra.mxu1 %v4683_v28  ;;  %v4708_v28 = vld [vmem:[%s5041_s3 + $0x44] sm:$0xff]  }
 0x112   : > { %3879 = vmatprep.subr.bf16.mxu1 %v4871_v0  ;;  %v2424_v32 = vrot.slane %v4708_v28, 3 }
 0x113   : > { %3852 = vmatmul.mubr.msk.bf16.gmra.mrb[4].mxu1 %vm269_vm4, %v793_v35  ;;  %4068 = vmatmul.mubr.msk.bf16.gmra.mrb[16].mxu0 %vm269_vm4, %v2015_v39  ;;  %v4712_v35 = vld [vmem:[#allocation5 + $0xf8] sm:$0xff]  }
 0x114   : > { %3855 = vmatprep.mubr.msk.bf16.mxu1 %vm4872_vm0, %v4871_v0  ;;  %4071 = vmatprep.mubr.msk.bf16.mxu0 %vm4872_vm0, %v4871_v0  ;;  %v4707_v39 = vld [vmem:[%s5041_s3 + $0x3c] sm:$0xff]   ;;  %v2425_v41 = vsel %vm788_vm6, %v2422_v11, %v2424_v32 }
 0x115   : > { %3880 = vmatpush3.bf16.msra.mxu1 %v1031_v46  ;;  %v4711_v46 = vld [vmem:[%s5041_s3 + $0x4c] sm:$0xff]  }
 0x116   : > { %3909 = vmatprep.subr.bf16.mxu1 %v4871_v0 }
 0x11b   : > { %3856 = vmatmul.mubr.msk.bf16.gmra.mrb[8].mxu1 %vm269_vm4, %v795_v51  ;;  %4072 = vmatmul.mubr.msk.bf16.gmra.mrb[20].mxu0 %vm269_vm4, %v2017_v55  ;;  %v4710_v51 = vld [vmem:[%s5041_s3 + $0x44] ss:$0 sps:$4 sm:$0xff]  }
 0x11c   : > { %3859 = vmatprep.mubr.msk.bf16.mxu1 %vm4872_vm0, %v4871_v0  ;;  %4075 = vmatprep.mubr.msk.bf16.mxu0 %vm4872_vm0, %v4871_v0  ;;  %v4714_v55 = vld [vmem:[%s5041_s3 + $0x20] sm:$0xff]  }
 0x11d   : > { %v1190_v59 = vrot.slane %v4714_v55, 1 }
 0x123   : > { %3860 = vmatmul.mubr.msk.bf16.gmra.mrb[12].mxu1 %vm269_vm4, %v797_v58  ;;  %4076 = vmatmul.mubr.msk.bf16.gmra.mrb[24].mxu0 %vm269_vm4, %v2016_v50  ;;  %v2426_v50 = vrot.slane %v4711_v46, 3  ;;  %v1189_v58 = vrot.slane %v4713_v54, 1 }
 0x124   : > { %3863 = vmatprep.mubr.msk.bf16.mxu1 %vm4872_vm0, %v4871_v0  ;;  %4085 = vmatprep.mubr.msk.bf16.mxu0 %vm4872_vm0, %v4871_v0 }
 0x125   : > { %v2427_v7 = vsel %vm788_vm6, %v2424_v32, %v2426_v50  ;;  %v1191_v62 = vsel %vm240_vm3, %v1189_v58, %v1190_v59  ;;  %v2429_v1 = vsel %vm788_vm6, %v2426_v50, %v2428_v60 }
 0x12b   : > { %3864 = vmatmul.mubr.msk.bf16.gmra.mrb[16].mxu1 %vm269_vm4, %v799_v3  ;;  %4086 = vmatmul.mubr.msk.bf16.vlgmr.msra.gmra.mrb[0].mxu0 %vm269_vm4, %v2215_v5  ;;  %v1192_v3 = vrot.slane %v4716_v63, 1  ;;  %v4735_v5 = vld [vmem:[#allocation5 + $0x78] sm:$0xff]  }
 0x12c   : > { %3867 = vmatprep.mubr.msk.bf16.mxu1 %vm4872_vm0, %v4871_v0  ;;  %4114 = vmatpush3.bf16.msra.mxu0 %v4687_v6 }
 0x12d   : > { %4089 = vmatprep.mubr.msk.bf16.mxu0 %vm4872_vm0, %v4871_v0  ;;  %4115 = vmatprep.subr.bf16.mxu0 %v4871_v0  ;;  %v1193_v6 = vsel %vm240_vm3, %v1190_v59, %v1192_v3 }
 0x130   : > { %4116 = vmatpush3.bf16.msra.mxu0 %v4692_v14  ;;  %v4736_v14 = vld [vmem:[#allocation5 + $0x80] sm:$0xff]  }
 0x131   : > { %4117 = vmatprep.subr.bf16.mxu0 %v4871_v0 }
 0x133   : > { %3868 = vmatmul.mubr.msk.bf16.gmra.mrb[20].mxu1 %vm269_vm4, %v801_v18  ;;  %4090 = vmatmul.mubr.msk.bf16.gmra.mrb[4].mxu0 %vm269_vm4, %v2217_v19  ;;  %v2432_v18 = vrot.slane %v4720_v12, 3  ;;  %v1195_v19 = vsel %vm240_vm3, %v1192_v3, %v1194_v17 }
 0x134   : > { %3871 = vmatprep.mubr.msk.bf16.mxu1 %vm4872_vm0, %v4871_v0  ;;  %4093 = vmatprep.mubr.msk.bf16.mxu0 %vm4872_vm0, %v4871_v0 }
 0x135   : > { %4118 = vmatpush3.bf16.msra.mxu0 %v2471_v21  ;;  %v2433_v21 = vsel %vm788_vm6, %v2430_v4, %v2432_v18 }
 0x136   : > { %4147 = vmatprep.subr.bf16.mxu0 %v4871_v0 }
 0x13b   : > { %3872 = vmatmul.mubr.msk.bf16.gmra.mrb[24].mxu1 %vm269_vm4, %v800_v9  ;;  %4094 = vmatmul.mubr.msk.bf16.gmra.mrb[8].mxu0 %vm269_vm4, %v2219_v23  ;;  %v2431_v9 = vsel %vm788_vm6, %v2428_v60, %v2430_v4  ;;  %v4722_v23 = vld [vmem:[%s5041_s3 + $0x40] sm:$0xff]  }
 0x13c   : > { %3881 = vmatprep.mubr.msk.bf16.mxu1 %vm4872_vm0, %v4871_v0  ;;  %4097 = vmatprep.mubr.msk.bf16.mxu0 %vm4872_vm0, %v4871_v0  ;;  %v1198_v24 = vrot.slane %v4722_v23, 1 }
 0x13e   : > { %v1199_v25 = vsel %vm240_vm3, %v1196_v22, %v1198_v24 }
 0x143   : > { %3882 = vmatmul.mubr.msk.bf16.vlgmr.msra.gmra.mrb[0].mxu1 %vm269_vm4, %v4693_v26  ;;  %4098 = vmatmul.mubr.msk.bf16.gmra.mrb[12].mxu0 %vm269_vm4, %v2221_v29  ;;  %v4723_v26 = vld [vmem:[%s5041_s3 + $0x3c] sm:$0xff]   ;;  %v4724_v29 = vld [vmem:[%s5041_s3 + $0x48] sm:$0x1f]  }
 0x144   : > { %3885 = vmatprep.mubr.msk.bf16.mxu1 %vm4872_vm0, %v4871_v0  ;;  %4101 = vmatprep.mubr.msk.bf16.mxu0 %vm4872_vm0, %v4871_v0  ;;  %v1200_v30 = vrot.slane %v4724_v29, 1 }
 0x145   : > { %3910 = vmatpush3.bf16.msra.mxu1 %v4697_v31 }
 0x146   : > { %3911 = vmatprep.subr.bf16.mxu1 %v4871_v0  ;;  %v1201_v31 = vsel %vm240_vm3, %v1198_v24, %v1200_v30 }
 0x149   : > { %3912 = vmatpush3.bf16.msra.mxu1 %v4702_v34  ;;  %v4726_v34 = vld [vmem:[%s5041_s3 + $0x4c] sm:$0xff]  }
 0x14a   : > { %3913 = vmatprep.subr.bf16.mxu1 %v4871_v0 }
 0x14b   : > { %3886 = vmatmul.mubr.msk.bf16.gmra.mrb[4].mxu1 %vm269_vm4, %v4695_v37  ;;  %4102 = vmatmul.mubr.msk.bf16.gmra.mrb[16].mxu0 %vm269_vm4, %v2223_v40  ;;  %v1406_v37 = vrot.slane %v4727_v36, 2 }
 0x14c   : > { %3889 = vmatprep.mubr.msk.bf16.mxu1 %vm4872_vm0, %v4871_v0  ;;  %4105 = vmatprep.mubr.msk.bf16.mxu0 %vm4872_vm0, %v4871_v0 }
 0x14d   : > { %3914 = vmatpush3.bf16.msra.mxu1 %v1239_v43  ;;  %v1407_v40 = vsel %vm579_vm5, %v1404_v61, %v1406_v37  ;;  %v4729_v43 = vld [vmem:[%s5041_s3 + $0x4c] sm:$0x3f]  }
 0x14e   : > { %4181 = vmatprep.subr.bf16.mxu1 %v4871_v0  ;;  %v4732_v61 = vld [vmem:[%s5041_s3 + $0x6c] ss:$0 sps:$4 sm:$0xff]  }
 0x153   : > { %3890 = vmatmul.mubr.msk.bf16.gmra.mrb[8].mxu1 %vm269_vm4, %v4699_v45  ;;  %4106 = vmatmul.mubr.msk.bf16.gmra.mrb[20].mxu0 %vm269_vm4, %v2225_v47  ;;  %v4730_v47 = vld [vmem:[%s5041_s3 + $0x5c] sm:$0xff]  }
 0x154   : > { %3893 = vmatprep.mubr.msk.bf16.mxu1 %vm4872_vm0, %v4871_v0  ;;  %4109 = vmatprep.mubr.msk.bf16.mxu0 %vm4872_vm0, %v4871_v0 }
 0x15b   : > { %3894 = vmatmul.mubr.msk.bf16.gmra.mrb[12].mxu1 %vm269_vm4, %v4701_v48  ;;  %4110 = vmatmul.mubr.msk.bf16.gmra.mrb[24].mxu0 %vm269_vm4, %v2224_v44  ;;  %v1408_v44 = vrot.slane %v4729_v43, 2  ;;  %v2766_v48 = vlaneseq }
 0x15c   : > { %3897 = vmatprep.mubr.msk.bf16.mxu1 %vm4872_vm0, %v4871_v0  ;;  %4119 = vmatprep.mubr.msk.bf16.mxu0 %vm4872_vm0, %v4871_v0 }
 0x15d   : > { %v1409_v45 = vsel %vm579_vm5, %v1406_v37, %v1408_v44  ;;  %v5597_v52 = vshrl.u32 %v2766_v48, 7  ;;  %vm3066_vm5 = vcmask 523264  }
 0x15f   : > { %v2768_v53 = vadd.s32 8, %v5597_v52  ;;  %v2770_v38 = vadd.s32 24, %v5597_v52  ;;  %v2772_v56 = vadd.s32 40, %v5597_v52  ;;  %v5650_v24 = vadd.s32 56, %v5597_v52 }
 0x163   : > { %3898 = vmatmul.mubr.msk.bf16.gmra.mrb[16].mxu1 %vm269_vm4, %v4703_v13  ;;  %4120 = vmatmul.mubr.msk.bf16.vlgmr.msra.gmra.mrb[0].mxu0 %vm269_vm4, %v2423_v15  ;;  %v5603_v13 = vmul.u32.u64.low 3435973837, %v5597_v52  ;;  %v5604_v15 = vmul.u32.u64.high 3435973837, %v5597_v52, %v5603_v13 }
 0x164   : > { %3901 = vmatprep.mubr.msk.bf16.mxu1 %vm4872_vm0, %v4871_v0  ;;  %4148 = vmatpush3.bf16.msra.mxu0 %v4706_v27 }
 0x165   : > { %4123 = vmatprep.mubr.msk.bf16.mxu0 %vm4872_vm0, %v4871_v0  ;;  %4149 = vmatprep.subr.bf16.mxu0 %v4871_v0 }
 0x168   : > { %4150 = vmatpush3.bf16.msra.mxu0 %v4712_v35  ;;  %v2769_v35 = vadd.s32 16, %v5597_v52 }
 0x169   : > { %4151 = vmatprep.subr.bf16.mxu0 %v4871_v0 }
 0x16b   : > { %3902 = vmatmul.mubr.msk.bf16.gmra.mrb[20].mxu1 %vm269_vm4, %v4707_v39  ;;  %4124 = vmatmul.mubr.msk.bf16.gmra.mrb[4].mxu0 %vm269_vm4, %v2425_v41  ;;  %v2771_v41 = vadd.s32 32, %v5597_v52 }
 0x16c   : > { %3905 = vmatprep.mubr.msk.bf16.mxu1 %vm4872_vm0, %v4871_v0  ;;  %4127 = vmatprep.mubr.msk.bf16.mxu0 %vm4872_vm0, %v4871_v0 }
 0x16d   : > { %4152 = vmatpush3.bf16.msra.mxu0 %v2663_v49  ;;  %v2786_v49 = vshrl.u32 %v5604_v15, 3 }
 0x16f   : > { %v2787_v63 = vmul.u32 10, %v2786_v49 }
 0x173   : > { %3906 = vmatmul.mubr.msk.bf16.gmra.mrb[24].mxu1 %vm269_vm4, %v4710_v51  ;;  %4128 = vmatmul.mubr.msk.bf16.gmra.mrb[8].mxu0 %vm269_vm4, %v2427_v7  ;;  %v5617_v50 = vmul.u32.u64.low 3435973837, %v2769_v35  ;;  %v5618_v51 = vmul.u32.u64.high 3435973837, %v2769_v35, %v5617_v50  ;;  %v5622_v55 = vmul.u32.u64.low 3435973837, %v2770_v38  ;;  %v5623_v7 = vmul.u32.u64.high 3435973837, %v2770_v38, %v5622_v55 }
 0x174   : > { %3915 = vmatprep.mubr.msk.bf16.mxu1 %vm4872_vm0, %v4871_v0  ;;  %4131 = vmatprep.mubr.msk.bf16.mxu0 %vm4872_vm0, %v4871_v0 }
 0x175   : > { %v2808_v8 = vshrl.u32 %v5618_v51, 3  ;;  %v2819_v12 = vshrl.u32 %v5623_v7, 3 }
 0x177   : > { %v2809_v20 = vmul.u32 10, %v2808_v8 }
 0x17b   : > { %3916 = vmatmul.mubr.msk.bf16.vlgmr.msra.gmra.mrb[0].mxu1 %vm269_vm4, %v1191_v62  ;;  %4132 = vmatmul.mubr.msk.bf16.gmra.mrb[12].mxu0 %vm269_vm4, %v2429_v1  ;;  %v5627_v60 = vmul.u32.u64.low 3435973837, %v2771_v41  ;;  %v5628_v62 = vmul.u32.u64.high 3435973837, %v2771_v41, %v5627_v60  ;;  %v5630_v1 = vmul.u32.u64.low 3435973837, %v2772_v56  ;;  %v5631_v2 = vmul.u32.u64.high 3435973837, %v2772_v56, %v5630_v1 }
 0x17c   : > { %3919 = vmatprep.mubr.msk.bf16.mxu1 %vm4872_vm0, %v4871_v0  ;;  %4135 = vmatprep.mubr.msk.bf16.mxu0 %vm4872_vm0, %v4871_v0 }
 0x17d   : > { %4184 = vmatpush3.bf16.msra.mxu1 %v4735_v5 }
 0x17e   : > { %4182 = vmatprep.subr.bf16.mxu1 %v4871_v0 }
 0x181   : > { %4185 = vmatpush3.bf16.msra.mxu1 %v4736_v14  ;;  %v5641_v14 = vadd.s32 48, %v5597_v52 }
 0x182   : > { %4183 = vmatprep.subr.bf16.mxu1 %v4871_v0 }
 0x183   : > { %3920 = vmatmul.mubr.msk.bf16.gmra.mrb[4].mxu1 %vm269_vm4, %v1193_v6  ;;  %4136 = vmatmul.mubr.msk.bf16.gmra.mrb[16].mxu0 %vm269_vm4, %v2431_v9  ;;  %v2788_v6 = vsub.s32 %v5597_v52, %v2787_v63 }
 0x184   : > { %3923 = vmatprep.mubr.msk.bf16.mxu1 %vm4872_vm0, %v4871_v0  ;;  %4139 = vmatprep.mubr.msk.bf16.mxu0 %vm4872_vm0, %v4871_v0 }
 0x185   : > { %4186 = vmatpush3.bf16.msra.mxu1 %v5076_v16  ;;  %v1197_v16 = vsel %vm240_vm3, %v1194_v17, %v1196_v22  ;;  %vm2923_vm7 = vcmp.ne.s32.totalorder %v2788_v6, 0  ;;  %vm2936_vm8 = vcmp.lt.s32.totalorder %v2788_v6, 0  ;;  %v2841_v22 = vshrl.u32 %v5631_v2, 3 }
 0x186   : > { %vm5654_vm11 = vmand %vm2936_vm8, %vm2923_vm7 }
 0x18b   : > { %3924 = vmatmul.mubr.msk.bf16.gmra.mrb[8].mxu1 %vm269_vm4, %v1195_v19  ;;  %4140 = vmatmul.mubr.msk.bf16.gmra.mrb[20].mxu0 %vm269_vm4, %v2433_v21  ;;  %v2830_v19 = vshrl.u32 %v5628_v62, 3  ;;  %v2820_v21 = vmul.u32 10, %v2819_v12 }
 0x18c   : > { %3927 = vmatprep.mubr.msk.bf16.mxu1 %vm4872_vm0, %v4871_v0  ;;  %4143 = vmatprep.mubr.msk.bf16.mxu0 %vm4872_vm0, %v4871_v0 }
 0x193   : > { %3928 = vmatmul.mubr.msk.bf16.gmra.mrb[12].mxu1 %vm269_vm4, %v1197_v16  ;;  %4144 = vmatmul.mubr.msk.bf16.gmra.mrb[24].mxu0 %vm269_vm4, %v2432_v18  ;;  %v5646_v16 = vmul.u32.u64.low 3435973837, %v5641_v14  ;;  %v5647_v23 = vmul.u32.u64.high 3435973837, %v5641_v14, %v5646_v16 }
 0x194   : > { %3931 = vmatprep.mubr.msk.bf16.mxu1 %vm4872_vm0, %v4871_v0  ;;  %4153 = vmatprep.mubr.msk.bf16.mxu0 %vm4872_vm0, %v4871_v0 }
 0x19b   : > { %3932 = vmatmul.mubr.msk.bf16.gmra.mrb[16].mxu1 %vm269_vm4, %v1199_v25  ;;  %4154 = vmatmul.mubr.msk.bf16.vlgmr.msra.gmra.mrb[0].mxu0 %vm269_vm4, %v4723_v26  ;;  %v2831_v26 = vmul.u32 10, %v2830_v19 }
 0x19c   : > { %3935 = vmatprep.mubr.msk.bf16.mxu1 %vm4872_vm0, %v4871_v0  ;;  %4157 = vmatprep.mubr.msk.bf16.mxu0 %vm4872_vm0, %v4871_v0 }
 0x1a3   : > { %3936 = vmatmul.mubr.msk.bf16.gmra.mrb[20].mxu1 %vm269_vm4, %v1201_v31  ;;  %4158 = vmatmul.mubr.msk.bf16.gmra.mrb[4].mxu0 %vm269_vm4, %v4725_v33  ;;  %v2962_v31 = vadd.s32 10, %v2788_v6 }
 0x1a4   : > { %3939 = vmatprep.mubr.msk.bf16.mxu1 %vm4872_vm0, %v4871_v0  ;;  %4161 = vmatprep.mubr.msk.bf16.mxu0 %vm4872_vm0, %v4871_v0 }
 0x1ab   : > { %3940 = vmatmul.mubr.msk.bf16.gmra.mrb[24].mxu1 %vm269_vm4, %v1200_v30  ;;  %4162 = vmatmul.mubr.msk.bf16.gmra.mrb[8].mxu0 %vm269_vm4, %v4726_v34  ;;  %v2810_v34 = vsub.s32 %v2769_v35, %v2809_v20 }
 0x1ac   : > { %3965 = vmatprep.mubr.msk.bf16.mxu1 %vm4872_vm0, %v4871_v0  ;;  %4165 = vmatprep.mubr.msk.bf16.mxu0 %vm4872_vm0, %v4871_v0 }
 0x1ad   : > { %vm2925_vm13 = vcmp.ne.s32.totalorder %v2810_v34, 0  ;;  %vm2938_vm14 = vcmp.lt.s32.totalorder %v2810_v34, 0  ;;  %v2964_v15 = vadd.s32 10, %v2810_v34 }
 0x1ae   : > { %vm5678_vm1 = vmand %vm2938_vm14, %vm2925_vm13 }
 0x1af   : > { %v2977_v62 = vsel %vm5678_vm1, %v2964_v15, %v2810_v34  ;;  %v5786_v15 = vadd.s32 96, %v5597_v52 }
 0x1b3   : > { %3966 = vmatmul.mubr.msk.bf16.vlgmr.msra.gmra.mrb[16].mxu1 %vm269_vm4, %v1407_v40  ;;  %4166 = vmatmul.mubr.msk.bf16.gmra.mrb[12].mxu0 %vm269_vm4, %v4728_v42  ;;  %v2821_v40 = vsub.s32 %v2770_v38, %v2820_v21  ;;  %v2842_v42 = vmul.u32 10, %v2841_v22  ;;  %v5692_v38 = vadd.s32 72, %v5597_v52 }
 0x1b4   : > { %3969 = vmatprep.mubr.msk.bf16.mxu1 %vm4872_vm0, %v4871_v0  ;;  %4169 = vmatprep.mubr.msk.bf16.mxu0 %vm4872_vm0, %v4871_v0 }
 0x1b5   : > { %vm2926_vm15 = vcmp.ne.s32.totalorder %v2821_v40, 0  ;;  %v5672_v48 = vsub.s32 %v2772_v56, %v2842_v42 }
 0x1b7   : > { %vm2928_vm8 = vcmp.ne.s32.totalorder %v5672_v48, 0  ;;  %v5717_v2 = vadd.s32 10, %v5672_v48 }
 0x1bb   : > { %3970 = vmatmul.mubr.msk.bf16.gmra.mrb[20].mxu1 %vm269_vm4, %v1409_v45  ;;  %4170 = vmatmul.mubr.msk.bf16.gmra.mrb[16].mxu0 %vm269_vm4, %v4730_v47  ;;  %v2832_v47 = vsub.s32 %v2771_v41, %v2831_v26 }
 0x1bc   : > { %3973 = vmatprep.mubr.msk.bf16.mxu1 %vm4872_vm0, %v4871_v0  ;;  %4173 = vmatprep.mubr.msk.bf16.mxu0 %vm4872_vm0, %v4871_v0 }
 0x1bd   : > { %vm2927_vm2 = vcmp.ne.s32.totalorder %v2832_v47, 0  ;;  %vm2940_vm3 = vcmp.lt.s32.totalorder %v2832_v47, 0  ;;  %v2966_v49 = vadd.s32 10, %v2832_v47 }
 0x1c3   : > { %3974 = vmatmul.mubr.msk.bf16.gmra.mrb[24].mxu1 %vm269_vm4, %v1408_v44  ;;  %4174 = vmatmul.mubr.msk.bf16.gmra.mrb[20].mxu0 %vm269_vm4, %v4731_v57  ;;  %v5665_v44 = vmul.u32.u64.low 3435973837, %v5650_v24  ;;  %v5666_v45 = vmul.u32.u64.high 3435973837, %v5650_v24, %v5665_v44  ;;  %v2975_v57 = vsel %vm5654_vm11, %v2962_v31, %v2788_v6 }
 0x1c4   : > { %4177 = vmatprep.mubr.msk.bf16.mxu0 %vm4872_vm0, %v4871_v0  ;;  %v5608_v32 = vmul.u32.u64.low 3435973837, %v2768_v53  ;;  %v5609_v0 = vmul.u32.u64.high 3435973837, %v2768_v53, %v5608_v32  ;;  %vm2939_vm0 = vcmp.lt.s32.totalorder %v2821_v40, 0 }
 0x1c5   : > { %vm5687_vm7 = vmand %vm2939_vm0, %vm2926_vm15  ;;  %v2863_v7 = vshrl.u32 %v5666_v45, 3 }
 0x1c6   : > { %v2797_v59 = vshrl.u32 %v5609_v0, 3 }
 0x1c7   : > { %v2864_v20 = vmul.u32 10, %v2863_v7 }
 0x1c8   : > { %v2798_v3 = vmul.u32 10, %v2797_v59 }
 0x1c9   : > { %v5770_v44 = vsub.s32 %v5650_v24, %v2864_v20 }
 0x1ca   : > { %v2799_v18 = vsub.s32 %v2768_v53, %v2798_v3  ;;  %v2852_v53 = vshrl.u32 %v5647_v23, 3  ;;  %v5748_v23 = vadd.s32 80, %v5597_v52 }
 0x1cb   : > { %4178 = vmatmul.mubr.msk.bf16.gmra.mrb[24].mxu0 %vm269_vm4, %v4732_v61  ;;  %vm2988_vm4 = vcmp.lt.s32.totalorder %v2975_v57, 10 }
 0x1cc   : > { %vm2924_vm9 = vcmp.ne.s32.totalorder %v2799_v18, 0  ;;  %vm2937_vm10 = vcmp.lt.s32.totalorder %v2799_v18, 0  ;;  %v2963_v33 = vadd.s32 10, %v2799_v18  ;;  %v2853_v50 = vmul.u32 10, %v2852_v53 }
 0x1cd   : > { %vm5660_vm12 = vmand %vm2937_vm10, %vm2924_vm9  ;;  %vm2941_vm10 = vcmp.lt.s32.totalorder %v5672_v48, 0 }
 0x1ce   : > { %v2976_v61 = vsel %vm5660_vm12, %v2963_v33, %v2799_v18  ;;  %vm5698_vm9 = vmand %vm2940_vm3, %vm2927_vm2  ;;  %v5735_v12 = vsub.s32 %v5641_v14, %v2853_v50  ;;  %vm5739_vm12 = vcmp.lt.s32.totalorder %v2977_v62, 10  ;;  %vm2930_vm2 = vcmp.ne.s32.totalorder %v5770_v44, 0 }
 0x1cf   : > { %vm5682_vm6 = vcmp.lt.s32.totalorder %v2976_v61, 10  ;;  %v2979_v6 = vsel %vm5698_vm9, %v2966_v49, %v2832_v47  ;;  %vm5730_vm11 = vmand %vm2941_vm10, %vm2928_vm8  ;;  %vm2943_vm3 = vcmp.lt.s32.totalorder %v5770_v44, 0 }
 0x1d0   : > { %vm5752_vm14 = vcmp.lt.s32.totalorder %v2979_v6, 10  ;;  %v2980_v31 = vsel %vm5730_vm11, %v5717_v2, %v5672_v48  ;;  %vm2929_vm15 = vcmp.ne.s32.totalorder %v5735_v12, 0  ;;  %vm2942_vm0 = vcmp.lt.s32.totalorder %v5735_v12, 0 }
 0x1d1   : > { %v5780_v61 = vmul.u32.u64.low 3435973837, %v5748_v23  ;;  %v5781_v48 = vmul.u32.u64.high 3435973837, %v5748_v23, %v5780_v61  ;;  %vm5801_vm1 = vmand %vm2942_vm0, %vm2929_vm15 }
 0x24e   : > { %v5600_v10 = vpop.f32.mrb[0].mxu1 }
 0x24f   : > { %v3917_v11 = vpop.f32.mrb[1].mxu1 }
 0x250   : > { %v5606_v27 = vpop.f32.mrb[2].mxu1  ;;  %v5676_v11 = vadd.s32 64, %v5597_v52 }
 0x251   : > { %v3918_v28 = vpop.f32.mrb[3].mxu1 }
 0x252   : > { %v2965_v28 = vadd.s32 10, %v2821_v40 }
 0x254   : > { %v2978_v63 = vsel %vm5687_vm7, %v2965_v28, %v2821_v40  ;;  %v5765_v40 = vadd.s32 88, %v5597_v52 }
 0x255   : > { %vm5743_vm13 = vcmp.lt.s32.totalorder %v2978_v63, 10 }
 0x256   : > { %v5613_v39 = vpop.f32.mrb[4].mxu1 }
 0x257   : > { %v3921_v46 = vpop.f32.mrb[5].mxu1 }
 0x258   : > { %v5620_v54 = vpop.f32.mrb[6].mxu1 }
 0x259   : > { %v3922_v58 = vpop.f32.mrb[7].mxu1 }
 0x25a   : > { %v5705_v56 = vmul.u32.u64.low 3435973837, %v5676_v11  ;;  %v5706_v58 = vmul.u32.u64.high 3435973837, %v5676_v11, %v5705_v56 }
 0x25c   : > { %v2874_v45 = vshrl.u32 %v5706_v58, 3 }
 0x25e   : > { %v5633_v4 = vpop.f32.mrb[8].mxu1  ;;  %v2875_v50 = vmul.u32 10, %v2874_v45 }
 0x25f   : > { %v3925_v5 = vpop.f32.mrb[9].mxu1 }
 0x260   : > { %v5637_v9 = vpop.f32.mrb[10].mxu1  ;;  %v5720_v3 = vmul.u32.u64.low 3435973837, %v5692_v38  ;;  %v5721_v5 = vmul.u32.u64.high 3435973837, %v5692_v38, %v5720_v3  ;;  %v5826_v6 = vsub.s32 %v5676_v11, %v2875_v50 }
 0x261   : > { %v3926_v17 = vpop.f32.mrb[11].mxu1  ;;  %v2969_v3 = vadd.s32 10, %v5770_v44 }
 0x262   : > { %v2885_v24 = vshrl.u32 %v5721_v5, 3  ;;  %vm2931_vm8 = vcmp.ne.s32.totalorder %v5826_v6, 0  ;;  %vm2944_vm9 = vcmp.lt.s32.totalorder %v5826_v6, 0 }
 0x264   : > { %v2886_v58 = vmul.u32 10, %v2885_v24 }
 0x266   : > { %v5652_v25 = vpop.f32.mrb[12].mxu1  ;;  %v5841_v11 = vsub.s32 %v5692_v38, %v2886_v58 }
 0x267   : > { %v3929_v29 = vpop.f32.mrb[13].mxu1 }
 0x268   : > { %v5658_v36 = vpop.f32.mrb[14].mxu1  ;;  %vm2932_vm10 = vcmp.ne.s32.totalorder %v5841_v11, 0  ;;  %vm2945_vm11 = vcmp.lt.s32.totalorder %v5841_v11, 0 }
 0x269   : > { %v3930_v43 = vpop.f32.mrb[15].mxu1 }
 0x26a   : > { %v2968_v43 = vadd.s32 10, %v5735_v12 }
 0x26c   : > { %v2981_v2 = vsel %vm5801_vm1, %v2968_v43, %v5735_v12 }
 0x26d   : > { %vm5836_vm7 = vcmp.lt.s32.totalorder %v2981_v2, 10 }
 0x26e   : > { %v2699_v32 = vpop.f32.mrb[0].mxu0 }
 0x26f   : > { %v5695_v41 = vadd.f32 %v2699_v32, %v5600_v10  ;;  %v4155_v46 = vpop.f32.mrb[1].mxu0 }
 0x270   : > { %v2702_v51 = vpop.f32.mrb[2].mxu0 }
 0x271   : > { %v3053_v10 = vsel %vm2988_vm4, %v5695_v41, 0.0  ;;  %v5710_v59 = vadd.f32 %v2702_v51, %v5606_v27  ;;  %v4156_v60 = vpop.f32.mrb[3].mxu0  ;;  %vm2993_vm4 = vcmp.lt.s32.totalorder %v2980_v31, 10 }
 0x272   : > { %v3099_v1 = vmul.f32 %v3053_v10, %v3053_v10  ;;  %v3067_v17 = vsel %vm3066_vm5, %v3053_v10, 0.0  ;;  %v5809_v10 = vmul.u32.u64.low 3435973837, %v5786_v15  ;;  %v5810_v60 = vmul.u32.u64.high 3435973837, %v5786_v15, %v5809_v10 }
 0x273   : > { %v3054_v27 = vsel %vm5682_vm6, %v5710_v59, 0.0  ;;  %vm5821_vm6 = vmand %vm2943_vm3, %vm2930_vm2 }
 0x274   : > { %v3068_v18 = vsel %vm3066_vm5, %v3054_v27, 0.0  ;;  %v3100_v19 = vmul.f32 %v3054_v27, %v3054_v27  ;;  %v3112_v14 = vsel %vm3066_vm5, %v3099_v1, 0.0 }
 0x275   : > { %v3069_v21 = vadd.f32 %v3068_v18, %v3067_v17  ;;  %v2896_v17 = vshrl.u32 %v5781_v48, 3  ;;  %v2970_v48 = vadd.s32 10, %v5826_v6 }
 0x276   : > { %v3113_v26 = vsel %vm3066_vm5, %v3100_v19, 0.0  ;;  %v2707_v29 = vpop.f32.mrb[4].mxu0 }
 0x277   : > { %v3114_v33 = vadd.f32 %v3113_v26, %v3112_v14  ;;  %v5761_v34 = vadd.f32 %v2707_v29, %v5613_v39  ;;  %v4159_v37 = vpop.f32.mrb[5].mxu0 }
 0x278   : > { %v2710_v42 = vpop.f32.mrb[6].mxu0 }
 0x279   : > { %v3055_v39 = vsel %vm5739_vm12, %v5761_v34, 0.0  ;;  %v5777_v47 = vadd.f32 %v2710_v42, %v5620_v54  ;;  %v4160_v57 = vpop.f32.mrb[7].mxu0  ;;  %v5792_v54 = vmul.u32.u64.low 3435973837, %v5765_v40  ;;  %v5793_v0 = vmul.u32.u64.high 3435973837, %v5765_v40, %v5792_v54 }
 0x27a   : > { %v3070_v53 = vsel %vm3066_vm5, %v3055_v39, 0.0  ;;  %v3101_v13 = vmul.f32 %v3055_v39, %v3055_v39 }
 0x27b   : > { %v3071_v28 = vadd.f32 %v3070_v53, %v3069_v21  ;;  %v3056_v32 = vsel %vm5743_vm13, %v5777_v47, 0.0  ;;  %v2907_v16 = vshrl.u32 %v5793_v0, 3  ;;  %vm5864_vm13 = vmand %vm2944_vm9, %vm2931_vm8 }
 0x27c   : > { %v3115_v35 = vsel %vm3066_vm5, %v3101_v13, 0.0  ;;  %v3072_v46 = vsel %vm3066_vm5, %v3056_v32, 0.0  ;;  %v3102_v49 = vmul.f32 %v3056_v32, %v3056_v32  ;;  %v2971_v32 = vadd.s32 10, %v5841_v11 }
 0x27d   : > { %v3116_v51 = vadd.f32 %v3115_v35, %v3114_v33  ;;  %v3073_v55 = vadd.f32 %v3072_v46, %v3071_v28  ;;  %v2897_v33 = vmul.u32 10, %v2896_v17  ;;  %v2908_v53 = vmul.u32 10, %v2907_v16 }
 0x27e   : > { %v3117_v7 = vsel %vm3066_vm5, %v3102_v49, 0.0  ;;  %v2715_v56 = vpop.f32.mrb[8].mxu0 }
 0x27f   : > { %v3118_v62 = vadd.f32 %v3117_v7, %v3116_v51  ;;  %v5813_v63 = vadd.f32 %v2715_v56, %v5633_v4  ;;  %v4163_v1 = vpop.f32.mrb[9].mxu0  ;;  %v2898_v46 = vsub.s32 %v5748_v23, %v2897_v33  ;;  %v2909_v7 = vsub.s32 %v5765_v40, %v2908_v53 }
 0x280   : > { %v2718_v5 = vpop.f32.mrb[10].mxu0 }
 0x281   : > { %v3057_v4 = vsel %vm5752_vm14, %v5813_v63, 0.0  ;;  %v5832_v8 = vadd.f32 %v2718_v5, %v5637_v9  ;;  %v4164_v12 = vpop.f32.mrb[11].mxu0  ;;  %v2982_v9 = vsel %vm5821_vm6, %v2969_v3, %v5770_v44  ;;  %v2918_v44 = vshrl.u32 %v5810_v60, 3  ;;  %vm5879_vm14 = vmand %vm2945_vm11, %vm2932_vm10 }
 0x282   : > { %v3074_v18 = vsel %vm3066_vm5, %v3057_v4, 0.0  ;;  %v3103_v19 = vmul.f32 %v3057_v4, %v3057_v4  ;;  %vm2995_vm12 = vcmp.lt.s32.totalorder %v2982_v9, 10  ;;  %v2984_v23 = vsel %vm5879_vm14, %v2971_v32, %v5841_v11 }
 0x283   : > { %v3075_v21 = vadd.f32 %v3074_v18, %v3073_v55  ;;  %v3058_v22 = vsel %vm2993_vm4, %v5832_v8, 0.0  ;;  %v2919_v50 = vmul.u32 10, %v2918_v44  ;;  %vm2933_vm15 = vcmp.ne.s32.totalorder %v2898_v46, 0 }
 0x284   : > { %v3119_v14 = vsel %vm3066_vm5, %v3103_v19, 0.0  ;;  %v3076_v26 = vsel %vm3066_vm5, %v3058_v22, 0.0  ;;  %v3104_v29 = vmul.f32 %v3058_v22, %v3058_v22  ;;  %vm2946_vm0 = vcmp.lt.s32.totalorder %v2898_v46, 0 }
 0x285   : > { %v3120_v30 = vadd.f32 %v3119_v14, %v3118_v62  ;;  %v3077_v31 = vadd.f32 %v3076_v26, %v3075_v21  ;;  %v2972_v40 = vadd.s32 10, %v2898_v46  ;;  %v2920_v27 = vsub.s32 %v5786_v15, %v2919_v50  ;;  %vm5901_vm6 = vmand %vm2946_vm0, %vm2933_vm15 }
 0x286   : > { %v1515_v38 = vpop.f32.mrb[16].mxu1  ;;  %v3121_v37 = vsel %vm3066_vm5, %v3104_v29, 0.0  ;;  %v2723_v42 = vpop.f32.mrb[12].mxu0  ;;  %vm2934_vm2 = vcmp.ne.s32.totalorder %v2909_v7, 0  ;;  %vm2947_vm3 = vcmp.lt.s32.totalorder %v2909_v7, 0  ;;  %vm2997_vm4 = vcmp.lt.s32.totalorder %v2984_v23, 10 }
 0x287   : > { %v3967_v43 = vpop.f32.mrb[17].mxu1  ;;  %v3122_v45 = vadd.f32 %v3121_v37, %v3120_v30  ;;  %v5857_v39 = vadd.f32 %v2723_v42, %v5652_v25  ;;  %v4167_v57 = vpop.f32.mrb[13].mxu0  ;;  %v2973_v9 = vadd.s32 10, %v2909_v7  ;;  %vm2935_vm8 = vcmp.ne.s32.totalorder %v2920_v27, 0 }
 0x288   : > { %v1518_v61 = vpop.f32.mrb[18].mxu1  ;;  %v2726_v13 = vpop.f32.mrb[14].mxu0  ;;  %vm2948_vm9 = vcmp.lt.s32.totalorder %v2920_v27, 0  ;;  %v2974_v42 = vadd.s32 10, %v2920_v27  ;;  %vm3013_vm14 = vcmp.lt.s32.totalorder %v5786_v15, 100 }
 0x289   : > { %v3968_v24 = vpop.f32.mrb[19].mxu1  ;;  %v3059_v25 = vsel %vm5836_vm7, %v5857_v39, 0.0  ;;  %v5873_v54 = vadd.f32 %v2726_v13, %v5658_v36  ;;  %v4168_v0 = vpop.f32.mrb[15].mxu0  ;;  %v2983_v36 = vsel %vm5864_vm13, %v2970_v48, %v5826_v6  ;;  %vm5909_vm7 = vmand %vm2947_vm3, %vm2934_vm2 }
 0x28a   : > { %v3078_v49 = vsel %vm3066_vm5, %v3059_v25, 0.0  ;;  %v3105_v52 = vmul.f32 %v3059_v25, %v3059_v25  ;;  %vm2996_vm1 = vcmp.lt.s32.totalorder %v2983_v36, 10  ;;  %v2986_v57 = vsel %vm5909_vm7, %v2973_v9, %v2909_v7  ;;  %vm5920_vm10 = vmand %vm2948_vm9, %vm2935_vm8 }
 0x28b   : > { %v3079_v51 = vadd.f32 %v3078_v49, %v3077_v31  ;;  %v3060_v55 = vsel %vm2995_vm12, %v5873_v54, 0.0  ;;  %v2985_v31 = vsel %vm5901_vm6, %v2972_v40, %v2898_v46  ;;  %vm2999_vm12 = vcmp.lt.s32.totalorder %v2986_v57, 10 }
 0x28c   : > { %v3123_v56 = vsel %vm3066_vm5, %v3105_v52, 0.0  ;;  %v3080_v58 = vsel %vm3066_vm5, %v3060_v55, 0.0  ;;  %v3106_v10 = vmul.f32 %v3060_v55, %v3060_v55  ;;  %vm2998_vm11 = vcmp.lt.s32.totalorder %v2985_v31, 10 }
 0x28d   : > { %v3124_v60 = vadd.f32 %v3123_v56, %v3122_v45  ;;  %v3081_v62 = vadd.f32 %v3080_v58, %v3079_v51  ;;  %v2987_v46 = vsel %vm5920_vm10, %v2974_v42, %v2920_v27 }
 0x28e   : > { %v1523_v1 = vpop.f32.mrb[20].mxu1  ;;  %v3125_v2 = vsel %vm3066_vm5, %v3106_v10, 0.0  ;;  %v2731_v3 = vpop.f32.mrb[16].mxu0  ;;  %vm3000_vm13 = vcmp.lt.s32.totalorder %v2987_v46, 10 }
 0x28f   : > { %v3971_v5 = vpop.f32.mrb[21].mxu1  ;;  %v3126_v6 = vadd.f32 %v3125_v2, %v3124_v60  ;;  %v5897_v4 = vadd.f32 %v2731_v3, %v1515_v38  ;;  %v4171_v12 = vpop.f32.mrb[17].mxu0  ;;  %vm3026_vm15 = vmand %vm3000_vm13, %vm3013_vm14 }
 0x290   : > { %v1526_v17 = vpop.f32.mrb[22].mxu1  ;;  %v2734_v18 = vpop.f32.mrb[18].mxu0 }
 0x291   : > { %v3972_v19 = vpop.f32.mrb[23].mxu1  ;;  %v3061_v11 = vsel %vm2996_vm1, %v5897_v4, 0.0  ;;  %v5906_v21 = vadd.f32 %v2734_v18, %v1518_v61  ;;  %v4172_v22 = vpop.f32.mrb[19].mxu0 }
 0x292   : > { %v3082_v16 = vsel %vm3066_vm5, %v3061_v11, 0.0  ;;  %v3107_v14 = vmul.f32 %v3061_v11, %v3061_v11 }
 0x293   : > { %v3083_v29 = vadd.f32 %v3082_v16, %v3081_v62  ;;  %v3062_v30 = vsel %vm2997_vm4, %v5906_v21, 0.0 }
 0x294   : > { %v3127_v38 = vsel %vm3066_vm5, %v3107_v14, 0.0  ;;  %v3084_v33 = vsel %vm3066_vm5, %v3062_v30, 0.0  ;;  %v3108_v37 = vmul.f32 %v3062_v30, %v3062_v30 }
 0x295   : > { %v3128_v43 = vadd.f32 %v3127_v38, %v3126_v6  ;;  %v3085_v44 = vadd.f32 %v3084_v33, %v3083_v29 }
 0x296   : > { %v1531_v45 = vpop.f32.mrb[24].mxu1  ;;  %v3129_v48 = vsel %vm3066_vm5, %v3108_v37, 0.0  ;;  %v2739_v53 = vpop.f32.mrb[20].mxu0 }
 0x297   : > { %v3975_v13 = vpop.f32.mrb[25].mxu1  ;;  %v3130_v24 = vadd.f32 %v3129_v48, %v3128_v43  ;;  %v5925_v28 = vadd.f32 %v2739_v53, %v1523_v1  ;;  %v4175_v32 = vpop.f32.mrb[21].mxu0 }
 0x298   : > { %v1534_v25 = vpop.f32.mrb[26].mxu1  ;;  %v2742_v0 = vpop.f32.mrb[22].mxu0 }
 0x299   : > { %v3976_v35 = vpop.f32.mrb[27].mxu1  ;;  %v3063_v49 = vsel %vm2998_vm11, %v5925_v28, 0.0  ;;  %v5930_v52 = vadd.f32 %v2742_v0, %v1526_v17  ;;  %v4176_v50 = vpop.f32.mrb[23].mxu0 }
 0x29a   : > { %v3086_v51 = vsel %vm3066_vm5, %v3063_v49, 0.0  ;;  %v3109_v55 = vmul.f32 %v3063_v49, %v3063_v49 }
 0x29b   : > { %v3087_v36 = vadd.f32 %v3086_v51, %v3085_v44  ;;  %v3064_v7 = vsel %vm2999_vm12, %v5930_v52, 0.0 }
 0x29c   : > { %v3131_v56 = vsel %vm3066_vm5, %v3109_v55, 0.0  ;;  %v3088_v58 = vsel %vm3066_vm5, %v3064_v7, 0.0  ;;  %v3110_v10 = vmul.f32 %v3064_v7, %v3064_v7 }
 0x29d   : > { %v3132_v23 = vadd.f32 %v3131_v56, %v3130_v24  ;;  %v3089_v60 = vadd.f32 %v3088_v58, %v3087_v36 }
 0x29e   : > { %v3133_v62 = vsel %vm3066_vm5, %v3110_v10, 0.0  ;;  %v2747_v1 = vpop.f32.mrb[24].mxu0 }
 0x29f   : > { %v3134_v2 = vadd.f32 %v3133_v62, %v3132_v23  ;;  %v4199_v3 = vadd.f32 %v2747_v1, %v1531_v45  ;;  %v4179_v5 = vpop.f32.mrb[25].mxu0 }
 0x2a0   : > { %v2750_v40 = vpop.f32.mrb[26].mxu0 }
 0x2a1   : > { %v3065_v27 = vsel %vm3026_vm15, %v4199_v3, 0.0  ;;  %v4180_v6 = vpop.f32.mrb[27].mxu0 }
 0x2a2   : > { %v3090_v12 = vsel %vm3066_vm5, %v3065_v27, 0.0  ;;  %v3111_v15 = vmul.f32 %v3065_v27, %v3065_v27 }
 0x2a3   : > { %v3091_v17 = vadd.f32 %v3090_v12, %v3089_v60 }
 0x2a4   : > { %v3135_v18 = vsel %vm3066_vm5, %v3111_v15, 0.0  ;;  %vm3241_vm5 = vcmask 519168  }
 0x2a5   : > { %v3092_v19 = vrot.slane %v3091_v17, 4  ;;  %v3136_v20 = vadd.f32 %v3135_v18, %v3134_v2 }
 0x2a7   : > { %v3093_v11 = vadd.f32 %v3092_v19, %v3091_v17  ;;  %v3137_v22 = vrot.slane %v3136_v20, 4 }
 0x2a9   : > { %v3094_v9 = vrot.slane %v3093_v11, 2  ;;  %v3138_v16 = vadd.f32 %v3137_v22, %v3136_v20 }
 0x2ab   : > { %v3095_v14 = vadd.f32 %v3094_v9, %v3093_v11  ;;  %v3139_v26 = vrot.slane %v3138_v16, 2 }
 0x2ad   : > { %v3096_v29 = vrot.slane %v3095_v14, 1  ;;  %v3140_v30 = vadd.f32 %v3139_v26, %v3138_v16 }
 0x2af   : > { %v3097_v31 = vadd.f32 %v3096_v29, %v3095_v14  ;;  %v3141_v38 = vrot.slane %v3140_v30, 1 }
 0x2b1   : > { %v3098_v33 = vmul.f32 0.01, %v3097_v31  ;;  %v3142_v37 = vadd.f32 %v3141_v38, %v3140_v30 }
 0x2b3   : > { %v3143_v42 = vmul.f32 0.01, %v3142_v37  ;;  %v3144_v43 = vmul.f32 %v3098_v33, %v3098_v33  ;;  %v3159_v44 = vsub.f32 %v4199_v3, %v3098_v33  ;;  %v3147_v45 = vsub.f32 %v5695_v41, %v3098_v33 }
 0x2b4   : > { %v3148_v57 = vsub.f32 %v5710_v59, %v3098_v33  ;;  %v3149_v61 = vsub.f32 %v5761_v34, %v3098_v33  ;;  %v3150_v48 = vsub.f32 %v5777_v47, %v3098_v33  ;;  %v3151_v53 = vsub.f32 %v5813_v63, %v3098_v33 }
 0x2b5   : > { %v3145_v13 = vsub.f32 %v3143_v42, %v3144_v43  ;;  %v3152_v24 = vsub.f32 %v5832_v8, %v3098_v33  ;;  %v3153_v32 = vsub.f32 %v5857_v39, %v3098_v33  ;;  %v3154_v25 = vsub.f32 %v5873_v54, %v3098_v33 }
 0x2b6   : > { %v3155_v0 = vsub.f32 %v5897_v4, %v3098_v33  ;;  %v3156_v41 = vsub.f32 %v5906_v21, %v3098_v33  ;;  %v3157_v35 = vsub.f32 %v5925_v28, %v3098_v33  ;;  %v3158_v59 = vsub.f32 %v5930_v52, %v3098_v33 }
 0x2b7   : > { %v3146_v34 = vmax.f32 %v3145_v13, 0.0 }
 0x2b9   : > { %v3160_v46 = vadd.f32 1e-05, %v3146_v34 }
 0x2bb   : > { %4733 = vrsqrt.f32 %v3160_v46 }
 0x2c5   : > { %v4734_v47 = vpop.eup %4733 }
 0x2c6   : > { %v3174_v63 = vmul.f32 %v4734_v47, %v3159_v44  ;;  %v3162_v8 = vmul.f32 %v4734_v47, %v3147_v45  ;;  %v3163_v49 = vmul.f32 %v4734_v47, %v3148_v57  ;;  %v3164_v39 = vmul.f32 %v4734_v47, %v3149_v61 }
 0x2c7   : > { %v3165_v50 = vmul.f32 %v4734_v47, %v3150_v48  ;;  %v3166_v54 = vmul.f32 %v4734_v47, %v3151_v53  ;;  %v3167_v4 = vmul.f32 %v4734_v47, %v3152_v24  ;;  %v3168_v51 = vmul.f32 %v4734_v47, %v3153_v32 }
 0x2c8   : > { %v3187_v21 = vmax.f32 %v3174_v63, 0.0  ;;  %v3169_v55 = vmul.f32 %v4734_v47, %v3154_v25  ;;  %v3170_v28 = vmul.f32 %v4734_v47, %v3155_v0  ;;  %v3171_v36 = vmul.f32 %v4734_v47, %v3156_v41 }
 0x2c9   : > { %v3172_v52 = vmul.f32 %v4734_v47, %v3157_v35  ;;  %v3173_v7 = vmul.f32 %v4734_v47, %v3158_v59  ;;  %v3175_v56 = vmax.f32 %v3162_v8, 0.0  ;;  %v3176_v58 = vmax.f32 %v3163_v49, 0.0 }
 0x2ca   : > { %v3608_v10 = vpack.c.bf16 %v3187_v21, %v3187_v21  ;;  %v3177_v23 = vmax.f32 %v3164_v39, 0.0  ;;  %v3178_v60 = vmax.f32 %v3165_v50, 0.0  ;;  %v3179_v62 = vmax.f32 %v3166_v54, 0.0 }
 0x2cb   : > { %v3180_v1 = vmax.f32 %v3167_v4, 0.0  ;;  %v3181_v2 = vmax.f32 %v3168_v51, 0.0  ;;  %v3182_v3 = vmax.f32 %v3169_v55, 0.0  ;;  %v3183_v5 = vmax.f32 %v3170_v28, 0.0 }
 0x2cc   : > { %3254 = vst.msk [vmem:[%s5954_s4 + $0x30] sm:$0xf] %vm3241_vm5, %v3608_v10  ;;  %v3184_v40 = vmax.f32 %v3171_v36, 0.0  ;;  %v3185_v27 = vmax.f32 %v3172_v52, 0.0  ;;  %v3186_v6 = vmax.f32 %v3173_v7, 0.0  ;;  %v3596_v12 = vpack.c.bf16 %v3175_v56, %v3175_v56 }
 0x2cd   : > { %v3597_v15 = vpack.c.bf16 %v3176_v58, %v3176_v58  ;;  %v3598_v17 = vpack.c.bf16 %v3177_v23, %v3177_v23  ;;  %v3599_v18 = vpack.c.bf16 %v3178_v60, %v3178_v60  ;;  %v3600_v19 = vpack.c.bf16 %v3179_v62, %v3179_v62 }
 0x2ce   : > { %v3601_v20 = vpack.c.bf16 %v3180_v1, %v3180_v1  ;;  %v3602_v11 = vpack.c.bf16 %v3181_v2, %v3181_v2  ;;  %v3603_v22 = vpack.c.bf16 %v3182_v3, %v3182_v3  ;;  %v3604_v9 = vpack.c.bf16 %v3183_v5, %v3183_v5  ;;  %3242 = vst.msk [vmem:[%s5954_s4] sm:$0xf] %vm3241_vm5, %v3596_v12 }
 0x2cf   : > { %v3605_v16 = vpack.c.bf16 %v3184_v40, %v3184_v40  ;;  %v3606_v14 = vpack.c.bf16 %v3185_v27, %v3185_v27  ;;  %v3607_v26 = vpack.c.bf16 %v3186_v6, %v3186_v6  ;;  %3243 = vst.msk [vmem:[%s5954_s4 + $0x4] sm:$0xf] %vm3241_vm5, %v3597_v15  ;;  %3244 = vst.msk [vmem:[%s5954_s4 + $0x8] sm:$0xf] %vm3241_vm5, %v3598_v17 }
 0x2d0   : > { %3245 = vst.msk [vmem:[%s5954_s4 + $0xc] sm:$0xf] %vm3241_vm5, %v3599_v18  ;;  %3246 = vst.msk [vmem:[%s5954_s4 + $0x10] sm:$0xf] %vm3241_vm5, %v3600_v19 }
 0x2d1   : > { %3247 = vst.msk [vmem:[%s5954_s4 + $0x14] sm:$0xf] %vm3241_vm5, %v3601_v20  ;;  %3248 = vst.msk [vmem:[%s5954_s4 + $0x18] sm:$0xf] %vm3241_vm5, %v3602_v11 }
 0x2d2   : > { %3249 = vst.msk [vmem:[%s5954_s4 + $0x1c] sm:$0xf] %vm3241_vm5, %v3603_v22  ;;  %3250 = vst.msk [vmem:[%s5954_s4 + $0x20] sm:$0xf] %vm3241_vm5, %v3604_v9 }
 0x2d3   : > { %3251 = vst.msk [vmem:[%s5954_s4 + $0x24] sm:$0xf] %vm3241_vm5, %v3605_v16  ;;  %3252 = vst.msk [vmem:[%s5954_s4 + $0x28] sm:$0xf] %vm3241_vm5, %v3606_v14 }
 0x2d4   : > { %3253 = vst.msk [vmem:[%s5954_s4 + $0x2c] sm:$0xf] %vm3241_vm5, %v3607_v26 }
 0x2d5   : > { %4808 = shalt.err (!%p4805_p7)
}
 0x2d6   : > { %s4809_s18 = scalar_lea.hbm %s5964_s22, 832  ;;  %s4813_s23 = scalar_lea.hbm %s6034_s2, 1664 }
 0x2d7   : > { %p4810_p9 = scmp.ne.s32.totalorder %s5964_s22, %s4809_s18  ;;  %p4814_p5 = scmp.lt.u32.totalorder %s5964_s22, %s6034_s2 }
 0x2d8   : > { %p4815_p13 = scmp.lt.u32.totalorder %s4813_s23, %s4809_s18  ;;  %p4817_p4 = scmp.lt.u32.totalorder %s4809_s18, %s5964_s22 }
 0x2d9   : > { %p4811_p1 = pnand %p4810_p9, %p4986_p12 }
 0x2da   : > { %p4816_p2 = por %p4815_p13, %p4814_p5 }
 0x2db   : > { %p4812_p0 = pneg %p4811_p1 }
 0x2dc   : > { %p4818_p6 = por %p4817_p4, %p4816_p2 }
 0x2de   : > { %p4819_p8 = pnand %p4818_p6, %p4812_p0 }
 0x2e0   : > { %4822 = shalt.err (!%p4819_p8)
}
 0x2e1   : > { %s4875_s3 = smov 64   ;;  %s4876_s15 = smov 4  }
 0x2e2   : > { %4545 = dma.vmem_to_hbm [thread:$0]  (%p4986_p12), %s5966_s5, 832, %s5964_s22, %s3256_s27, %s4875_s3, %s4875_s3, %s4876_s15  }
 0x2e3 PF: > { %s3284_s17 = sand.u32 1, %s4853_s9   ;;  %p6085_p10 = scmp.ne.s32.totalorder %s6039_s16, 0 }
 0x2e4   : > { %p6086_p11 = scmp.ge.s32.totalorder %s4865_s12, 2  ;;  %s3285_s4 = scalar_lea.sflag [#allocation4], %s3284_s17 }
 0x2e6   : > { %p4556_p3 = pnand %p6086_p11, %p6085_p10 }
 0x2e8   : > { %4848 = dma.done.wait (!%p4556_p3), %s3285_s4, 832  }
 0x2e9   : > { %4850 = vsyncadd (!%p4556_p3), %s3285_s4, 4294966464  ;;  %p16_p7 = scmp.ge.s32.totalorder %s4948_s21, 4   ;;  %s6087_s9 = smov %s4857_s10 }
 0x2ea   : > { %s6088_s10 = smov %s4861_s11  ;;  %s6089_s11 = smov %s4982_s8 }
 0x2eb   : > { %s6090_s12 = smov %s4948_s21  ;;  %18 = sbr.rel (!%p16_p7) target bundleno = 6 (0x6), region = 89 }
 0x2f2   :  { %3290 = vsyncpa [#allocation3], 1 }
 0x2f3   :  { %3292 = vsyncpa [#allocation3 + $0x1], 1 }
 0x2f4   :  { %3293 = vsyncpa [#allocation6], 1 }
 0x2f5   :  { %3294 = vsyncpa [#allocation4], 1 }
 0x2f6   :  { %3296 = vsyncpa [#allocation4 + $0x1], 1 }

// kernel: refiner_forward.9
= control target key start
LH: loop header
LB: loop body
LE: loop exit
PB: predicated region body
PF: predicated region fallthrough
CT: control target
= control target key end

     0   :  { %7 = vsyncpa [#allocation3], 0  ;;  %s4973_s0 = inlined_call_operand.hbm [shape: bf16[2,152,64], index: 0, kind: input, shape index: {}]   ;;  %s4974_s1 = inlined_call_operand.hbm [shape: bf16[9,64,64], index: 1, kind: input, shape index: {}]   ;;  %s4975_s2 = inlined_call_operand.hbm [shape: bf16[2,120,64], index: 2, kind: output, shape index: {}]  }
   0x1   :  { %9 = vsyncpa [#allocation3 + $0x1], 0 }
   0x2   :  { %10 = vsyncpa [#allocation6], 0 }
   0x3   :  { %11 = vsyncpa [#allocation4], 0 }
   0x4   :  { %13 = vsyncpa [#allocation4 + $0x1], 0  ;;  %s3777_s9 = smov 0   ;;  %s3779_s10 = smov 0  }
   0x5   :  { %s3781_s11 = smov 0   ;;  %s3783_s12 = smov 0  }
   0x6 LB: > { %s3798_s13 = sadd.s32 4294967295, %s3753_s12   ;;  %s2810_s14 = sadd.s32 4294967294, %s3753_s12   ;;  %s3753_s12 = sphi %s3783_s12, %s5053_s12   ;;  %s3749_s11 = sphi %s3781_s11, %s5052_s11   ;;  %s3745_s10 = sphi %s3779_s10, %s5051_s10   ;;  %s3741_s9 = sphi %s3777_s9, %s5050_s9  }
   0x7   : > { %p39_p0 = scmp.ne.s32.totalorder %s3745_s10, %s3741_s9  ;;  %p4976_p1 = scmp.eq.s32.totalorder %s3798_s13, 0 }
   0x8   : > { %p90_p3 = scmp.eq.s32.totalorder %s2810_s14, 1  ;;  %p2811_p5 = scmp.ge.s32.totalorder %s3753_s12, 1 }
   0x9   : > { %p3807_p4 = por %p4976_p1, %p39_p0  ;;  %p97_p7 = scmp.lt.s32.totalorder %s3753_s12, 3 }
   0xa   : > { %p3812_p6 = por %p90_p3, %p39_p0  ;;  %s3755_s18 = smov [#allocation5]  }
   0xb   : > { %s4979_s15 = scalar_select %p3807_p4, 1, 0 }
   0xc   : > { %s4980_s16 = scalar_select %p3812_p6, 1, 0 }
   0xd   : > { %p3817_p8 = pnand %p2811_p5, %p97_p7  ;;  %s109_s19 = sshll.u32 %s3755_s18, 4  ;;  %s3821_s19 = int_to_ptr.vmem [resolvable:$true] %s109_s19 }
   0xe   : > { %s3833_s21 = sadd.s32 1, %s3753_s12   ;;  %s26_s22 = sadd.s32 1, %s3749_s11 }
   0xf   : > { %s4981_s17 = scalar_select %p3817_p8, 1, 0 }
  0x10   : > { %p3497_p9 = pneg %p3817_p8  ;;  %s23_s23 = ssub.s32 %s3753_s12, %s3833_s21 }
  0x11   : > { %s3625_s26 = scalar_lea.hbm %s4974_s1, 4608 }
  0x12   : > { %p3828_p11 = pnand %p3497_p9, %p4976_p1  ;;  %p3626_p12 = scmp.ne.s32.totalorder %s4974_s1, %s3625_s26 }
  0x13   : > { %p3632_p5 = scmp.lt.u32.totalorder %s3625_s26, %s4974_s1 }
  0x14   : > { %p3627_p13 = pneg %p3828_p11 }
  0x16   : > { %p3628_p0 = pnand %p3627_p13, %p3626_p12 }
  0x18   : > { %p3629_p3 = pneg %p3628_p0 }
  0x1a   : > { %p3634_p7 = pnand %p3632_p5, %p3629_p3 }
  0x1c   : > { %3637 = shalt.err (!%p3634_p7)
}
  0x1d   : > { %s3638_s3 = scalar_lea.vmem %s3821_s19, 4608  ;;  %p3646_p2 = scmp.lt.s32.totalorder %s3821_s19, %s3821_s19 }
  0x1e   : > { %p3639_p9 = scmp.ne.s32.totalorder %s3821_s19, %s3638_s3  ;;  %p3647_p6 = scmp.lt.s32.totalorder %s3638_s3, %s3638_s3 }
  0x20   : > { %p3641_p10 = pnand %p3639_p9, %p3627_p13  ;;  %p3648_p4 = por %p3647_p6, %p3646_p2 }
  0x22   : > { %p3642_p1 = pneg %p3641_p10 }
  0x24   : > { %p3649_p8 = pnand %p3648_p4, %p3642_p1 }
  0x26   : > { %3652 = shalt.err (!%p3649_p8)
}
  0x27   : > { %s3756_s4 = smov 64   ;;  %s3757_s5 = smov 4  }
  0x28   : > { %3500 = dma.hbm_to_vmem [thread:$0]  (!%p3828_p11), %s4974_s1, 4608, %s3821_s19, [#allocation6], %s3756_s4, %s3756_s4, %s3757_s5  }
  0x29   : > { %p24_p1 = scmp.eq.s32.totalorder %s23_s23, 0  ;;  %p33_p2 = scmp.ne.s32.totalorder %s3749_s11, %s3745_s10 }
  0x2a   : > { %p34_p4 = scmp.eq.s32.totalorder %s3753_s12, 0  ;;  %p3510_p6 = scmp.lt.s32.totalorder %s3753_s12, 2 }
  0x2b   : > { %s3867_s8 = scalar_select %p24_p1, %s3749_s11, %s26_s22  }
  0x2c   : > { %p35_p8 = por %p34_p4, %p33_p2  ;;  %p4983_p10 = scmp.eq.s32.totalorder %s3798_s13, 1 }
  0x2d   : > { %s123_s18 = sand.u32 1, %s3749_s11   ;;  %s3455_s20 = smul.u32 1216, %s3753_s12 }
  0x2e   : > { %p3871_p12 = por %p4983_p10, %p33_p2  ;;  %s3454_s24 = smul.u32 76, %s123_s18 }
  0x2f   : > { %p3877_p13 = pnand %p3510_p6, %p35_p8  ;;  %s3884_s22 = scalar_lea.hbm %s4973_s0, %s3455_s20 }
  0x30   : > { %s127_s26 = scalar_lea.vmem [#allocation2], %s3454_s24  ;;  %s3888_s28 = scalar_lea.sflag [#allocation3], %s123_s18 }
  0x31   : > { %s134_s27 = sshll.u32 %s127_s26, 4  ;;  %s3653_s29 = scalar_lea.hbm %s3884_s22, 1216  ;;  %s3886_s27 = int_to_ptr.vmem [resolvable:$true] %s134_s27 }
  0x32   : > { %p3654_p11 = scmp.ne.s32.totalorder %s3884_s22, %s3653_s29  ;;  %p3655_p0 = pneg %p3877_p13 }
  0x33   : > { %s3658_s6 = scalar_lea.hbm %s4973_s0, 2432  ;;  %p3659_p7 = scmp.lt.u32.totalorder %s3884_s22, %s4973_s0 }
  0x34   : > { %p3656_p3 = pnand %p3655_p0, %p3654_p11  ;;  %p3660_p9 = scmp.lt.u32.totalorder %s3658_s6, %s3653_s29 }
  0x35   : > { %p3662_p2 = scmp.lt.u32.totalorder %s3653_s29, %s3884_s22 }
  0x36   : > { %p3657_p5 = pneg %p3656_p3  ;;  %p3661_p1 = por %p3660_p9, %p3659_p7 }
  0x38   : > { %p3663_p4 = por %p3662_p2, %p3661_p1 }
  0x3a   : > { %p3664_p6 = pnand %p3663_p4, %p3657_p5 }
  0x3c   : > { %3667 = shalt.err (!%p3664_p6)
}
  0x3d   : > { %s3668_s18 = scalar_lea.vmem %s3886_s27, 1216  ;;  %s3758_s24 = smov [#allocation2]  }
  0x3e   : > { %p3669_p8 = scmp.ne.s32.totalorder %s3886_s27, %s3668_s18  ;;  %s3673_s19 = sshll.u32 %s3758_s24, 4  ;;  %s3674_s19 = int_to_ptr.vmem [resolvable:$false] %s3673_s19 }
  0x3f   : > { %s3675_s23 = scalar_lea.vmem %s3674_s19, 2432  ;;  %p3676_p3 = scmp.lt.s32.totalorder %s3886_s27, %s3674_s19 }
  0x40   : > { %p3671_p10 = pnand %p3669_p8, %p3655_p0  ;;  %p3677_p7 = scmp.lt.s32.totalorder %s3675_s23, %s3668_s18 }
  0x42   : > { %p3672_p11 = pneg %p3671_p10  ;;  %p3678_p9 = por %p3677_p7, %p3676_p3 }
  0x44   : > { %p3679_p1 = pnand %p3678_p9, %p3672_p11 }
  0x46   : > { %3682 = shalt.err (!%p3679_p1)
}
  0x47   : > { %3504 = dma.hbm_to_vmem [thread:$0]  (!%p3877_p13), %s3884_s22, 1216, %s3886_s27, %s3888_s28, %s3756_s4, %s3756_s4, %s3757_s5  }
  0x48   : > { %p4986_p0 = scmp.ne.s32.totalorder %s4981_s17, 0 }
  0x49   : > { %s3922_s26 = sand.u32 (!%p4986_p0), 1, %s3745_s10   ;;  %p4987_p5 = scmp.ne.s32.totalorder (!%p4986_p0), %s4979_s15, 0 }
  0x4a   : > { %146 = sbr.rel (%p4986_p0) target bundleno = 529 (0x211), region = 28  ;;  %s149_s30 = scalar_lea.sflag (!%p4986_p0), [#allocation3], %s3922_s26 }
  0x4b   : > { %s3456_s29 = smul.u32 (!%p4986_p0), 76, %s3922_s26 }
  0x4d   : > { %s3926_s3 = scalar_lea.vmem (!%p4986_p0), [#allocation2], %s3456_s29 }
  0x51   : > { %3728 = dma.done.wait (%p4987_p5), %s149_s30, 1216  }
  0x52   : > { %3730 = vsyncadd (%p4987_p5), %s149_s30, 4294966080  ;;  %p4988_p13 = scmp.eq.s32.totalorder %s3798_s13, 0 }
  0x54   : > { %3732 = dma.done.wait (%p4988_p13), [#allocation6], 4608   ;;  %p4989_p2 = pmov %p4988_p13 }
  0x55   : > { %v3550_v0 = vld [vmem:[#allocation5 + $0x20] sm:$0xff]   ;;  %v3552_v2 = vld [vmem:[#allocation5 + $0x28] sm:$0xff]   ;;  %v3554_v4 = vld [vmem:[#allocation5 + $0x30] sm:$0xff]   ;;  %vm251_vm0 = vsmask.f32 7424  ;;  %vm339_vm1 = vcmask 523264  }
  0x56   : > { %3734 = vsyncadd (%p4989_p2), [#allocation6], 4294962688  ;;  %v3936_v1 = vld [vmem:[#allocation5 + $0x80] sm:$0xff]   ;;  %3103 = vmatprep.subr.bf16.mxu1 %v3550_v0  ;;  %v3939_v3 = vld [vmem:[#allocation5 + $0x88] sm:$0xff]   ;;  %vm1039_vm2 = vsmask.f32 5376 }
  0x57   : > { %3199 = vmatprep.subr.bf16.mxu0 %v3936_v1  ;;  %3104 = vmatpush3.bf16.msra.mxu1 %v3550_v0  ;;  %v3943_v5 = vld [vmem:[#allocation5 + $0x90] sm:$0xff]   ;;  %v3556_v6 = vld [vmem:[#allocation5 + $0x38] sm:$0xff]   ;;  %v3563_v28 = vld [vmem:[#allocation5] sm:$0xff]   ;;  %vm1283_vm3 = vcmask 1044480   ;;  %vm611_vm4 = vcmask 1046528   ;;  %vm851_vm5 = vcmask 1045504  }
  0x58   : > { %3200 = vmatpush3.bf16.msra.mxu0 %v3936_v1  ;;  %3105 = vmatprep.subr.bf16.mxu1 %v3552_v2  ;;  %v3945_v7 = vld [vmem:[#allocation5 + $0x98] sm:$0xff]   ;;  %v178_v8 = vld [vmem:[%s3926_s3] sm:$0xf]  ;;  %v3565_v34 = vld [vmem:[#allocation5 + $0xa0] sm:$0xff]   ;;  %s3457_s15 = smul.u32 60, %s3922_s26  ;;  %s2714_s27 = scalar_lea.sflag [#allocation4], %s3922_s26 }
  0x59   : > { %3201 = vmatprep.subr.bf16.mxu0 %v3939_v3  ;;  %v3950_v9 = vld [vmem:[%s3926_s3 + $0x4] sm:$0xf]  ;;  %v3957_v11 = vld [vmem:[%s3926_s3 + $0x8] sm:$0xff]   ;;  %v3971_v19 = vld [vmem:[%s3926_s3 + $0x10] sm:$0xff]   ;;  %s3488_s4 = smul.u32 960, %s3798_s13  ;;  %s3759_s6 = smov [#allocation7]  }
  0x5a   : > { %v3954_v10 = vcombine.low %v178_v8, %v3950_v9  ;;  %v786_v12 = vld [vmem:[%s3926_s3 + $0x4] sm:$0xc]  ;;  %v3961_v13 = vld [vmem:[%s3926_s3 + $0x8] sm:$0xf]  ;;  %v260_v16 = vshll.u32 %v3957_v11, 16  ;;  %v264_v17 = vshrl.u32 %v3957_v11, 16 }
  0x5b   : > { %3106 = vmatpush3.bf16.msra.mxu1 %v3552_v2  ;;  %v3968_v18 = vld [vmem:[%s3926_s3 + $0xc] sm:$0xff]   ;;  %v3975_v20 = vcombine.low %v786_v12, %v3961_v13  ;;  %v268_v27 = vshll.u32 %v3971_v19, 16  ;;  %v3984_v33 = vld [vmem:[%s3926_s3 + $0x14] sm:$0xff]   ;;  %v272_v47 = vshrl.u32 %v3971_v19, 16  ;;  %v3999_v50 = vld [vmem:[%s3926_s3 + $0x1c] sm:$0xff]   ;;  %s4890_s17 = scalar_lea.vmem [#allocation7], %s3457_s15  ;;  %s4909_s22 = scalar_lea.hbm %s4975_s2, %s3488_s4 }
  0x5c   : > { %3202 = vmatpush3.bf16.msra.mxu0 %v3939_v3  ;;  %3107 = vmatprep.subr.bf16.mxu1 %v3554_v4  ;;  %v253_v14 = vshrl.u32 %v3954_v10, 16  ;;  %v255_v15 = vshll.u32 %v3954_v10, 16  ;;  %v262_v22 = vrot.slane %v260_v16, 1  ;;  %v1049_v23 = vshrl.u32 %v3968_v18, 16  ;;  %v3994_v46 = vld [vmem:[%s3926_s3 + $0x18] sm:$0xff]   ;;  %v4004_v54 = vld [vmem:[%s3926_s3 + $0x20] sm:$0xff]  }
  0x5d   : > { %3203 = vmatprep.subr.bf16.mxu0 %v3943_v5  ;;  %v1052_v24 = vshll.u32 %v3968_v18, 16  ;;  %v1041_v25 = vshrl.u32 %v3975_v20, 16  ;;  %v1044_v26 = vshll.u32 %v3975_v20, 16  ;;  %v270_v37 = vrot.slane %v268_v27, 1  ;;  %v3566_v49 = vld [vmem:[#allocation5 + $0xa8] sm:$0xff]   ;;  %v3572_v12 = vld [vmem:[#allocation5 + $0xb0] sm:$0xff]  }
  0x5e   : > { %v257_v21 = vrot.slane %v255_v15, 1  ;;  %v266_v30 = vor.u32 %v264_v17, %v262_v22  ;;  %v1051_v31 = vrot.slane %v1049_v23, 2  ;;  %v1058_v40 = vshrl.u32 %v3984_v33, 16  ;;  %v3570_v56 = vld [vmem:[#allocation5 + $0x8] sm:$0xff]   ;;  %s2727_s5 = sshll.u32 %s4890_s17, 4  ;;  %s3687_s7 = sshll.u32 %s3759_s6, 4  ;;  %s4911_s5 = int_to_ptr.vmem [resolvable:$true] %s2727_s5  ;;  %s3688_s7 = int_to_ptr.vmem [resolvable:$false] %s3687_s7 }
  0x5f   : > { %3108 = vmatpush3.bf16.msra.mxu1 %v3554_v4  ;;  %v1054_v32 = vrot.slane %v1052_v24, 3  ;;  %v1043_v35 = vrot.slane %v1041_v25, 2  ;;  %v1046_v36 = vrot.slane %v1044_v26, 3  ;;  %v1061_v41 = vshll.u32 %v3984_v33, 16  ;;  %v4013_v0 = vld [vmem:[%s3926_s3 + $0x24] sm:$0xff]   ;;  %s3683_s28 = scalar_lea.vmem %s4911_s5, 960  ;;  %p3690_p10 = scmp.lt.s32.totalorder %s4911_s5, %s3688_s7 }
  0x60   : > { %3204 = vmatpush3.bf16.msra.mxu0 %v3943_v5  ;;  %3109 = vmatprep.subr.bf16.mxu1 %v3556_v6  ;;  %v258_v29 = vor.u32 %v257_v21, %v253_v14  ;;  %v271_v43 = vsel %vm251_vm0, %v266_v30, %v270_v37  ;;  %v1060_v44 = vrot.slane %v1058_v40, 2  ;;  %v274_v52 = vor.u32 %v272_v47, %v270_v37  ;;  %v4022_v21 = vld [vmem:[%s3926_s3 + $0x28] sm:$0xff]   ;;  %v1270_v23 = vld [vmem:[%s3926_s3 + $0x4] sm:$0x8]  ;;  %v4032_v30 = vld [vmem:[%s3926_s3 + $0x30] sm:$0xff]   ;;  %p3684_p4 = scmp.ne.s32.totalorder %s4911_s5, %s3683_s28  ;;  %s3689_s20 = scalar_lea.vmem %s3688_s7, 1920 }
  0x61   : > { %3205 = vmatprep.subr.bf16.mxu0 %v3945_v7  ;;  %v1055_v39 = vor.u32 %v1054_v32, %v1051_v31  ;;  %v1047_v42 = vor.u32 %v1046_v36, %v1043_v35  ;;  %v1063_v45 = vrot.slane %v1061_v41, 3  ;;  %v276_v53 = vshll.u32 %v3994_v46, 16  ;;  %v3577_v32 = vld [vmem:[#allocation5 + $0x10] sm:$0xff]   ;;  %v3573_v36 = vld [vmem:[#allocation5 + $0xb8] sm:$0xff]   ;;  %v4045_v41 = vld [vmem:[%s3926_s3 + $0x38] sm:$0xf]  ;;  %p3691_p11 = scmp.lt.s32.totalorder %s3689_s20, %s3683_s28 }
  0x62   : > { %v263_v38 = vsel %vm251_vm0, %v258_v29, %v262_v22  ;;  %v280_v55 = vshrl.u32 %v3994_v46, 16  ;;  %v1067_v57 = vshrl.u32 %v3999_v50, 16  ;;  %v1070_v58 = vshll.u32 %v3999_v50, 16  ;;  %p3685_p6 = pnand %p3684_p4, %p3871_p12 }
  0x63   : > { %3110 = vmatpush3.bf16.msra.mxu1 %v3556_v6  ;;  %3111 = vmatprep.mubr.msk.bf16.mxu1 %vm339_vm1, %v263_v38  ;;  %v1056_v48 = vsel %vm1039_vm2, %v1047_v42, %v1055_v39  ;;  %v1064_v51 = vor.u32 %v1063_v45, %v1060_v44  ;;  %v278_v60 = vrot.slane %v276_v53, 1  ;;  %v284_v61 = vshll.u32 %v4004_v54, 16  ;;  %v201_v42 = vld [vmem:[%s3926_s3 + $0x3c] sm:$0x1]  ;;  %p3692_p3 = por %p3691_p11, %p3690_p10 }
  0x64   : > { %3206 = vmatpush3.bf16.msra.mxu0 %v3945_v7  ;;  %3127 = vmatprep.subr.bf16.mxu1 %v3563_v28  ;;  %v1069_v62 = vrot.slane %v1067_v57, 2  ;;  %v1072_v63 = vrot.slane %v1070_v58, 3  ;;  %v1285_v2 = vrot.slane %v3968_v18, 3  ;;  %v1076_v15 = vshrl.u32 %v4013_v0, 16  ;;  %v3583_v58 = vld [vmem:[#allocation5 + $0x40] sm:$0xff]   ;;  %p3686_p8 = pneg %p3685_p6 }
  0x65   : > { %3223 = vmatprep.subr.bf16.mxu0 %v3565_v34  ;;  %3207 = vmatprep.mubr.msk.bf16.mxu0 %vm339_vm1, %v1056_v48  ;;  %v1065_v59 = vsel %vm1039_vm2, %v1055_v39, %v1064_v51  ;;  %v279_v4 = vsel %vm251_vm0, %v274_v52, %v278_v60  ;;  %v282_v6 = vor.u32 %v280_v55, %v278_v60  ;;  %v286_v8 = vrot.slane %v284_v61, 1  ;;  %v4062_v60 = vld [vmem:[%s3926_s3 + $0x2c] sm:$0xff]  }
  0x66   : > { %3112 = vmatmul.mubr.msk.bf16.vlgmr.msra.gmra.mrb[0].mxu1 %vm339_vm1, %v271_v43  ;;  %v1073_v14 = vor.u32 %v1072_v63, %v1069_v62  ;;  %v1079_v16 = vshll.u32 %v4013_v0, 16  ;;  %v288_v22 = vshrl.u32 %v4004_v54, 16  ;;  %v1078_v25 = vrot.slane %v1076_v15, 2  ;;  %v3580_v43 = vld [vmem:[#allocation5 + $0x18] sm:$0xff]   ;;  %v1026_v15 = vld [vmem:[%s3926_s3 + $0x40] sm:$0x7]  ;;  %p3693_p7 = pnand %p3692_p3, %p3686_p8 }
  0x67   : > { %3128 = vmatpush3.bf16.msra.mxu1 %v3563_v28  ;;  %3208 = vmatmul.mubr.msk.bf16.vlgmr.msra.gmra.mrb[0].mxu0 %vm339_vm1, %v1065_v59  ;;  %v287_v17 = vsel %vm251_vm0, %v282_v6, %v286_v8  ;;  %v2896_v27 = vcombine.low %v1270_v23, %v3961_v13  ;;  %v292_v29 = vshll.u32 %v4022_v21, 16  ;;  %v296_v31 = vshrl.u32 %v4022_v21, 16  ;;  %v3581_v6 = vld [vmem:[#allocation5 + $0xc8] sm:$0xff]   ;;  %v3588_v23 = vld [vmem:[#allocation5 + $0xd8] sm:$0xff]  }
  0x68   : > { %3129 = vmatprep.subr.bf16.mxu1 %v3570_v56  ;;  %3224 = vmatpush3.bf16.msra.mxu0 %v3565_v34  ;;  %v1074_v24 = vsel %vm1039_vm2, %v1064_v51, %v1073_v14  ;;  %v1081_v26 = vrot.slane %v1079_v16, 3  ;;  %v290_v28 = vor.u32 %v288_v22, %v286_v8  ;;  %v300_v13 = vshll.u32 %v4032_v30, 16  ;;  %v3578_v51 = vld [vmem:[#allocation5 + $0xc0] sm:$0xff]  }
  0x69   : > { %3225 = vmatprep.subr.bf16.mxu0 %v3566_v49  ;;  %3115 = vmatprep.mubr.msk.bf16.mxu1 %vm339_vm1, %v279_v4  ;;  %v1284_v35 = vrot.slane %v2896_v27, 3  ;;  %v294_v37 = vrot.slane %v292_v29, 1  ;;  %v304_v38 = vshrl.u32 %v4032_v30, 16  ;;  %v4051_v48 = vcombine.low %v4045_v41, %v201_v42  ;;  %v4082_v16 = vld [vmem:[%s3926_s3 + $0x34] sm:$0xff]  }
  0x6a   : > { %3211 = vmatprep.mubr.msk.bf16.mxu0 %vm339_vm1, %v1074_v24  ;;  %v4035_v34 = vor.u32 %v1081_v26, %v1078_v25  ;;  %v302_v47 = vrot.slane %v300_v13, 1  ;;  %v1291_v4 = vrot.slane %v4013_v0, 3  ;;  %v623_v25 = vrot.slane %v4032_v30, 1 }
  0x6b   : > { %3130 = vmatpush3.bf16.msra.mxu1 %v3570_v56  ;;  %v1286_v40 = vsel %vm1283_vm3, %v1284_v35, %v1285_v2  ;;  %v295_v44 = vsel %vm251_vm0, %v290_v28, %v294_v37  ;;  %v298_v45 = vor.u32 %v296_v31, %v294_v37  ;;  %v308_v55 = vshll.u32 %v4051_v48, 16  ;;  %v3587_v28 = vld [vmem:[#allocation5 + $0x48] sm:$0xff]   ;;  %v3592_v35 = vld [vmem:[#allocation5 + $0xe0] sm:$0xff]  }
  0x6c   : > { %3226 = vmatpush3.bf16.msra.mxu0 %v3566_v49  ;;  %3131 = vmatprep.subr.bf16.mxu1 %v3577_v32  ;;  %v1083_v39 = vsel %vm1039_vm2, %v1073_v14, %v4035_v34  ;;  %v1287_v49 = vrot.slane %v3984_v33, 3  ;;  %v306_v53 = vor.u32 %v304_v38, %v302_v47  ;;  %v1289_v56 = vrot.slane %v3999_v50, 3  ;;  %v3585_v14 = vld [vmem:[#allocation5 + $0xd0] sm:$0xff]  }
  0x6d   : > { %3227 = vmatprep.subr.bf16.mxu0 %v3572_v12  ;;  %v303_v52 = vsel %vm251_vm0, %v298_v45, %v302_v47  ;;  %v312_v57 = vshrl.u32 %v4051_v48, 16  ;;  %v310_v59 = vrot.slane %v308_v55, 1  ;;  %v625_v26 = vrot.slane %v4051_v48, 1  ;;  %v3595_v45 = vld [vmem:[#allocation5 + $0x58] sm:$0xff]   ;;  %v3593_v55 = vld [vmem:[%s3926_s3 + $0x1c] sm:$0xff]  }
  0x6e   : > { %3116 = vmatmul.mubr.msk.bf16.gmra.mrb[4].mxu1 %vm339_vm1, %v287_v17  ;;  %v1288_v61 = vsel %vm1283_vm3, %v1285_v2, %v1287_v49  ;;  %v1290_v63 = vsel %vm1283_vm3, %v1287_v49, %v1289_v56  ;;  %v4075_v2 = vld [vmem:[%s3926_s3 + $0x3c] sm:$0xf]  ;;  %v1292_v17 = vsel %vm1283_vm3, %v1289_v56, %v1291_v4  ;;  %v1295_v27 = vrot.slane %v4082_v16, 3  ;;  %v3589_v47 = vld [vmem:[%s3926_s3 + $0xc] sm:$0xff]  }
  0x6f   : > { %3132 = vmatpush3.bf16.msra.mxu1 %v3577_v32  ;;  %3212 = vmatmul.mubr.msk.bf16.gmra.mrb[4].mxu0 %vm339_vm1, %v1083_v39  ;;  %v311_v62 = vsel %vm251_vm0, %v306_v53, %v310_v59  ;;  %v314_v8 = vor.u32 %v312_v57, %v310_v59  ;;  %v4086_v22 = vcombine.low %v4075_v2, %v1026_v15  ;;  %v853_v31 = vrot.slane %v3968_v18, 2  ;;  %v4140_v49 = vld [vmem:[#allocation5 + $0x60] sm:$0xff]  }
  0x70   : > { %3228 = vmatpush3.bf16.msra.mxu0 %v3572_v12  ;;  %3119 = vmatprep.mubr.msk.bf16.mxu1 %vm339_vm1, %v295_v44  ;;  %v1293_v12 = vrot.slane %v4062_v60, 3  ;;  %v4099_v29 = vsel %vm611_vm4, %v623_v25, %v625_v26  ;;  %v857_v37 = vrot.slane %v3999_v50, 2  ;;  %v3590_v50 = vld [vmem:[#allocation5 + $0x50] sm:$0xff]   ;;  %v861_v39 = vrot.slane %v4062_v60, 2  ;;  %v3591_v53 = vld [vmem:[%s3926_s3 + $0x14] sm:$0xff]  }
  0x71   : > { %3229 = vmatprep.subr.bf16.mxu0 %v3573_v36  ;;  %3231 = vmatprep.mubr.msk.bf16.mxu0 %vm339_vm1, %v1286_v40  ;;  %v1297_v32 = vrot.slane %v4086_v22, 3  ;;  %v613_v57 = vrot.slane %v3957_v11, 1  ;;  %v1085_v59 = vshrl.u32 %v4062_v60, 16 }
  0x72   : > { %3133 = vmatprep.subr.bf16.mxu1 %v3580_v43  ;;  %v1294_v24 = vsel %vm1283_vm3, %v1291_v4, %v1293_v12  ;;  %v1296_v38 = vsel %vm1283_vm3, %v1293_v12, %v1295_v27  ;;  %v3596_v12 = vld [vmem:[%s3926_s3 + $0x24] sm:$0xff]  }
  0x73   : > { %3134 = vmatpush3.bf16.msra.mxu1 %v3580_v43  ;;  %v1298_v40 = vsel %vm1283_vm3, %v1295_v27, %v1297_v32  ;;  %v863_v43 = vrot.slane %v4082_v16, 2  ;;  %v1094_v27 = vshrl.u32 %v4082_v16, 16 }
  0x74   : > { %3230 = vmatpush3.bf16.msra.mxu0 %v3573_v36  ;;  %3151 = vmatprep.subr.bf16.mxu1 %v3583_v58 }
  0x75   : > { %3247 = vmatprep.subr.bf16.mxu0 %v3578_v51 }
  0x76   : > { %3120 = vmatmul.mubr.msk.bf16.gmra.mrb[8].mxu1 %vm339_vm1, %v303_v52 }
  0x77   : > { %3123 = vmatprep.mubr.msk.bf16.mxu1 %vm339_vm1, %v311_v62  ;;  %3232 = vmatmul.mubr.msk.bf16.vlgmr.msra.gmra.mrb[0].mxu0 %vm339_vm1, %v1288_v61  ;;  %v801_v62 = vld [vmem:[%s3926_s3 + $0x40] sm:$0x3] }
  0x78   : > { %3248 = vmatpush3.bf16.msra.mxu0 %v3578_v51  ;;  %3235 = vmatprep.mubr.msk.bf16.mxu0 %vm339_vm1, %v1290_v63  ;;  %v598_v51 = vld [vmem:[%s3926_s3] sm:$0xe]  ;;  %v1088_v63 = vshll.u32 %v4062_v60, 16  ;;  %v2870_v4 = vcombine.low %v4075_v2, %v801_v62  ;;  %v617_v60 = vrot.slane %v3994_v46, 1  ;;  %v3606_v2 = vld [vmem:[#allocation5 + $0xf8] sm:$0xff]  }
  0x79   : > { %3249 = vmatprep.subr.bf16.mxu0 %v3581_v6  ;;  %v2850_v52 = vcombine.low %v598_v51, %v3950_v9  ;;  %v2837_v9 = vcombine.low %v4045_v41, %v4045_v41  ;;  %v1679_v41 = vld [vmem:[%s3926_s3 + $0xc] sm:$0xf] }
  0x7a   : > { %v4171_v15 = vrot.slane %v2870_v4, 2 }
  0x7b   : > { %v612_v56 = vrot.slane %v2850_v52, 1  ;;  %v3603_v52 = vld [vmem:[%s3926_s3 + $0x3c] sm:$0xff]  }
  0x7c   : > { %3250 = vmatpush3.bf16.msra.mxu0 %v3581_v6  ;;  %v4166_v6 = vld [vmem:[%s3926_s3 + $0x10] sm:$0xf] }
  0x7d   : > { %3251 = vmatprep.subr.bf16.mxu0 %v3585_v14  ;;  %v614_v61 = vsel %vm611_vm4, %v612_v56, %v613_v57 }
  0x7e   : > { %3124 = vmatmul.mubr.msk.bf16.gmra.mrb[12].mxu1 %vm339_vm1, %v314_v8  ;;  %v1087_v8 = vrot.slane %v1085_v59, 2  ;;  %v3613_v59 = vld [vmem:[#allocation5 + $0x78] sm:$0xff]  }
  0x7f   : > { %3135 = vmatprep.mubr.msk.bf16.mxu1 %vm339_vm1, %v3954_v10  ;;  %v852_v10 = vrot.slane %v3975_v20, 2  ;;  %3236 = vmatmul.mubr.msk.bf16.gmra.mrb[4].mxu0 %vm339_vm1, %v1292_v17  ;;  %v855_v20 = vrot.slane %v3984_v33, 2  ;;  %v859_v33 = vrot.slane %v4013_v0, 2  ;;  %v4132_v0 = vsel %vm851_vm5, %v861_v39, %v863_v43  ;;  %v3599_v17 = vld [vmem:[%s3926_s3 + $0x2c] sm:$0xff]  }
  0x80   : > { %3239 = vmatprep.mubr.msk.bf16.mxu0 %vm339_vm1, %v1294_v24  ;;  %3252 = vmatpush3.bf16.msra.mxu0 %v3585_v14  ;;  %v615_v14 = vrot.slane %v3971_v19, 1  ;;  %v2929_v24 = vcombine.low %v1679_v41, %v4166_v6 }
  0x81   : > { %3253 = vmatprep.subr.bf16.mxu0 %v3588_v23  ;;  %v4106_v36 = vsel %vm851_vm5, %v852_v10, %v853_v31  ;;  %v4112_v13 = vsel %vm851_vm5, %v853_v31, %v855_v20  ;;  %v4117_v18 = vsel %vm851_vm5, %v855_v20, %v857_v37  ;;  %v4124_v42 = vsel %vm851_vm5, %v857_v37, %v859_v33 }
  0x82   : > { %v4128_v44 = vsel %vm851_vm5, %v859_v33, %v861_v39  ;;  %v4178_v10 = vsel %vm851_vm5, %v863_v43, %v4171_v15  ;;  %v1103_v31 = vshrl.u32 %v4086_v22, 16  ;;  %v1096_v20 = vrot.slane %v1094_v27, 2  ;;  %v3604_v33 = vld [vmem:[#allocation5 + $0x68] sm:$0xff]  }
  0x83   : > { %v618_v37 = vsel %vm611_vm4, %v615_v14, %v617_v60  ;;  %v1747_v39 = vshll.u32 %v2929_v24, 16 }
  0x84   : > { %3254 = vmatpush3.bf16.msra.mxu0 %v3588_v23  ;;  %v1090_v23 = vrot.slane %v1088_v63, 3  ;;  %v4220_v63 = vld [vmem:[%s3926_s3 + $0x24] sm:$0xff]  }
  0x85   : > { %3271 = vmatprep.subr.bf16.mxu0 %v3592_v35 }
  0x86   : > { %3136 = vmatmul.mubr.msk.bf16.vlgmr.msra.gmra.mrb[0].mxu1 %vm339_vm1, %v3957_v11  ;;  %v3602_v11 = vld [vmem:[#allocation5 + $0xf0] sm:$0xff]  }
  0x87   : > { %3152 = vmatpush3.bf16.msra.mxu1 %v3583_v58  ;;  %3139 = vmatprep.mubr.msk.bf16.mxu1 %vm339_vm1, %v3971_v19  ;;  %v3597_v58 = vld [vmem:[#allocation5 + $0xe8] sm:$0xff]   ;;  %v1091_v19 = vor.u32 %v1090_v23, %v1087_v8  ;;  %v4235_v23 = vld [vmem:[%s3926_s3 + $0x2c] sm:$0xff]  }
  0x88   : > { %3153 = vmatprep.subr.bf16.mxu1 %v3587_v28  ;;  %3240 = vmatmul.mubr.msk.bf16.gmra.mrb[8].mxu0 %vm339_vm1, %v1296_v38  ;;  %v1105_v38 = vrot.slane %v1103_v31, 2 }
  0x89   : > { %3243 = vmatprep.mubr.msk.bf16.mxu0 %vm339_vm1, %v1298_v40  ;;  %v3611_v40 = vld [vmem:[#allocation5 + $0x100] sm:$0xff]  }
  0x8b   : > { %3154 = vmatpush3.bf16.msra.mxu1 %v3587_v28  ;;  %v1097_v28 = vshll.u32 %v4082_v16, 16  ;;  %v4190_v16 = vsel %vm1039_vm2, %v4035_v34, %v1091_v19  ;;  %v619_v34 = vrot.slane %v4004_v54, 1 }
  0x8c   : > { %3155 = vmatprep.subr.bf16.mxu1 %v3590_v50 }
  0x8e   : > { %3140 = vmatmul.mubr.msk.bf16.gmra.mrb[4].mxu1 %vm339_vm1, %v3994_v46  ;;  %v616_v46 = vsel %vm611_vm4, %v613_v57, %v615_v14  ;;  %v1749_v57 = vrot.slane %v1747_v39, 1  ;;  %v1768_v14 = vshll.u32 %v4220_v63, 16  ;;  %v4257_v39 = vld [vmem:[%s3926_s3 + $0x44] sm:$0x1f]  }
  0x8f   : > { %3143 = vmatprep.mubr.msk.bf16.mxu1 %vm339_vm1, %v4004_v54  ;;  %3156 = vmatpush3.bf16.msra.mxu1 %v3590_v50  ;;  %v4193_v50 = vld [vmem:[%s3926_s3 + $0x14] sm:$0xff]   ;;  %v620_v54 = vsel %vm611_vm4, %v617_v60, %v619_v34  ;;  %v1800_v48 = vshll.u32 %v4257_v39, 16 }
  0x90   : > { %3157 = vmatprep.subr.bf16.mxu1 %v3595_v45  ;;  %3244 = vmatmul.mubr.msk.bf16.gmra.mrb[12].mxu0 %vm339_vm1, %v1297_v32  ;;  %v1106_v32 = vshll.u32 %v4086_v22, 16  ;;  %v1756_v41 = vshrl.u32 %v4193_v50, 16  ;;  %v1770_v27 = vrot.slane %v1768_v14, 1 }
  0x91   : > { %3255 = vmatprep.mubr.msk.bf16.mxu0 %vm339_vm1, %v3589_v47  ;;  %v3601_v47 = vld [vmem:[%s3926_s3 + $0x34] sm:$0xff]  }
  0x92   : > { %v1108_v22 = vrot.slane %v1106_v32, 3  ;;  %v3615_v32 = vld [vmem:[#allocation5 + $0x108] sm:$0xff]  }
  0x93   : > { %3158 = vmatpush3.bf16.msra.mxu1 %v3595_v45 }
  0x94   : > { %3175 = vmatprep.subr.bf16.mxu1 %v4140_v49  ;;  %v4196_v45 = vor.u32 %v1108_v22, %v1105_v38  ;;  %v3618_v22 = vld [vmem:[#allocation5 + $0x110] sm:$0xff]  }
  0x96   : > { %3144 = vmatmul.mubr.msk.bf16.gmra.mrb[8].mxu1 %vm339_vm1, %v4022_v21 }
  0x97   : > { %3147 = vmatprep.mubr.msk.bf16.mxu1 %vm339_vm1, %v4032_v30  ;;  %v1776_v30 = vshll.u32 %v4235_v23, 16 }
  0x98   : > { %3256 = vmatmul.mubr.msk.bf16.vlgmr.msra.gmra.mrb[0].mxu0 %vm339_vm1, %v3591_v53  ;;  %v621_v53 = vrot.slane %v4022_v21, 1 }
  0x99   : > { %3272 = vmatpush3.bf16.msra.mxu0 %v3592_v35  ;;  %3259 = vmatprep.mubr.msk.bf16.mxu0 %vm339_vm1, %v3593_v55  ;;  %v1099_v35 = vrot.slane %v1097_v28, 3  ;;  %v3609_v55 = vld [vmem:[#allocation5 + $0x70] sm:$0xff]   ;;  %v4240_v28 = vld [vmem:[%s3926_s3 + $0x34] sm:$0xff]  }
  0x9a   : > { %3273 = vmatprep.subr.bf16.mxu0 %v3597_v58  ;;  %v622_v21 = vsel %vm611_vm4, %v619_v34, %v621_v53 }
  0x9b   : > { %v1100_v43 = vor.u32 %v1099_v35, %v1096_v20  ;;  %v1784_v20 = vshll.u32 %v4240_v28, 16  ;;  %v1778_v35 = vrot.slane %v1776_v30, 1 }
  0x9d   : > { %3274 = vmatpush3.bf16.msra.mxu0 %v3597_v58  ;;  %v4203_v51 = vsel %vm1039_vm2, %v1091_v19, %v1100_v43  ;;  %v4209_v56 = vsel %vm1039_vm2, %v1100_v43, %v4196_v45  ;;  %v1752_v58 = vshll.u32 %v4193_v50, 16  ;;  %v1772_v19 = vshrl.u32 %v4220_v63, 16 }
  0x9e   : > { %3148 = vmatmul.mubr.msk.bf16.gmra.mrb[12].mxu1 %vm339_vm1, %v2837_v9  ;;  %3275 = vmatprep.subr.bf16.mxu0 %v3602_v11  ;;  %v4215_v9 = vld [vmem:[%s3926_s3 + $0x1c] sm:$0xff]   ;;  %v1786_v38 = vrot.slane %v1784_v20, 1 }
  0x9f   : > { %3159 = vmatprep.mubr.msk.bf16.mxu1 %vm339_vm1, %v614_v61  ;;  %v1754_v62 = vrot.slane %v1752_v58, 1  ;;  %v1760_v4 = vshll.u32 %v4215_v9, 16 }
  0xa0   : > { %3260 = vmatmul.mubr.msk.bf16.gmra.mrb[4].mxu0 %vm339_vm1, %v3596_v12  ;;  %v1764_v12 = vshrl.u32 %v4215_v9, 16 }
  0xa1   : > { %3263 = vmatprep.mubr.msk.bf16.mxu0 %vm339_vm1, %v3599_v17  ;;  %3276 = vmatpush3.bf16.msra.mxu0 %v3602_v11  ;;  %v3605_v11 = vld [vmem:[%s3926_s3 + $0x44] ss:$0 sps:$4 sm:$0xff]   ;;  %v624_v17 = vsel %vm611_vm4, %v621_v53, %v623_v25  ;;  %v1762_v60 = vrot.slane %v1760_v4, 1 }
  0xa2   : > { %3277 = vmatprep.subr.bf16.mxu0 %v3606_v2  ;;  %v3620_v53 = vld [vmem:[#allocation5 + $0x118] sm:$0xff]  }
  0xa5   : > { %3278 = vmatpush3.bf16.msra.mxu0 %v3606_v2  ;;  %v1758_v2 = vor.u32 %v1756_v41, %v1754_v62 }
  0xa6   : > { %3160 = vmatmul.mubr.msk.bf16.vlgmr.msra.gmra.mrb[0].mxu1 %vm339_vm1, %v616_v46  ;;  %3295 = vmatprep.subr.bf16.mxu0 %v3611_v40  ;;  %v1780_v46 = vshrl.u32 %v4235_v23, 16 }
  0xa7   : > { %3176 = vmatpush3.bf16.msra.mxu1 %v4140_v49  ;;  %3163 = vmatprep.mubr.msk.bf16.mxu1 %vm339_vm1, %v618_v37  ;;  %v1745_v49 = vshrl.u32 %v2929_v24, 16  ;;  %v1766_v24 = vor.u32 %v1764_v12, %v1762_v60  ;;  %v1763_v25 = vsel %vm251_vm0, %v1758_v2, %v1762_v60  ;;  %v4253_v37 = vld [vmem:[%s3926_s3 + $0x3c] sm:$0xff]  }
  0xa8   : > { %3177 = vmatprep.subr.bf16.mxu1 %v3604_v33  ;;  %3264 = vmatmul.mubr.msk.bf16.gmra.mrb[8].mxu0 %vm339_vm1, %v3601_v47  ;;  %v1792_v43 = vshll.u32 %v4253_v37, 16  ;;  %v1788_v47 = vshrl.u32 %v4240_v28, 16 }
  0xa9   : > { %3267 = vmatprep.mubr.msk.bf16.mxu0 %vm339_vm1, %v3603_v52  ;;  %v1750_v61 = vor.u32 %v1749_v57, %v1745_v49  ;;  %v1771_v31 = vsel %vm251_vm0, %v1766_v24, %v1770_v27  ;;  %v1796_v52 = vshrl.u32 %v4253_v37, 16  ;;  %v1802_v49 = vrot.slane %v1800_v48, 1  ;;  %v1966_v57 = vld [vmem:[%s3926_s3 + $0xc] sm:$0xe] }
  0xab   : > { %3178 = vmatpush3.bf16.msra.mxu1 %v3604_v33  ;;  %v1755_v8 = vsel %vm251_vm0, %v1750_v61, %v1754_v62  ;;  %v1782_v33 = vor.u32 %v1780_v46, %v1778_v35  ;;  %v1992_v61 = vrot.slane %v4257_v39, 1  ;;  %v2153_v62 = vlaneseq }
  0xac   : > { %3179 = vmatprep.subr.bf16.mxu1 %v3609_v55 }
  0xad   : > { %v1787_v34 = vsel %vm251_vm0, %v1782_v33, %v1786_v38 }
  0xae   : > { %3164 = vmatmul.mubr.msk.bf16.gmra.mrb[4].mxu1 %vm339_vm1, %v620_v54 }
  0xaf   : > { %3167 = vmatprep.mubr.msk.bf16.mxu1 %vm339_vm1, %v622_v21  ;;  %3180 = vmatpush3.bf16.msra.mxu1 %v3609_v55  ;;  %v2949_v21 = vcombine.low %v1966_v57, %v4166_v6  ;;  %v1982_v6 = vrot.slane %v4215_v9, 1  ;;  %v1990_v9 = vrot.slane %v4253_v37, 1 }
  0xb0   : > { %3181 = vmatprep.subr.bf16.mxu1 %v3613_v59  ;;  %3268 = vmatmul.mubr.msk.bf16.gmra.mrb[12].mxu0 %vm339_vm1, %v3605_v11 }
  0xb1   : > { %3279 = vmatprep.mubr.msk.bf16.mxu0 %vm339_vm1, %v1755_v8 }
  0xb3   : > { %3182 = vmatpush3.bf16.msra.mxu1 %v3613_v59  ;;  %v1804_v59 = vshrl.u32 %v4257_v39, 16 }
  0xb4   : > { %3319 = vmatprep.subr.bf16.mxu1 %v3936_v1 }
  0xb6   : > { %3168 = vmatmul.mubr.msk.bf16.gmra.mrb[8].mxu1 %vm339_vm1, %v624_v17 }
  0xb7   : > { %3171 = vmatprep.mubr.msk.bf16.mxu1 %vm339_vm1, %v4099_v29  ;;  %v1774_v29 = vor.u32 %v1772_v19, %v1770_v27 }
  0xb8   : > { %3280 = vmatmul.mubr.msk.bf16.vlgmr.msra.gmra.mrb[0].mxu0 %vm339_vm1, %v1763_v25 }
  0xb9   : > { %3296 = vmatpush3.bf16.msra.mxu0 %v3611_v40  ;;  %3283 = vmatprep.mubr.msk.bf16.mxu0 %vm339_vm1, %v1771_v31  ;;  %v1779_v40 = vsel %vm251_vm0, %v1774_v29, %v1778_v35 }
  0xba   : > { %3297 = vmatprep.subr.bf16.mxu0 %v3615_v32 }
  0xbd   : > { %3298 = vmatpush3.bf16.msra.mxu0 %v3615_v32 }
  0xbe   : > { %3172 = vmatmul.mubr.msk.bf16.gmra.mrb[12].mxu1 %vm339_vm1, %v625_v26  ;;  %3299 = vmatprep.subr.bf16.mxu0 %v3618_v22  ;;  %v1794_v26 = vrot.slane %v1792_v43, 1 }
  0xbf   : > { %3183 = vmatprep.mubr.msk.bf16.mxu1 %vm339_vm1, %v4106_v36  ;;  %v1790_v36 = vor.u32 %v1788_v47, %v1786_v38 }
  0xc0   : > { %3284 = vmatmul.mubr.msk.bf16.gmra.mrb[4].mxu0 %vm339_vm1, %v1779_v40  ;;  %v1798_v55 = vor.u32 %v1796_v52, %v1794_v26 }
  0xc1   : > { %3287 = vmatprep.mubr.msk.bf16.mxu0 %vm339_vm1, %v1787_v34  ;;  %3300 = vmatpush3.bf16.msra.mxu0 %v3618_v22  ;;  %v1795_v58 = vsel %vm251_vm0, %v1790_v36, %v1794_v26 }
  0xc2   : > { %3301 = vmatprep.subr.bf16.mxu0 %v3620_v53  ;;  %v1803_v54 = vsel %vm251_vm0, %v1798_v55, %v1802_v49 }
  0xc5   : > { %3302 = vmatpush3.bf16.msra.mxu0 %v3620_v53 }
  0xc6   : > { %3184 = vmatmul.mubr.msk.bf16.vlgmr.msra.gmra.mrb[0].mxu1 %vm339_vm1, %v4112_v13  ;;  %v1980_v13 = vrot.slane %v4193_v50, 1  ;;  %v1988_v50 = vrot.slane %v4240_v28, 1 }
  0xc7   : > { %3323 = vmatpush3.bf16.msra.mxu1 %v3936_v1  ;;  %3187 = vmatprep.mubr.msk.bf16.mxu1 %vm339_vm1, %v4117_v18  ;;  %v1979_v1 = vrot.slane %v2949_v21, 1  ;;  %v1806_v18 = vor.u32 %v1804_v59, %v1802_v49 }
  0xc8   : > { %3320 = vmatprep.subr.bf16.mxu1 %v3939_v3  ;;  %3288 = vmatmul.mubr.msk.bf16.gmra.mrb[8].mxu0 %vm339_vm1, %v1795_v58 }
  0xc9   : > { %3291 = vmatprep.mubr.msk.bf16.mxu0 %vm339_vm1, %v1803_v54 }
  0xcb   : > { %3324 = vmatpush3.bf16.msra.mxu1 %v3939_v3  ;;  %v1981_v3 = vsel %vm611_vm4, %v1979_v1, %v1980_v13 }
  0xcc   : > { %3321 = vmatprep.subr.bf16.mxu1 %v3943_v5 }
  0xce   : > { %3188 = vmatmul.mubr.msk.bf16.gmra.mrb[4].mxu1 %vm339_vm1, %v4124_v42  ;;  %v1984_v42 = vrot.slane %v4220_v63, 1  ;;  %v4331_v63 = vshrl.u32 %v2153_v62, 7 }
  0xcf   : > { %3191 = vmatprep.mubr.msk.bf16.mxu1 %vm339_vm1, %v4128_v44  ;;  %3325 = vmatpush3.bf16.msra.mxu1 %v3943_v5  ;;  %v1983_v5 = vsel %vm611_vm4, %v1980_v13, %v1982_v6 }
  0xd0   : > { %3322 = vmatprep.subr.bf16.mxu1 %v3945_v7  ;;  %3292 = vmatmul.mubr.msk.bf16.gmra.mrb[12].mxu0 %vm339_vm1, %v1806_v18  ;;  %v1985_v44 = vsel %vm611_vm4, %v1982_v6, %v1984_v42  ;;  %v2155_v41 = vadd.s32 8, %v4331_v63  ;;  %v4340_v8 = vmul.u32.u64.low 2863311531, %v4331_v63  ;;  %v4341_v12 = vmul.u32.u64.high 2863311531, %v4331_v63, %v4340_v8 }
  0xd1   : > { %3303 = vmatprep.mubr.msk.bf16.mxu0 %vm339_vm1, %v1981_v3  ;;  %v4354_v24 = vadd.s32 48, %v4331_v63  ;;  %v4362_v25 = vadd.s32 56, %v4331_v63  ;;  %v4366_v31 = vadd.s32 40, %v4331_v63  ;;  %v4373_v35 = vadd.s32 80, %v4331_v63 }
  0xd2   : > { %v4346_v17 = vmul.u32.u64.low 2863311531, %v2155_v41  ;;  %v4347_v60 = vmul.u32.u64.high 2863311531, %v2155_v41, %v4346_v17  ;;  %v2175_v30 = vshrl.u32 %v4341_v12, 3  ;;  %v4377_v29 = vadd.s32 64, %v4331_v63 }
  0xd3   : > { %3326 = vmatpush3.bf16.msra.mxu1 %v3945_v7  ;;  %v1986_v7 = vrot.slane %v4235_v23, 1  ;;  %v4350_v23 = vadd.s32 32, %v4331_v63  ;;  %v4369_v46 = vmul.u32.u64.low 2863311531, %v4354_v24  ;;  %v4370_v20 = vmul.u32.u64.high 2863311531, %v4354_v24, %v4369_v46 }
  0xd4   : > { %v2186_v37 = vshrl.u32 %v4347_v60, 3  ;;  %v2176_v33 = vmul.u32 12, %v2175_v30  ;;  %v4380_v38 = vmul.u32.u64.low 2863311531, %v4362_v25  ;;  %v4381_v22 = vmul.u32.u64.high 2863311531, %v4362_v25, %v4380_v38 }
  0xd5   : > { %v4357_v27 = vmul.u32.u64.low 2863311531, %v4350_v23  ;;  %v4358_v28 = vmul.u32.u64.high 2863311531, %v4350_v23, %v4357_v27  ;;  %v4384_v39 = vadd.s32 88, %v4331_v63  ;;  %v4391_v34 = vadd.s32 72, %v4331_v63 }
  0xd6   : > { %3192 = vmatmul.mubr.msk.bf16.gmra.mrb[8].mxu1 %vm339_vm1, %v4132_v0  ;;  %v1987_v0 = vsel %vm611_vm4, %v1984_v42, %v1986_v7  ;;  %v4387_v40 = vmul.u32.u64.low 2863311531, %v4366_v31  ;;  %v4388_v47 = vmul.u32.u64.high 2863311531, %v4366_v31, %v4387_v40  ;;  %v2187_v26 = vmul.u32 12, %v2186_v37 }
  0xd7   : > { %3195 = vmatprep.mubr.msk.bf16.mxu1 %vm339_vm1, %v4178_v10  ;;  %v1989_v10 = vsel %vm611_vm4, %v1986_v7, %v1988_v50  ;;  %v4396_v48 = vmul.u32.u64.low 2863311531, %v4373_v35  ;;  %v4397_v53 = vmul.u32.u64.high 2863311531, %v4373_v35, %v4396_v48  ;;  %v2219_v36 = vshrl.u32 %v4358_v28, 3 }
  0xd8   : > { %3304 = vmatmul.mubr.msk.bf16.vlgmr.msra.gmra.mrb[0].mxu0 %vm339_vm1, %v1983_v5  ;;  %v4401_v55 = vmul.u32.u64.low 2863311531, %v4377_v29  ;;  %v4402_v49 = vmul.u32.u64.high 2863311531, %v4377_v29, %v4401_v55  ;;  %v4405_v57 = vsub.s32 %v4331_v63, %v2176_v33  ;;  %v2241_v3 = vshrl.u32 %v4370_v20, 3 }
  0xd9   : > { %3307 = vmatprep.mubr.msk.bf16.mxu0 %vm339_vm1, %v1985_v44  ;;  %v4408_v58 = vmul.u32.u64.low 2863311531, %v4384_v39  ;;  %v4409_v54 = vmul.u32.u64.high 2863311531, %v4384_v39, %v4408_v58  ;;  %v4416_v1 = vmul.u32.u64.low 2863311531, %v4391_v34  ;;  %v4417_v13 = vmul.u32.u64.high 2863311531, %v4391_v34, %v4416_v1 }
  0xda   : > { %v4427_v5 = vsub.s32 %v2155_v41, %v2187_v26  ;;  %v2220_v44 = vmul.u32 12, %v2219_v36  ;;  %vm2334_vm8 = vcmp.ne.s32.totalorder %v4405_v57, 0  ;;  %vm2349_vm9 = vcmp.lt.s32.totalorder %v4405_v57, 0 }
  0xdb   : > { %v2285_v62 = vshrl.u32 %v4397_v53, 3  ;;  %vm4468_vm15 = vmand %vm2349_vm9, %vm2334_vm8  ;;  %v2296_v8 = vshrl.u32 %v4409_v54, 3 }
  0xdc   : > { %vm2335_vm13 = vcmp.ne.s32.totalorder %v4427_v5, 0  ;;  %vm2350_vm14 = vcmp.lt.s32.totalorder %v4427_v5, 0  ;;  %v2380_v30 = vadd.s32 12, %v4427_v5 }
  0xdd   : > { %vm4505_vm2 = vmand %vm2350_vm14, %vm2335_vm13  ;;  %v2297_v40 = vmul.u32 12, %v2296_v8 }
  0xde   : > { %3196 = vmatmul.mubr.msk.bf16.gmra.mrb[12].mxu1 %vm339_vm1, %v4171_v15  ;;  %v1991_v15 = vsel %vm611_vm4, %v1988_v50, %v1990_v9  ;;  %v2252_v50 = vshrl.u32 %v4381_v22, 3  ;;  %v2395_v48 = vsel %vm4505_vm2, %v2380_v30, %v4427_v5 }
  0xdf   : > { %3215 = vmatprep.mubr.msk.bf16.mxu1 %vm339_vm1, %v4190_v16  ;;  %v1993_v16 = vsel %vm611_vm4, %v1990_v9, %v1992_v61  ;;  %v2230_v9 = vshrl.u32 %v4388_v47, 3 }
  0xe0   : > { %3308 = vmatmul.mubr.msk.bf16.gmra.mrb[4].mxu0 %vm339_vm1, %v1987_v0  ;;  %v4435_v0 = vadd.s32 112, %v4331_v63  ;;  %v2253_v41 = vmul.u32 12, %v2252_v50 }
  0xe1   : > { %3311 = vmatprep.mubr.msk.bf16.mxu0 %vm339_vm1, %v1989_v10  ;;  %v4438_v10 = vadd.s32 12, %v4405_v57  ;;  %v2231_v60 = vmul.u32 12, %v2230_v9 }
  0xe3   : > { %v4525_v47 = vsub.s32 %v4366_v31, %v2231_v60 }
  0xe6   : > { %3216 = vmatmul.mubr.msk.bf16.vlgmr.msra.gmra.mrb[8].mxu1 %vm339_vm1, %v4203_v51  ;;  %v2156_v51 = vadd.s32 16, %v4331_v63 }
  0xe7   : > { %3219 = vmatprep.mubr.msk.bf16.mxu1 %vm339_vm1, %v4209_v56  ;;  %v2157_v56 = vadd.s32 24, %v4331_v63 }
  0xe8   : > { %3312 = vmatmul.mubr.msk.bf16.gmra.mrb[8].mxu0 %vm339_vm1, %v1991_v15  ;;  %v4335_v11 = vmul.u32.u64.low 2863311531, %v2156_v51  ;;  %v4336_v4 = vmul.u32.u64.high 2863311531, %v2156_v51, %v4335_v11 }
  0xe9   : > { %3315 = vmatprep.mubr.msk.bf16.mxu0 %vm339_vm1, %v1993_v16  ;;  %v2242_v16 = vmul.u32 12, %v2241_v3  ;;  %v2263_v11 = vshrl.u32 %v4402_v49, 3  ;;  %v2384_v3 = vadd.s32 12, %v4525_v47 }
  0xea   : > { %v2197_v2 = vshrl.u32 %v4336_v4, 3 }
  0xeb   : > { %v2264_v33 = vmul.u32 12, %v2263_v11 }
  0xec   : > { %v2198_v32 = vmul.u32 12, %v2197_v2 }
  0xed   : > { %v4545_v55 = vsub.s32 %v4377_v29, %v2264_v33 }
  0xee   : > { %3220 = vmatmul.mubr.msk.bf16.gmra.mrb[12].mxu1 %vm339_vm1, %v4196_v45  ;;  %v4343_v14 = vmul.u32.u64.low 2863311531, %v2157_v56  ;;  %v4344_v45 = vmul.u32.u64.high 2863311531, %v2157_v56, %v4343_v14  ;;  %v4393_v52 = vsub.s32 %v2156_v51, %v2198_v32  ;;  %v2286_v32 = vmul.u32 12, %v2285_v62 }
  0xef   : > { %v4474_v12 = vmul.u32.u64.low 2863311531, %v4435_v0  ;;  %v4475_v14 = vmul.u32.u64.high 2863311531, %v4435_v0, %v4474_v12  ;;  %vm2342_vm2 = vcmp.ne.s32.totalorder %v4545_v55, 0  ;;  %v4626_v4 = vadd.s32 12, %v4545_v55 }
  0xf0   : > { %3316 = vmatmul.mubr.msk.bf16.gmra.mrb[12].mxu0 %vm339_vm1, %v1992_v61  ;;  %v2208_v19 = vshrl.u32 %v4344_v45, 3  ;;  %vm2336_vm6 = vcmp.ne.s32.totalorder %v4393_v52, 0  ;;  %vm2351_vm7 = vcmp.lt.s32.totalorder %v4393_v52, 0  ;;  %v2381_v42 = vadd.s32 12, %v4393_v52 }
  0xf1   : > { %v4443_v61 = vadd.s32 96, %v4331_v63  ;;  %vm4454_vm12 = vmand %vm2351_vm7, %vm2336_vm6  ;;  %v4532_v53 = vsub.s32 %v4373_v35, %v2286_v32  ;;  %v2329_v35 = vshrl.u32 %v4475_v14, 3 }
  0xf2   : > { %v2209_v43 = vmul.u32 12, %v2208_v19  ;;  %v4494_v19 = vsub.s32 %v4354_v24, %v2242_v16  ;;  %v2396_v20 = vsel %vm4454_vm12, %v2381_v42, %v4393_v52  ;;  %v2394_v24 = vsel %vm4468_vm15, %v4438_v10, %v4405_v57 }
  0xf3   : > { %v4487_v2 = vmul.u32.u64.low 2863311531, %v4443_v61  ;;  %v4488_v27 = vmul.u32.u64.high 2863311531, %v4443_v61, %v4487_v2  ;;  %vm4537_vm6 = vcmp.lt.s32.totalorder %v2396_v20, 10  ;;  %vm2354_vm12 = vcmp.lt.s32.totalorder %v4525_v47, 0 }
  0xf4   : > { %v4413_v59 = vsub.s32 %v2157_v56, %v2209_v43  ;;  %v4461_v56 = vsub.s32 %v4350_v23, %v2220_v44  ;;  %v2274_v23 = vshrl.u32 %v4417_v13, 3  ;;  %v4520_v43 = vsub.s32 %v4362_v25, %v2253_v41 }
  0xf5   : > { %vm2340_vm5 = vcmp.ne.s32.totalorder %v4494_v19, 0  ;;  %v4535_v25 = vadd.s32 104, %v4331_v63  ;;  %vm2355_vm7 = vcmp.lt.s32.totalorder %v4494_v19, 0  ;;  %v2385_v31 = vadd.s32 12, %v4494_v19 }
  0xf6   : > { %vm2337_vm10 = vcmp.ne.s32.totalorder %v4413_v59, 0  ;;  %vm2352_vm11 = vcmp.lt.s32.totalorder %v4413_v59, 0  ;;  %v4447_v15 = vadd.s32 12, %v4413_v59  ;;  %vm2338_vm3 = vcmp.ne.s32.totalorder %v4461_v56, 0  ;;  %vm4565_vm13 = vmand %vm2355_vm7, %vm2340_vm5 }
  0xf7   : > { %vm4481_vm0 = vmand %vm2352_vm11, %vm2337_vm10  ;;  %vm2353_vm4 = vcmp.lt.s32.totalorder %v4461_v56, 0  ;;  %v2275_v52 = vmul.u32 12, %v2274_v23  ;;  %v2383_v36 = vadd.s32 12, %v4461_v56  ;;  %vm2341_vm9 = vcmp.ne.s32.totalorder %v4520_v43, 0 }
  0xf8   : > { %v2397_v22 = vsel %vm4481_vm0, %v4447_v15, %v4413_v59  ;;  %vm4547_vm8 = vmand %vm2353_vm4, %vm2338_vm3  ;;  %vm2356_vm10 = vcmp.lt.s32.totalorder %v4520_v43, 0  ;;  %v4554_v63 = vsub.s32 %v4384_v39, %v2297_v40  ;;  %vm2339_vm11 = vcmp.ne.s32.totalorder %v4525_v47, 0 }
  0xf9   : > { %v4560_v29 = vsub.s32 %v4391_v34, %v2275_v52  ;;  %v2307_v57 = vshrl.u32 %v4488_v27, 3  ;;  %vm2344_vm14 = vcmp.ne.s32.totalorder %v4532_v53, 0  ;;  %vm2359_vm15 = vcmp.lt.s32.totalorder %v4532_v53, 0  ;;  %vm4578_vm0 = vmand %vm2356_vm10, %vm2341_vm9 }
  0xfa   : > { %v4572_v39 = vmul.u32.u64.low 2863311531, %v4535_v25  ;;  %v4573_v54 = vmul.u32.u64.high 2863311531, %v4535_v25, %v4572_v39  ;;  %v2398_v34 = vsel %vm4547_vm8, %v2383_v36, %v4461_v56  ;;  %v2386_v1 = vadd.s32 12, %v4520_v43  ;;  %vm4585_vm4 = vmand %vm2354_vm12, %vm2339_vm11 }
  0xfb   : > { %vm2357_vm3 = vcmp.lt.s32.totalorder %v4545_v55, 0  ;;  %vm2345_vm5 = vcmp.ne.s32.totalorder %v4554_v63, 0  ;;  %vm2360_vm7 = vcmp.lt.s32.totalorder %v4554_v63, 0  ;;  %v2330_v42 = vmul.u32 12, %v2329_v35  ;;  %vm4592_vm8 = vmand %vm2359_vm15, %vm2344_vm14 }
  0xfc   : > { %v2389_v44 = vadd.s32 12, %v4532_v53  ;;  %vm2343_vm9 = vcmp.ne.s32.totalorder %v4560_v29, 0  ;;  %vm2358_vm10 = vcmp.lt.s32.totalorder %v4560_v29, 0  ;;  %v2308_v50 = vmul.u32 12, %v2307_v57  ;;  %vm4618_vm15 = vmand %vm2357_vm3, %vm2342_vm2 }
  0xfd   : > { %vm4599_vm11 = vcmp.lt.s32.totalorder %v2394_v24, 10  ;;  %vm4603_vm12 = vcmp.lt.s32.totalorder %v2397_v22, 10  ;;  %vm4607_vm14 = vcmp.lt.s32.totalorder %v2395_v48, 10  ;;  %v2400_v62 = vsel %vm4565_vm13, %v2385_v31, %v4494_v19  ;;  %vm4632_vm13 = vmand %vm2360_vm7, %vm2345_vm5 }
  0xfe   : > { %v4637_v8 = vadd.s32 12, %v4554_v63  ;;  %v4640_v12 = vadd.s32 12, %v4560_v29  ;;  %vm4645_vm2 = vcmp.lt.s32.totalorder %v2398_v34, 10  ;;  %v2401_v60 = vsel %vm4578_vm0, %v2386_v1, %v4520_v43  ;;  %vm4656_vm3 = vmand %vm2358_vm10, %vm2343_vm9 }
  0xff   : > { %v2399_v30 = vsel %vm4585_vm4, %v2384_v3, %v4525_v47  ;;  %v2404_v19 = vsel %vm4592_vm8, %v2389_v44, %v4532_v53  ;;  %v4673_v32 = vsub.s32 %v4443_v61, %v2308_v50  ;;  %vm4684_vm0 = vcmp.lt.s32.totalorder %v2400_v62, 10 }
 0x100   : > { %v2318_v33 = vshrl.u32 %v4573_v54, 3  ;;  %vm4689_vm4 = vcmp.lt.s32.totalorder %v2401_v60, 10  ;;  %v2402_v22 = vsel %vm4618_vm15, %v4626_v4, %v4545_v55  ;;  %v2403_v43 = vsel %vm4656_vm3, %v4640_v12, %v4560_v29 }
 0x101   : > { %vm2346_vm8 = vcmp.ne.s32.totalorder %v4673_v32, 0  ;;  %vm4729_vm9 = vcmp.lt.s32.totalorder %v2404_v19, 10  ;;  %vm2361_vm10 = vcmp.lt.s32.totalorder %v4673_v32, 0 }
 0x199   : > { %v4411_v21 = vpop.f32.mrb[0].mxu1 }
 0x19a   : > { %v4419_v18 = vpop.f32.mrb[1].mxu1 }
 0x19b   : > { %v4423_v6 = vpop.f32.mrb[2].mxu1 }
 0x19c   : > { %v4429_v7 = vpop.f32.mrb[3].mxu1 }
 0x1a1   : > { %v4477_v45 = vpop.f32.mrb[4].mxu1 }
 0x1a2   : > { %v4490_v28 = vpop.f32.mrb[5].mxu1 }
 0x1a3   : > { %v4496_v46 = vpop.f32.mrb[6].mxu1 }
 0x1a4   : > { %v4509_v38 = vpop.f32.mrb[7].mxu1 }
 0x1ab   : > { %v3305_v10 = vpop.f32.mrb[0].mxu0 }
 0x1ac   : > { %v4623_v56 = vadd.f32 %v3305_v10, %v4411_v21  ;;  %v2076_v11 = vpop.f32.mrb[1].mxu0 }
 0x1ad   : > { %v4643_v21 = vadd.f32 %v2076_v11, %v4419_v18  ;;  %v3306_v14 = vpop.f32.mrb[2].mxu0  ;;  %v4661_v18 = vsub.s32 %v4435_v0, %v2330_v42 }
 0x1ae   : > { %v4664_v2 = vadd.f32 %v3306_v14, %v4423_v6  ;;  %v2079_v27 = vpop.f32.mrb[3].mxu0  ;;  %v2486_v0 = vsel %vm4537_vm6, %v4623_v56, 0.0  ;;  %vm4711_vm6 = vcmp.lt.s32.totalorder %v2399_v30, 10 }
 0x1af   : > { %v2484_v6 = vsel %vm4599_vm11, %v4643_v21, 0.0  ;;  %v4682_v20 = vadd.f32 %v2079_v27, %v4429_v7  ;;  %v2405_v7 = vsel %vm4632_vm13, %v4637_v8, %v4554_v63  ;;  %vm2348_vm5 = vcmp.ne.s32.totalorder %v4661_v18, 0 }
 0x1b0   : > { %v2535_v24 = vmul.f32 %v2484_v6, %v2484_v6  ;;  %v2487_v40 = vsel %vm4603_vm12, %v4664_v2, 0.0  ;;  %vm2363_vm7 = vcmp.lt.s32.totalorder %v4661_v18, 0  ;;  %v2537_v48 = vmul.f32 %v2486_v0, %v2486_v0  ;;  %vm4763_vm12 = vmand %vm2361_vm10, %vm2346_vm8 }
 0x1b1   : > { %v2485_v47 = vsel %vm4607_vm14, %v4682_v20, 0.0  ;;  %v2499_v53 = vsel %vm339_vm1, %v2484_v6, 0.0  ;;  %v2502_v36 = vsel %vm339_vm1, %v2486_v0, 0.0  ;;  %v2319_v63 = vmul.u32 12, %v2318_v33  ;;  %vm4750_vm11 = vmand %vm2363_vm7, %vm2348_vm5 }
 0x1b2   : > { %v2500_v26 = vsel %vm339_vm1, %v2485_v47, 0.0  ;;  %v2536_v31 = vmul.f32 %v2485_v47, %v2485_v47  ;;  %v2550_v35 = vsel %vm339_vm1, %v2535_v24, 0.0  ;;  %v2538_v29 = vmul.f32 %v2487_v40, %v2487_v40 }
 0x1b3   : > { %v2501_v55 = vadd.f32 %v2500_v26, %v2499_v53  ;;  %v3309_v49 = vpop.f32.mrb[4].mxu0  ;;  %v2553_v3 = vsel %vm339_vm1, %v2537_v48, 0.0  ;;  %v4739_v44 = vadd.s32 12, %v4661_v18  ;;  %v2504_v50 = vsel %vm339_vm1, %v2487_v40, 0.0 }
 0x1b4   : > { %v2551_v57 = vsel %vm339_vm1, %v2536_v31, 0.0  ;;  %v4724_v58 = vadd.f32 %v3309_v49, %v4477_v45  ;;  %v2092_v39 = vpop.f32.mrb[5].mxu0  ;;  %v4755_v16 = vsub.s32 %v4535_v25, %v2319_v63  ;;  %v2555_v62 = vsel %vm339_vm1, %v2538_v29, 0.0 }
 0x1b5   : > { %v2503_v54 = vadd.f32 %v2502_v36, %v2501_v55  ;;  %v2552_v34 = vadd.f32 %v2551_v57, %v2550_v35  ;;  %v4727_v59 = vadd.f32 %v2092_v39, %v4490_v28  ;;  %v3310_v1 = vpop.f32.mrb[6].mxu0  ;;  %v2391_v28 = vadd.s32 12, %v4673_v32 }
 0x1b6   : > { %v4736_v42 = vadd.f32 %v3310_v1, %v4496_v46  ;;  %v2095_v45 = vpop.f32.mrb[7].mxu0  ;;  %vm4767_vm14 = vcmp.lt.s32.totalorder %v2402_v22, 10  ;;  %vm4771_vm15 = vcmp.lt.s32.totalorder %v2405_v7, 10  ;;  %vm4775_vm13 = vcmp.lt.s32.totalorder %v2403_v43, 10 }
 0x1b7   : > { %v2554_v10 = vadd.f32 %v2553_v3, %v2552_v34  ;;  %v2488_v9 = vsel %vm4645_vm2, %v4727_v59, 0.0  ;;  %v2505_v51 = vadd.f32 %v2504_v50, %v2503_v54  ;;  %v2490_v23 = vsel %vm4684_vm0, %v4724_v58, 0.0 }
 0x1b8   : > { %v2506_v11 = vsel %vm339_vm1, %v2488_v9, 0.0  ;;  %v2539_v4 = vmul.f32 %v2488_v9, %v2488_v9  ;;  %v4784_v19 = vadd.f32 %v2095_v45, %v4509_v38  ;;  %v2491_v6 = vsel %vm4689_vm4, %v4736_v42, 0.0 }
 0x1b9   : > { %v3217_v5 = vpop.f32.mrb[8].mxu1  ;;  %v2556_v12 = vadd.f32 %v2555_v62, %v2554_v10  ;;  %v2507_v27 = vadd.f32 %v2506_v11, %v2505_v51  ;;  %v2408_v24 = vsel %vm4750_vm11, %v4739_v44, %v4661_v18  ;;  %v2406_v37 = vsel %vm4763_vm12, %v2391_v28, %v4673_v32 }
 0x1ba   : > { %v1225_v15 = vpop.f32.mrb[9].mxu1  ;;  %v2557_v30 = vsel %vm339_vm1, %v2539_v4, 0.0  ;;  %v2489_v38 = vsel %vm4711_vm6, %v4784_v19, 0.0  ;;  %vm2347_vm2 = vcmp.ne.s32.totalorder %v4755_v16, 0  ;;  %vm2362_vm3 = vcmp.lt.s32.totalorder %v4755_v16, 0 }
 0x1bb   : > { %v3218_v41 = vpop.f32.mrb[10].mxu1  ;;  %v2558_v0 = vadd.f32 %v2557_v30, %v2556_v12  ;;  %v3313_v33 = vpop.f32.mrb[8].mxu0  ;;  %v2541_v61 = vmul.f32 %v2490_v23, %v2490_v23  ;;  %v2508_v43 = vsel %vm339_vm1, %v2489_v38, 0.0  ;;  %v2540_v40 = vmul.f32 %v2489_v38, %v2489_v38  ;;  %vm4822_vm4 = vmand %vm2362_vm3, %vm2347_vm2 }
 0x1bc   : > { %v1228_v17 = vpop.f32.mrb[11].mxu1  ;;  %v4799_v22 = vadd.f32 %v3313_v33, %v3217_v5  ;;  %v2108_v7 = vpop.f32.mrb[9].mxu0  ;;  %v2542_v48 = vmul.f32 %v2491_v6, %v2491_v6  ;;  %v2509_v32 = vadd.f32 %v2508_v43, %v2507_v27  ;;  %v2392_v31 = vadd.s32 12, %v4755_v16 }
 0x1bd   : > { %v4804_v18 = vadd.f32 %v2108_v7, %v1225_v15  ;;  %v3314_v47 = vpop.f32.mrb[10].mxu0  ;;  %v2510_v36 = vsel %vm339_vm1, %v2490_v23, 0.0  ;;  %v2559_v55 = vsel %vm339_vm1, %v2540_v40, 0.0  ;;  %vm4814_vm0 = vcmp.lt.s32.totalorder %v2406_v37, 10 }
 0x1be   : > { %v4806_v53 = vadd.f32 %v3314_v47, %v3218_v41  ;;  %v2111_v52 = vpop.f32.mrb[11].mxu0  ;;  %v2511_v57 = vadd.f32 %v2510_v36, %v2509_v32  ;;  %v2560_v39 = vadd.f32 %v2559_v55, %v2558_v0  ;;  %v2494_v54 = vsel %vm4729_vm9, %v4799_v22, 0.0 }
 0x1bf   : > { %v2492_v49 = vsel %vm4767_vm14, %v4804_v18, 0.0  ;;  %v2561_v3 = vsel %vm339_vm1, %v2541_v61, 0.0  ;;  %v2512_v45 = vsel %vm339_vm1, %v2491_v6, 0.0  ;;  %v4832_v44 = vadd.f32 %v2111_v52, %v1228_v17 }
 0x1c0   : > { %v2543_v34 = vmul.f32 %v2492_v49, %v2492_v49  ;;  %v2514_v5 = vsel %vm339_vm1, %v2492_v49, 0.0  ;;  %v2563_v50 = vsel %vm339_vm1, %v2542_v48, 0.0  ;;  %v2562_v10 = vadd.f32 %v2561_v3, %v2560_v39 }
 0x1c1   : > { %v3221_v26 = vpop.f32.mrb[12].mxu1  ;;  %v2513_v9 = vadd.f32 %v2512_v45, %v2511_v57  ;;  %v2407_v13 = vsel %vm4822_vm4, %v2392_v31, %v4755_v16  ;;  %v2545_v15 = vmul.f32 %v2494_v54, %v2494_v54  ;;  %v2495_v62 = vsel %vm4771_vm15, %v4806_v53, 0.0 }
 0x1c2   : > { %v1241_v63 = vpop.f32.mrb[13].mxu1  ;;  %v2565_v46 = vsel %vm339_vm1, %v2543_v34, 0.0  ;;  %v2493_v51 = vsel %vm4775_vm13, %v4832_v44, 0.0  ;;  %v2564_v41 = vadd.f32 %v2563_v50, %v2562_v10  ;;  %vm4848_vm6 = vcmp.lt.s32.totalorder %v2408_v24, 10 }
 0x1c3   : > { %v3222_v1 = vpop.f32.mrb[14].mxu1  ;;  %v3317_v11 = vpop.f32.mrb[12].mxu0  ;;  %v2515_v4 = vadd.f32 %v2514_v5, %v2513_v9  ;;  %v2516_v8 = vsel %vm339_vm1, %v2493_v51, 0.0  ;;  %v2544_v12 = vmul.f32 %v2493_v51, %v2493_v51  ;;  %vm2422_vm5 = vcmp.lt.s32.totalorder %v2407_v13, 10 }
 0x1c4   : > { %v1244_v28 = vpop.f32.mrb[15].mxu1  ;;  %v2124_v14 = vpop.f32.mrb[13].mxu0  ;;  %v4846_v17 = vadd.f32 %v3317_v11, %v3221_v26  ;;  %v2566_v27 = vadd.f32 %v2565_v46, %v2564_v41  ;;  %v2518_v6 = vsel %vm339_vm1, %v2494_v54, 0.0  ;;  %v2546_v33 = vmul.f32 %v2495_v62, %v2495_v62 }
 0x1c5   : > { %v4852_v23 = vadd.f32 %v2124_v14, %v1241_v63  ;;  %v3318_v25 = vpop.f32.mrb[14].mxu0  ;;  %v2517_v30 = vadd.f32 %v2516_v8, %v2515_v4  ;;  %v2567_v60 = vsel %vm339_vm1, %v2544_v12, 0.0  ;;  %v2569_v38 = vsel %vm339_vm1, %v2545_v15, 0.0 }
 0x1c6   : > { %v2127_v0 = vpop.f32.mrb[15].mxu0  ;;  %v2568_v61 = vadd.f32 %v2567_v60, %v2566_v27  ;;  %v2520_v43 = vsel %vm339_vm1, %v2495_v62, 0.0  ;;  %v2498_v52 = vsel %vm4848_vm6, %v4846_v17, 0.0  ;;  %v2571_v31 = vsel %vm339_vm1, %v2546_v33, 0.0 }
 0x1c7   : > { %v2496_v37 = vsel %vm4814_vm0, %v4852_v23, 0.0  ;;  %v4859_v24 = vadd.f32 %v2127_v0, %v1244_v28  ;;  %v2519_v7 = vadd.f32 %v2518_v6, %v2517_v30  ;;  %v2549_v29 = vmul.f32 %v2498_v52, %v2498_v52 }
 0x1c8   : > { %v2522_v40 = vsel %vm339_vm1, %v2496_v37, 0.0  ;;  %v2547_v47 = vmul.f32 %v2496_v37, %v2496_v37  ;;  %v2570_v32 = vadd.f32 %v2569_v38, %v2568_v61  ;;  %v2526_v34 = vsel %vm339_vm1, %v2498_v52, 0.0 }
 0x1c9   : > { %v2497_v48 = vsel %vm2422_vm5, %v4859_v24, 0.0  ;;  %v2521_v26 = vadd.f32 %v2520_v43, %v2519_v7  ;;  %v2577_v45 = vsel %vm339_vm1, %v2549_v29, 0.0 }
 0x1ca   : > { %v2573_v36 = vsel %vm339_vm1, %v2547_v47, 0.0  ;;  %v2524_v55 = vsel %vm339_vm1, %v2497_v48, 0.0  ;;  %v2548_v49 = vmul.f32 %v2497_v48, %v2497_v48  ;;  %v2572_v35 = vadd.f32 %v2571_v31, %v2570_v32 }
 0x1cb   : > { %v2523_v63 = vadd.f32 %v2522_v40, %v2521_v26 }
 0x1cc   : > { %v2575_v57 = vsel %vm339_vm1, %v2548_v49, 0.0  ;;  %v2574_v39 = vadd.f32 %v2573_v36, %v2572_v35  ;;  %vm2697_vm1 = vcmask 519168  }
 0x1cd   : > { %v2525_v54 = vadd.f32 %v2524_v55, %v2523_v63 }
 0x1ce   : > { %v2576_v3 = vadd.f32 %v2575_v57, %v2574_v39 }
 0x1cf   : > { %v2527_v1 = vadd.f32 %v2526_v34, %v2525_v54 }
 0x1d0   : > { %v2578_v28 = vadd.f32 %v2577_v45, %v2576_v3 }
 0x1d1   : > { %v2528_v5 = vrot.slane %v2527_v1, 4 }
 0x1d2   : > { %v2579_v10 = vrot.slane %v2578_v28, 4 }
 0x1d3   : > { %v2529_v50 = vadd.f32 %v2528_v5, %v2527_v1 }
 0x1d4   : > { %v2580_v13 = vadd.f32 %v2579_v10, %v2578_v28 }
 0x1d5   : > { %v2530_v9 = vrot.slane %v2529_v50, 2 }
 0x1d6   : > { %v2581_v46 = vrot.slane %v2580_v13, 2 }
 0x1d7   : > { %v2531_v15 = vadd.f32 %v2530_v9, %v2529_v50 }
 0x1d8   : > { %v2582_v51 = vadd.f32 %v2581_v46, %v2580_v13 }
 0x1d9   : > { %v2532_v62 = vrot.slane %v2531_v15, 1 }
 0x1da   : > { %v2583_v4 = vrot.slane %v2582_v51, 1 }
 0x1db   : > { %v2533_v11 = vadd.f32 %v2532_v62, %v2531_v15 }
 0x1dc   : > { %v2584_v8 = vadd.f32 %v2583_v4, %v2582_v51 }
 0x1dd   : > { %v2534_v41 = vmul.f32 0.01, %v2533_v11 }
 0x1de   : > { %v2585_v12 = vmul.f32 0.01, %v2584_v8 }
 0x1df   : > { %v2586_v14 = vmul.f32 %v2534_v41, %v2534_v41  ;;  %v2602_v16 = vsub.f32 %v4859_v24, %v2534_v41  ;;  %v2589_v25 = vsub.f32 %v4643_v21, %v2534_v41  ;;  %v2590_v27 = vsub.f32 %v4682_v20, %v2534_v41 }
 0x1e0   : > { %v2591_v30 = vsub.f32 %v4623_v56, %v2534_v41  ;;  %v2592_v60 = vsub.f32 %v4664_v2, %v2534_v41  ;;  %v2593_v0 = vsub.f32 %v4727_v59, %v2534_v41  ;;  %v2594_v33 = vsub.f32 %v4784_v19, %v2534_v41 }
 0x1e1   : > { %v2587_v6 = vsub.f32 %v2585_v12, %v2586_v14  ;;  %v2595_v37 = vsub.f32 %v4724_v58, %v2534_v41  ;;  %v2596_v38 = vsub.f32 %v4736_v42, %v2534_v41  ;;  %v2597_v24 = vsub.f32 %v4804_v18, %v2534_v41 }
 0x1e2   : > { %v2598_v21 = vsub.f32 %v4832_v44, %v2534_v41  ;;  %v2599_v20 = vsub.f32 %v4799_v22, %v2534_v41  ;;  %v2600_v56 = vsub.f32 %v4806_v53, %v2534_v41  ;;  %v2601_v2 = vsub.f32 %v4852_v23, %v2534_v41 }
 0x1e3   : > { %v2588_v7 = vmax.f32 %v2587_v6, 0.0  ;;  %v2603_v59 = vsub.f32 %v4846_v17, %v2534_v41 }
 0x1e5   : > { %v2604_v61 = vadd.f32 1e-05, %v2588_v7 }
 0x1e7   : > { %3623 = vrsqrt.f32 %v2604_v61 }
 0x1f1   : > { %v3624_v19 = vpop.eup %3623 }
 0x1f2   : > { %v2619_v58 = vmul.f32 %v3624_v19, %v2602_v16  ;;  %v2606_v42 = vmul.f32 %v3624_v19, %v2589_v25  ;;  %v2607_v43 = vmul.f32 %v3624_v19, %v2590_v27  ;;  %v2608_v18 = vmul.f32 %v3624_v19, %v2591_v30 }
 0x1f3   : > { %v2609_v40 = vmul.f32 %v3624_v19, %v2592_v60  ;;  %v2610_v44 = vmul.f32 %v3624_v19, %v2593_v0  ;;  %v2611_v47 = vmul.f32 %v3624_v19, %v2594_v33  ;;  %v2612_v22 = vmul.f32 %v3624_v19, %v2595_v37 }
 0x1f4   : > { %v2634_v48 = vmax.f32 %v2619_v58, 0.0  ;;  %v2613_v53 = vmul.f32 %v3624_v19, %v2596_v38  ;;  %v2614_v32 = vmul.f32 %v3624_v19, %v2597_v24  ;;  %v2615_v52 = vmul.f32 %v3624_v19, %v2598_v21 }
 0x1f5   : > { %v2616_v23 = vmul.f32 %v3624_v19, %v2599_v20  ;;  %v2617_v26 = vmul.f32 %v3624_v19, %v2600_v56  ;;  %v2618_v17 = vmul.f32 %v3624_v19, %v2601_v2  ;;  %v2620_v31 = vmul.f32 %v3624_v19, %v2603_v59 }
 0x1f6   : > { %v2993_v36 = vpack.c.bf16 %v2634_v48, %v2634_v48  ;;  %v2621_v55 = vmax.f32 %v2606_v42, 0.0  ;;  %v2622_v49 = vmax.f32 %v2607_v43, 0.0  ;;  %v2623_v63 = vmax.f32 %v2608_v18, 0.0 }
 0x1f7   : > { %v2624_v35 = vmax.f32 %v2609_v40, 0.0  ;;  %v2625_v29 = vmax.f32 %v2610_v44, 0.0  ;;  %v2626_v57 = vmax.f32 %v2611_v47, 0.0  ;;  %v2627_v39 = vmax.f32 %v2612_v22, 0.0 }
 0x1f8   : > { %2711 = vst.msk [vmem:[%s4890_s17 + $0x34] sm:$0xf] %vm2697_vm1, %v2993_v36  ;;  %v2628_v54 = vmax.f32 %v2613_v53, 0.0  ;;  %v2629_v34 = vmax.f32 %v2614_v32, 0.0  ;;  %v2630_v1 = vmax.f32 %v2615_v52, 0.0  ;;  %v2631_v3 = vmax.f32 %v2616_v23, 0.0 }
 0x1f9   : > { %v2632_v45 = vmax.f32 %v2617_v26, 0.0  ;;  %v2633_v5 = vmax.f32 %v2618_v17, 0.0  ;;  %v2635_v28 = vmax.f32 %v2620_v31, 0.0  ;;  %v2980_v50 = vpack.c.bf16 %v2621_v55, %v2621_v55 }
 0x1fa   : > { %v2981_v10 = vpack.c.bf16 %v2622_v49, %v2622_v49  ;;  %v2982_v9 = vpack.c.bf16 %v2623_v63, %v2623_v63  ;;  %v2983_v13 = vpack.c.bf16 %v2624_v35, %v2624_v35  ;;  %v2984_v15 = vpack.c.bf16 %v2625_v29, %v2625_v29 }
 0x1fb   : > { %v2985_v46 = vpack.c.bf16 %v2626_v57, %v2626_v57  ;;  %v2986_v62 = vpack.c.bf16 %v2627_v39, %v2627_v39  ;;  %v2987_v51 = vpack.c.bf16 %v2628_v54, %v2628_v54  ;;  %v2988_v11 = vpack.c.bf16 %v2629_v34, %v2629_v34  ;;  %2698 = vst.msk [vmem:[%s4890_s17] sm:$0xf] %vm2697_vm1, %v2980_v50 }
 0x1fc   : > { %v2989_v4 = vpack.c.bf16 %v2630_v1, %v2630_v1  ;;  %v2990_v41 = vpack.c.bf16 %v2631_v3, %v2631_v3  ;;  %v2991_v8 = vpack.c.bf16 %v2632_v45, %v2632_v45  ;;  %v2992_v12 = vpack.c.bf16 %v2633_v5, %v2633_v5  ;;  %2699 = vst.msk [vmem:[%s4890_s17 + $0x4] sm:$0xf] %vm2697_vm1, %v2981_v10 }
 0x1fd   : > { %2700 = vst.msk [vmem:[%s4890_s17 + $0x8] sm:$0xf] %vm2697_vm1, %v2982_v9  ;;  %2701 = vst.msk [vmem:[%s4890_s17 + $0xc] sm:$0xf] %vm2697_vm1, %v2983_v13  ;;  %v2994_v14 = vpack.c.bf16 %v2635_v28, %v2635_v28 }
 0x1fe   : > { %2702 = vst.msk [vmem:[%s4890_s17 + $0x10] sm:$0xf] %vm2697_vm1, %v2984_v15  ;;  %2703 = vst.msk [vmem:[%s4890_s17 + $0x14] sm:$0xf] %vm2697_vm1, %v2985_v46 }
 0x1ff   : > { %2704 = vst.msk [vmem:[%s4890_s17 + $0x18] sm:$0xf] %vm2697_vm1, %v2986_v62  ;;  %2705 = vst.msk [vmem:[%s4890_s17 + $0x1c] sm:$0xf] %vm2697_vm1, %v2987_v51 }
 0x200   : > { %2706 = vst.msk [vmem:[%s4890_s17 + $0x20] sm:$0xf] %vm2697_vm1, %v2988_v11  ;;  %2707 = vst.msk [vmem:[%s4890_s17 + $0x24] sm:$0xf] %vm2697_vm1, %v2989_v4 }
 0x201   : > { %2708 = vst.msk [vmem:[%s4890_s17 + $0x28] sm:$0xf] %vm2697_vm1, %v2990_v41  ;;  %2709 = vst.msk [vmem:[%s4890_s17 + $0x2c] sm:$0xf] %vm2697_vm1, %v2991_v8 }
 0x202   : > { %2710 = vst.msk [vmem:[%s4890_s17 + $0x30] sm:$0xf] %vm2697_vm1, %v2992_v12  ;;  %2712 = vst.msk [vmem:[%s4890_s17 + $0x38] sm:$0xf] %vm2697_vm1, %v2994_v14 }
 0x203   : > { %3696 = shalt.err (!%p3693_p7)
}
 0x204   : > { %s3697_s18 = scalar_lea.hbm %s4909_s22, 960  ;;  %s3701_s23 = scalar_lea.hbm %s4975_s2, 1920 }
 0x205   : > { %p3698_p9 = scmp.ne.s32.totalorder %s4909_s22, %s3697_s18  ;;  %p3702_p5 = scmp.lt.u32.totalorder %s4909_s22, %s4975_s2 }
 0x206   : > { %p3703_p13 = scmp.lt.u32.totalorder %s3701_s23, %s3697_s18  ;;  %p3705_p4 = scmp.lt.u32.totalorder %s3697_s18, %s4909_s22 }
 0x207   : > { %p3699_p1 = pnand %p3698_p9, %p3871_p12 }
 0x208   : > { %p3704_p2 = por %p3703_p13, %p3702_p5 }
 0x209   : > { %p3700_p0 = pneg %p3699_p1 }
 0x20a   : > { %p3706_p6 = por %p3705_p4, %p3704_p2 }
 0x20c   : > { %p3707_p8 = pnand %p3706_p6, %p3700_p0 }
 0x20e   : > { %3710 = shalt.err (!%p3707_p8)
}
 0x20f   : > { %s3760_s3 = smov 64   ;;  %s3761_s15 = smov 4  }
 0x210   : > { %3495 = dma.vmem_to_hbm [thread:$0]  (%p3871_p12), %s4911_s5, 960, %s4909_s22, %s2714_s27, %s3760_s3, %s3760_s3, %s3761_s15  }
 0x211 PF: > { %s2742_s17 = sand.u32 1, %s3741_s9   ;;  %p5048_p10 = scmp.ne.s32.totalorder %s4980_s16, 0 }
 0x212   : > { %p5049_p11 = scmp.ge.s32.totalorder %s3753_s12, 2  ;;  %s2743_s4 = scalar_lea.sflag [#allocation4], %s2742_s17 }
 0x214   : > { %p3506_p3 = pnand %p5049_p11, %p5048_p10 }
 0x216   : > { %3736 = dma.done.wait (!%p3506_p3), %s2743_s4, 960  }
 0x217   : > { %3738 = vsyncadd (!%p3506_p3), %s2743_s4, 4294966336  ;;  %p16_p7 = scmp.ge.s32.totalorder %s3833_s21, 4   ;;  %s5050_s9 = smov %s3745_s10 }
 0x218   : > { %s5051_s10 = smov %s3749_s11  ;;  %s5052_s11 = smov %s3867_s8 }
 0x219   : > { %s5053_s12 = smov %s3833_s21  ;;  %18 = sbr.rel (!%p16_p7) target bundleno = 6 (0x6), region = 85 }
 0x220   :  { %2748 = vsyncpa [#allocation3], 1 }
 0x221   :  { %2750 = vsyncpa [#allocation3 + $0x1], 1 }
 0x222   :  { %2751 = vsyncpa [#allocation6], 1 }
 0x223   :  { %2752 = vsyncpa [#allocation4], 1 }
 0x224   :  { %2754 = vsyncpa [#allocation4 + $0x1], 1 }

// kernel: refiner_forward.10
= control target key start
LH: loop header
LB: loop body
LE: loop exit
PB: predicated region body
PF: predicated region fallthrough
CT: control target
= control target key end

     0   :  { %8 = vsyncpa [#allocation3], 0  ;;  %s5378_s0 = inlined_call_operand.hbm [shape: bf16[2,152,64], index: 0, kind: input, shape index: {}]   ;;  %s5379_s1 = inlined_call_operand.hbm [shape: bf16[9,64,64], index: 1, kind: input, shape index: {}]   ;;  %s5380_s2 = inlined_call_operand.hbm [shape: bf16[2,152,64], index: 2, kind: input, shape index: {}]   ;;  %s5381_s3 = inlined_call_operand.hbm [shape: bf16[2,120,64], index: 3, kind: output, shape index: {}]  }
   0x1   :  { %10 = vsyncpa [#allocation3 + $0x1], 0 }
   0x2   :  { %11 = vsyncpa [#allocation6], 0 }
   0x3   :  { %12 = vsyncpa [#allocation4], 0 }
   0x4   :  { %14 = vsyncpa [#allocation4 + $0x1], 0  ;;  %s4039_s12 = smov 0   ;;  %s4041_s13 = smov 0  }
   0x5   :  { %s4043_s14 = smov 0   ;;  %s4045_s15 = smov 0  }
   0x6 LB: > { %s4060_s16 = sadd.s32 1, %s4009_s15   ;;  %s27_s17 = sadd.s32 1, %s4005_s14  ;;  %s4009_s15 = sphi %s4045_s15, %s5461_s15   ;;  %s4005_s14 = sphi %s4043_s14, %s5460_s14   ;;  %s4001_s13 = sphi %s4041_s13, %s5459_s13   ;;  %s3997_s12 = sphi %s4039_s12, %s5458_s12  }
   0x7   : > { %s24_s18 = ssub.s32 %s4009_s15, %s4060_s16  ;;  %p34_p0 = scmp.ne.s32.totalorder %s4005_s14, %s4001_s13 }
   0x8   : > { %p25_p1 = scmp.eq.s32.totalorder %s24_s18, 0  ;;  %p35_p2 = scmp.eq.s32.totalorder %s4009_s15, 0 }
   0x9   : > { %p3732_p5 = scmp.lt.s32.totalorder %s4009_s15, 2  ;;  %s150_s20 = sand.u32 1, %s4009_s15  }
   0xa   : > { %s4069_s19 = scalar_select %p25_p1, %s4005_s14, %s27_s17  }
   0xb   : > { %p36_p3 = por %p35_p2, %p34_p0  ;;  %s152_s21 = sand.u32 1, %s4005_s14  }
   0xc   : > { %s4078_s22 = smul.u32 76, %s152_s21  ;;  %s4095_s30 = scalar_lea.sflag [#allocation3], %s150_s20 }
   0xd   : > { %p4080_p6 = pnand %p3732_p5, %p36_p3  ;;  %s3670_s24 = smul.u32 1216, %s4009_s15 }
   0xe   : > { %s154_s28 = scalar_lea.vmem [#allocation2], %s4078_s22  ;;  %s3852_s7 = scalar_lea.hbm %s5378_s0, 2432 }
   0xf   : > { %s4090_s27 = scalar_lea.hbm %s5378_s0, %s3670_s24  ;;  %s161_s29 = sshll.u32 %s154_s28, 4  ;;  %s4093_s29 = int_to_ptr.vmem [resolvable:$true] %s161_s29 }
  0x10   : > { %s3847_s4 = scalar_lea.hbm %s4090_s27, 1216  ;;  %p3849_p8 = pneg %p4080_p6 }
  0x11   : > { %p3848_p7 = scmp.ne.s32.totalorder %s4090_s27, %s3847_s4  ;;  %p3853_p11 = scmp.lt.u32.totalorder %s4090_s27, %s5378_s0 }
  0x12   : > { %p3854_p12 = scmp.lt.u32.totalorder %s3852_s7, %s3847_s4  ;;  %p3856_p1 = scmp.lt.u32.totalorder %s3847_s4, %s4090_s27 }
  0x13   : > { %p3850_p9 = pnand %p3849_p8, %p3848_p7 }
  0x14   : > { %p3855_p13 = por %p3854_p12, %p3853_p11 }
  0x15   : > { %p3851_p10 = pneg %p3850_p9 }
  0x16   : > { %p3857_p2 = por %p3856_p1, %p3855_p13 }
  0x18   : > { %p3858_p3 = pnand %p3857_p2, %p3851_p10 }
  0x1a   : > { %3861 = shalt.err (!%p3858_p3)
}
  0x1b   : > { %s3862_s10 = scalar_lea.vmem %s4093_s29, 1216  ;;  %s4011_s11 = smov [#allocation2]  }
  0x1c   : > { %p3863_p5 = scmp.ne.s32.totalorder %s4093_s29, %s3862_s10  ;;  %s3867_s17 = sshll.u32 %s4011_s11, 4  ;;  %s3868_s17 = int_to_ptr.vmem [resolvable:$false] %s3867_s17 }
  0x1d   : > { %s3869_s18 = scalar_lea.vmem %s3868_s17, 2432  ;;  %p3870_p4 = scmp.lt.s32.totalorder %s4093_s29, %s3868_s17 }
  0x1e   : > { %p3865_p7 = pnand %p3863_p5, %p3849_p8  ;;  %p3871_p11 = scmp.lt.s32.totalorder %s3869_s18, %s3862_s10 }
  0x20   : > { %p3866_p9 = pneg %p3865_p7  ;;  %p3872_p12 = por %p3871_p11, %p3870_p4 }
  0x22   : > { %p3873_p13 = pnand %p3872_p12, %p3866_p9 }
  0x24   : > { %3876 = shalt.err (!%p3873_p13)
}
  0x25   : > { %s4012_s20 = smov 64   ;;  %s4013_s21 = smov 4  }
  0x26   : > { %3723 = dma.hbm_to_vmem [thread:$0]  (!%p4080_p6), %s4090_s27, 1216, %s4093_s29, %s4095_s30, %s4012_s20, %s4012_s20, %s4013_s21  }
  0x27   : > { %s4127_s25 = sadd.s32 4294967295, %s4009_s15   ;;  %s2989_s26 = sadd.s32 4294967294, %s4009_s15  }
  0x28   : > { %p40_p4 = scmp.ne.s32.totalorder %s4001_s13, %s3997_s12  ;;  %p5382_p10 = scmp.eq.s32.totalorder %s4127_s25, 0 }
  0x29   : > { %p111_p1 = scmp.eq.s32.totalorder %s4127_s25, 1  ;;  %p117_p2 = scmp.eq.s32.totalorder %s2989_s26, 1 }
  0x2a   : > { %p4136_p3 = por %p5382_p10, %p40_p4  ;;  %p2990_p5 = scmp.ge.s32.totalorder %s4009_s15, 1 }
  0x2b   : > { %p4144_p7 = por %p111_p1, %p34_p0  ;;  %p4148_p9 = por %p117_p2, %p40_p4 }
  0x2c   : > { %s5387_s28 = scalar_select %p4136_p3, 1, 0 }
  0x2d   : > { %s5388_s27 = scalar_select %p4144_p7, 1, 0 }
  0x2e   : > { %s5389_s29 = scalar_select %p4148_p9, 1, 0 }
  0x2f   : > { %p124_p11 = scmp.lt.s32.totalorder %s4009_s15, 3  ;;  %s4014_s5 = smov [#allocation5]  }
  0x30   : > { %s136_s6 = sshll.u32 %s4014_s5, 4  ;;  %s4162_s9 = scalar_lea.hbm %s5380_s2, %s3670_s24  ;;  %s4169_s6 = int_to_ptr.vmem [resolvable:$true] %s136_s6 }
  0x31   : > { %p4153_p12 = pnand %p2990_p5, %p124_p11  ;;  %s175_s10 = scalar_lea.vmem [#allocation7], %s4078_s22 }
  0x32   : > { %s182_s11 = sshll.u32 %s175_s10, 4  ;;  %s3877_s18 = scalar_lea.hbm %s4162_s9, 1216  ;;  %s4167_s11 = int_to_ptr.vmem [resolvable:$true] %s182_s11 }
  0x33   : > { %s5390_s4 = scalar_select %p4153_p12, 1, 0 }
  0x34   : > { %p3716_p0 = pneg %p4153_p12  ;;  %p3878_p4 = scmp.ne.s32.totalorder %s4162_s9, %s3877_s18 }
  0x35   : > { %s3882_s22 = scalar_lea.hbm %s5380_s2, 2432  ;;  %p3883_p5 = scmp.lt.u32.totalorder %s4162_s9, %s5380_s2 }
  0x36   : > { %p4173_p13 = pnand %p3716_p0, %p5382_p10  ;;  %p3880_p1 = pnand %p3878_p4, %p3849_p8 }
  0x37   : > { %p3884_p11 = scmp.lt.u32.totalorder %s3882_s22, %s3877_s18  ;;  %p3886_p0 = scmp.lt.u32.totalorder %s3877_s18, %s4162_s9 }
  0x38   : > { %p3881_p2 = pneg %p3880_p1 }
  0x39   : > { %p3885_p9 = por %p3884_p11, %p3883_p5 }
  0x3b   : > { %p3887_p10 = por %p3886_p0, %p3885_p9 }
  0x3d   : > { %p3888_p7 = pnand %p3887_p10, %p3881_p2 }
  0x3f   : > { %3891 = shalt.err (!%p3888_p7)
}
  0x40   : > { %s3892_s8 = scalar_lea.vmem %s4167_s11, 1216  ;;  %s4015_s10 = smov [#allocation7]  }
  0x41   : > { %p3893_p4 = scmp.ne.s32.totalorder %s4167_s11, %s3892_s8  ;;  %s3897_s24 = sshll.u32 %s4015_s10, 4  ;;  %s3898_s24 = int_to_ptr.vmem [resolvable:$false] %s3897_s24 }
  0x42   : > { %s3899_s26 = scalar_lea.vmem %s3898_s24, 2432  ;;  %p3900_p12 = scmp.lt.s32.totalorder %s4167_s11, %s3898_s24 }
  0x43   : > { %p3895_p1 = pnand %p3893_p4, %p3849_p8  ;;  %p3901_p5 = scmp.lt.s32.totalorder %s3899_s26, %s3892_s8 }
  0x45   : > { %p3896_p3 = pneg %p3895_p1  ;;  %p3902_p11 = por %p3901_p5, %p3900_p12 }
  0x47   : > { %p3903_p9 = pnand %p3902_p11, %p3896_p3 }
  0x49   : > { %3906 = shalt.err (!%p3903_p9)
}
  0x4a   : > { %3726 = dma.hbm_to_vmem [thread:$0]  (!%p4080_p6), %s4162_s9, 1216, %s4167_s11, %s4095_s30, %s4012_s20, %s4012_s20, %s4013_s21  }
  0x4b   : > { %s3907_s5 = scalar_lea.hbm %s5379_s1, 4608  ;;  %p3909_p10 = pneg %p4173_p13 }
  0x4c   : > { %p3908_p8 = scmp.ne.s32.totalorder %s5379_s1, %s3907_s5  ;;  %p3914_p12 = scmp.lt.u32.totalorder %s3907_s5, %s5379_s1 }
  0x4e   : > { %p3910_p3 = pnand %p3909_p10, %p3908_p8 }
  0x50   : > { %p3911_p7 = pneg %p3910_p3 }
  0x52   : > { %p3916_p2 = pnand %p3914_p12, %p3911_p7 }
  0x54   : > { %3919 = shalt.err (!%p3916_p2)
}
  0x55   : > { %s3920_s30 = scalar_lea.vmem %s4169_s6, 4608  ;;  %p3928_p1 = scmp.lt.s32.totalorder %s4169_s6, %s4169_s6 }
  0x56   : > { %p3921_p6 = scmp.ne.s32.totalorder %s4169_s6, %s3920_s30  ;;  %p3929_p5 = scmp.lt.s32.totalorder %s3920_s30, %s3920_s30 }
  0x58   : > { %p3923_p0 = pnand %p3921_p6, %p3909_p10  ;;  %p3930_p11 = por %p3929_p5, %p3928_p1 }
  0x5a   : > { %p3924_p4 = pneg %p3923_p0 }
  0x5c   : > { %p3931_p9 = pnand %p3930_p11, %p3924_p4 }
  0x5e   : > { %3934 = shalt.err (!%p3931_p9)
}
  0x5f   : > { %3719 = dma.hbm_to_vmem [thread:$0]  (!%p4173_p13), %s5379_s1, 4608, %s4169_s6, [#allocation6], %s4012_s20, %s4012_s20, %s4013_s21  }
  0x60   : > { %p5392_p8 = scmp.ne.s32.totalorder %s5390_s4, 0 }
  0x61   : > { %s196_s24 = sand.u32 (!%p5392_p8), 1, %s4127_s25   ;;  %s4232_s26 = sand.u32 (!%p5392_p8), 1, %s4001_s13  }
  0x62   : > { %194 = sbr.rel (%p5392_p8) target bundleno = 557 (0x22d), region = 32  ;;  %s197_s17 = scalar_lea.sflag (!%p5392_p8), [#allocation3], %s196_s24 }
  0x63   : > { %s3673_s18 = smul.u32 (!%p5392_p8), 76, %s4232_s26  ;;  %p5393_p10 = scmp.ne.s32.totalorder (!%p5392_p8), %s5387_s28, 0 }
  0x65   : > { %s4235_s22 = scalar_lea.vmem (!%p5392_p8), [#allocation2], %s3673_s18 }
  0x69   : > { %3980 = dma.done.wait (%p5393_p10), %s197_s17, 1216  }
  0x6a   : > { %3982 = vsyncadd (%p5393_p10), %s197_s17, 4294966080  ;;  %p5394_p13 = scmp.eq.s32.totalorder %s4127_s25, 0 }
  0x6c   : > { %3984 = dma.done.wait (%p5394_p13), [#allocation6], 4608   ;;  %p5395_p3 = pmov %p5394_p13 }
  0x6d   : > { %s4245_s20 = scalar_lea.vmem [#allocation7], %s3673_s18 }
  0x6e   : > { %3986 = vsyncadd (%p5395_p3), [#allocation6], 4294962688 }
  0x6f   : > { %3988 = dma.done.wait (%p5393_p10), %s197_s17, 1216  }
  0x70   : > { %3990 = vsyncadd (%p5393_p10), %s197_s17, 4294966080  ;;  %v3772_v0 = vld [vmem:[#allocation5 + $0x20] sm:$0xff]   ;;  %v3774_v2 = vld [vmem:[#allocation5 + $0x28] sm:$0xff]   ;;  %vm315_vm0 = vsmask.f32 7424  ;;  %vm403_vm1 = vcmask 523264  }
  0x71   : > { %v4251_v1 = vld [vmem:[#allocation5 + $0x80] sm:$0xff]   ;;  %3318 = vmatprep.subr.bf16.mxu1 %v3772_v0  ;;  %v4254_v3 = vld [vmem:[#allocation5 + $0x88] sm:$0xff]   ;;  %v3776_v4 = vld [vmem:[#allocation5 + $0x30] sm:$0xff]   ;;  %vm1103_vm2 = vsmask.f32 5376  ;;  %vm1347_vm3 = vcmask 1044480  }
  0x72   : > { %3414 = vmatprep.subr.bf16.mxu0 %v4251_v1  ;;  %3319 = vmatpush3.bf16.msra.mxu1 %v3772_v0  ;;  %v4258_v5 = vld [vmem:[#allocation5 + $0x90] sm:$0xff]   ;;  %v3778_v6 = vld [vmem:[#allocation5 + $0x38] sm:$0xff]   ;;  %v3785_v28 = vld [vmem:[#allocation5] sm:$0xff]   ;;  %vm675_vm4 = vcmask 1046528   ;;  %vm915_vm5 = vcmask 1045504   ;;  %s3674_s21 = smul.u32 60, %s4232_s26 }
  0x73   : > { %3415 = vmatpush3.bf16.msra.mxu0 %v4251_v1  ;;  %3320 = vmatprep.subr.bf16.mxu1 %v3774_v2  ;;  %v4260_v7 = vld [vmem:[#allocation5 + $0x98] sm:$0xff]   ;;  %v242_v8 = vld [vmem:[%s4235_s22] sm:$0xf]  ;;  %v3787_v34 = vld [vmem:[#allocation5 + $0xa0] sm:$0xff]   ;;  %s3705_s28 = smul.u32 960, %s4127_s25  ;;  %s2873_s10 = scalar_lea.sflag [#allocation4], %s4232_s26 }
  0x74   : > { %3416 = vmatprep.subr.bf16.mxu0 %v4254_v3  ;;  %v4265_v9 = vld [vmem:[%s4235_s22 + $0x4] sm:$0xf]  ;;  %v4272_v11 = vld [vmem:[%s4235_s22 + $0x8] sm:$0xff]   ;;  %v4286_v19 = vld [vmem:[%s4235_s22 + $0x10] sm:$0xff]   ;;  %s5296_s4 = scalar_lea.vmem [#allocation8], %s3674_s21  ;;  %p5455_p12 = scmp.ne.s32.totalorder %s5388_s27, 0 }
  0x75   : > { %v4269_v10 = vcombine.low %v242_v8, %v4265_v9  ;;  %v850_v12 = vld [vmem:[%s4235_s22 + $0x4] sm:$0xc]  ;;  %v4276_v13 = vld [vmem:[%s4235_s22 + $0x8] sm:$0xf]  ;;  %v324_v16 = vshll.u32 %v4272_v11, 16  ;;  %v328_v17 = vshrl.u32 %v4272_v11, 16  ;;  %s5314_s7 = scalar_lea.hbm %s5381_s3, %s3705_s28 }
  0x76   : > { %3321 = vmatpush3.bf16.msra.mxu1 %v3774_v2  ;;  %v4283_v18 = vld [vmem:[%s4235_s22 + $0xc] sm:$0xff]   ;;  %v4290_v20 = vcombine.low %v850_v12, %v4276_v13  ;;  %v332_v27 = vshll.u32 %v4286_v19, 16  ;;  %v4299_v33 = vld [vmem:[%s4235_s22 + $0x14] sm:$0xff]   ;;  %v336_v47 = vshrl.u32 %v4286_v19, 16  ;;  %v4314_v50 = vld [vmem:[%s4235_s22 + $0x1c] sm:$0xff]   ;;  %s2886_s6 = sshll.u32 %s5296_s4, 4  ;;  %s5316_s6 = int_to_ptr.vmem [resolvable:$true] %s2886_s6 }
  0x77   : > { %3417 = vmatpush3.bf16.msra.mxu0 %v4254_v3  ;;  %3322 = vmatprep.subr.bf16.mxu1 %v3776_v4  ;;  %v317_v14 = vshrl.u32 %v4269_v10, 16  ;;  %v319_v15 = vshll.u32 %v4269_v10, 16  ;;  %v326_v22 = vrot.slane %v324_v16, 1  ;;  %v1113_v23 = vshrl.u32 %v4283_v18, 16  ;;  %v4309_v46 = vld [vmem:[%s4235_s22 + $0x18] sm:$0xff]   ;;  %v4319_v54 = vld [vmem:[%s4235_s22 + $0x20] sm:$0xff]  }
  0x78   : > { %3418 = vmatprep.subr.bf16.mxu0 %v4258_v5  ;;  %v1116_v24 = vshll.u32 %v4283_v18, 16  ;;  %v1105_v25 = vshrl.u32 %v4290_v20, 16  ;;  %v1108_v26 = vshll.u32 %v4290_v20, 16  ;;  %v334_v37 = vrot.slane %v332_v27, 1  ;;  %v3788_v49 = vld [vmem:[#allocation5 + $0xa8] sm:$0xff]   ;;  %v3794_v12 = vld [vmem:[#allocation5 + $0xb0] sm:$0xff]  }
  0x79   : > { %v321_v21 = vrot.slane %v319_v15, 1  ;;  %v330_v30 = vor.u32 %v328_v17, %v326_v22  ;;  %v1115_v31 = vrot.slane %v1113_v23, 2  ;;  %v1122_v40 = vshrl.u32 %v4299_v33, 16  ;;  %v3792_v56 = vld [vmem:[#allocation5 + $0x8] sm:$0xff]   ;;  %s3935_s23 = scalar_lea.vmem %s5316_s6, 960  ;;  %s4016_s8 = smov [#allocation8]  }
  0x7a   : > { %3323 = vmatpush3.bf16.msra.mxu1 %v3776_v4  ;;  %v1118_v32 = vrot.slane %v1116_v24, 3  ;;  %v1107_v35 = vrot.slane %v1105_v25, 2  ;;  %v1110_v36 = vrot.slane %v1108_v26, 3  ;;  %v1125_v41 = vshll.u32 %v4299_v33, 16  ;;  %v4328_v0 = vld [vmem:[%s4235_s22 + $0x24] sm:$0xff]   ;;  %p3936_p7 = scmp.ne.s32.totalorder %s5316_s6, %s3935_s23  ;;  %s3939_s30 = sshll.u32 %s4016_s8, 4  ;;  %s3940_s30 = int_to_ptr.vmem [resolvable:$false] %s3939_s30 }
  0x7b   : > { %3419 = vmatpush3.bf16.msra.mxu0 %v4258_v5  ;;  %3324 = vmatprep.subr.bf16.mxu1 %v3778_v6  ;;  %v322_v29 = vor.u32 %v321_v21, %v317_v14  ;;  %v335_v43 = vsel %vm315_vm0, %v330_v30, %v334_v37  ;;  %v1124_v44 = vrot.slane %v1122_v40, 2  ;;  %v338_v52 = vor.u32 %v336_v47, %v334_v37  ;;  %v4337_v21 = vld [vmem:[%s4235_s22 + $0x28] sm:$0xff]   ;;  %v1334_v23 = vld [vmem:[%s4235_s22 + $0x4] sm:$0x8]  ;;  %v4347_v30 = vld [vmem:[%s4235_s22 + $0x30] sm:$0xff]   ;;  %s3941_s9 = scalar_lea.vmem %s3940_s30, 1920  ;;  %p3942_p0 = scmp.lt.s32.totalorder %s5316_s6, %s3940_s30 }
  0x7c   : > { %3420 = vmatprep.subr.bf16.mxu0 %v4260_v7  ;;  %v1119_v39 = vor.u32 %v1118_v32, %v1115_v31  ;;  %v1111_v42 = vor.u32 %v1110_v36, %v1107_v35  ;;  %v1127_v45 = vrot.slane %v1125_v41, 3  ;;  %v340_v53 = vshll.u32 %v4309_v46, 16  ;;  %v3799_v32 = vld [vmem:[#allocation5 + $0x10] sm:$0xff]   ;;  %v3795_v36 = vld [vmem:[#allocation5 + $0xb8] sm:$0xff]   ;;  %v4360_v41 = vld [vmem:[%s4235_s22 + $0x38] sm:$0xf]  ;;  %p3937_p2 = pnand %p3936_p7, %p5455_p12  ;;  %p3943_p4 = scmp.lt.s32.totalorder %s3941_s9, %s3935_s23 }
  0x7d   : > { %v327_v38 = vsel %vm315_vm0, %v322_v29, %v326_v22  ;;  %v344_v55 = vshrl.u32 %v4309_v46, 16  ;;  %v1131_v57 = vshrl.u32 %v4314_v50, 16  ;;  %v1134_v58 = vshll.u32 %v4314_v50, 16 }
  0x7e   : > { %3325 = vmatpush3.bf16.msra.mxu1 %v3778_v6  ;;  %3326 = vmatprep.mubr.msk.bf16.mxu1 %vm403_vm1, %v327_v38  ;;  %v1120_v48 = vsel %vm1103_vm2, %v1111_v42, %v1119_v39  ;;  %v1128_v51 = vor.u32 %v1127_v45, %v1124_v44  ;;  %v342_v60 = vrot.slane %v340_v53, 1  ;;  %v348_v61 = vshll.u32 %v4319_v54, 16  ;;  %v265_v42 = vld [vmem:[%s4235_s22 + $0x3c] sm:$0x1]  ;;  %p3938_p6 = pneg %p3937_p2  ;;  %p3944_p1 = por %p3943_p4, %p3942_p0 }
  0x7f   : > { %3421 = vmatpush3.bf16.msra.mxu0 %v4260_v7  ;;  %3342 = vmatprep.subr.bf16.mxu1 %v3785_v28  ;;  %v1133_v62 = vrot.slane %v1131_v57, 2  ;;  %v1136_v63 = vrot.slane %v1134_v58, 3  ;;  %v1349_v2 = vrot.slane %v4283_v18, 3  ;;  %v1140_v15 = vshrl.u32 %v4328_v0, 16  ;;  %v3805_v58 = vld [vmem:[#allocation5 + $0x40] sm:$0xff]  }
  0x80   : > { %3438 = vmatprep.subr.bf16.mxu0 %v3787_v34  ;;  %3422 = vmatprep.mubr.msk.bf16.mxu0 %vm403_vm1, %v1120_v48  ;;  %v1129_v59 = vsel %vm1103_vm2, %v1119_v39, %v1128_v51  ;;  %v343_v4 = vsel %vm315_vm0, %v338_v52, %v342_v60  ;;  %v346_v6 = vor.u32 %v344_v55, %v342_v60  ;;  %v350_v8 = vrot.slane %v348_v61, 1  ;;  %v4377_v60 = vld [vmem:[%s4235_s22 + $0x2c] sm:$0xff]   ;;  %p3945_p5 = pnand %p3944_p1, %p3938_p6 }
  0x81   : > { %3327 = vmatmul.mubr.msk.bf16.vlgmr.msra.gmra.mrb[0].mxu1 %vm403_vm1, %v335_v43  ;;  %v1137_v14 = vor.u32 %v1136_v63, %v1133_v62  ;;  %v1143_v16 = vshll.u32 %v4328_v0, 16  ;;  %v352_v22 = vshrl.u32 %v4319_v54, 16  ;;  %v1142_v25 = vrot.slane %v1140_v15, 2  ;;  %v3802_v43 = vld [vmem:[#allocation5 + $0x18] sm:$0xff]   ;;  %v1090_v15 = vld [vmem:[%s4235_s22 + $0x40] sm:$0x7] }
  0x82   : > { %3343 = vmatpush3.bf16.msra.mxu1 %v3785_v28  ;;  %3423 = vmatmul.mubr.msk.bf16.vlgmr.msra.gmra.mrb[0].mxu0 %vm403_vm1, %v1129_v59  ;;  %v351_v17 = vsel %vm315_vm0, %v346_v6, %v350_v8  ;;  %v3076_v27 = vcombine.low %v1334_v23, %v4276_v13  ;;  %v356_v29 = vshll.u32 %v4337_v21, 16  ;;  %v360_v31 = vshrl.u32 %v4337_v21, 16  ;;  %v3803_v6 = vld [vmem:[#allocation5 + $0xc8] sm:$0xff]   ;;  %v3810_v23 = vld [vmem:[#allocation5 + $0xd8] sm:$0xff]  }
  0x83   : > { %3344 = vmatprep.subr.bf16.mxu1 %v3792_v56  ;;  %3439 = vmatpush3.bf16.msra.mxu0 %v3787_v34  ;;  %v1138_v24 = vsel %vm1103_vm2, %v1128_v51, %v1137_v14  ;;  %v1145_v26 = vrot.slane %v1143_v16, 3  ;;  %v354_v28 = vor.u32 %v352_v22, %v350_v8  ;;  %v364_v13 = vshll.u32 %v4347_v30, 16  ;;  %v3800_v51 = vld [vmem:[#allocation5 + $0xc0] sm:$0xff]  }
  0x84   : > { %3440 = vmatprep.subr.bf16.mxu0 %v3788_v49  ;;  %3330 = vmatprep.mubr.msk.bf16.mxu1 %vm403_vm1, %v343_v4  ;;  %v1348_v35 = vrot.slane %v3076_v27, 3  ;;  %v358_v37 = vrot.slane %v356_v29, 1  ;;  %v368_v38 = vshrl.u32 %v4347_v30, 16  ;;  %v4366_v48 = vcombine.low %v4360_v41, %v265_v42  ;;  %v4397_v16 = vld [vmem:[%s4235_s22 + $0x34] sm:$0xff]  }
  0x85   : > { %3426 = vmatprep.mubr.msk.bf16.mxu0 %vm403_vm1, %v1138_v24  ;;  %v4350_v34 = vor.u32 %v1145_v26, %v1142_v25  ;;  %v366_v47 = vrot.slane %v364_v13, 1  ;;  %v1355_v4 = vrot.slane %v4328_v0, 3  ;;  %v687_v25 = vrot.slane %v4347_v30, 1 }
  0x86   : > { %3345 = vmatpush3.bf16.msra.mxu1 %v3792_v56  ;;  %v1350_v40 = vsel %vm1347_vm3, %v1348_v35, %v1349_v2  ;;  %v359_v44 = vsel %vm315_vm0, %v354_v28, %v358_v37  ;;  %v362_v45 = vor.u32 %v360_v31, %v358_v37  ;;  %v372_v55 = vshll.u32 %v4366_v48, 16  ;;  %v3809_v28 = vld [vmem:[#allocation5 + $0x48] sm:$0xff]   ;;  %v3814_v35 = vld [vmem:[#allocation5 + $0xe0] sm:$0xff]  }
  0x87   : > { %3441 = vmatpush3.bf16.msra.mxu0 %v3788_v49  ;;  %3346 = vmatprep.subr.bf16.mxu1 %v3799_v32  ;;  %v1147_v39 = vsel %vm1103_vm2, %v1137_v14, %v4350_v34  ;;  %v1351_v49 = vrot.slane %v4299_v33, 3  ;;  %v370_v53 = vor.u32 %v368_v38, %v366_v47  ;;  %v1353_v56 = vrot.slane %v4314_v50, 3  ;;  %v3807_v14 = vld [vmem:[#allocation5 + $0xd0] sm:$0xff]  }
  0x88   : > { %3442 = vmatprep.subr.bf16.mxu0 %v3794_v12  ;;  %v367_v52 = vsel %vm315_vm0, %v362_v45, %v366_v47  ;;  %v376_v57 = vshrl.u32 %v4366_v48, 16  ;;  %v374_v59 = vrot.slane %v372_v55, 1  ;;  %v689_v26 = vrot.slane %v4366_v48, 1  ;;  %v3817_v45 = vld [vmem:[#allocation5 + $0x58] sm:$0xff]   ;;  %v3815_v55 = vld [vmem:[%s4235_s22 + $0x1c] sm:$0xff]  }
  0x89   : > { %3331 = vmatmul.mubr.msk.bf16.gmra.mrb[4].mxu1 %vm403_vm1, %v351_v17  ;;  %v1352_v61 = vsel %vm1347_vm3, %v1349_v2, %v1351_v49  ;;  %v1354_v63 = vsel %vm1347_vm3, %v1351_v49, %v1353_v56  ;;  %v4390_v2 = vld [vmem:[%s4235_s22 + $0x3c] sm:$0xf]  ;;  %v1356_v17 = vsel %vm1347_vm3, %v1353_v56, %v1355_v4  ;;  %v1359_v27 = vrot.slane %v4397_v16, 3  ;;  %v3811_v47 = vld [vmem:[%s4235_s22 + $0xc] sm:$0xff]  }
  0x8a   : > { %3347 = vmatpush3.bf16.msra.mxu1 %v3799_v32  ;;  %3427 = vmatmul.mubr.msk.bf16.gmra.mrb[4].mxu0 %vm403_vm1, %v1147_v39  ;;  %v375_v62 = vsel %vm315_vm0, %v370_v53, %v374_v59  ;;  %v378_v8 = vor.u32 %v376_v57, %v374_v59  ;;  %v4401_v22 = vcombine.low %v4390_v2, %v1090_v15  ;;  %v917_v31 = vrot.slane %v4283_v18, 2  ;;  %v4455_v49 = vld [vmem:[#allocation5 + $0x60] sm:$0xff]  }
  0x8b   : > { %3443 = vmatpush3.bf16.msra.mxu0 %v3794_v12  ;;  %3334 = vmatprep.mubr.msk.bf16.mxu1 %vm403_vm1, %v359_v44  ;;  %v1357_v12 = vrot.slane %v4377_v60, 3  ;;  %v4414_v29 = vsel %vm675_vm4, %v687_v25, %v689_v26  ;;  %v921_v37 = vrot.slane %v4314_v50, 2  ;;  %v3812_v50 = vld [vmem:[#allocation5 + $0x50] sm:$0xff]   ;;  %v925_v39 = vrot.slane %v4377_v60, 2  ;;  %v3813_v53 = vld [vmem:[%s4235_s22 + $0x14] sm:$0xff]  }
  0x8c   : > { %3444 = vmatprep.subr.bf16.mxu0 %v3795_v36  ;;  %3446 = vmatprep.mubr.msk.bf16.mxu0 %vm403_vm1, %v1350_v40  ;;  %v1361_v32 = vrot.slane %v4401_v22, 3  ;;  %v677_v57 = vrot.slane %v4272_v11, 1  ;;  %v1149_v59 = vshrl.u32 %v4377_v60, 16 }
  0x8d   : > { %3348 = vmatprep.subr.bf16.mxu1 %v3802_v43  ;;  %v1358_v24 = vsel %vm1347_vm3, %v1355_v4, %v1357_v12  ;;  %v1360_v38 = vsel %vm1347_vm3, %v1357_v12, %v1359_v27  ;;  %v3818_v12 = vld [vmem:[%s4235_s22 + $0x24] sm:$0xff]  }
  0x8e   : > { %3349 = vmatpush3.bf16.msra.mxu1 %v3802_v43  ;;  %v1362_v40 = vsel %vm1347_vm3, %v1359_v27, %v1361_v32  ;;  %v927_v43 = vrot.slane %v4397_v16, 2  ;;  %v1158_v27 = vshrl.u32 %v4397_v16, 16 }
  0x8f   : > { %3445 = vmatpush3.bf16.msra.mxu0 %v3795_v36  ;;  %3366 = vmatprep.subr.bf16.mxu1 %v3805_v58 }
  0x90   : > { %3462 = vmatprep.subr.bf16.mxu0 %v3800_v51 }
  0x91   : > { %3335 = vmatmul.mubr.msk.bf16.gmra.mrb[8].mxu1 %vm403_vm1, %v367_v52 }
  0x92   : > { %3338 = vmatprep.mubr.msk.bf16.mxu1 %vm403_vm1, %v375_v62  ;;  %3447 = vmatmul.mubr.msk.bf16.vlgmr.msra.gmra.mrb[0].mxu0 %vm403_vm1, %v1352_v61  ;;  %v865_v62 = vld [vmem:[%s4235_s22 + $0x40] sm:$0x3] }
  0x93   : > { %3463 = vmatpush3.bf16.msra.mxu0 %v3800_v51  ;;  %3450 = vmatprep.mubr.msk.bf16.mxu0 %vm403_vm1, %v1354_v63  ;;  %v662_v51 = vld [vmem:[%s4235_s22] sm:$0xe]  ;;  %v1152_v63 = vshll.u32 %v4377_v60, 16  ;;  %v3050_v4 = vcombine.low %v4390_v2, %v865_v62  ;;  %v681_v60 = vrot.slane %v4309_v46, 1  ;;  %v3828_v2 = vld [vmem:[#allocation5 + $0xf8] sm:$0xff]  }
  0x94   : > { %3464 = vmatprep.subr.bf16.mxu0 %v3803_v6  ;;  %v3030_v52 = vcombine.low %v662_v51, %v4265_v9  ;;  %v3017_v9 = vcombine.low %v4360_v41, %v4360_v41  ;;  %v1743_v41 = vld [vmem:[%s4235_s22 + $0xc] sm:$0xf] }
  0x95   : > { %v4486_v15 = vrot.slane %v3050_v4, 2 }
  0x96   : > { %v676_v56 = vrot.slane %v3030_v52, 1  ;;  %v3825_v52 = vld [vmem:[%s4235_s22 + $0x3c] sm:$0xff]  }
  0x97   : > { %3465 = vmatpush3.bf16.msra.mxu0 %v3803_v6  ;;  %v4481_v6 = vld [vmem:[%s4235_s22 + $0x10] sm:$0xf] }
  0x98   : > { %3466 = vmatprep.subr.bf16.mxu0 %v3807_v14  ;;  %v678_v61 = vsel %vm675_vm4, %v676_v56, %v677_v57 }
  0x99   : > { %3339 = vmatmul.mubr.msk.bf16.gmra.mrb[12].mxu1 %vm403_vm1, %v378_v8  ;;  %v1151_v8 = vrot.slane %v1149_v59, 2  ;;  %v3835_v59 = vld [vmem:[#allocation5 + $0x78] sm:$0xff]  }
  0x9a   : > { %3350 = vmatprep.mubr.msk.bf16.mxu1 %vm403_vm1, %v4269_v10  ;;  %v916_v10 = vrot.slane %v4290_v20, 2  ;;  %3451 = vmatmul.mubr.msk.bf16.gmra.mrb[4].mxu0 %vm403_vm1, %v1356_v17  ;;  %v919_v20 = vrot.slane %v4299_v33, 2  ;;  %v923_v33 = vrot.slane %v4328_v0, 2  ;;  %v4447_v0 = vsel %vm915_vm5, %v925_v39, %v927_v43  ;;  %v3821_v17 = vld [vmem:[%s4235_s22 + $0x2c] sm:$0xff]  }
  0x9b   : > { %3454 = vmatprep.mubr.msk.bf16.mxu0 %vm403_vm1, %v1358_v24  ;;  %3467 = vmatpush3.bf16.msra.mxu0 %v3807_v14  ;;  %v679_v14 = vrot.slane %v4286_v19, 1  ;;  %v3109_v24 = vcombine.low %v1743_v41, %v4481_v6 }
  0x9c   : > { %3468 = vmatprep.subr.bf16.mxu0 %v3810_v23  ;;  %v4421_v36 = vsel %vm915_vm5, %v916_v10, %v917_v31  ;;  %v4427_v13 = vsel %vm915_vm5, %v917_v31, %v919_v20  ;;  %v4432_v18 = vsel %vm915_vm5, %v919_v20, %v921_v37  ;;  %v4439_v42 = vsel %vm915_vm5, %v921_v37, %v923_v33 }
  0x9d   : > { %v4443_v44 = vsel %vm915_vm5, %v923_v33, %v925_v39  ;;  %v4493_v10 = vsel %vm915_vm5, %v927_v43, %v4486_v15  ;;  %v1167_v31 = vshrl.u32 %v4401_v22, 16  ;;  %v1160_v20 = vrot.slane %v1158_v27, 2  ;;  %v3826_v33 = vld [vmem:[#allocation5 + $0x68] sm:$0xff]  }
  0x9e   : > { %v682_v37 = vsel %vm675_vm4, %v679_v14, %v681_v60  ;;  %v1811_v39 = vshll.u32 %v3109_v24, 16 }
  0x9f   : > { %3469 = vmatpush3.bf16.msra.mxu0 %v3810_v23  ;;  %v1154_v23 = vrot.slane %v1152_v63, 3  ;;  %v4535_v63 = vld [vmem:[%s4235_s22 + $0x24] sm:$0xff]  }
  0xa0   : > { %3486 = vmatprep.subr.bf16.mxu0 %v3814_v35 }
  0xa1   : > { %3351 = vmatmul.mubr.msk.bf16.vlgmr.msra.gmra.mrb[0].mxu1 %vm403_vm1, %v4272_v11  ;;  %v3824_v11 = vld [vmem:[#allocation5 + $0xf0] sm:$0xff]  }
  0xa2   : > { %3367 = vmatpush3.bf16.msra.mxu1 %v3805_v58  ;;  %3354 = vmatprep.mubr.msk.bf16.mxu1 %vm403_vm1, %v4286_v19  ;;  %v3819_v58 = vld [vmem:[#allocation5 + $0xe8] sm:$0xff]   ;;  %v1155_v19 = vor.u32 %v1154_v23, %v1151_v8  ;;  %v4550_v23 = vld [vmem:[%s4235_s22 + $0x2c] sm:$0xff]  }
  0xa3   : > { %3368 = vmatprep.subr.bf16.mxu1 %v3809_v28  ;;  %3455 = vmatmul.mubr.msk.bf16.gmra.mrb[8].mxu0 %vm403_vm1, %v1360_v38  ;;  %v1169_v38 = vrot.slane %v1167_v31, 2 }
  0xa4   : > { %3458 = vmatprep.mubr.msk.bf16.mxu0 %vm403_vm1, %v1362_v40  ;;  %v3833_v40 = vld [vmem:[#allocation5 + $0x100] sm:$0xff]  }
  0xa6   : > { %3369 = vmatpush3.bf16.msra.mxu1 %v3809_v28  ;;  %v1161_v28 = vshll.u32 %v4397_v16, 16  ;;  %v4505_v16 = vsel %vm1103_vm2, %v4350_v34, %v1155_v19  ;;  %v683_v34 = vrot.slane %v4319_v54, 1 }
  0xa7   : > { %3370 = vmatprep.subr.bf16.mxu1 %v3812_v50 }
  0xa9   : > { %3355 = vmatmul.mubr.msk.bf16.gmra.mrb[4].mxu1 %vm403_vm1, %v4309_v46  ;;  %v680_v46 = vsel %vm675_vm4, %v677_v57, %v679_v14  ;;  %v1813_v57 = vrot.slane %v1811_v39, 1  ;;  %v1832_v14 = vshll.u32 %v4535_v63, 16  ;;  %v4572_v39 = vld [vmem:[%s4235_s22 + $0x44] sm:$0x1f]  }
  0xaa   : > { %3358 = vmatprep.mubr.msk.bf16.mxu1 %vm403_vm1, %v4319_v54  ;;  %3371 = vmatpush3.bf16.msra.mxu1 %v3812_v50  ;;  %v4508_v50 = vld [vmem:[%s4235_s22 + $0x14] sm:$0xff]   ;;  %v684_v54 = vsel %vm675_vm4, %v681_v60, %v683_v34  ;;  %v1864_v48 = vshll.u32 %v4572_v39, 16 }
  0xab   : > { %3372 = vmatprep.subr.bf16.mxu1 %v3817_v45  ;;  %3459 = vmatmul.mubr.msk.bf16.gmra.mrb[12].mxu0 %vm403_vm1, %v1361_v32  ;;  %v1170_v32 = vshll.u32 %v4401_v22, 16  ;;  %v1820_v41 = vshrl.u32 %v4508_v50, 16  ;;  %v1834_v27 = vrot.slane %v1832_v14, 1 }
  0xac   : > { %3470 = vmatprep.mubr.msk.bf16.mxu0 %vm403_vm1, %v3811_v47  ;;  %v3823_v47 = vld [vmem:[%s4235_s22 + $0x34] sm:$0xff]  }
  0xad   : > { %v1172_v22 = vrot.slane %v1170_v32, 3  ;;  %v3837_v32 = vld [vmem:[#allocation5 + $0x108] sm:$0xff]  }
  0xae   : > { %3373 = vmatpush3.bf16.msra.mxu1 %v3817_v45 }
  0xaf   : > { %3390 = vmatprep.subr.bf16.mxu1 %v4455_v49  ;;  %v4511_v45 = vor.u32 %v1172_v22, %v1169_v38  ;;  %v3840_v22 = vld [vmem:[#allocation5 + $0x110] sm:$0xff]  }
  0xb1   : > { %3359 = vmatmul.mubr.msk.bf16.gmra.mrb[8].mxu1 %vm403_vm1, %v4337_v21 }
  0xb2   : > { %3362 = vmatprep.mubr.msk.bf16.mxu1 %vm403_vm1, %v4347_v30  ;;  %v1840_v30 = vshll.u32 %v4550_v23, 16 }
  0xb3   : > { %3471 = vmatmul.mubr.msk.bf16.vlgmr.msra.gmra.mrb[0].mxu0 %vm403_vm1, %v3813_v53  ;;  %v685_v53 = vrot.slane %v4337_v21, 1 }
  0xb4   : > { %3487 = vmatpush3.bf16.msra.mxu0 %v3814_v35  ;;  %3474 = vmatprep.mubr.msk.bf16.mxu0 %vm403_vm1, %v3815_v55  ;;  %v1163_v35 = vrot.slane %v1161_v28, 3  ;;  %v3831_v55 = vld [vmem:[#allocation5 + $0x70] sm:$0xff]   ;;  %v4555_v28 = vld [vmem:[%s4235_s22 + $0x34] sm:$0xff]  }
  0xb5   : > { %3488 = vmatprep.subr.bf16.mxu0 %v3819_v58  ;;  %v686_v21 = vsel %vm675_vm4, %v683_v34, %v685_v53 }
  0xb6   : > { %v1164_v43 = vor.u32 %v1163_v35, %v1160_v20  ;;  %v1848_v20 = vshll.u32 %v4555_v28, 16  ;;  %v1842_v35 = vrot.slane %v1840_v30, 1 }
  0xb8   : > { %3489 = vmatpush3.bf16.msra.mxu0 %v3819_v58  ;;  %v4518_v51 = vsel %vm1103_vm2, %v1155_v19, %v1164_v43  ;;  %v4524_v56 = vsel %vm1103_vm2, %v1164_v43, %v4511_v45  ;;  %v1816_v58 = vshll.u32 %v4508_v50, 16  ;;  %v1836_v19 = vshrl.u32 %v4535_v63, 16 }
  0xb9   : > { %3363 = vmatmul.mubr.msk.bf16.gmra.mrb[12].mxu1 %vm403_vm1, %v3017_v9  ;;  %3490 = vmatprep.subr.bf16.mxu0 %v3824_v11  ;;  %v4530_v9 = vld [vmem:[%s4235_s22 + $0x1c] sm:$0xff]   ;;  %v1850_v38 = vrot.slane %v1848_v20, 1 }
  0xba   : > { %3374 = vmatprep.mubr.msk.bf16.mxu1 %vm403_vm1, %v678_v61  ;;  %v1818_v62 = vrot.slane %v1816_v58, 1  ;;  %v1824_v4 = vshll.u32 %v4530_v9, 16 }
  0xbb   : > { %3475 = vmatmul.mubr.msk.bf16.gmra.mrb[4].mxu0 %vm403_vm1, %v3818_v12  ;;  %v1828_v12 = vshrl.u32 %v4530_v9, 16 }
  0xbc   : > { %3478 = vmatprep.mubr.msk.bf16.mxu0 %vm403_vm1, %v3821_v17  ;;  %3491 = vmatpush3.bf16.msra.mxu0 %v3824_v11  ;;  %v3827_v11 = vld [vmem:[%s4235_s22 + $0x44] ss:$0 sps:$4 sm:$0xff]   ;;  %v688_v17 = vsel %vm675_vm4, %v685_v53, %v687_v25  ;;  %v1826_v60 = vrot.slane %v1824_v4, 1 }
  0xbd   : > { %3492 = vmatprep.subr.bf16.mxu0 %v3828_v2  ;;  %v3842_v53 = vld [vmem:[#allocation5 + $0x118] sm:$0xff]  }
  0xc0   : > { %3493 = vmatpush3.bf16.msra.mxu0 %v3828_v2  ;;  %v1822_v2 = vor.u32 %v1820_v41, %v1818_v62 }
  0xc1   : > { %3375 = vmatmul.mubr.msk.bf16.vlgmr.msra.gmra.mrb[0].mxu1 %vm403_vm1, %v680_v46  ;;  %3510 = vmatprep.subr.bf16.mxu0 %v3833_v40  ;;  %v1844_v46 = vshrl.u32 %v4550_v23, 16 }
  0xc2   : > { %3391 = vmatpush3.bf16.msra.mxu1 %v4455_v49  ;;  %3378 = vmatprep.mubr.msk.bf16.mxu1 %vm403_vm1, %v682_v37  ;;  %v1809_v49 = vshrl.u32 %v3109_v24, 16  ;;  %v1830_v24 = vor.u32 %v1828_v12, %v1826_v60  ;;  %v1827_v25 = vsel %vm315_vm0, %v1822_v2, %v1826_v60  ;;  %v4568_v37 = vld [vmem:[%s4235_s22 + $0x3c] sm:$0xff]  }
  0xc3   : > { %3392 = vmatprep.subr.bf16.mxu1 %v3826_v33  ;;  %3479 = vmatmul.mubr.msk.bf16.gmra.mrb[8].mxu0 %vm403_vm1, %v3823_v47  ;;  %v1856_v43 = vshll.u32 %v4568_v37, 16  ;;  %v1852_v47 = vshrl.u32 %v4555_v28, 16 }
  0xc4   : > { %3482 = vmatprep.mubr.msk.bf16.mxu0 %vm403_vm1, %v3825_v52  ;;  %v1814_v61 = vor.u32 %v1813_v57, %v1809_v49  ;;  %v1835_v31 = vsel %vm315_vm0, %v1830_v24, %v1834_v27  ;;  %v1860_v52 = vshrl.u32 %v4568_v37, 16  ;;  %v1866_v49 = vrot.slane %v1864_v48, 1  ;;  %v2030_v57 = vld [vmem:[%s4235_s22 + $0xc] sm:$0xe] }
  0xc6   : > { %3393 = vmatpush3.bf16.msra.mxu1 %v3826_v33  ;;  %v1819_v8 = vsel %vm315_vm0, %v1814_v61, %v1818_v62  ;;  %v1846_v33 = vor.u32 %v1844_v46, %v1842_v35  ;;  %v2056_v61 = vrot.slane %v4572_v39, 1  ;;  %v2217_v62 = vlaneseq }
  0xc7   : > { %3394 = vmatprep.subr.bf16.mxu1 %v3831_v55 }
  0xc8   : > { %v1851_v34 = vsel %vm315_vm0, %v1846_v33, %v1850_v38 }
  0xc9   : > { %3379 = vmatmul.mubr.msk.bf16.gmra.mrb[4].mxu1 %vm403_vm1, %v684_v54 }
  0xca   : > { %3382 = vmatprep.mubr.msk.bf16.mxu1 %vm403_vm1, %v686_v21  ;;  %3395 = vmatpush3.bf16.msra.mxu1 %v3831_v55  ;;  %v3129_v21 = vcombine.low %v2030_v57, %v4481_v6  ;;  %v2046_v6 = vrot.slane %v4530_v9, 1  ;;  %v2054_v9 = vrot.slane %v4568_v37, 1 }
  0xcb   : > { %3396 = vmatprep.subr.bf16.mxu1 %v3835_v59  ;;  %3483 = vmatmul.mubr.msk.bf16.gmra.mrb[12].mxu0 %vm403_vm1, %v3827_v11 }
  0xcc   : > { %3494 = vmatprep.mubr.msk.bf16.mxu0 %vm403_vm1, %v1819_v8 }
  0xce   : > { %3397 = vmatpush3.bf16.msra.mxu1 %v3835_v59  ;;  %v1868_v59 = vshrl.u32 %v4572_v39, 16 }
  0xcf   : > { %3534 = vmatprep.subr.bf16.mxu1 %v4251_v1 }
  0xd1   : > { %3383 = vmatmul.mubr.msk.bf16.gmra.mrb[8].mxu1 %vm403_vm1, %v688_v17 }
  0xd2   : > { %3386 = vmatprep.mubr.msk.bf16.mxu1 %vm403_vm1, %v4414_v29  ;;  %v1838_v29 = vor.u32 %v1836_v19, %v1834_v27 }
  0xd3   : > { %3495 = vmatmul.mubr.msk.bf16.vlgmr.msra.gmra.mrb[0].mxu0 %vm403_vm1, %v1827_v25 }
  0xd4   : > { %3511 = vmatpush3.bf16.msra.mxu0 %v3833_v40  ;;  %3498 = vmatprep.mubr.msk.bf16.mxu0 %vm403_vm1, %v1835_v31  ;;  %v1843_v40 = vsel %vm315_vm0, %v1838_v29, %v1842_v35 }
  0xd5   : > { %3512 = vmatprep.subr.bf16.mxu0 %v3837_v32 }
  0xd8   : > { %3513 = vmatpush3.bf16.msra.mxu0 %v3837_v32 }
  0xd9   : > { %3387 = vmatmul.mubr.msk.bf16.gmra.mrb[12].mxu1 %vm403_vm1, %v689_v26  ;;  %3514 = vmatprep.subr.bf16.mxu0 %v3840_v22  ;;  %v1858_v26 = vrot.slane %v1856_v43, 1 }
  0xda   : > { %3398 = vmatprep.mubr.msk.bf16.mxu1 %vm403_vm1, %v4421_v36  ;;  %v1854_v36 = vor.u32 %v1852_v47, %v1850_v38 }
  0xdb   : > { %3499 = vmatmul.mubr.msk.bf16.gmra.mrb[4].mxu0 %vm403_vm1, %v1843_v40  ;;  %v1862_v55 = vor.u32 %v1860_v52, %v1858_v26 }
  0xdc   : > { %3502 = vmatprep.mubr.msk.bf16.mxu0 %vm403_vm1, %v1851_v34  ;;  %3515 = vmatpush3.bf16.msra.mxu0 %v3840_v22  ;;  %v1859_v58 = vsel %vm315_vm0, %v1854_v36, %v1858_v26 }
  0xdd   : > { %3516 = vmatprep.subr.bf16.mxu0 %v3842_v53  ;;  %v1867_v54 = vsel %vm315_vm0, %v1862_v55, %v1866_v49 }
  0xe0   : > { %3517 = vmatpush3.bf16.msra.mxu0 %v3842_v53 }
  0xe1   : > { %3399 = vmatmul.mubr.msk.bf16.vlgmr.msra.gmra.mrb[0].mxu1 %vm403_vm1, %v4427_v13  ;;  %v2044_v13 = vrot.slane %v4508_v50, 1  ;;  %v2052_v50 = vrot.slane %v4555_v28, 1 }
  0xe2   : > { %3538 = vmatpush3.bf16.msra.mxu1 %v4251_v1  ;;  %3402 = vmatprep.mubr.msk.bf16.mxu1 %vm403_vm1, %v4432_v18  ;;  %v2043_v1 = vrot.slane %v3129_v21, 1  ;;  %v1870_v18 = vor.u32 %v1868_v59, %v1866_v49 }
  0xe3   : > { %3535 = vmatprep.subr.bf16.mxu1 %v4254_v3  ;;  %3503 = vmatmul.mubr.msk.bf16.gmra.mrb[8].mxu0 %vm403_vm1, %v1859_v58 }
  0xe4   : > { %3506 = vmatprep.mubr.msk.bf16.mxu0 %vm403_vm1, %v1867_v54 }
  0xe6   : > { %3539 = vmatpush3.bf16.msra.mxu1 %v4254_v3  ;;  %v2045_v3 = vsel %vm675_vm4, %v2043_v1, %v2044_v13 }
  0xe7   : > { %3536 = vmatprep.subr.bf16.mxu1 %v4258_v5 }
  0xe9   : > { %3403 = vmatmul.mubr.msk.bf16.gmra.mrb[4].mxu1 %vm403_vm1, %v4439_v42  ;;  %v2048_v42 = vrot.slane %v4535_v63, 1  ;;  %v4646_v63 = vshrl.u32 %v2217_v62, 7 }
  0xea   : > { %3406 = vmatprep.mubr.msk.bf16.mxu1 %vm403_vm1, %v4443_v44  ;;  %3540 = vmatpush3.bf16.msra.mxu1 %v4258_v5  ;;  %v2047_v5 = vsel %vm675_vm4, %v2044_v13, %v2046_v6 }
  0xeb   : > { %3537 = vmatprep.subr.bf16.mxu1 %v4260_v7  ;;  %3507 = vmatmul.mubr.msk.bf16.gmra.mrb[12].mxu0 %vm403_vm1, %v1870_v18  ;;  %v2049_v44 = vsel %vm675_vm4, %v2046_v6, %v2048_v42  ;;  %v2219_v41 = vadd.s32 8, %v4646_v63  ;;  %v4655_v8 = vmul.u32.u64.low 2863311531, %v4646_v63  ;;  %v4656_v12 = vmul.u32.u64.high 2863311531, %v4646_v63, %v4655_v8 }
  0xec   : > { %3518 = vmatprep.mubr.msk.bf16.mxu0 %vm403_vm1, %v2045_v3  ;;  %v4669_v24 = vadd.s32 48, %v4646_v63  ;;  %v4677_v25 = vadd.s32 56, %v4646_v63  ;;  %v4681_v31 = vadd.s32 40, %v4646_v63  ;;  %v4688_v35 = vadd.s32 80, %v4646_v63 }
  0xed   : > { %v4661_v17 = vmul.u32.u64.low 2863311531, %v2219_v41  ;;  %v4662_v60 = vmul.u32.u64.high 2863311531, %v2219_v41, %v4661_v17  ;;  %v2239_v30 = vshrl.u32 %v4656_v12, 3  ;;  %v4692_v29 = vadd.s32 64, %v4646_v63 }
  0xee   : > { %3541 = vmatpush3.bf16.msra.mxu1 %v4260_v7  ;;  %v2050_v7 = vrot.slane %v4550_v23, 1  ;;  %v4665_v23 = vadd.s32 32, %v4646_v63  ;;  %v4684_v46 = vmul.u32.u64.low 2863311531, %v4669_v24  ;;  %v4685_v20 = vmul.u32.u64.high 2863311531, %v4669_v24, %v4684_v46 }
  0xef   : > { %v2250_v37 = vshrl.u32 %v4662_v60, 3  ;;  %v2240_v33 = vmul.u32 12, %v2239_v30  ;;  %v4695_v38 = vmul.u32.u64.low 2863311531, %v4677_v25  ;;  %v4696_v22 = vmul.u32.u64.high 2863311531, %v4677_v25, %v4695_v38 }
  0xf0   : > { %v4672_v27 = vmul.u32.u64.low 2863311531, %v4665_v23  ;;  %v4673_v28 = vmul.u32.u64.high 2863311531, %v4665_v23, %v4672_v27  ;;  %v4699_v39 = vadd.s32 88, %v4646_v63  ;;  %v4706_v34 = vadd.s32 72, %v4646_v63 }
  0xf1   : > { %3407 = vmatmul.mubr.msk.bf16.gmra.mrb[8].mxu1 %vm403_vm1, %v4447_v0  ;;  %v2051_v0 = vsel %vm675_vm4, %v2048_v42, %v2050_v7  ;;  %v4702_v40 = vmul.u32.u64.low 2863311531, %v4681_v31  ;;  %v4703_v47 = vmul.u32.u64.high 2863311531, %v4681_v31, %v4702_v40  ;;  %v2251_v26 = vmul.u32 12, %v2250_v37 }
  0xf2   : > { %3410 = vmatprep.mubr.msk.bf16.mxu1 %vm403_vm1, %v4493_v10  ;;  %v2053_v10 = vsel %vm675_vm4, %v2050_v7, %v2052_v50  ;;  %v4711_v48 = vmul.u32.u64.low 2863311531, %v4688_v35  ;;  %v4712_v53 = vmul.u32.u64.high 2863311531, %v4688_v35, %v4711_v48  ;;  %v2283_v36 = vshrl.u32 %v4673_v28, 3 }
  0xf3   : > { %3519 = vmatmul.mubr.msk.bf16.vlgmr.msra.gmra.mrb[0].mxu0 %vm403_vm1, %v2047_v5  ;;  %v4716_v55 = vmul.u32.u64.low 2863311531, %v4692_v29  ;;  %v4717_v49 = vmul.u32.u64.high 2863311531, %v4692_v29, %v4716_v55  ;;  %v4720_v57 = vsub.s32 %v4646_v63, %v2240_v33  ;;  %v2305_v3 = vshrl.u32 %v4685_v20, 3 }
  0xf4   : > { %3522 = vmatprep.mubr.msk.bf16.mxu0 %vm403_vm1, %v2049_v44  ;;  %v4723_v58 = vmul.u32.u64.low 2863311531, %v4699_v39  ;;  %v4724_v54 = vmul.u32.u64.high 2863311531, %v4699_v39, %v4723_v58  ;;  %v4731_v1 = vmul.u32.u64.low 2863311531, %v4706_v34  ;;  %v4732_v13 = vmul.u32.u64.high 2863311531, %v4706_v34, %v4731_v1 }
  0xf5   : > { %v4742_v5 = vsub.s32 %v2219_v41, %v2251_v26  ;;  %v2284_v44 = vmul.u32 12, %v2283_v36  ;;  %vm2398_vm8 = vcmp.ne.s32.totalorder %v4720_v57, 0  ;;  %vm2413_vm9 = vcmp.lt.s32.totalorder %v4720_v57, 0 }
  0xf6   : > { %v2349_v62 = vshrl.u32 %v4712_v53, 3  ;;  %vm4783_vm15 = vmand %vm2413_vm9, %vm2398_vm8  ;;  %v2360_v8 = vshrl.u32 %v4724_v54, 3 }
  0xf7   : > { %vm2399_vm13 = vcmp.ne.s32.totalorder %v4742_v5, 0  ;;  %vm2414_vm14 = vcmp.lt.s32.totalorder %v4742_v5, 0  ;;  %v2444_v30 = vadd.s32 12, %v4742_v5 }
  0xf8   : > { %vm4820_vm2 = vmand %vm2414_vm14, %vm2399_vm13  ;;  %v2361_v40 = vmul.u32 12, %v2360_v8 }
  0xf9   : > { %3411 = vmatmul.mubr.msk.bf16.gmra.mrb[12].mxu1 %vm403_vm1, %v4486_v15  ;;  %v2055_v15 = vsel %vm675_vm4, %v2052_v50, %v2054_v9  ;;  %v2316_v50 = vshrl.u32 %v4696_v22, 3  ;;  %v2459_v48 = vsel %vm4820_vm2, %v2444_v30, %v4742_v5 }
  0xfa   : > { %3430 = vmatprep.mubr.msk.bf16.mxu1 %vm403_vm1, %v4505_v16  ;;  %v2057_v16 = vsel %vm675_vm4, %v2054_v9, %v2056_v61  ;;  %v2294_v9 = vshrl.u32 %v4703_v47, 3 }
  0xfb   : > { %3523 = vmatmul.mubr.msk.bf16.gmra.mrb[4].mxu0 %vm403_vm1, %v2051_v0  ;;  %v4750_v0 = vadd.s32 112, %v4646_v63  ;;  %v2317_v41 = vmul.u32 12, %v2316_v50 }
  0xfc   : > { %3526 = vmatprep.mubr.msk.bf16.mxu0 %vm403_vm1, %v2053_v10  ;;  %v4753_v10 = vadd.s32 12, %v4720_v57  ;;  %v2295_v60 = vmul.u32 12, %v2294_v9 }
  0xfe   : > { %v4840_v47 = vsub.s32 %v4681_v31, %v2295_v60 }
 0x101   : > { %3431 = vmatmul.mubr.msk.bf16.vlgmr.msra.gmra.mrb[8].mxu1 %vm403_vm1, %v4518_v51  ;;  %v2220_v51 = vadd.s32 16, %v4646_v63 }
 0x102   : > { %3434 = vmatprep.mubr.msk.bf16.mxu1 %vm403_vm1, %v4524_v56  ;;  %v2221_v56 = vadd.s32 24, %v4646_v63 }
 0x103   : > { %3527 = vmatmul.mubr.msk.bf16.gmra.mrb[8].mxu0 %vm403_vm1, %v2055_v15  ;;  %v4650_v11 = vmul.u32.u64.low 2863311531, %v2220_v51  ;;  %v4651_v4 = vmul.u32.u64.high 2863311531, %v2220_v51, %v4650_v11 }
 0x104   : > { %3530 = vmatprep.mubr.msk.bf16.mxu0 %vm403_vm1, %v2057_v16  ;;  %v2306_v16 = vmul.u32 12, %v2305_v3  ;;  %v2327_v11 = vshrl.u32 %v4717_v49, 3  ;;  %v2448_v3 = vadd.s32 12, %v4840_v47 }
 0x105   : > { %v2261_v2 = vshrl.u32 %v4651_v4, 3 }
 0x106   : > { %v2328_v33 = vmul.u32 12, %v2327_v11 }
 0x107   : > { %v2262_v32 = vmul.u32 12, %v2261_v2 }
 0x108   : > { %v4860_v55 = vsub.s32 %v4692_v29, %v2328_v33 }
 0x109   : > { %3435 = vmatmul.mubr.msk.bf16.gmra.mrb[12].mxu1 %vm403_vm1, %v4511_v45  ;;  %v4658_v14 = vmul.u32.u64.low 2863311531, %v2221_v56  ;;  %v4659_v45 = vmul.u32.u64.high 2863311531, %v2221_v56, %v4658_v14  ;;  %v4708_v52 = vsub.s32 %v2220_v51, %v2262_v32  ;;  %v2350_v32 = vmul.u32 12, %v2349_v62 }
 0x10a   : > { %v4789_v12 = vmul.u32.u64.low 2863311531, %v4750_v0  ;;  %v4790_v14 = vmul.u32.u64.high 2863311531, %v4750_v0, %v4789_v12  ;;  %vm2406_vm2 = vcmp.ne.s32.totalorder %v4860_v55, 0  ;;  %v4941_v4 = vadd.s32 12, %v4860_v55 }
 0x10b   : > { %3531 = vmatmul.mubr.msk.bf16.gmra.mrb[12].mxu0 %vm403_vm1, %v2056_v61  ;;  %v2272_v19 = vshrl.u32 %v4659_v45, 3  ;;  %vm2400_vm6 = vcmp.ne.s32.totalorder %v4708_v52, 0  ;;  %vm2415_vm7 = vcmp.lt.s32.totalorder %v4708_v52, 0  ;;  %v2445_v42 = vadd.s32 12, %v4708_v52 }
 0x10c   : > { %v4758_v61 = vadd.s32 96, %v4646_v63  ;;  %vm4769_vm12 = vmand %vm2415_vm7, %vm2400_vm6  ;;  %v4847_v53 = vsub.s32 %v4688_v35, %v2350_v32  ;;  %v2393_v35 = vshrl.u32 %v4790_v14, 3 }
 0x10d   : > { %v2273_v43 = vmul.u32 12, %v2272_v19  ;;  %v4809_v19 = vsub.s32 %v4669_v24, %v2306_v16  ;;  %v2460_v20 = vsel %vm4769_vm12, %v2445_v42, %v4708_v52  ;;  %v2458_v24 = vsel %vm4783_vm15, %v4753_v10, %v4720_v57 }
 0x10e   : > { %v4802_v2 = vmul.u32.u64.low 2863311531, %v4758_v61  ;;  %v4803_v27 = vmul.u32.u64.high 2863311531, %v4758_v61, %v4802_v2  ;;  %vm4852_vm6 = vcmp.lt.s32.totalorder %v2460_v20, 10  ;;  %vm2418_vm12 = vcmp.lt.s32.totalorder %v4840_v47, 0 }
 0x10f   : > { %v4728_v59 = vsub.s32 %v2221_v56, %v2273_v43  ;;  %v4776_v56 = vsub.s32 %v4665_v23, %v2284_v44  ;;  %v2338_v23 = vshrl.u32 %v4732_v13, 3  ;;  %v4835_v43 = vsub.s32 %v4677_v25, %v2317_v41 }
 0x110   : > { %vm2404_vm5 = vcmp.ne.s32.totalorder %v4809_v19, 0  ;;  %v4850_v25 = vadd.s32 104, %v4646_v63  ;;  %vm2419_vm7 = vcmp.lt.s32.totalorder %v4809_v19, 0  ;;  %v2449_v31 = vadd.s32 12, %v4809_v19 }
 0x111   : > { %vm2401_vm10 = vcmp.ne.s32.totalorder %v4728_v59, 0  ;;  %vm2416_vm11 = vcmp.lt.s32.totalorder %v4728_v59, 0  ;;  %v4762_v15 = vadd.s32 12, %v4728_v59  ;;  %vm2402_vm3 = vcmp.ne.s32.totalorder %v4776_v56, 0  ;;  %vm4880_vm13 = vmand %vm2419_vm7, %vm2404_vm5 }
 0x112   : > { %vm4796_vm0 = vmand %vm2416_vm11, %vm2401_vm10  ;;  %vm2417_vm4 = vcmp.lt.s32.totalorder %v4776_v56, 0  ;;  %v2339_v52 = vmul.u32 12, %v2338_v23  ;;  %v2447_v36 = vadd.s32 12, %v4776_v56  ;;  %vm2405_vm9 = vcmp.ne.s32.totalorder %v4835_v43, 0 }
 0x113   : > { %v2461_v22 = vsel %vm4796_vm0, %v4762_v15, %v4728_v59  ;;  %vm4862_vm8 = vmand %vm2417_vm4, %vm2402_vm3  ;;  %vm2420_vm10 = vcmp.lt.s32.totalorder %v4835_v43, 0  ;;  %v4869_v63 = vsub.s32 %v4699_v39, %v2361_v40  ;;  %vm2403_vm11 = vcmp.ne.s32.totalorder %v4840_v47, 0 }
 0x114   : > { %v4875_v29 = vsub.s32 %v4706_v34, %v2339_v52  ;;  %v2371_v57 = vshrl.u32 %v4803_v27, 3  ;;  %vm2408_vm14 = vcmp.ne.s32.totalorder %v4847_v53, 0  ;;  %vm2423_vm15 = vcmp.lt.s32.totalorder %v4847_v53, 0  ;;  %vm4893_vm0 = vmand %vm2420_vm10, %vm2405_vm9 }
 0x115   : > { %v4887_v39 = vmul.u32.u64.low 2863311531, %v4850_v25  ;;  %v4888_v54 = vmul.u32.u64.high 2863311531, %v4850_v25, %v4887_v39  ;;  %v2462_v34 = vsel %vm4862_vm8, %v2447_v36, %v4776_v56  ;;  %v2450_v1 = vadd.s32 12, %v4835_v43  ;;  %vm4900_vm4 = vmand %vm2418_vm12, %vm2403_vm11 }
 0x116   : > { %vm2421_vm3 = vcmp.lt.s32.totalorder %v4860_v55, 0  ;;  %vm2409_vm5 = vcmp.ne.s32.totalorder %v4869_v63, 0  ;;  %vm2424_vm7 = vcmp.lt.s32.totalorder %v4869_v63, 0  ;;  %v2394_v42 = vmul.u32 12, %v2393_v35  ;;  %vm4907_vm8 = vmand %vm2423_vm15, %vm2408_vm14 }
 0x117   : > { %v2453_v44 = vadd.s32 12, %v4847_v53  ;;  %vm2407_vm9 = vcmp.ne.s32.totalorder %v4875_v29, 0  ;;  %vm2422_vm10 = vcmp.lt.s32.totalorder %v4875_v29, 0  ;;  %v2372_v50 = vmul.u32 12, %v2371_v57  ;;  %vm4933_vm15 = vmand %vm2421_vm3, %vm2406_vm2 }
 0x118   : > { %vm4914_vm11 = vcmp.lt.s32.totalorder %v2458_v24, 10  ;;  %vm4918_vm12 = vcmp.lt.s32.totalorder %v2461_v22, 10  ;;  %vm4922_vm14 = vcmp.lt.s32.totalorder %v2459_v48, 10  ;;  %v2464_v62 = vsel %vm4880_vm13, %v2449_v31, %v4809_v19  ;;  %vm4947_vm13 = vmand %vm2424_vm7, %vm2409_vm5 }
 0x119   : > { %v4952_v8 = vadd.s32 12, %v4869_v63  ;;  %v4955_v12 = vadd.s32 12, %v4875_v29  ;;  %vm4960_vm2 = vcmp.lt.s32.totalorder %v2462_v34, 10  ;;  %v2465_v60 = vsel %vm4893_vm0, %v2450_v1, %v4835_v43  ;;  %vm4971_vm3 = vmand %vm2422_vm10, %vm2407_vm9 }
 0x11a   : > { %v2463_v30 = vsel %vm4900_vm4, %v2448_v3, %v4840_v47  ;;  %v2468_v19 = vsel %vm4907_vm8, %v2453_v44, %v4847_v53  ;;  %v4988_v32 = vsub.s32 %v4758_v61, %v2372_v50  ;;  %vm4999_vm0 = vcmp.lt.s32.totalorder %v2464_v62, 10 }
 0x11b   : > { %v2382_v33 = vshrl.u32 %v4888_v54, 3  ;;  %vm5004_vm4 = vcmp.lt.s32.totalorder %v2465_v60, 10  ;;  %v2466_v22 = vsel %vm4933_vm15, %v4941_v4, %v4860_v55  ;;  %v2467_v43 = vsel %vm4971_vm3, %v4955_v12, %v4875_v29 }
 0x11c   : > { %vm2410_vm8 = vcmp.ne.s32.totalorder %v4988_v32, 0  ;;  %vm5044_vm9 = vcmp.lt.s32.totalorder %v2468_v19, 10  ;;  %vm2425_vm10 = vcmp.lt.s32.totalorder %v4988_v32, 0 }
 0x1b4   : > { %v4726_v21 = vpop.f32.mrb[0].mxu1 }
 0x1b5   : > { %v4734_v18 = vpop.f32.mrb[1].mxu1 }
 0x1b6   : > { %v4738_v6 = vpop.f32.mrb[2].mxu1 }
 0x1b7   : > { %v4744_v7 = vpop.f32.mrb[3].mxu1 }
 0x1bc   : > { %v4792_v45 = vpop.f32.mrb[4].mxu1 }
 0x1bd   : > { %v4805_v28 = vpop.f32.mrb[5].mxu1 }
 0x1be   : > { %v4811_v46 = vpop.f32.mrb[6].mxu1 }
 0x1bf   : > { %v4824_v38 = vpop.f32.mrb[7].mxu1 }
 0x1c6   : > { %v3520_v10 = vpop.f32.mrb[0].mxu0 }
 0x1c7   : > { %v4938_v56 = vadd.f32 %v3520_v10, %v4726_v21  ;;  %v2140_v11 = vpop.f32.mrb[1].mxu0 }
 0x1c8   : > { %v4958_v21 = vadd.f32 %v2140_v11, %v4734_v18  ;;  %v3521_v14 = vpop.f32.mrb[2].mxu0  ;;  %v4976_v18 = vsub.s32 %v4750_v0, %v2394_v42 }
 0x1c9   : > { %v4979_v2 = vadd.f32 %v3521_v14, %v4738_v6  ;;  %v2143_v27 = vpop.f32.mrb[3].mxu0  ;;  %v2550_v0 = vsel %vm4852_vm6, %v4938_v56, 0.0  ;;  %vm5026_vm6 = vcmp.lt.s32.totalorder %v2463_v30, 10 }
 0x1ca   : > { %v2548_v6 = vsel %vm4914_vm11, %v4958_v21, 0.0  ;;  %v4997_v20 = vadd.f32 %v2143_v27, %v4744_v7  ;;  %v2469_v7 = vsel %vm4947_vm13, %v4952_v8, %v4869_v63  ;;  %vm2412_vm5 = vcmp.ne.s32.totalorder %v4976_v18, 0 }
 0x1cb   : > { %v2599_v24 = vmul.f32 %v2548_v6, %v2548_v6  ;;  %v2551_v40 = vsel %vm4918_vm12, %v4979_v2, 0.0  ;;  %vm2427_vm7 = vcmp.lt.s32.totalorder %v4976_v18, 0  ;;  %v2601_v48 = vmul.f32 %v2550_v0, %v2550_v0  ;;  %vm5078_vm12 = vmand %vm2425_vm10, %vm2410_vm8 }
 0x1cc   : > { %v2549_v47 = vsel %vm4922_vm14, %v4997_v20, 0.0  ;;  %v2563_v53 = vsel %vm403_vm1, %v2548_v6, 0.0  ;;  %v2566_v36 = vsel %vm403_vm1, %v2550_v0, 0.0  ;;  %v2383_v63 = vmul.u32 12, %v2382_v33  ;;  %vm5065_vm11 = vmand %vm2427_vm7, %vm2412_vm5 }
 0x1cd   : > { %v2564_v26 = vsel %vm403_vm1, %v2549_v47, 0.0  ;;  %v2600_v31 = vmul.f32 %v2549_v47, %v2549_v47  ;;  %v2614_v35 = vsel %vm403_vm1, %v2599_v24, 0.0  ;;  %v2602_v29 = vmul.f32 %v2551_v40, %v2551_v40 }
 0x1ce   : > { %v2565_v55 = vadd.f32 %v2564_v26, %v2563_v53  ;;  %v3524_v49 = vpop.f32.mrb[4].mxu0  ;;  %v2617_v3 = vsel %vm403_vm1, %v2601_v48, 0.0  ;;  %v5054_v44 = vadd.s32 12, %v4976_v18  ;;  %v2568_v50 = vsel %vm403_vm1, %v2551_v40, 0.0 }
 0x1cf   : > { %v2615_v57 = vsel %vm403_vm1, %v2600_v31, 0.0  ;;  %v5039_v58 = vadd.f32 %v3524_v49, %v4792_v45  ;;  %v2156_v39 = vpop.f32.mrb[5].mxu0  ;;  %v5070_v16 = vsub.s32 %v4850_v25, %v2383_v63  ;;  %v2619_v62 = vsel %vm403_vm1, %v2602_v29, 0.0 }
 0x1d0   : > { %v2567_v54 = vadd.f32 %v2566_v36, %v2565_v55  ;;  %v2616_v34 = vadd.f32 %v2615_v57, %v2614_v35  ;;  %v5042_v59 = vadd.f32 %v2156_v39, %v4805_v28  ;;  %v3525_v1 = vpop.f32.mrb[6].mxu0  ;;  %v2455_v28 = vadd.s32 12, %v4988_v32 }
 0x1d1   : > { %v5051_v42 = vadd.f32 %v3525_v1, %v4811_v46  ;;  %v2159_v45 = vpop.f32.mrb[7].mxu0  ;;  %vm5082_vm14 = vcmp.lt.s32.totalorder %v2466_v22, 10  ;;  %vm5086_vm15 = vcmp.lt.s32.totalorder %v2469_v7, 10  ;;  %vm5090_vm13 = vcmp.lt.s32.totalorder %v2467_v43, 10 }
 0x1d2   : > { %v2618_v10 = vadd.f32 %v2617_v3, %v2616_v34  ;;  %v2552_v9 = vsel %vm4960_vm2, %v5042_v59, 0.0  ;;  %v2569_v51 = vadd.f32 %v2568_v50, %v2567_v54  ;;  %v2554_v23 = vsel %vm4999_vm0, %v5039_v58, 0.0 }
 0x1d3   : > { %v2570_v11 = vsel %vm403_vm1, %v2552_v9, 0.0  ;;  %v2603_v4 = vmul.f32 %v2552_v9, %v2552_v9  ;;  %v5099_v19 = vadd.f32 %v2159_v45, %v4824_v38  ;;  %v2555_v6 = vsel %vm5004_vm4, %v5051_v42, 0.0 }
 0x1d4   : > { %v3432_v5 = vpop.f32.mrb[8].mxu1  ;;  %v2620_v12 = vadd.f32 %v2619_v62, %v2618_v10  ;;  %v2571_v27 = vadd.f32 %v2570_v11, %v2569_v51  ;;  %v2472_v24 = vsel %vm5065_vm11, %v5054_v44, %v4976_v18  ;;  %v2470_v37 = vsel %vm5078_vm12, %v2455_v28, %v4988_v32 }
 0x1d5   : > { %v1289_v15 = vpop.f32.mrb[9].mxu1  ;;  %v2621_v30 = vsel %vm403_vm1, %v2603_v4, 0.0  ;;  %v2553_v38 = vsel %vm5026_vm6, %v5099_v19, 0.0  ;;  %vm2411_vm2 = vcmp.ne.s32.totalorder %v5070_v16, 0  ;;  %vm2426_vm3 = vcmp.lt.s32.totalorder %v5070_v16, 0 }
 0x1d6   : > { %v3433_v41 = vpop.f32.mrb[10].mxu1  ;;  %v2622_v0 = vadd.f32 %v2621_v30, %v2620_v12  ;;  %v3528_v33 = vpop.f32.mrb[8].mxu0  ;;  %v2605_v61 = vmul.f32 %v2554_v23, %v2554_v23  ;;  %v2572_v43 = vsel %vm403_vm1, %v2553_v38, 0.0  ;;  %v2604_v40 = vmul.f32 %v2553_v38, %v2553_v38  ;;  %vm5137_vm4 = vmand %vm2426_vm3, %vm2411_vm2 }
 0x1d7   : > { %v1292_v17 = vpop.f32.mrb[11].mxu1  ;;  %v5114_v22 = vadd.f32 %v3528_v33, %v3432_v5  ;;  %v2172_v7 = vpop.f32.mrb[9].mxu0  ;;  %v2606_v48 = vmul.f32 %v2555_v6, %v2555_v6  ;;  %v2573_v32 = vadd.f32 %v2572_v43, %v2571_v27  ;;  %v2456_v31 = vadd.s32 12, %v5070_v16 }
 0x1d8   : > { %v5119_v18 = vadd.f32 %v2172_v7, %v1289_v15  ;;  %v3529_v47 = vpop.f32.mrb[10].mxu0  ;;  %v2574_v36 = vsel %vm403_vm1, %v2554_v23, 0.0  ;;  %v2623_v55 = vsel %vm403_vm1, %v2604_v40, 0.0  ;;  %vm5129_vm0 = vcmp.lt.s32.totalorder %v2470_v37, 10 }
 0x1d9   : > { %v5121_v53 = vadd.f32 %v3529_v47, %v3433_v41  ;;  %v2175_v52 = vpop.f32.mrb[11].mxu0  ;;  %v2575_v57 = vadd.f32 %v2574_v36, %v2573_v32  ;;  %v2624_v39 = vadd.f32 %v2623_v55, %v2622_v0  ;;  %v2558_v54 = vsel %vm5044_vm9, %v5114_v22, 0.0 }
 0x1da   : > { %v2556_v49 = vsel %vm5082_vm14, %v5119_v18, 0.0  ;;  %v2625_v3 = vsel %vm403_vm1, %v2605_v61, 0.0  ;;  %v2576_v45 = vsel %vm403_vm1, %v2555_v6, 0.0  ;;  %v5147_v44 = vadd.f32 %v2175_v52, %v1292_v17 }
 0x1db   : > { %v2607_v34 = vmul.f32 %v2556_v49, %v2556_v49  ;;  %v2578_v5 = vsel %vm403_vm1, %v2556_v49, 0.0  ;;  %v2627_v50 = vsel %vm403_vm1, %v2606_v48, 0.0  ;;  %v2626_v10 = vadd.f32 %v2625_v3, %v2624_v39 }
 0x1dc   : > { %v3436_v26 = vpop.f32.mrb[12].mxu1  ;;  %v2577_v9 = vadd.f32 %v2576_v45, %v2575_v57  ;;  %v2471_v13 = vsel %vm5137_vm4, %v2456_v31, %v5070_v16  ;;  %v2609_v15 = vmul.f32 %v2558_v54, %v2558_v54  ;;  %v2559_v62 = vsel %vm5086_vm15, %v5121_v53, 0.0 }
 0x1dd   : > { %v1305_v63 = vpop.f32.mrb[13].mxu1  ;;  %v2629_v46 = vsel %vm403_vm1, %v2607_v34, 0.0  ;;  %v2557_v51 = vsel %vm5090_vm13, %v5147_v44, 0.0  ;;  %v2628_v41 = vadd.f32 %v2627_v50, %v2626_v10  ;;  %vm5163_vm6 = vcmp.lt.s32.totalorder %v2472_v24, 10 }
 0x1de   : > { %v3437_v1 = vpop.f32.mrb[14].mxu1  ;;  %v3532_v11 = vpop.f32.mrb[12].mxu0  ;;  %v2579_v4 = vadd.f32 %v2578_v5, %v2577_v9  ;;  %v2580_v8 = vsel %vm403_vm1, %v2557_v51, 0.0  ;;  %v2608_v12 = vmul.f32 %v2557_v51, %v2557_v51  ;;  %vm2486_vm5 = vcmp.lt.s32.totalorder %v2471_v13, 10 }
 0x1df   : > { %v1308_v28 = vpop.f32.mrb[15].mxu1  ;;  %v2188_v14 = vpop.f32.mrb[13].mxu0  ;;  %v5161_v17 = vadd.f32 %v3532_v11, %v3436_v26  ;;  %v2630_v27 = vadd.f32 %v2629_v46, %v2628_v41  ;;  %v2582_v6 = vsel %vm403_vm1, %v2558_v54, 0.0  ;;  %v2610_v33 = vmul.f32 %v2559_v62, %v2559_v62 }
 0x1e0   : > { %v5167_v23 = vadd.f32 %v2188_v14, %v1305_v63  ;;  %v3533_v25 = vpop.f32.mrb[14].mxu0  ;;  %v2581_v30 = vadd.f32 %v2580_v8, %v2579_v4  ;;  %v2631_v60 = vsel %vm403_vm1, %v2608_v12, 0.0  ;;  %v2633_v38 = vsel %vm403_vm1, %v2609_v15, 0.0 }
 0x1e1   : > { %v2191_v0 = vpop.f32.mrb[15].mxu0  ;;  %v2632_v61 = vadd.f32 %v2631_v60, %v2630_v27  ;;  %v2584_v43 = vsel %vm403_vm1, %v2559_v62, 0.0  ;;  %v2562_v52 = vsel %vm5163_vm6, %v5161_v17, 0.0  ;;  %v2635_v31 = vsel %vm403_vm1, %v2610_v33, 0.0 }
 0x1e2   : > { %v2560_v37 = vsel %vm5129_vm0, %v5167_v23, 0.0  ;;  %v5174_v24 = vadd.f32 %v2191_v0, %v1308_v28  ;;  %v2583_v7 = vadd.f32 %v2582_v6, %v2581_v30  ;;  %v2613_v29 = vmul.f32 %v2562_v52, %v2562_v52 }
 0x1e3   : > { %v2586_v40 = vsel %vm403_vm1, %v2560_v37, 0.0  ;;  %v2611_v47 = vmul.f32 %v2560_v37, %v2560_v37  ;;  %v2634_v32 = vadd.f32 %v2633_v38, %v2632_v61  ;;  %v2590_v34 = vsel %vm403_vm1, %v2562_v52, 0.0 }
 0x1e4   : > { %v2561_v48 = vsel %vm2486_vm5, %v5174_v24, 0.0  ;;  %v2585_v26 = vadd.f32 %v2584_v43, %v2583_v7  ;;  %v2641_v45 = vsel %vm403_vm1, %v2613_v29, 0.0  ;;  %vm2856_vm7 = vcmask 519168  }
 0x1e5   : > { %v2637_v36 = vsel %vm403_vm1, %v2611_v47, 0.0  ;;  %v2588_v55 = vsel %vm403_vm1, %v2561_v48, 0.0  ;;  %v2612_v49 = vmul.f32 %v2561_v48, %v2561_v48  ;;  %v2636_v35 = vadd.f32 %v2635_v31, %v2634_v32  ;;  %v3203_v47 = vld [vmem:[%s4245_s20 + $0x8] sm:$0xff]   ;;  %v3204_v48 = vld [vmem:[%s4245_s20 + $0x10] sm:$0xff]   ;;  %v2685_v31 = vld [vmem:[%s4245_s20 + $0x4] sm:$0xc] }
 0x1e6   : > { %v2587_v63 = vadd.f32 %v2586_v40, %v2585_v26  ;;  %v3178_v29 = vunpack.c.h.bf16 %v3203_v47 }
 0x1e7   : > { %v2639_v57 = vsel %vm403_vm1, %v2612_v49, 0.0  ;;  %v2638_v39 = vadd.f32 %v2637_v36, %v2636_v35  ;;  %v3205_v36 = vld [vmem:[%s4245_s20 + $0x18] sm:$0xff]   ;;  %v3207_v49 = vld [vmem:[%s4245_s20 + $0x28] sm:$0xff]   ;;  %v3177_v35 = vunpack.c.l.bf16 %v3203_v47  ;;  %vm2733_vm1 = vcmask 1042432  }
 0x1e8   : > { %v2589_v54 = vadd.f32 %v2588_v55, %v2587_v63  ;;  %v3206_v55 = vld [vmem:[%s4245_s20 + $0x20] sm:$0xff]  }
 0x1e9   : > { %v2640_v3 = vadd.f32 %v2639_v57, %v2638_v39  ;;  %v3181_v57 = vunpack.c.l.bf16 %v3204_v48  ;;  %v3208_v39 = vld [vmem:[%s4245_s20 + $0x30] sm:$0xff]  }
 0x1ea   : > { %v2591_v1 = vadd.f32 %v2590_v34, %v2589_v54  ;;  %v3209_v54 = vld [vmem:[%s4245_s20 + $0x38] sm:$0xff]   ;;  %v3182_v34 = vunpack.c.h.bf16 %v3204_v48 }
 0x1eb   : > { %v2642_v28 = vadd.f32 %v2641_v45, %v2640_v3  ;;  %v3186_v3 = vunpack.c.h.bf16 %v3205_v36  ;;  %v2700_v45 = vld [vmem:[%s4245_s20 + $0x40] sm:$0x7] }
 0x1ec   : > { %v2592_v5 = vrot.slane %v2591_v1, 4 }
 0x1ed   : > { %v2643_v10 = vrot.slane %v2642_v28, 4  ;;  %v2745_v47 = vrot.slane %v3186_v3, 5 }
 0x1ee   : > { %v2593_v50 = vadd.f32 %v2592_v5, %v2591_v1  ;;  %v3185_v1 = vunpack.c.l.bf16 %v3205_v36  ;;  %v2701_v5 = vunpack.c.l.bf16 %v2685_v31 }
 0x1ef   : > { %v2644_v13 = vadd.f32 %v2643_v10, %v2642_v28  ;;  %v3189_v28 = vunpack.c.l.bf16 %v3206_v55  ;;  %v3193_v10 = vunpack.c.l.bf16 %v3207_v49 }
 0x1f0   : > { %v2594_v9 = vrot.slane %v2593_v50, 2 }
 0x1f1   : > { %v2645_v46 = vrot.slane %v2644_v13, 2  ;;  %v2747_v48 = vrot.slane %v3189_v28, 5  ;;  %v2751_v31 = vrot.slane %v3193_v10, 5 }
 0x1f2   : > { %v2595_v15 = vadd.f32 %v2594_v9, %v2593_v50  ;;  %v3190_v50 = vunpack.c.h.bf16 %v3206_v55  ;;  %v3194_v9 = vunpack.c.h.bf16 %v3207_v49 }
 0x1f3   : > { %v2646_v51 = vadd.f32 %v2645_v46, %v2644_v13  ;;  %v3197_v13 = vunpack.c.l.bf16 %v3208_v39  ;;  %v3201_v46 = vunpack.c.l.bf16 %v3209_v54 }
 0x1f4   : > { %v2596_v62 = vrot.slane %v2595_v15, 1  ;;  %v2753_v36 = vrot.slane %v3194_v9, 5 }
 0x1f5   : > { %v2647_v4 = vrot.slane %v2646_v51, 1  ;;  %v2755_v55 = vrot.slane %v3197_v13, 5  ;;  %v2759_v49 = vrot.slane %v3201_v46, 5 }
 0x1f6   : > { %v2597_v11 = vadd.f32 %v2596_v62, %v2595_v15  ;;  %v3198_v15 = vunpack.c.h.bf16 %v3208_v39  ;;  %v3202_v62 = vunpack.c.h.bf16 %v3209_v54  ;;  %v2754_v28 = vsel %vm2733_vm1, %v2751_v31, %v2753_v36 }
 0x1f7   : > { %v2648_v8 = vadd.f32 %v2647_v4, %v2646_v51  ;;  %v2716_v51 = vunpack.c.l.bf16 %v2700_v45  ;;  %v2734_v4 = vrot.slane %v2701_v5, 5 }
 0x1f8   : > { %v5189_v41 = vmul.f32 0.01, %v2597_v11  ;;  %v2735_v11 = vrot.slane %v3177_v35, 5  ;;  %v2761_v26 = vrot.slane %v3202_v62, 5 }
 0x1f9   : > { %v2649_v12 = vmul.f32 0.01, %v2648_v8  ;;  %v2737_v8 = vrot.slane %v3178_v29, 5  ;;  %v2763_v39 = vrot.slane %v2716_v51, 5 }
 0x1fa   : > { %v2650_v14 = vmul.f32 %v5189_v41, %v5189_v41  ;;  %v2653_v16 = vsub.f32 %v4958_v21, %v5189_v41  ;;  %v2654_v25 = vsub.f32 %v4997_v20, %v5189_v41  ;;  %v2655_v27 = vsub.f32 %v4938_v56, %v5189_v41 }
 0x1fb   : > { %v2656_v30 = vsub.f32 %v4979_v2, %v5189_v41  ;;  %v2657_v60 = vsub.f32 %v5042_v59, %v5189_v41  ;;  %v2658_v0 = vsub.f32 %v5099_v19, %v5189_v41  ;;  %v2659_v33 = vsub.f32 %v5039_v58, %v5189_v41 }
 0x1fc   : > { %v2651_v6 = vsub.f32 %v2649_v12, %v2650_v14  ;;  %v2660_v37 = vsub.f32 %v5051_v42, %v5189_v41  ;;  %v2661_v38 = vsub.f32 %v5119_v18, %v5189_v41  ;;  %v2662_v7 = vsub.f32 %v5147_v44, %v5189_v41 }
 0x1fd   : > { %v2663_v61 = vsub.f32 %v5114_v22, %v5189_v41  ;;  %v2664_v43 = vsub.f32 %v5121_v53, %v5189_v41  ;;  %v2665_v40 = vsub.f32 %v5167_v23, %v5189_v41  ;;  %v2666_v52 = vsub.f32 %v5174_v24, %v5189_v41 }
 0x1fe   : > { %v2652_v32 = vmax.f32 %v2651_v6, 0.0  ;;  %v2739_v12 = vrot.slane %v3181_v57, 5  ;;  %v2741_v14 = vrot.slane %v3182_v34, 5  ;;  %v2743_v6 = vrot.slane %v3185_v1, 5 }
 0x1ff   : > { %v2736_v54 = vsel %vm2733_vm1, %v2734_v4, %v2735_v11  ;;  %v2738_v45 = vsel %vm2733_vm1, %v2735_v11, %v2737_v8  ;;  %v2748_v1 = vsel %vm2733_vm1, %v2745_v47, %v2747_v48  ;;  %v2764_v46 = vsel %vm2733_vm1, %v2761_v26, %v2763_v39 }
 0x200   : > { %v2668_v63 = vadd.f32 1e-05, %v2652_v32  ;;  %v2749_v32 = vrot.slane %v3190_v50, 5  ;;  %v2740_v35 = vsel %vm2733_vm1, %v2737_v8, %v2739_v12  ;;  %v2742_v29 = vsel %vm2733_vm1, %v2739_v12, %v2741_v14 }
 0x201   : > { %v2744_v57 = vsel %vm2733_vm1, %v2741_v14, %v2743_v6  ;;  %v2746_v34 = vsel %vm2733_vm1, %v2743_v6, %v2745_v47  ;;  %v2756_v50 = vsel %vm2733_vm1, %v2753_v36, %v2755_v55  ;;  %v5454_v44 = vsub.f32 %v5161_v17, %v5189_v41 }
 0x202   : > { %3845 = vrsqrt.f32 %v2668_v63  ;;  %v2757_v63 = vrot.slane %v3198_v15, 5  ;;  %v2750_v3 = vsel %vm2733_vm1, %v2747_v48, %v2749_v32  ;;  %v2752_v5 = vsel %vm2733_vm1, %v2749_v32, %v2751_v31 }
 0x203   : > { %v2762_v15 = vsel %vm2733_vm1, %v2759_v49, %v2761_v26 }
 0x204   : > { %v2758_v9 = vsel %vm2733_vm1, %v2755_v55, %v2757_v63  ;;  %v2760_v13 = vsel %vm2733_vm1, %v2757_v63, %v2759_v49 }
 0x20c   : > { %v3846_v10 = vpop.eup %3845 }
 0x20d   : > { %v2670_v62 = vmul.f32 %v3846_v10, %v2653_v16  ;;  %v2671_v51 = vmul.f32 %v3846_v10, %v2654_v25  ;;  %v2672_v11 = vmul.f32 %v3846_v10, %v2655_v27  ;;  %v2673_v4 = vmul.f32 %v3846_v10, %v2656_v30 }
 0x20e   : > { %v2674_v26 = vmul.f32 %v3846_v10, %v2657_v60  ;;  %v2675_v21 = vmul.f32 %v3846_v10, %v2658_v0  ;;  %v2676_v20 = vmul.f32 %v3846_v10, %v2659_v33  ;;  %v2677_v56 = vmul.f32 %v3846_v10, %v2660_v37 }
 0x20f   : > { %v2678_v2 = vmul.f32 %v3846_v10, %v2661_v38  ;;  %v2679_v59 = vmul.f32 %v3846_v10, %v2662_v7  ;;  %v2680_v19 = vmul.f32 %v3846_v10, %v2663_v61  ;;  %v2681_v58 = vmul.f32 %v3846_v10, %v2664_v43 }
 0x210   : > { %v2682_v42 = vmul.f32 %v3846_v10, %v2665_v40  ;;  %v2683_v18 = vmul.f32 %v3846_v10, %v2666_v52  ;;  %v2684_v16 = vmul.f32 %v3846_v10, %v5454_v44  ;;  %v2780_v25 = vadd.f32 %v2736_v54, %v2670_v62 }
 0x211   : > { %v2781_v22 = vadd.f32 %v2738_v45, %v2671_v51  ;;  %v2782_v27 = vadd.f32 %v2740_v35, %v2672_v11  ;;  %v2783_v30 = vadd.f32 %v2742_v29, %v2673_v4  ;;  %v2784_v53 = vadd.f32 %v2744_v57, %v2674_v26 }
 0x212   : > { %v2785_v60 = vadd.f32 %v2746_v34, %v2675_v21  ;;  %v2786_v0 = vadd.f32 %v2748_v1, %v2676_v20  ;;  %v2787_v33 = vadd.f32 %v2750_v3, %v2677_v56  ;;  %v2788_v23 = vadd.f32 %v2752_v5, %v2678_v2 }
 0x213   : > { %v2789_v37 = vadd.f32 %v2754_v28, %v2679_v59  ;;  %v2790_v38 = vadd.f32 %v2756_v50, %v2680_v19  ;;  %v2791_v7 = vadd.f32 %v2758_v9, %v2681_v58  ;;  %v2792_v24 = vadd.f32 %v2760_v13, %v2682_v42 }
 0x214   : > { %v2793_v61 = vadd.f32 %v2762_v15, %v2683_v18  ;;  %v2794_v43 = vadd.f32 %v2764_v46, %v2684_v16  ;;  %v3160_v40 = vpack.c.bf16 %v2780_v25, %v2780_v25  ;;  %v3161_v17 = vpack.c.bf16 %v2781_v22, %v2781_v22 }
 0x215   : > { %v3162_v41 = vpack.c.bf16 %v2782_v27, %v2782_v27  ;;  %v3163_v52 = vpack.c.bf16 %v2783_v30, %v2783_v30  ;;  %v3164_v8 = vpack.c.bf16 %v2784_v53, %v2784_v53  ;;  %v3165_v12 = vpack.c.bf16 %v2785_v60, %v2785_v60 }
 0x216   : > { %v3166_v14 = vpack.c.bf16 %v2786_v0, %v2786_v0  ;;  %v3167_v6 = vpack.c.bf16 %v2787_v33, %v2787_v33  ;;  %v3168_v47 = vpack.c.bf16 %v2788_v23, %v2788_v23  ;;  %v3169_v48 = vpack.c.bf16 %v2789_v37, %v2789_v37  ;;  %2857 = vst.msk [vmem:[%s5296_s4] sm:$0xf] %vm2856_vm7, %v3160_v40 }
 0x217   : > { %2858 = vst.msk [vmem:[%s5296_s4 + $0x4] sm:$0xf] %vm2856_vm7, %v3161_v17  ;;  %v3170_v32 = vpack.c.bf16 %v2790_v38, %v2790_v38  ;;  %v3171_v31 = vpack.c.bf16 %v2791_v7, %v2791_v7  ;;  %v3172_v36 = vpack.c.bf16 %v2792_v24, %v2792_v24  ;;  %v3173_v55 = vpack.c.bf16 %v2793_v61, %v2793_v61 }
 0x218   : > { %2859 = vst.msk [vmem:[%s5296_s4 + $0x8] sm:$0xf] %vm2856_vm7, %v3162_v41  ;;  %2860 = vst.msk [vmem:[%s5296_s4 + $0xc] sm:$0xf] %vm2856_vm7, %v3163_v52  ;;  %v3174_v63 = vpack.c.bf16 %v2794_v43, %v2794_v43 }
 0x219   : > { %2861 = vst.msk [vmem:[%s5296_s4 + $0x10] sm:$0xf] %vm2856_vm7, %v3164_v8  ;;  %2862 = vst.msk [vmem:[%s5296_s4 + $0x14] sm:$0xf] %vm2856_vm7, %v3165_v12 }
 0x21a   : > { %2863 = vst.msk [vmem:[%s5296_s4 + $0x18] sm:$0xf] %vm2856_vm7, %v3166_v14  ;;  %2864 = vst.msk [vmem:[%s5296_s4 + $0x1c] sm:$0xf] %vm2856_vm7, %v3167_v6 }
 0x21b   : > { %2865 = vst.msk [vmem:[%s5296_s4 + $0x20] sm:$0xf] %vm2856_vm7, %v3168_v47  ;;  %2866 = vst.msk [vmem:[%s5296_s4 + $0x24] sm:$0xf] %vm2856_vm7, %v3169_v48 }
 0x21c   : > { %2867 = vst.msk [vmem:[%s5296_s4 + $0x28] sm:$0xf] %vm2856_vm7, %v3170_v32  ;;  %2868 = vst.msk [vmem:[%s5296_s4 + $0x2c] sm:$0xf] %vm2856_vm7, %v3171_v31 }
 0x21d   : > { %2869 = vst.msk [vmem:[%s5296_s4 + $0x30] sm:$0xf] %vm2856_vm7, %v3172_v36  ;;  %2870 = vst.msk [vmem:[%s5296_s4 + $0x34] sm:$0xf] %vm2856_vm7, %v3173_v55 }
 0x21e   : > { %2871 = vst.msk [vmem:[%s5296_s4 + $0x38] sm:$0xf] %vm2856_vm7, %v3174_v63 }
 0x21f   : > { %3948 = shalt.err (!%p3945_p5)
}
 0x220   : > { %s3949_s11 = scalar_lea.hbm %s5314_s7, 960  ;;  %s3953_s17 = scalar_lea.hbm %s5381_s3, 1920 }
 0x221   : > { %p3950_p11 = scmp.ne.s32.totalorder %s5314_s7, %s3949_s11  ;;  %p3954_p10 = scmp.lt.u32.totalorder %s5314_s7, %s5381_s3 }
 0x222   : > { %p3955_p13 = scmp.lt.u32.totalorder %s3953_s17, %s3949_s11  ;;  %p3957_p7 = scmp.lt.u32.totalorder %s3949_s11, %s5314_s7 }
 0x223   : > { %p3951_p9 = pnand %p3950_p11, %p5455_p12 }
 0x224   : > { %p3956_p3 = por %p3955_p13, %p3954_p10 }
 0x225   : > { %p3952_p8 = pneg %p3951_p9 }
 0x226   : > { %p3958_p2 = por %p3957_p7, %p3956_p3 }
 0x228   : > { %p3959_p6 = pnand %p3958_p2, %p3952_p8 }
 0x22a   : > { %3962 = shalt.err (!%p3959_p6)
}
 0x22b   : > { %s4017_s21 = smov 64   ;;  %s4018_s28 = smov 4  }
 0x22c   : > { %3714 = dma.vmem_to_hbm [thread:$0]  (%p5455_p12), %s5316_s6, 960, %s5314_s7, %s2873_s10, %s4017_s21, %s4017_s21, %s4018_s28  }
 0x22d PF: > { %s2901_s4 = sand.u32 1, %s3997_s12   ;;  %p5456_p0 = scmp.ne.s32.totalorder %s5389_s29, 0 }
 0x22e   : > { %p5457_p4 = scmp.ge.s32.totalorder %s4009_s15, 2  ;;  %s2902_s25 = scalar_lea.sflag [#allocation4], %s2901_s4 }
 0x230   : > { %p3728_p1 = pnand %p5457_p4, %p5456_p0 }
 0x232   : > { %3992 = dma.done.wait (!%p3728_p1), %s2902_s25, 960  }
 0x233   : > { %3994 = vsyncadd (!%p3728_p1), %s2902_s25, 4294966336  ;;  %p17_p5 = scmp.ge.s32.totalorder %s4060_s16, 4   ;;  %s5458_s12 = smov %s4001_s13 }
 0x234   : > { %s5459_s13 = smov %s4005_s14  ;;  %s5460_s14 = smov %s4069_s19 }
 0x235   : > { %s5461_s15 = smov %s4060_s16  ;;  %19 = sbr.rel (!%p17_p5) target bundleno = 6 (0x6), region = 100 }
 0x23c   :  { %2907 = vsyncpa [#allocation3], 1 }
 0x23d   :  { %2909 = vsyncpa [#allocation3 + $0x1], 1 }
 0x23e   :  { %2910 = vsyncpa [#allocation6], 1 }
 0x23f   :  { %2911 = vsyncpa [#allocation4], 1 }
 0x240   :  { %2913 = vsyncpa [#allocation4 + $0x1], 1 }

// kernel: refiner_forward.15
= control target key start
LH: loop header
LB: loop body
LE: loop exit
PB: predicated region body
PF: predicated region fallthrough
CT: control target
= control target key end

     0   :  { %8 = vsyncpa [#allocation3], 0  ;;  %s1559_s0 = inlined_call_operand.hbm [shape: bf16[2,256,64], index: 0, kind: input, shape index: {}]   ;;  %s1560_s1 = inlined_call_operand.hbm [shape: bf16[1,64,128], index: 1, kind: input, shape index: {}]   ;;  %s1561_s2 = inlined_call_operand.hbm [shape: f32[1,128], index: 2, kind: input, shape index: {}]   ;;  %s1562_s3 = inlined_call_operand.hbm [shape: f32[2,256,128], index: 3, kind: output, shape index: {}]  }
   0x1   :  { %10 = vsyncpa [#allocation3 + $0x1], 0 }
   0x2   :  { %11 = vsyncpa [#allocation6], 0 }
   0x3   :  { %12 = vsyncpa [#allocation4], 0 }
   0x4   :  { %14 = vsyncpa [#allocation4 + $0x1], 0  ;;  %s1214_s12 = smov 0   ;;  %s1216_s13 = smov 0  }
   0x5   :  { %s1218_s14 = smov 0   ;;  %s1220_s15 = smov 0  }
   0x6 LB: > { %s1235_s16 = sadd.s32 4294967295, %s1184_s15   ;;  %s748_s17 = sadd.s32 4294967294, %s1184_s15   ;;  %s1184_s15 = sphi %s1220_s15, %s1582_s15   ;;  %s1180_s14 = sphi %s1218_s14, %s1581_s14   ;;  %s1176_s13 = sphi %s1216_s13, %s1580_s13   ;;  %s1172_s12 = sphi %s1214_s12, %s1579_s12  }
   0x7   : > { %p40_p0 = scmp.ne.s32.totalorder %s1176_s13, %s1172_s12  ;;  %p1563_p1 = scmp.eq.s32.totalorder %s1235_s16, 0 }
   0x8   : > { %p112_p3 = scmp.eq.s32.totalorder %s748_s17, 1  ;;  %p749_p5 = scmp.ge.s32.totalorder %s1184_s15, 1 }
   0x9   : > { %p1244_p4 = por %p1563_p1, %p40_p0  ;;  %p119_p7 = scmp.lt.s32.totalorder %s1184_s15, 3 }
   0xa   : > { %p1249_p6 = por %p112_p3, %p40_p0  ;;  %s1186_s21 = smov [#allocation5]  }
   0xb   : > { %s1566_s18 = scalar_select %p1244_p4, 1, 0 }
   0xc   : > { %s1567_s19 = scalar_select %p1249_p6, 1, 0 }
   0xd   : > { %p1254_p8 = pnand %p749_p5, %p119_p7  ;;  %s131_s22 = sshll.u32 %s1186_s21, 4  ;;  %s1258_s22 = int_to_ptr.vmem [resolvable:$true] %s131_s22 }
   0xe   : > { %s1187_s24 = smov [#allocation7]   ;;  %s1028_s28 = scalar_lea.hbm %s1560_s1, 512 }
   0xf   : > { %p885_p9 = pneg %p1254_p8  ;;  %s145_s25 = sshll.u32 %s1187_s24, 4  ;;  %s1269_s25 = int_to_ptr.vmem [resolvable:$true] %s145_s25 }
  0x10   : > { %p1029_p12 = scmp.ne.s32.totalorder %s1560_s1, %s1028_s28  ;;  %p1035_p5 = scmp.lt.u32.totalorder %s1028_s28, %s1560_s1 }
  0x11   : > { %p1265_p11 = pnand %p885_p9, %p1563_p1 }
  0x13   : > { %p1030_p13 = pneg %p1265_p11 }
  0x15   : > { %p1031_p0 = pnand %p1030_p13, %p1029_p12 }
  0x17   : > { %p1032_p3 = pneg %p1031_p0 }
  0x19   : > { %p1037_p7 = pnand %p1035_p5, %p1032_p3 }
  0x1b   : > { %1040 = shalt.err (!%p1037_p7)
}
  0x1c   : > { %s1041_s6 = scalar_lea.vmem %s1258_s22, 512  ;;  %p1049_p2 = scmp.lt.s32.totalorder %s1258_s22, %s1258_s22 }
  0x1d   : > { %p1042_p9 = scmp.ne.s32.totalorder %s1258_s22, %s1041_s6  ;;  %p1050_p12 = scmp.lt.s32.totalorder %s1041_s6, %s1041_s6 }
  0x1f   : > { %p1044_p10 = pnand %p1042_p9, %p1030_p13  ;;  %p1051_p0 = por %p1050_p12, %p1049_p2 }
  0x21   : > { %p1045_p1 = pneg %p1044_p10 }
  0x23   : > { %p1052_p6 = pnand %p1051_p0, %p1045_p1 }
  0x25   : > { %1055 = shalt.err (!%p1052_p6)
}
  0x26   : > { %s1188_s7 = smov 64   ;;  %s1189_s8 = smov 4  }
  0x27   : > { %888 = dma.hbm_to_vmem [thread:$0]  (!%p1265_p11), %s1560_s1, 512, %s1258_s22, [#allocation6], %s1188_s7, %s1188_s7, %s1189_s8  }
  0x28   : > { %s1056_s21 = scalar_lea.hbm %s1561_s2, 16 }
  0x29   : > { %p1057_p1 = scmp.ne.s32.totalorder %s1561_s2, %s1056_s21  ;;  %p1063_p10 = scmp.lt.u32.totalorder %s1056_s21, %s1561_s2 }
  0x2b   : > { %p1059_p2 = pnand %p1057_p1, %p1030_p13 }
  0x2d   : > { %p1060_p6 = pneg %p1059_p2 }
  0x2f   : > { %p1065_p3 = pnand %p1063_p10, %p1060_p6 }
  0x31   : > { %1068 = shalt.err (!%p1065_p3)
}
  0x32   : > { %s1069_s22 = scalar_lea.vmem %s1269_s25, 16  ;;  %s1076_s29 = scalar_lea.vmem %s1269_s25, 32 }
  0x33   : > { %p1070_p5 = scmp.ne.s32.totalorder %s1269_s25, %s1069_s22  ;;  %p1077_p12 = scmp.lt.s32.totalorder %s1269_s25, %s1269_s25 }
  0x34   : > { %p1078_p0 = scmp.lt.s32.totalorder %s1076_s29, %s1069_s22 }
  0x35   : > { %p1072_p7 = pnand %p1070_p5, %p1030_p13 }
  0x36   : > { %p1079_p1 = por %p1078_p0, %p1077_p12 }
  0x37   : > { %p1073_p9 = pneg %p1072_p7 }
  0x39   : > { %p1080_p2 = pnand %p1079_p1, %p1073_p9 }
  0x3b   : > { %1083 = shalt.err (!%p1080_p2)
}
  0x3c   : > { %891 = dma.hbm_to_vmem [thread:$0]  (!%p1265_p11), %s1561_s2, 16, %s1269_s25, [#allocation6]  }
  0x3d   : > { %s1328_s5 = sadd.s32 1, %s1184_s15   ;;  %s27_s23 = sadd.s32 1, %s1180_s14 }
  0x3e   : > { %s24_s6 = ssub.s32 %s1184_s15, %s1328_s5  ;;  %p34_p13 = scmp.ne.s32.totalorder %s1180_s14, %s1176_s13 }
  0x3f   : > { %p25_p6 = scmp.eq.s32.totalorder %s24_s6, 0  ;;  %p35_p10 = scmp.eq.s32.totalorder %s1184_s15, 0 }
  0x40   : > { %p1570_p3 = scmp.eq.s32.totalorder %s1235_s16, 1  ;;  %p902_p7 = scmp.lt.s32.totalorder %s1184_s15, 2 }
  0x41   : > { %s1344_s10 = scalar_select %p25_p6, %s1180_s14, %s27_s23  }
  0x42   : > { %p1338_p5 = por %p1570_p3, %p34_p13  ;;  %p36_p9 = por %p35_p10, %p34_p13 }
  0x43   : > { %s156_s11 = sand.u32 1, %s1180_s14   ;;  %s803_s25 = sshll.u32 %s1184_s15, 11 }
  0x44   : > { %s1571_s9 = scalar_select %p1338_p5, 1, 0 }
  0x45   : > { %s753_s17 = sshll.u32 %s156_s11, 7  ;;  %s1351_s26 = scalar_lea.hbm %s1559_s0, %s803_s25 }
  0x46   : > { %s160_s27 = scalar_lea.vmem [#allocation2], %s753_s17  ;;  %p1355_p11 = pnand %p902_p7, %p36_p9 }
  0x47   : > { %s167_s28 = sshll.u32 %s160_s27, 4  ;;  %s1359_s29 = scalar_lea.sflag [#allocation3], %s156_s11  ;;  %s1353_s28 = int_to_ptr.vmem [resolvable:$true] %s167_s28 }
  0x48   : > { %s1084_s30 = scalar_lea.hbm %s1351_s26, 2048  ;;  %p1086_p0 = pneg %p1355_p11 }
  0x49   : > { %p1085_p12 = scmp.ne.s32.totalorder %s1351_s26, %s1084_s30  ;;  %s1089_s6 = scalar_lea.hbm %s1559_s0, 4096 }
  0x4a   : > { %p1090_p13 = scmp.lt.u32.totalorder %s1351_s26, %s1559_s0  ;;  %p1091_p6 = scmp.lt.u32.totalorder %s1089_s6, %s1084_s30 }
  0x4b   : > { %p1087_p1 = pnand %p1086_p0, %p1085_p12  ;;  %p1093_p3 = scmp.lt.u32.totalorder %s1084_s30, %s1351_s26 }
  0x4c   : > { %p1092_p10 = por %p1091_p6, %p1090_p13 }
  0x4d   : > { %p1088_p2 = pneg %p1087_p1 }
  0x4e   : > { %p1094_p7 = por %p1093_p3, %p1092_p10 }
  0x50   : > { %p1095_p9 = pnand %p1094_p7, %p1088_p2 }
  0x52   : > { %1098 = shalt.err (!%p1095_p9)
}
  0x53   : > { %s1099_s11 = scalar_lea.vmem %s1353_s28, 2048  ;;  %s1190_s21 = smov [#allocation2]  }
  0x54   : > { %p1100_p12 = scmp.ne.s32.totalorder %s1353_s28, %s1099_s11  ;;  %s1104_s24 = sshll.u32 %s1190_s21, 4  ;;  %s1105_s24 = int_to_ptr.vmem [resolvable:$false] %s1104_s24 }
  0x55   : > { %s1106_s27 = scalar_lea.vmem %s1105_s24, 4096  ;;  %p1107_p4 = scmp.lt.s32.totalorder %s1353_s28, %s1105_s24 }
  0x56   : > { %p1102_p1 = pnand %p1100_p12, %p1086_p0  ;;  %p1108_p13 = scmp.lt.s32.totalorder %s1106_s27, %s1099_s11 }
  0x58   : > { %p1103_p5 = pneg %p1102_p1  ;;  %p1109_p6 = por %p1108_p13, %p1107_p4 }
  0x5a   : > { %p1110_p10 = pnand %p1109_p6, %p1103_p5 }
  0x5c   : > { %1113 = shalt.err (!%p1110_p10)
}
  0x5d   : > { %895 = dma.hbm_to_vmem [thread:$0]  (!%p1355_p11), %s1351_s26, 2048, %s1353_s28, %s1359_s29, %s1188_s7, %s1188_s7, %s1189_s8  }
  0x5e   : > { %179 = sbr.rel (%p1254_p8) target bundleno = 396 (0x18c), region = 32  ;;  %s1393_s30 = sand.u32 (!%p1254_p8), 1, %s1176_s13  }
  0x5f   : > { %s757_s4 = sshll.u32 (!%p1254_p8), %s1393_s30, 7  ;;  %s182_s23 = scalar_lea.sflag (!%p1254_p8), [#allocation3], %s1393_s30 }
  0x60   : > { %s1397_s6 = scalar_lea.vmem (!%p1254_p8), [#allocation2], %s757_s4  ;;  %p1573_p4 = scmp.ne.s32.totalorder (!%p1254_p8), %s1566_s18, 0 }
  0x65   : > { %1159 = dma.done.wait (%p1573_p4), %s182_s23, 2048  }
  0x66   : > { %1161 = vsyncadd (%p1573_p4), %s182_s23, 4294965248  ;;  %p1574_p5 = scmp.eq.s32.totalorder %s1235_s16, 0 }
  0x68   : > { %1163 = dma.done.wait (%p1574_p5), [#allocation6], 528   ;;  %p1575_p8 = pmov %p1574_p5 }
  0x69   : > { %v944_v0 = vld [vmem:[#allocation5] sm:$0xff]   ;;  %v945_v1 = vld [vmem:[#allocation5 + $0x8] sm:$0xff]   ;;  %v946_v2 = vld [vmem:[#allocation5 + $0x10] sm:$0xff]   ;;  %vm368_vm0 = vcmask 523264   ;;  %s760_s18 = sshll.u32 %s1393_s30, 8  ;;  %s804_s7 = sshll.u32 %s1235_s16, 12 }
  0x6a   : > { %1165 = vsyncadd (%p1575_p8), [#allocation6], 4294966768  ;;  %825 = vmatprep.subr.bf16.mxu0 %v944_v0  ;;  %865 = vmatprep.subr.bf16.mxu1 %v944_v0  ;;  %v948_v3 = vld [vmem:[%s1397_s6] sm:$0xff]   ;;  %v947_v5 = vld [vmem:[#allocation5 + $0x18] sm:$0xff]   ;;  %s1457_s20 = scalar_lea.vmem [#allocation8], %s760_s18  ;;  %s1510_s22 = scalar_lea.hbm %s1562_s3, %s804_s7 }
  0x6b   : > { %826 = vmatpush3.bf16.msra.mxu0 %v944_v0  ;;  %869 = vmatpush3.bf16.msra.mxu1 %v944_v0  ;;  %v949_v4 = vld [vmem:[%s1397_s6 + $0x40] sm:$0xff]   ;;  %v950_v6 = vld [vmem:[%s1397_s6 + $0x8] sm:$0xff]   ;;  %v952_v8 = vld [vmem:[%s1397_s6 + $0x10] sm:$0xff]   ;;  %s656_s8 = sshll.u32 %s1457_s20, 4  ;;  %s643_s16 = scalar_lea.sflag [#allocation4], %s1393_s30  ;;  %s1512_s8 = int_to_ptr.vmem [resolvable:$true] %s656_s8 }
  0x6c   : > { %827 = vmatprep.subr.bf16.mxu0 %v945_v1  ;;  %866 = vmatprep.subr.bf16.mxu1 %v945_v1  ;;  %v951_v7 = vld [vmem:[%s1397_s6 + $0x48] sm:$0xff]   ;;  %v953_v9 = vld [vmem:[%s1397_s6 + $0x50] sm:$0xff]   ;;  %v954_v10 = vld [vmem:[%s1397_s6 + $0x18] sm:$0xff]   ;;  %s1114_s29 = scalar_lea.vmem %s1512_s8, 4096  ;;  %p1576_p0 = scmp.ne.s32.totalorder %s1571_s9, 0 }
  0x6d   : > { %833 = vmatprep.mubr.msk.bf16.mxu0 %vm368_vm0, %v948_v3  ;;  %849 = vmatprep.mubr.msk.bf16.mxu1 %vm368_vm0, %v949_v4  ;;  %v955_v11 = vld [vmem:[%s1397_s6 + $0x58] sm:$0xff]   ;;  %v956_v12 = vld [vmem:[%s1397_s6 + $0x20] sm:$0xff]   ;;  %v958_v14 = vld [vmem:[%s1397_s6 + $0x28] sm:$0xff]   ;;  %p1115_p11 = scmp.ne.s32.totalorder %s1512_s8, %s1114_s29  ;;  %s1191_s17 = smov [#allocation8]  }
  0x6e   : > { %v957_v13 = vld [vmem:[%s1397_s6 + $0x60] sm:$0xff]   ;;  %v959_v15 = vld [vmem:[%s1397_s6 + $0x68] sm:$0xff]   ;;  %v960_v16 = vld [vmem:[%s1397_s6 + $0x30] sm:$0xff]   ;;  %s1118_s25 = sshll.u32 %s1191_s17, 4  ;;  %s1119_s25 = int_to_ptr.vmem [resolvable:$false] %s1118_s25 }
  0x6f   : > { %828 = vmatpush3.bf16.msra.mxu0 %v945_v1  ;;  %870 = vmatpush3.bf16.msra.mxu1 %v945_v1  ;;  %v961_v17 = vld [vmem:[%s1397_s6 + $0x70] sm:$0xff]   ;;  %v962_v18 = vld [vmem:[%s1397_s6 + $0x38] sm:$0xff]   ;;  %v1439_v20 = vld [vmem:[#allocation7] ss:$0 sm:$0xff]  ;;  %p1116_p2 = pnand %p1115_p11, %p1576_p0  ;;  %s1120_s11 = scalar_lea.vmem %s1119_s25, 8192 }
  0x70   : > { %829 = vmatprep.subr.bf16.mxu0 %v946_v2  ;;  %867 = vmatprep.subr.bf16.mxu1 %v946_v2  ;;  %v963_v19 = vld [vmem:[%s1397_s6 + $0x78] sm:$0xff]   ;;  %p1121_p7 = scmp.lt.s32.totalorder %s1512_s8, %s1119_s25  ;;  %p1122_p9 = scmp.lt.s32.totalorder %s1120_s11, %s1114_s29 }
  0x71   : > { %p1117_p3 = pneg %p1116_p2 }
  0x72   : > { %p1123_p12 = por %p1122_p9, %p1121_p7 }
  0x73   : > { %830 = vmatpush3.bf16.msra.mxu0 %v946_v2  ;;  %871 = vmatpush3.bf16.msra.mxu1 %v946_v2 }
  0x74   : > { %831 = vmatprep.subr.bf16.mxu0 %v947_v5  ;;  %868 = vmatprep.subr.bf16.mxu1 %v947_v5  ;;  %p1124_p1 = pnand %p1123_p12, %p1117_p3 }
  0x77   : > { %832 = vmatpush3.bf16.msra.mxu0 %v947_v5  ;;  %872 = vmatpush3.bf16.msra.mxu1 %v947_v5 }
  0x7a   : > { %834 = vmatmul.mubr.msk.bf16.vlgmr.msra.gmra.mrb[0].mxu0 %vm368_vm0, %v950_v6  ;;  %850 = vmatmul.mubr.msk.bf16.vlgmr.msra.gmra.mrb[0].mxu1 %vm368_vm0, %v951_v7 }
  0x7b   : > { %837 = vmatprep.mubr.msk.bf16.mxu0 %vm368_vm0, %v952_v8  ;;  %853 = vmatprep.mubr.msk.bf16.mxu1 %vm368_vm0, %v953_v9 }
  0x82   : > { %838 = vmatmul.mubr.msk.bf16.gmra.mrb[4].mxu0 %vm368_vm0, %v954_v10  ;;  %854 = vmatmul.mubr.msk.bf16.gmra.mrb[4].mxu1 %vm368_vm0, %v955_v11 }
  0x83   : > { %841 = vmatprep.mubr.msk.bf16.mxu0 %vm368_vm0, %v956_v12  ;;  %857 = vmatprep.mubr.msk.bf16.mxu1 %vm368_vm0, %v957_v13 }
  0x8a   : > { %842 = vmatmul.mubr.msk.bf16.gmra.mrb[8].mxu0 %vm368_vm0, %v958_v14  ;;  %858 = vmatmul.mubr.msk.bf16.gmra.mrb[8].mxu1 %vm368_vm0, %v959_v15 }
  0x8b   : > { %845 = vmatprep.mubr.msk.bf16.mxu0 %vm368_vm0, %v960_v16  ;;  %861 = vmatprep.mubr.msk.bf16.mxu1 %vm368_vm0, %v961_v17 }
  0x92   : > { %846 = vmatmul.mubr.msk.bf16.gmra.mrb[12].mxu0 %vm368_vm0, %v962_v18  ;;  %862 = vmatmul.mubr.msk.bf16.gmra.mrb[12].mxu1 %vm368_vm0, %v963_v19 }
 0x14d   : > { %v835_v21 = vpop.f32.mrb[0].mxu0  ;;  %v851_v22 = vpop.f32.mrb[0].mxu1 }
 0x14e   : > { %v460_v23 = vadd.f32 %v835_v21, %v1439_v20  ;;  %v524_v24 = vadd.f32 %v851_v22, %v1439_v20  ;;  %v451_v25 = vpop.f32.mrb[1].mxu0  ;;  %v515_v26 = vpop.f32.mrb[1].mxu1 }
 0x14f   : > { %v452_v27 = vadd.f32 %v1439_v20, %v451_v25  ;;  %v516_v28 = vadd.f32 %v1439_v20, %v515_v26  ;;  %v836_v29 = vpop.f32.mrb[2].mxu0  ;;  %v852_v30 = vpop.f32.mrb[2].mxu1 }
 0x150   : > { %964 = vtanh.f32 %v460_v23  ;;  %v463_v31 = vadd.f32 %v836_v29, %v1439_v20  ;;  %v454_v32 = vpop.f32.mrb[3].mxu0  ;;  %v518_v33 = vpop.f32.mrb[3].mxu1  ;;  %v527_v34 = vadd.f32 %v852_v30, %v1439_v20 }
 0x151   : > { %966 = vtanh.f32 %v524_v24  ;;  %v455_v35 = vadd.f32 %v1439_v20, %v454_v32  ;;  %v519_v36 = vadd.f32 %v1439_v20, %v518_v33 }
 0x152   : > { %968 = vtanh.f32 %v452_v27 }
 0x153   : > { %970 = vtanh.f32 %v516_v28 }
 0x154   : > { %972 = vtanh.f32 %v463_v31 }
 0x155   : > { %974 = vtanh.f32 %v527_v34  ;;  %v839_v37 = vpop.f32.mrb[4].mxu0  ;;  %v855_v38 = vpop.f32.mrb[4].mxu1 }
 0x156   : > { %976 = vtanh.f32 %v455_v35  ;;  %v476_v39 = vadd.f32 %v839_v37, %v1439_v20  ;;  %v540_v40 = vadd.f32 %v855_v38, %v1439_v20  ;;  %v467_v41 = vpop.f32.mrb[5].mxu0  ;;  %v531_v42 = vpop.f32.mrb[5].mxu1 }
 0x157   : > { %978 = vtanh.f32 %v519_v36  ;;  %v468_v43 = vadd.f32 %v1439_v20, %v467_v41  ;;  %v532_v44 = vadd.f32 %v1439_v20, %v531_v42  ;;  %v840_v45 = vpop.f32.mrb[6].mxu0  ;;  %v856_v46 = vpop.f32.mrb[6].mxu1 }
 0x158   : > { %980 = vtanh.f32 %v476_v39  ;;  %v479_v47 = vadd.f32 %v840_v45, %v1439_v20  ;;  %v470_v48 = vpop.f32.mrb[7].mxu0  ;;  %v534_v49 = vpop.f32.mrb[7].mxu1  ;;  %v543_v50 = vadd.f32 %v856_v46, %v1439_v20 }
 0x159   : > { %982 = vtanh.f32 %v540_v40  ;;  %v471_v52 = vadd.f32 %v1439_v20, %v470_v48  ;;  %v535_v54 = vadd.f32 %v1439_v20, %v534_v49 }
 0x15a   : > { %v965_v51 = vpop.eup %964  ;;  %984 = vtanh.f32 %v468_v43 }
 0x15b   : > { %v967_v53 = vpop.eup %966  ;;  %612 = vst [vmem:[%s1457_s20 + $0x10] sm:$0xff] %v965_v51  ;;  %986 = vtanh.f32 %v532_v44 }
 0x15c   : > { %v969_v55 = vpop.eup %968  ;;  %628 = vst [vmem:[%s1457_s20 + $0x90] sm:$0xff] %v967_v53  ;;  %988 = vtanh.f32 %v479_v47 }
 0x15d   : > { %v971_v56 = vpop.eup %970  ;;  %610 = vst [vmem:[%s1457_s20] sm:$0xff] %v969_v55  ;;  %990 = vtanh.f32 %v543_v50  ;;  %v843_v57 = vpop.f32.mrb[8].mxu0 }
 0x15e   : > { %v859_v58 = vpop.f32.mrb[8].mxu1  ;;  %v973_v59 = vpop.eup %972  ;;  %626 = vst [vmem:[%s1457_s20 + $0x80] sm:$0xff] %v971_v56  ;;  %992 = vtanh.f32 %v471_v52  ;;  %v492_v60 = vadd.f32 %v843_v57, %v1439_v20 }
 0x15f   : > { %v556_v61 = vadd.f32 %v859_v58, %v1439_v20  ;;  %v483_v62 = vpop.f32.mrb[9].mxu0  ;;  %v547_v63 = vpop.f32.mrb[9].mxu1  ;;  %613 = vst [vmem:[%s1457_s20 + $0x18] sm:$0xff] %v973_v59  ;;  %994 = vtanh.f32 %v535_v54 }
 0x160   : > { %v975_v0 = vpop.eup %974  ;;  %v484_v1 = vadd.f32 %v1439_v20, %v483_v62  ;;  %v548_v2 = vadd.f32 %v1439_v20, %v547_v63  ;;  %v844_v3 = vpop.f32.mrb[10].mxu0  ;;  %996 = vtanh.f32 %v492_v60 }
 0x161   : > { %v860_v4 = vpop.f32.mrb[10].mxu1  ;;  %v977_v5 = vpop.eup %976  ;;  %629 = vst [vmem:[%s1457_s20 + $0x98] sm:$0xff] %v975_v0  ;;  %v495_v6 = vadd.f32 %v844_v3, %v1439_v20  ;;  %998 = vtanh.f32 %v556_v61 }
 0x162   : > { %v486_v7 = vpop.f32.mrb[11].mxu0  ;;  %v550_v8 = vpop.f32.mrb[11].mxu1  ;;  %611 = vst [vmem:[%s1457_s20 + $0x8] sm:$0xff] %v977_v5  ;;  %v559_v10 = vadd.f32 %v860_v4, %v1439_v20  ;;  %1000 = vtanh.f32 %v484_v1 }
 0x163   : > { %v979_v9 = vpop.eup %978  ;;  %v487_v12 = vadd.f32 %v1439_v20, %v486_v7  ;;  %1002 = vtanh.f32 %v548_v2  ;;  %v551_v14 = vadd.f32 %v1439_v20, %v550_v8 }
 0x164   : > { %v981_v11 = vpop.eup %980  ;;  %627 = vst [vmem:[%s1457_s20 + $0x88] sm:$0xff] %v979_v9  ;;  %1004 = vtanh.f32 %v495_v6 }
 0x165   : > { %v983_v13 = vpop.eup %982  ;;  %616 = vst [vmem:[%s1457_s20 + $0x30] sm:$0xff] %v981_v11  ;;  %1006 = vtanh.f32 %v559_v10  ;;  %v847_v17 = vpop.f32.mrb[12].mxu0 }
 0x166   : > { %v985_v15 = vpop.eup %984  ;;  %632 = vst [vmem:[%s1457_s20 + $0xb0] sm:$0xff] %v983_v13  ;;  %v863_v18 = vpop.f32.mrb[12].mxu1  ;;  %1008 = vtanh.f32 %v487_v12  ;;  %v508_v21 = vadd.f32 %v847_v17, %v1439_v20 }
 0x167   : > { %v987_v16 = vpop.eup %986  ;;  %614 = vst [vmem:[%s1457_s20 + $0x20] sm:$0xff] %v985_v15  ;;  %v572_v22 = vadd.f32 %v863_v18, %v1439_v20  ;;  %v499_v23 = vpop.f32.mrb[13].mxu0  ;;  %1010 = vtanh.f32 %v551_v14 }
 0x168   : > { %v989_v19 = vpop.eup %988  ;;  %630 = vst [vmem:[%s1457_s20 + $0xa0] sm:$0xff] %v987_v16  ;;  %v563_v24 = vpop.f32.mrb[13].mxu1  ;;  %v500_v26 = vadd.f32 %v1439_v20, %v499_v23  ;;  %1012 = vtanh.f32 %v508_v21 }
 0x169   : > { %v991_v25 = vpop.eup %990  ;;  %617 = vst [vmem:[%s1457_s20 + $0x38] sm:$0xff] %v989_v19  ;;  %v564_v27 = vadd.f32 %v1439_v20, %v563_v24  ;;  %v848_v28 = vpop.f32.mrb[14].mxu0  ;;  %1014 = vtanh.f32 %v572_v22 }
 0x16a   : > { %v864_v29 = vpop.f32.mrb[14].mxu1  ;;  %v993_v30 = vpop.eup %992  ;;  %633 = vst [vmem:[%s1457_s20 + $0xb8] sm:$0xff] %v991_v25  ;;  %v511_v31 = vadd.f32 %v848_v28, %v1439_v20  ;;  %1016 = vtanh.f32 %v500_v26 }
 0x16b   : > { %v502_v32 = vpop.f32.mrb[15].mxu0  ;;  %v566_v33 = vpop.f32.mrb[15].mxu1  ;;  %615 = vst [vmem:[%s1457_s20 + $0x28] sm:$0xff] %v993_v30  ;;  %v575_v35 = vadd.f32 %v864_v29, %v1439_v20  ;;  %1018 = vtanh.f32 %v564_v27 }
 0x16c   : > { %v995_v34 = vpop.eup %994  ;;  %v503_v37 = vadd.f32 %v1439_v20, %v502_v32  ;;  %v567_v39 = vadd.f32 %v1439_v20, %v566_v33  ;;  %1020 = vtanh.f32 %v511_v31 }
 0x16d   : > { %v997_v36 = vpop.eup %996  ;;  %631 = vst [vmem:[%s1457_s20 + $0xa8] sm:$0xff] %v995_v34  ;;  %1022 = vtanh.f32 %v575_v35 }
 0x16e   : > { %v999_v38 = vpop.eup %998  ;;  %620 = vst [vmem:[%s1457_s20 + $0x50] sm:$0xff] %v997_v36  ;;  %1024 = vtanh.f32 %v503_v37 }
 0x16f   : > { %v1001_v40 = vpop.eup %1000  ;;  %636 = vst [vmem:[%s1457_s20 + $0xd0] sm:$0xff] %v999_v38  ;;  %1026 = vtanh.f32 %v567_v39 }
 0x170   : > { %v1003_v41 = vpop.eup %1002  ;;  %618 = vst [vmem:[%s1457_s20 + $0x40] sm:$0xff] %v1001_v40 }
 0x171   : > { %v1005_v42 = vpop.eup %1004  ;;  %634 = vst [vmem:[%s1457_s20 + $0xc0] sm:$0xff] %v1003_v41 }
 0x172   : > { %v1007_v43 = vpop.eup %1006  ;;  %621 = vst [vmem:[%s1457_s20 + $0x58] sm:$0xff] %v1005_v42 }
 0x173   : > { %v1009_v20 = vpop.eup %1008  ;;  %637 = vst [vmem:[%s1457_s20 + $0xd8] sm:$0xff] %v1007_v43 }
 0x174   : > { %v1011_v44 = vpop.eup %1010  ;;  %619 = vst [vmem:[%s1457_s20 + $0x48] sm:$0xff] %v1009_v20 }
 0x175   : > { %v1013_v45 = vpop.eup %1012  ;;  %635 = vst [vmem:[%s1457_s20 + $0xc8] sm:$0xff] %v1011_v44 }
 0x176   : > { %v1015_v46 = vpop.eup %1014  ;;  %624 = vst [vmem:[%s1457_s20 + $0x70] sm:$0xff] %v1013_v45 }
 0x177   : > { %v1017_v47 = vpop.eup %1016  ;;  %640 = vst [vmem:[%s1457_s20 + $0xf0] sm:$0xff] %v1015_v46 }
 0x178   : > { %v1019_v48 = vpop.eup %1018  ;;  %622 = vst [vmem:[%s1457_s20 + $0x60] sm:$0xff] %v1017_v47 }
 0x179   : > { %v1021_v49 = vpop.eup %1020  ;;  %638 = vst [vmem:[%s1457_s20 + $0xe0] sm:$0xff] %v1019_v48 }
 0x17a   : > { %v1023_v50 = vpop.eup %1022  ;;  %625 = vst [vmem:[%s1457_s20 + $0x78] sm:$0xff] %v1021_v49 }
 0x17b   : > { %v1025_v51 = vpop.eup %1024  ;;  %641 = vst [vmem:[%s1457_s20 + $0xf8] sm:$0xff] %v1023_v50 }
 0x17c   : > { %v1027_v52 = vpop.eup %1026  ;;  %623 = vst [vmem:[%s1457_s20 + $0x68] sm:$0xff] %v1025_v51 }
 0x17d   : > { %639 = vst [vmem:[%s1457_s20 + $0xe8] sm:$0xff] %v1027_v52 }
 0x17e   : > { %1127 = shalt.err (!%p1124_p1)
}
 0x17f   : > { %s1128_s21 = scalar_lea.hbm %s1510_s22, 4096  ;;  %s1132_s4 = scalar_lea.hbm %s1562_s3, 8192 }
 0x180   : > { %p1129_p13 = scmp.ne.s32.totalorder %s1510_s22, %s1128_s21  ;;  %p1133_p4 = scmp.lt.u32.totalorder %s1510_s22, %s1562_s3 }
 0x181   : > { %p1134_p5 = scmp.lt.u32.totalorder %s1132_s4, %s1128_s21  ;;  %p1136_p11 = scmp.lt.u32.totalorder %s1128_s21, %s1510_s22 }
 0x182   : > { %p1130_p6 = pnand %p1129_p13, %p1576_p0 }
 0x183   : > { %p1135_p8 = por %p1134_p5, %p1133_p4 }
 0x184   : > { %p1131_p10 = pneg %p1130_p6 }
 0x185   : > { %p1137_p2 = por %p1136_p11, %p1135_p8 }
 0x187   : > { %p1138_p3 = pnand %p1137_p2, %p1131_p10 }
 0x189   : > { %1141 = shalt.err (!%p1138_p3)
}
 0x18a   : > { %s1192_s18 = smov 128   ;;  %s1193_s20 = smov 8  }
 0x18b   : > { %883 = dma.vmem_to_hbm [thread:$0]  (%p1576_p0), %s1512_s8, 4096, %s1510_s22, %s643_s16, %s1192_s18, %s1192_s18, %s1193_s20  }
 0x18c PF: > { %s671_s7 = sand.u32 1, %s1172_s12   ;;  %p1577_p7 = scmp.ne.s32.totalorder %s1567_s19, 0 }
 0x18d   : > { %p1578_p9 = scmp.ge.s32.totalorder %s1184_s15, 2  ;;  %s672_s26 = scalar_lea.sflag [#allocation4], %s671_s7 }
 0x18f   : > { %p897_p12 = pnand %p1578_p9, %p1577_p7 }
 0x191   : > { %1167 = dma.done.wait (!%p897_p12), %s672_s26, 4096  }
 0x192   : > { %1169 = vsyncadd (!%p897_p12), %s672_s26, 4294963200  ;;  %p17_p1 = scmp.ge.s32.totalorder %s1328_s5, 4   ;;  %s1579_s12 = smov %s1176_s13 }
 0x193   : > { %s1580_s13 = smov %s1180_s14  ;;  %s1581_s14 = smov %s1344_s10 }
 0x194   : > { %s1582_s15 = smov %s1328_s5  ;;  %19 = sbr.rel (!%p17_p1) target bundleno = 6 (0x6), region = 85 }
 0x19b   :  { %677 = vsyncpa [#allocation3], 1 }
 0x19c   :  { %679 = vsyncpa [#allocation3 + $0x1], 1 }
 0x19d   :  { %680 = vsyncpa [#allocation6], 1 }
 0x19e   :  { %681 = vsyncpa [#allocation4], 1 }
 0x19f   :  { %683 = vsyncpa [#allocation4 + $0x1], 1 }

</bundles_post_ra>
